<compile_context>
chip_gen: v6e
topology: v6e:2x2x1
jax: 0.10.0
libtpu: 0.0.40
codegen_flags: <defaults>
</compile_context>

<pallas_src>
import functools

import jax
import jax.numpy as jnp
from jax.experimental import pallas as pl
from jax.experimental.pallas import tpu as pltpu

BN_EPS = 1e-5
MATMUL_DTYPE = jnp.bfloat16      # MXU input dtype; accumulate / epilogue in f32
DEFAULT_TILE_CAP = 1024          # points per grid step (per-generation knob)
# Worst case VMEM at tile=1024 is ~20-25 MiB (f32 (tile,1024) temp + bf16
# recast + double-buffered inputs + resident head weights).  40 MiB clears
# v5e's 16 MiB scoped default and v6e/v7x's 32 MiB default, and stays inside
# v7x's 64 MiB physical VMEM.
VMEM_LIMIT_BYTES = 40 * 1024 * 1024


def _points_tile(n, cap=DEFAULT_TILE_CAP):
    """Tile over the points axis.  cap is a multiple of 8; a ragged tail tile
    is handled with an in-kernel row mask, so the tile never has to divide N."""
    if n <= cap:
        return n               # single full-extent tile
    return cap


def _const_spec(shape):
    """BlockSpec for a weight that is resident for the whole grid."""
    zeros = (0,) * len(shape)
    return pl.BlockSpec(shape, lambda b, n, _z=zeros: _z)


# ----------------------------------------------------------------------------
# In-kernel building blocks (traced inline into each kernel body)
# ----------------------------------------------------------------------------
def _head_mlp(x_f32, hw1, hb1, hw2, hb2, hw3, hb3, *, log_softmax):
    """3-layer MLP head on a single pooled row (M=1).  Dropout(p=0.3) in the
    classifier head is identity in inference mode."""
    h = jnp.dot(x_f32.astype(hw1.dtype), hw1, preferred_element_type=jnp.float32)
    h = jnp.maximum(h + hb1, 0.0)
    h = jnp.dot(h.astype(hw2.dtype), hw2, preferred_element_type=jnp.float32)
    h = jnp.maximum(h + hb2, 0.0)
    y = jnp.dot(h.astype(hw3.dtype), hw3, preferred_element_type=jnp.float32) + hb3
    if log_softmax:
        m = jnp.max(y, axis=-1, keepdims=True)
        z = y - m
        y = z - jnp.log(jnp.sum(jnp.exp(z), axis=-1, keepdims=True))
    return y


def _update_pool(pooled_ref, h, *, n_points, tile_pts, mask_tail):
    """Running max over point tiles into a per-batch VMEM accumulator."""
    if mask_tail:
        row = jax.lax.broadcasted_iota(jnp.int32, (tile_pts, 1), 0)
        row = row + pl.program_id(1) * tile_pts
        h = jnp.where(row < n_points, h, -jnp.inf)
    tile_max = jnp.max(h, axis=0, keepdims=True)

    @pl.when(pl.program_id(1) == 0)
    def _():
        pooled_ref[...] = jnp.full(pooled_ref.shape, -jnp.inf, pooled_ref.dtype)

    pooled_ref[...] = jnp.maximum(pooled_ref[...], tile_max)


# ----------------------------------------------------------------------------
# Kernel 1: input T-Net (k=3): conv stack + max-pool + FC head, one call
# ----------------------------------------------------------------------------
def _tnet3_kernel(x_ref, w1, b1, w2, b2, w3, b3,
                  hw1, hb1, hw2, hb2, hw3, hb3,
                  o_ref, pooled_ref, *, n_points, tile_pts, mask_tail):
    x = x_ref[0].astype(MATMUL_DTYPE)                                   # (tn, 3)
    h = jnp.maximum(jnp.dot(x, w1[...], preferred_element_type=jnp.float32)
                    + b1[...], 0.0)
    h = jnp.maximum(jnp.dot(h.astype(MATMUL_DTYPE), w2[...],
                            preferred_element_type=jnp.float32) + b2[...], 0.0)
    h = jnp.maximum(jnp.dot(h.astype(MATMUL_DTYPE), w3[...],
                            preferred_element_type=jnp.float32) + b3[...], 0.0)
    _update_pool(pooled_ref, h, n_points=n_points, tile_pts=tile_pts,
                 mask_tail=mask_tail)

    @pl.when(pl.program_id(1) == pl.num_programs(1) - 1)
    def _():
        o_ref[0] = _head_mlp(pooled_ref[...], hw1[...], hb1[...], hw2[...],
                             hb2[...], hw3[...], hb3[...], log_softmax=False)


# ----------------------------------------------------------------------------
# Kernel 2: feature T-Net (k=64) with the m3-fused trunk conv1 recomputed
#           in-kernel (no h64 HBM intermediate)
# ----------------------------------------------------------------------------
def _tnet64_kernel(x_ref, cw_ref, cb_ref, w1, b1, w2, b2, w3, b3,
                   hw1, hb1, hw2, hb2, hw3, hb3,
                   o_ref, pooled_ref, *, n_points, tile_pts, mask_tail):
    x = x_ref[0].astype(MATMUL_DTYPE)                                   # (tn, 3)
    h64 = jnp.maximum(jnp.dot(x, cw_ref[0], preferred_element_type=jnp.float32)
                      + cb_ref[...], 0.0)                               # (tn, 64)
    h = jnp.maximum(jnp.dot(h64.astype(MATMUL_DTYPE), w1[...],
                            preferred_element_type=jnp.float32) + b1[...], 0.0)
    h = jnp.maximum(jnp.dot(h.astype(MATMUL_DTYPE), w2[...],
                            preferred_element_type=jnp.float32) + b2[...], 0.0)
    h = jnp.maximum(jnp.dot(h.astype(MATMUL_DTYPE), w3[...],
                            preferred_element_type=jnp.float32) + b3[...], 0.0)
    _update_pool(pooled_ref, h, n_points=n_points, tile_pts=tile_pts,
                 mask_tail=mask_tail)

    @pl.when(pl.program_id(1) == pl.num_programs(1) - 1)
    def _():
        o_ref[0] = _head_mlp(pooled_ref[...], hw1[...], hb1[...], hw2[...],
                             hb2[...], hw3[...], hb3[...], log_softmax=False)


# ----------------------------------------------------------------------------
# Kernel 3: trunk tail: conv1 (m3-fused, recomputed) + conv2 (m64-fused) +
#           conv3 (bn, no relu) + max-pool + classifier head (LogSoftmax)
# ----------------------------------------------------------------------------
def _trunk_kernel(x_ref, cw_ref, cb_ref, w2b_ref, b2, w3, b3,
                  hw1, hb1, hw2, hb2, hw3, hb3,
                  o_ref, pooled_ref, *, n_points, tile_pts, mask_tail):
    x = x_ref[0].astype(MATMUL_DTYPE)                                   # (tn, 3)
    h64 = jnp.maximum(jnp.dot(x, cw_ref[0], preferred_element_type=jnp.float32)
                      + cb_ref[...], 0.0)                               # (tn, 64)
    h = jnp.maximum(jnp.dot(h64.astype(MATMUL_DTYPE), w2b_ref[0],
                            preferred_element_type=jnp.float32) + b2[...], 0.0)
    h = jnp.dot(h.astype(MATMUL_DTYPE), w3[...],
                preferred_element_type=jnp.float32) + b3[...]   # bn3 folded, no relu
    _update_pool(pooled_ref, h, n_points=n_points, tile_pts=tile_pts,
                 mask_tail=mask_tail)

    @pl.when(pl.program_id(1) == pl.num_programs(1) - 1)
    def _():
        o_ref[0] = _head_mlp(pooled_ref[...], hw1[...], hb1[...], hw2[...],
                             hb2[...], hw3[...], hb3[...], log_softmax=True)


# ----------------------------------------------------------------------------
# pallas_call wrappers
# ----------------------------------------------------------------------------
def tnet_forward_fused(x_bnc, enc, head, *, k, tile_pts, conv1=None):
    """Full T-Net (conv stack + max-pool + FC head) as one pallas_call.
    If conv1=(w1b, b1) is given, the per-batch m3-fused trunk conv1 is
    recomputed in-kernel and x_bnc is the raw (B,N,3) point cloud."""
    B, N, C = x_bnc.shape
    nt = pl.cdiv(N, tile_pts)
    mask_tail = (N % tile_pts) != 0
    kk = k * k

    args = [x_bnc]
    in_specs = [pl.BlockSpec((1, tile_pts, C), lambda b, n: (b, n, 0))]
    kw = dict(n_points=N, tile_pts=tile_pts, mask_tail=mask_tail)
    if conv1 is None:
        kernel = functools.partial(_tnet3_kernel, **kw)
    else:
        cw, cb = conv1
        args += [cw, cb]
        in_specs += [pl.BlockSpec((1, C, cw.shape[2]), lambda b, n: (b, 0, 0)),
                     _const_spec(cb.shape)]
        kernel = functools.partial(_tnet64_kernel, **kw)
    args += [*enc, *head]
    in_specs += [_const_spec(a.shape) for a in (*enc, *head)]

    out = pl.pallas_call(
        kernel,
        out_shape=jax.ShapeDtypeStruct((B, 1, kk), jnp.float32),
        grid=(B, nt),
        in_specs=in_specs,
        out_specs=pl.BlockSpec((1, 1, kk), lambda b, n: (b, 0, 0)),
        scratch_shapes=[pltpu.VMEM((1, 1024), jnp.float32)],
        compiler_params=pltpu.CompilerParams(
            dimension_semantics=("parallel", "arbitrary"),
            vmem_limit_bytes=VMEM_LIMIT_BYTES),
    )(*args)
    return out.reshape(B, k, k) + jnp.eye(k, dtype=jnp.float32)[None]


def trunk_forward_fused(x_bnc, conv1, conv2, conv3, head, *, tile_pts):
    """Trunk conv1+conv2+conv3 + max-pool + classifier head as one call."""
    B, N, C = x_bnc.shape
    nt = pl.cdiv(N, tile_pts)
    mask_tail = (N % tile_pts) != 0
    cw, cb = conv1          # (B, 3, 64) bf16, (1, 64) f32
    w2b, b2 = conv2         # (B, 64, 128) bf16, (1, 128) f32
    w3, b3 = conv3          # (128, 1024) bf16, (1, 1024) f32
    classes = head[4].shape[1]

    args = [x_bnc, cw, cb, w2b, b2, w3, b3, *head]
    in_specs = [
        pl.BlockSpec((1, tile_pts, C), lambda b, n: (b, n, 0)),
        pl.BlockSpec((1, C, 64), lambda b, n: (b, 0, 0)),
        _const_spec(cb.shape),
        pl.BlockSpec((1, 64, 128), lambda b, n: (b, 0, 0)),
        _const_spec(b2.shape),
        _const_spec(w3.shape), _const_spec(b3.shape),
    ] + [_const_spec(a.shape) for a in head]

    out = pl.pallas_call(
        functools.partial(_trunk_kernel, n_points=N, tile_pts=tile_pts,
                          mask_tail=mask_tail),
        out_shape=jax.ShapeDtypeStruct((B, 1, classes), jnp.float32),
        grid=(B, nt),
        in_specs=in_specs,
        out_specs=pl.BlockSpec((1, 1, classes), lambda b, n: (b, 0, 0)),
        scratch_shapes=[pltpu.VMEM((1, 1024), jnp.float32)],
        compiler_params=pltpu.CompilerParams(
            dimension_semantics=("parallel", "arbitrary"),
            vmem_limit_bytes=VMEM_LIMIT_BYTES),
    )(*args)
    return out[:, 0, :]                                       # (B, classes)


# ----------------------------------------------------------------------------
# Deterministic parameter init (PyTorch-style); BatchNorm folded at init.
# ----------------------------------------------------------------------------
def init_linear(key, cin, cout):
    kw, kb = jax.random.split(key)
    bound = 1.0 / (cin ** 0.5)
    # stored (Cin, Cout) == transpose of torch's (out, in) weight
    w = jax.random.uniform(kw, (cin, cout), jnp.float32, -bound, bound)
    b = jax.random.uniform(kb, (cout,), jnp.float32, -bound, bound)
    return {"w": w, "b": b}


def init_bn(key, c):
    kg, kb = jax.random.split(key)
    return {"gamma": 1.0 + 0.1 * jax.random.normal(kg, (c,), jnp.float32),
            "beta": 0.1 * jax.random.normal(kb, (c,), jnp.float32),
            # inference-mode running statistics (fresh init)
            "mean": jnp.zeros((c,), jnp.float32),
            "var": jnp.ones((c,), jnp.float32)}


def fold_bn(lin, bn, w_dtype=MATMUL_DTYPE):
    """Fold inference-mode BN into the preceding linear/1x1-conv.
    General form (valid for trained running stats, not just fresh init)."""
    scale = bn["gamma"] / jnp.sqrt(bn["var"] + BN_EPS)
    shift = bn["beta"] - bn["mean"] * scale
    w = (lin["w"] * scale[None, :]).astype(w_dtype)
    b = (lin["b"] * scale + shift).astype(jnp.float32).reshape(1, -1)
    return w, b


def plain(lin, w_dtype=MATMUL_DTYPE):
    return lin["w"].astype(w_dtype), lin["b"].astype(jnp.float32).reshape(1, -1)


def init_tnet_params(key, k):
    ks = jax.random.split(key, 11)
    c1, c2, c3 = (init_linear(ks[0], k, 64), init_linear(ks[1], 64, 128),
                  init_linear(ks[2], 128, 1024))
    f1, f2, f3 = (init_linear(ks[3], 1024, 512), init_linear(ks[4], 512, 256),
                  init_linear(ks[5], 256, k * k))
    bn1, bn2, bn3 = init_bn(ks[6], 64), init_bn(ks[7], 128), init_bn(ks[8], 1024)
    bn4, bn5 = init_bn(ks[9], 512), init_bn(ks[10], 256)
    enc = (*fold_bn(c1, bn1), *fold_bn(c2, bn2), *fold_bn(c3, bn3))
    head = (*fold_bn(f1, bn4), *fold_bn(f2, bn5), *plain(f3))
    return {"enc": enc, "head": head}


def init_transform_params(key):
    ks = jax.random.split(key, 8)
    tnet3 = init_tnet_params(ks[0], 3)
    tnet64 = init_tnet_params(ks[1], 64)
    c1, c2, c3 = (init_linear(ks[2], 3, 64), init_linear(ks[3], 64, 128),
                  init_linear(ks[4], 128, 1024))
    bn1, bn2, bn3 = init_bn(ks[5], 64), init_bn(ks[6], 128), init_bn(ks[7], 1024)
    # conv1/conv2 stay f32: fused per batch with the T-Net matrices (m @ W)
    # before the bf16 cast.
    w1, b1 = fold_bn(c1, bn1, w_dtype=jnp.float32)
    w2, b2 = fold_bn(c2, bn2, w_dtype=jnp.float32)
    w3, b3 = fold_bn(c3, bn3)
    return {"tnet3": tnet3, "tnet64": tnet64,
            "conv1_w": w1, "conv1_b": b1,
            "conv2_w": w2, "conv2_b": b2,
            "conv3_w": w3, "conv3_b": b3}


def init_pointnet_params(key, classes=40):
    ks = jax.random.split(key, 6)
    transform = init_transform_params(ks[0])
    f1, f2, f3 = (init_linear(ks[1], 1024, 512), init_linear(ks[2], 512, 256),
                  init_linear(ks[3], 256, classes))
    bn1, bn2 = init_bn(ks[4], 512), init_bn(ks[5], 256)
    head = (*fold_bn(f1, bn1), *fold_bn(f2, bn2), *plain(f3))
    return {"transform": transform, "head": head}


# ----------------------------------------------------------------------------
# Forward pass: 3 pallas_calls total (+ two tiny per-batch weight einsums)
# ----------------------------------------------------------------------------
def pointnet_forward(params, x_ncw, *, tile_cap=DEFAULT_TILE_CAP):
    """x_ncw: (B, 3, N), the layout the PyTorch module's Conv1d consumes."""
    x_bnc = jnp.transpose(x_ncw, (0, 2, 1)).astype(jnp.float32)   # (B, N, 3)
    N = x_bnc.shape[1]
    tile_pts = _points_tile(N, tile_cap)
    t = params["transform"]

    # input T-Net (conv stack + pool + FC head fused)
    m3 = tnet_forward_fused(x_bnc, t["tnet3"]["enc"], t["tnet3"]["head"],
                            k=3, tile_pts=tile_pts)               # (B, 3, 3)

    # fold the input transform into trunk conv1:  x @ m3 @ W1 == x @ (m3 @ W1)
    w1b = jnp.einsum("bij,jk->bik", m3, t["conv1_w"]).astype(MATMUL_DTYPE)
    conv1 = (w1b, t["conv1_b"])

    # feature T-Net; h64 is recomputed per point tile in-kernel
    m64 = tnet_forward_fused(x_bnc, t["tnet64"]["enc"], t["tnet64"]["head"],
                             k=64, tile_pts=tile_pts, conv1=conv1)  # (B, 64, 64)

    # fold the feature transform into conv2:  h @ m64 @ W2 == h @ (m64 @ W2)
    w2b = jnp.einsum("bij,jk->bik", m64, t["conv2_w"]).astype(MATMUL_DTYPE)

    # trunk tail + classifier head (LogSoftmax) fused
    logp = trunk_forward_fused(x_bnc, conv1, (w2b, t["conv2_b"]),
                               (t["conv3_w"], t["conv3_b"]), params["head"],
                               tile_pts=tile_pts)                  # (B, classes)
    return logp, m3, m64


# ----------------------------------------------------------------------------
if __name__ == "__main__":
    key = jax.random.PRNGKey(0)
    k_params, k_input = jax.random.split(key)

    B, N, CLASSES = 2, 64, 40
    params = init_pointnet_params(k_params, classes=CLASSES)
    x = jax.random.normal(k_input, (B, 3, N), jnp.float32)   # NCW like PyTorch

    fwd = jax.jit(pointnet_forward)
    log_probs, matrix3x3, matrix64x64 = fwd(params, x)
    jax.block_until_ready((log_probs, matrix3x3, matrix64x64))

    assert log_probs.shape == (B, CLASSES)
    assert matrix3x3.shape == (B, 3, 3)
    assert matrix64x64.shape == (B, 64, 64)
    assert bool(jnp.all(jnp.isfinite(log_probs)))
    # log-softmax rows sum to 1 in probability space
    assert jnp.allclose(jnp.exp(log_probs).sum(axis=1), 1.0, atol=1e-3)

    print("KERNEL_OK")
</pallas_src>

<mosaic_0001>
module attributes {stable_mosaic.version = 11 : i64} {
  func.func @_tnet3_kernel(%arg0: i32, %arg1: i32, %arg2: memref<1x64x3xf32, #tpu.memory_space<vmem>>, %arg3: memref<3x64xbf16, #tpu.memory_space<vmem>>, %arg4: memref<1x64xf32, #tpu.memory_space<vmem>>, %arg5: memref<64x128xbf16, #tpu.memory_space<vmem>>, %arg6: memref<1x128xf32, #tpu.memory_space<vmem>>, %arg7: memref<128x1024xbf16, #tpu.memory_space<vmem>>, %arg8: memref<1x1024xf32, #tpu.memory_space<vmem>>, %arg9: memref<1024x512xbf16, #tpu.memory_space<vmem>>, %arg10: memref<1x512xf32, #tpu.memory_space<vmem>>, %arg11: memref<512x256xbf16, #tpu.memory_space<vmem>>, %arg12: memref<1x256xf32, #tpu.memory_space<vmem>>, %arg13: memref<256x9xbf16, #tpu.memory_space<vmem>>, %arg14: memref<1x9xf32, #tpu.memory_space<vmem>>, %arg15: memref<1x1x9xf32, #tpu.memory_space<vmem>>, %arg16: memref<1x1024xf32, #tpu.memory_space<vmem>>) attributes {dimension_semantics = [#tpu.dimension_semantics<parallel>, #tpu.dimension_semantics<arbitrary>], iteration_bounds = array<i64: 2, 1>, scalar_prefetch = 0 : i64, scratch_operands = 1 : i64, tpu.core_type = #tpu.core_type<tc>, window_params = [{transform_indices = @transform_0, window_bounds = array<i64: 1, 64, 3>}, {pipeline_mode = #tpu.pipeline_mode<synchronous>, transform_indices = @transform_1, window_bounds = array<i64: 3, 64>}, {pipeline_mode = #tpu.pipeline_mode<synchronous>, transform_indices = @transform_2, window_bounds = array<i64: 1, 64>}, {pipeline_mode = #tpu.pipeline_mode<synchronous>, transform_indices = @transform_3, window_bounds = array<i64: 64, 128>}, {pipeline_mode = #tpu.pipeline_mode<synchronous>, transform_indices = @transform_4, window_bounds = array<i64: 1, 128>}, {pipeline_mode = #tpu.pipeline_mode<synchronous>, transform_indices = @transform_5, window_bounds = array<i64: 128, 1024>}, {pipeline_mode = #tpu.pipeline_mode<synchronous>, transform_indices = @transform_6, window_bounds = array<i64: 1, 1024>}, {pipeline_mode = #tpu.pipeline_mode<synchronous>, transform_indices = @transform_7, window_bounds = array<i64: 1024, 512>}, {pipeline_mode = #tpu.pipeline_mode<synchronous>, transform_indices = @transform_8, window_bounds = array<i64: 1, 512>}, {pipeline_mode = #tpu.pipeline_mode<synchronous>, transform_indices = @transform_9, window_bounds = array<i64: 512, 256>}, {pipeline_mode = #tpu.pipeline_mode<synchronous>, transform_indices = @transform_10, window_bounds = array<i64: 1, 256>}, {pipeline_mode = #tpu.pipeline_mode<synchronous>, transform_indices = @transform_11, window_bounds = array<i64: 256, 9>}, {pipeline_mode = #tpu.pipeline_mode<synchronous>, transform_indices = @transform_12, window_bounds = array<i64: 1, 9>}, {transform_indices = @transform_13, window_bounds = array<i64: 1, 1, 9>}]} {
    %c0 = arith.constant 0 : index
    %c0_0 = arith.constant 0 : index
    %c0_1 = arith.constant 0 : index
    %0 = vector.load %arg2[%c0, %c0_0, %c0_1] : memref<1x64x3xf32, #tpu.memory_space<vmem>>, vector<1x64x3xf32>
    %1 = vector.shape_cast %0 : vector<1x64x3xf32> to vector<64x3xf32>
    %2 = arith.truncf %1 : vector<64x3xf32> to vector<64x3xbf16>
    %c0_2 = arith.constant 0 : index
    %c0_3 = arith.constant 0 : index
    %3 = vector.load %arg3[%c0_2, %c0_3] : memref<3x64xbf16, #tpu.memory_space<vmem>>, vector<3x64xbf16>
    %cst = arith.constant dense<0.000000e+00> : vector<64x64xf32>
    %4 = tpu.matmul %2, %3, %cst {dimension_numbers = #tpu.dot_dimension_numbers<[1], [0], [0], [1], [0, 0, 1, 1], [], []>} : vector<64x3xbf16>, vector<3x64xbf16>, vector<64x64xf32> -> vector<64x64xf32>
    %c0_4 = arith.constant 0 : index
    %c0_5 = arith.constant 0 : index
    %5 = vector.load %arg4[%c0_4, %c0_5] : memref<1x64xf32, #tpu.memory_space<vmem>>, vector<1x64xf32>
    %6 = vector.broadcast %5 : vector<1x64xf32> to vector<64x64xf32>
    %7 = arith.addf %4, %6 : vector<64x64xf32>
    %cst_6 = arith.constant 0.000000e+00 : f32
    %8 = vector.broadcast %cst_6 : f32 to vector<64x64xf32>
    %9 = arith.maximumf %7, %8 : vector<64x64xf32>
    %10 = arith.truncf %9 : vector<64x64xf32> to vector<64x64xbf16>
    %c0_7 = arith.constant 0 : index
    %c0_8 = arith.constant 0 : index
    %11 = vector.load %arg5[%c0_7, %c0_8] : memref<64x128xbf16, #tpu.memory_space<vmem>>, vector<64x128xbf16>
    %cst_9 = arith.constant dense<0.000000e+00> : vector<64x128xf32>
    %12 = tpu.matmul %10, %11, %cst_9 {dimension_numbers = #tpu.dot_dimension_numbers<[1], [0], [0], [1], [0, 0, 1, 1], [], []>} : vector<64x64xbf16>, vector<64x128xbf16>, vector<64x128xf32> -> vector<64x128xf32>
    %c0_10 = arith.constant 0 : index
    %c0_11 = arith.constant 0 : index
    %13 = vector.load %arg6[%c0_10, %c0_11] : memref<1x128xf32, #tpu.memory_space<vmem>>, vector<1x128xf32>
    %14 = vector.broadcast %13 : vector<1x128xf32> to vector<64x128xf32>
    %15 = arith.addf %12, %14 : vector<64x128xf32>
    %cst_12 = arith.constant 0.000000e+00 : f32
    %16 = vector.broadcast %cst_12 : f32 to vector<64x128xf32>
    %17 = arith.maximumf %15, %16 : vector<64x128xf32>
    %18 = arith.truncf %17 : vector<64x128xf32> to vector<64x128xbf16>
    %c0_13 = arith.constant 0 : index
    %c0_14 = arith.constant 0 : index
    %19 = vector.load %arg7[%c0_13, %c0_14] : memref<128x1024xbf16, #tpu.memory_space<vmem>>, vector<128x1024xbf16>
    %cst_15 = arith.constant dense<0.000000e+00> : vector<64x1024xf32>
    %20 = tpu.matmul %18, %19, %cst_15 {dimension_numbers = #tpu.dot_dimension_numbers<[1], [0], [0], [1], [0, 0, 1, 1], [], []>} : vector<64x128xbf16>, vector<128x1024xbf16>, vector<64x1024xf32> -> vector<64x1024xf32>
    %c0_16 = arith.constant 0 : index
    %c0_17 = arith.constant 0 : index
    %21 = vector.load %arg8[%c0_16, %c0_17] : memref<1x1024xf32, #tpu.memory_space<vmem>>, vector<1x1024xf32>
    %22 = vector.broadcast %21 : vector<1x1024xf32> to vector<64x1024xf32>
    %23 = arith.addf %20, %22 : vector<64x1024xf32>
    %cst_18 = arith.constant 0.000000e+00 : f32
    %24 = vector.broadcast %cst_18 : f32 to vector<64x1024xf32>
    %25 = arith.maximumf %23, %24 : vector<64x1024xf32>
    %cst_19 = arith.constant dense<0xFF800000> : vector<1024xf32>
    %26 = vector.multi_reduction <maximumf>, %25, %cst_19 [0] : vector<64x1024xf32> to vector<1024xf32>
    %27 = vector.shape_cast %26 : vector<1024xf32> to vector<1x1024xf32>
    %c0_i32 = arith.constant 0 : i32
    %28 = arith.cmpi eq, %arg1, %c0_i32 : i32
    %29 = arith.extui %28 : i1 to i32
    %c0_i32_20 = arith.constant 0 : i32
    %30 = arith.cmpi ne, %29, %c0_i32_20 : i32
    scf.if %30 {
      %cst_27 = arith.constant 0xFF800000 : f32
      %37 = vector.broadcast %cst_27 : f32 to vector<1x1024xf32>
      %c0_28 = arith.constant 0 : index
      %c0_29 = arith.constant 0 : index
      %38 = vector.load %arg16[%c0_28, %c0_29] : memref<1x1024xf32, #tpu.memory_space<vmem>>, vector<1x1024xf32>
      tpu.vector_store %arg16[%c0_28, %c0_29], %37 {strides = array<i32>} : memref<1x1024xf32, #tpu.memory_space<vmem>>, vector<1x1024xf32>,
    } else {
    }
    %c0_21 = arith.constant 0 : index
    %c0_22 = arith.constant 0 : index
    %31 = vector.load %arg16[%c0_21, %c0_22] : memref<1x1024xf32, #tpu.memory_space<vmem>>, vector<1x1024xf32>
    %32 = arith.maximumf %31, %27 : vector<1x1024xf32>
    %c0_23 = arith.constant 0 : index
    %c0_24 = arith.constant 0 : index
    %33 = vector.load %arg16[%c0_23, %c0_24] : memref<1x1024xf32, #tpu.memory_space<vmem>>, vector<1x1024xf32>
    tpu.vector_store %arg16[%c0_23, %c0_24], %32 {strides = array<i32>} : memref<1x1024xf32, #tpu.memory_space<vmem>>, vector<1x1024xf32>,
    %c0_i32_25 = arith.constant 0 : i32
    %34 = arith.cmpi eq, %arg1, %c0_i32_25 : i32
    %35 = arith.extui %34 : i1 to i32
    %c0_i32_26 = arith.constant 0 : i32
    %36 = arith.cmpi ne, %35, %c0_i32_26 : i32
    scf.if %36 {
      %c0_27 = arith.constant 0 : index
      %c0_28 = arith.constant 0 : index
      %37 = vector.load %arg16[%c0_27, %c0_28] : memref<1x1024xf32, #tpu.memory_space<vmem>>, vector<1x1024xf32>
      %c0_29 = arith.constant 0 : index
      %c0_30 = arith.constant 0 : index
      %38 = vector.load %arg9[%c0_29, %c0_30] : memref<1024x512xbf16, #tpu.memory_space<vmem>>, vector<1024x512xbf16>
      %c0_31 = arith.constant 0 : index
      %c0_32 = arith.constant 0 : index
      %39 = vector.load %arg10[%c0_31, %c0_32] : memref<1x512xf32, #tpu.memory_space<vmem>>, vector<1x512xf32>
      %c0_33 = arith.constant 0 : index
      %c0_34 = arith.constant 0 : index
      %40 = vector.load %arg11[%c0_33, %c0_34] : memref<512x256xbf16, #tpu.memory_space<vmem>>, vector<512x256xbf16>
      %c0_35 = arith.constant 0 : index
      %c0_36 = arith.constant 0 : index
      %41 = vector.load %arg12[%c0_35, %c0_36] : memref<1x256xf32, #tpu.memory_space<vmem>>, vector<1x256xf32>
      %c0_37 = arith.constant 0 : index
      %c0_38 = arith.constant 0 : index
      %42 = vector.load %arg13[%c0_37, %c0_38] : memref<256x9xbf16, #tpu.memory_space<vmem>>, vector<256x9xbf16>
      %c0_39 = arith.constant 0 : index
      %c0_40 = arith.constant 0 : index
      %43 = vector.load %arg14[%c0_39, %c0_40] : memref<1x9xf32, #tpu.memory_space<vmem>>, vector<1x9xf32>
      %44 = arith.truncf %37 : vector<1x1024xf32> to vector<1x1024xbf16>
      %cst_41 = arith.constant dense<0.000000e+00> : vector<1x512xf32>
      %45 = tpu.matmul %44, %38, %cst_41 {dimension_numbers = #tpu.dot_dimension_numbers<[1], [0], [0], [1], [0, 0, 1, 1], [], []>} : vector<1x1024xbf16>, vector<1024x512xbf16>, vector<1x512xf32> -> vector<1x512xf32>
      %46 = arith.addf %45, %39 : vector<1x512xf32>
      %cst_42 = arith.constant 0.000000e+00 : f32
      %47 = vector.broadcast %cst_42 : f32 to vector<1x512xf32>
      %48 = arith.maximumf %46, %47 : vector<1x512xf32>
      %49 = arith.truncf %48 : vector<1x512xf32> to vector<1x512xbf16>
      %cst_43 = arith.constant dense<0.000000e+00> : vector<1x256xf32>
      %50 = tpu.matmul %49, %40, %cst_43 {dimension_numbers = #tpu.dot_dimension_numbers<[1], [0], [0], [1], [0, 0, 1, 1], [], []>} : vector<1x512xbf16>, vector<512x256xbf16>, vector<1x256xf32> -> vector<1x256xf32>
      %51 = arith.addf %50, %41 : vector<1x256xf32>
      %cst_44 = arith.constant 0.000000e+00 : f32
      %52 = vector.broadcast %cst_44 : f32 to vector<1x256xf32>
      %53 = arith.maximumf %51, %52 : vector<1x256xf32>
      %54 = arith.truncf %53 : vector<1x256xf32> to vector<1x256xbf16>
      %cst_45 = arith.constant dense<0.000000e+00> : vector<1x9xf32>
      %55 = tpu.matmul %54, %42, %cst_45 {dimension_numbers = #tpu.dot_dimension_numbers<[1], [0], [0], [1], [0, 0, 1, 1], [], []>} : vector<1x256xbf16>, vector<256x9xbf16>, vector<1x9xf32> -> vector<1x9xf32>
      %56 = arith.addf %55, %43 : vector<1x9xf32>
      %c0_46 = arith.constant 0 : index
      %c0_47 = arith.constant 0 : index
      %c0_48 = arith.constant 0 : index
      %57 = vector.load %arg15[%c0_46, %c0_47, %c0_48] : memref<1x1x9xf32, #tpu.memory_space<vmem>>, vector<1x1x9xf32>
      %58 = vector.shape_cast %57 : vector<1x1x9xf32> to vector<1x9xf32>
      %59 = vector.shape_cast %56 : vector<1x9xf32> to vector<1x1x9xf32>
      tpu.vector_store %arg15[%c0_46, %c0_47, %c0_48], %59 {strides = array<i32>} : memref<1x1x9xf32, #tpu.memory_space<vmem>>, vector<1x1x9xf32>,
    } else {
    }
    return
  }
  func.func @transform_0(%arg0: i32, %arg1: i32) -> (i32, i32, i32) {
    %c0_i32 = arith.constant 0 : i32
    %c0_i32_0 = arith.constant 0 : i32
    return %arg0, %arg1, %c0_i32 : i32, i32, i32
  }
  func.func @transform_1(%arg0: i32, %arg1: i32) -> (i32, i32) {
    %c0_i32 = arith.constant 0 : i32
    %c0_i32_0 = arith.constant 0 : i32
    %c0_i32_1 = arith.constant 0 : i32
    return %c0_i32, %c0_i32_0 : i32, i32
  }
  func.func @transform_2(%arg0: i32, %arg1: i32) -> (i32, i32) {
    %c0_i32 = arith.constant 0 : i32
    %c0_i32_0 = arith.constant 0 : i32
    %c0_i32_1 = arith.constant 0 : i32
    return %c0_i32, %c0_i32_0 : i32, i32
  }
  func.func @transform_3(%arg0: i32, %arg1: i32) -> (i32, i32) {
    %c0_i32 = arith.constant 0 : i32
    %c0_i32_0 = arith.constant 0 : i32
    %c0_i32_1 = arith.constant 0 : i32
    return %c0_i32, %c0_i32_0 : i32, i32
  }
  func.func @transform_4(%arg0: i32, %arg1: i32) -> (i32, i32) {
    %c0_i32 = arith.constant 0 : i32
    %c0_i32_0 = arith.constant 0 : i32
    %c0_i32_1 = arith.constant 0 : i32
    return %c0_i32, %c0_i32_0 : i32, i32
  }
  func.func @transform_5(%arg0: i32, %arg1: i32) -> (i32, i32) {
    %c0_i32 = arith.constant 0 : i32
    %c0_i32_0 = arith.constant 0 : i32
    %c0_i32_1 = arith.constant 0 : i32
    return %c0_i32, %c0_i32_0 : i32, i32
  }
  func.func @transform_6(%arg0: i32, %arg1: i32) -> (i32, i32) {
    %c0_i32 = arith.constant 0 : i32
    %c0_i32_0 = arith.constant 0 : i32
    %c0_i32_1 = arith.constant 0 : i32
    return %c0_i32, %c0_i32_0 : i32, i32
  }
  func.func @transform_7(%arg0: i32, %arg1: i32) -> (i32, i32) {
    %c0_i32 = arith.constant 0 : i32
    %c0_i32_0 = arith.constant 0 : i32
    %c0_i32_1 = arith.constant 0 : i32
    return %c0_i32, %c0_i32_0 : i32, i32
  }
  func.func @transform_8(%arg0: i32, %arg1: i32) -> (i32, i32) {
    %c0_i32 = arith.constant 0 : i32
    %c0_i32_0 = arith.constant 0 : i32
    %c0_i32_1 = arith.constant 0 : i32
    return %c0_i32, %c0_i32_0 : i32, i32
  }
  func.func @transform_9(%arg0: i32, %arg1: i32) -> (i32, i32) {
    %c0_i32 = arith.constant 0 : i32
    %c0_i32_0 = arith.constant 0 : i32
    %c0_i32_1 = arith.constant 0 : i32
    return %c0_i32, %c0_i32_0 : i32, i32
  }
  func.func @transform_10(%arg0: i32, %arg1: i32) -> (i32, i32) {
    %c0_i32 = arith.constant 0 : i32
    %c0_i32_0 = arith.constant 0 : i32
    %c0_i32_1 = arith.constant 0 : i32
    return %c0_i32, %c0_i32_0 : i32, i32
  }
  func.func @transform_11(%arg0: i32, %arg1: i32) -> (i32, i32) {
    %c0_i32 = arith.constant 0 : i32
    %c0_i32_0 = arith.constant 0 : i32
    %c0_i32_1 = arith.constant 0 : i32
    return %c0_i32, %c0_i32_0 : i32, i32
  }
  func.func @transform_12(%arg0: i32, %arg1: i32) -> (i32, i32) {
    %c0_i32 = arith.constant 0 : i32
    %c0_i32_0 = arith.constant 0 : i32
    %c0_i32_1 = arith.constant 0 : i32
    return %c0_i32, %c0_i32_0 : i32, i32
  }
  func.func @transform_13(%arg0: i32, %arg1: i32) -> (i32, i32, i32) {
    %c0_i32 = arith.constant 0 : i32
    %c0_i32_0 = arith.constant 0 : i32
    %c0_i32_1 = arith.constant 0 : i32
    return %arg0, %c0_i32, %c0_i32_0 : i32, i32, i32
  }
}

module attributes {stable_mosaic.version = 11 : i64} {
  func.func @_tnet64_kernel(%arg0: i32, %arg1: i32, %arg2: memref<1x64x3xf32, #tpu.memory_space<vmem>>, %arg3: memref<1x3x64xbf16, #tpu.memory_space<vmem>>, %arg4: memref<1x64xf32, #tpu.memory_space<vmem>>, %arg5: memref<64x64xbf16, #tpu.memory_space<vmem>>, %arg6: memref<1x64xf32, #tpu.memory_space<vmem>>, %arg7: memref<64x128xbf16, #tpu.memory_space<vmem>>, %arg8: memref<1x128xf32, #tpu.memory_space<vmem>>, %arg9: memref<128x1024xbf16, #tpu.memory_space<vmem>>, %arg10: memref<1x1024xf32, #tpu.memory_space<vmem>>, %arg11: memref<1024x512xbf16, #tpu.memory_space<vmem>>, %arg12: memref<1x512xf32, #tpu.memory_space<vmem>>, %arg13: memref<512x256xbf16, #tpu.memory_space<vmem>>, %arg14: memref<1x256xf32, #tpu.memory_space<vmem>>, %arg15: memref<256x4096xbf16, #tpu.memory_space<vmem>>, %arg16: memref<1x4096xf32, #tpu.memory_space<vmem>>, %arg17: memref<1x1x4096xf32, #tpu.memory_space<vmem>>, %arg18: memref<1x1024xf32, #tpu.memory_space<vmem>>) attributes {dimension_semantics = [#tpu.dimension_semantics<parallel>, #tpu.dimension_semantics<arbitrary>], iteration_bounds = array<i64: 2, 1>, scalar_prefetch = 0 : i64, scratch_operands = 1 : i64, tpu.core_type = #tpu.core_type<tc>, window_params = [{transform_indices = @transform_0, window_bounds = array<i64: 1, 64, 3>}, {transform_indices = @transform_1, window_bounds = array<i64: 1, 3, 64>}, {pipeline_mode = #tpu.pipeline_mode<synchronous>, transform_indices = @transform_2, window_bounds = array<i64: 1, 64>}, {pipeline_mode = #tpu.pipeline_mode<synchronous>, transform_indices = @transform_3, window_bounds = array<i64: 64, 64>}, {pipeline_mode = #tpu.pipeline_mode<synchronous>, transform_indices = @transform_4, window_bounds = array<i64: 1, 64>}, {pipeline_mode = #tpu.pipeline_mode<synchronous>, transform_indices = @transform_5, window_bounds = array<i64: 64, 128>}, {pipeline_mode = #tpu.pipeline_mode<synchronous>, transform_indices = @transform_6, window_bounds = array<i64: 1, 128>}, {pipeline_mode = #tpu.pipeline_mode<synchronous>, transform_indices = @transform_7, window_bounds = array<i64: 128, 1024>}, {pipeline_mode = #tpu.pipeline_mode<synchronous>, transform_indices = @transform_8, window_bounds = array<i64: 1, 1024>}, {pipeline_mode = #tpu.pipeline_mode<synchronous>, transform_indices = @transform_9, window_bounds = array<i64: 1024, 512>}, {pipeline_mode = #tpu.pipeline_mode<synchronous>, transform_indices = @transform_10, window_bounds = array<i64: 1, 512>}, {pipeline_mode = #tpu.pipeline_mode<synchronous>, transform_indices = @transform_11, window_bounds = array<i64: 512, 256>}, {pipeline_mode = #tpu.pipeline_mode<synchronous>, transform_indices = @transform_12, window_bounds = array<i64: 1, 256>}, {pipeline_mode = #tpu.pipeline_mode<synchronous>, transform_indices = @transform_13, window_bounds = array<i64: 256, 4096>}, {pipeline_mode = #tpu.pipeline_mode<synchronous>, transform_indices = @transform_14, window_bounds = array<i64: 1, 4096>}, {transform_indices = @transform_15, window_bounds = array<i64: 1, 1, 4096>}]} {
    %c0 = arith.constant 0 : index
    %c0_0 = arith.constant 0 : index
    %c0_1 = arith.constant 0 : index
    %0 = vector.load %arg2[%c0, %c0_0, %c0_1] : memref<1x64x3xf32, #tpu.memory_space<vmem>>, vector<1x64x3xf32>
    %1 = vector.shape_cast %0 : vector<1x64x3xf32> to vector<64x3xf32>
    %2 = arith.truncf %1 : vector<64x3xf32> to vector<64x3xbf16>
    %c0_2 = arith.constant 0 : index
    %c0_3 = arith.constant 0 : index
    %c0_4 = arith.constant 0 : index
    %3 = vector.load %arg3[%c0_2, %c0_3, %c0_4] : memref<1x3x64xbf16, #tpu.memory_space<vmem>>, vector<1x3x64xbf16>
    %4 = vector.shape_cast %3 : vector<1x3x64xbf16> to vector<3x64xbf16>
    %cst = arith.constant dense<0.000000e+00> : vector<64x64xf32>
    %5 = tpu.matmul %2, %4, %cst {dimension_numbers = #tpu.dot_dimension_numbers<[1], [0], [0], [1], [0, 0, 1, 1], [], []>} : vector<64x3xbf16>, vector<3x64xbf16>, vector<64x64xf32> -> vector<64x64xf32>
    %c0_5 = arith.constant 0 : index
    %c0_6 = arith.constant 0 : index
    %6 = vector.load %arg4[%c0_5, %c0_6] : memref<1x64xf32, #tpu.memory_space<vmem>>, vector<1x64xf32>
    %7 = vector.broadcast %6 : vector<1x64xf32> to vector<64x64xf32>
    %8 = arith.addf %5, %7 : vector<64x64xf32>
    %cst_7 = arith.constant 0.000000e+00 : f32
    %9 = vector.broadcast %cst_7 : f32 to vector<64x64xf32>
    %10 = arith.maximumf %8, %9 : vector<64x64xf32>
    %11 = arith.truncf %10 : vector<64x64xf32> to vector<64x64xbf16>
    %c0_8 = arith.constant 0 : index
    %c0_9 = arith.constant 0 : index
    %12 = vector.load %arg5[%c0_8, %c0_9] : memref<64x64xbf16, #tpu.memory_space<vmem>>, vector<64x64xbf16>
    %cst_10 = arith.constant dense<0.000000e+00> : vector<64x64xf32>
    %13 = tpu.matmul %11, %12, %cst_10 {dimension_numbers = #tpu.dot_dimension_numbers<[1], [0], [0], [1], [0, 0, 1, 1], [], []>} : vector<64x64xbf16>, vector<64x64xbf16>, vector<64x64xf32> -> vector<64x64xf32>
    %c0_11 = arith.constant 0 : index
    %c0_12 = arith.constant 0 : index
    %14 = vector.load %arg6[%c0_11, %c0_12] : memref<1x64xf32, #tpu.memory_space<vmem>>, vector<1x64xf32>
    %15 = vector.broadcast %14 : vector<1x64xf32> to vector<64x64xf32>
    %16 = arith.addf %13, %15 : vector<64x64xf32>
    %cst_13 = arith.constant 0.000000e+00 : f32
    %17 = vector.broadcast %cst_13 : f32 to vector<64x64xf32>
    %18 = arith.maximumf %16, %17 : vector<64x64xf32>
    %19 = arith.truncf %18 : vector<64x64xf32> to vector<64x64xbf16>
    %c0_14 = arith.constant 0 : index
    %c0_15 = arith.constant 0 : index
    %20 = vector.load %arg7[%c0_14, %c0_15] : memref<64x128xbf16, #tpu.memory_space<vmem>>, vector<64x128xbf16>
    %cst_16 = arith.constant dense<0.000000e+00> : vector<64x128xf32>
    %21 = tpu.matmul %19, %20, %cst_16 {dimension_numbers = #tpu.dot_dimension_numbers<[1], [0], [0], [1], [0, 0, 1, 1], [], []>} : vector<64x64xbf16>, vector<64x128xbf16>, vector<64x128xf32> -> vector<64x128xf32>
    %c0_17 = arith.constant 0 : index
    %c0_18 = arith.constant 0 : index
    %22 = vector.load %arg8[%c0_17, %c0_18] : memref<1x128xf32, #tpu.memory_space<vmem>>, vector<1x128xf32>
    %23 = vector.broadcast %22 : vector<1x128xf32> to vector<64x128xf32>
    %24 = arith.addf %21, %23 : vector<64x128xf32>
    %cst_19 = arith.constant 0.000000e+00 : f32
    %25 = vector.broadcast %cst_19 : f32 to vector<64x128xf32>
    %26 = arith.maximumf %24, %25 : vector<64x128xf32>
    %27 = arith.truncf %26 : vector<64x128xf32> to vector<64x128xbf16>
    %c0_20 = arith.constant 0 : index
    %c0_21 = arith.constant 0 : index
    %28 = vector.load %arg9[%c0_20, %c0_21] : memref<128x1024xbf16, #tpu.memory_space<vmem>>, vector<128x1024xbf16>
    %cst_22 = arith.constant dense<0.000000e+00> : vector<64x1024xf32>
    %29 = tpu.matmul %27, %28, %cst_22 {dimension_numbers = #tpu.dot_dimension_numbers<[1], [0], [0], [1], [0, 0, 1, 1], [], []>} : vector<64x128xbf16>, vector<128x1024xbf16>, vector<64x1024xf32> -> vector<64x1024xf32>
    %c0_23 = arith.constant 0 : index
    %c0_24 = arith.constant 0 : index
    %30 = vector.load %arg10[%c0_23, %c0_24] : memref<1x1024xf32, #tpu.memory_space<vmem>>, vector<1x1024xf32>
    %31 = vector.broadcast %30 : vector<1x1024xf32> to vector<64x1024xf32>
    %32 = arith.addf %29, %31 : vector<64x1024xf32>
    %cst_25 = arith.constant 0.000000e+00 : f32
    %33 = vector.broadcast %cst_25 : f32 to vector<64x1024xf32>
    %34 = arith.maximumf %32, %33 : vector<64x1024xf32>
    %cst_26 = arith.constant dense<0xFF800000> : vector<1024xf32>
    %35 = vector.multi_reduction <maximumf>, %34, %cst_26 [0] : vector<64x1024xf32> to vector<1024xf32>
    %36 = vector.shape_cast %35 : vector<1024xf32> to vector<1x1024xf32>
    %c0_i32 = arith.constant 0 : i32
    %37 = arith.cmpi eq, %arg1, %c0_i32 : i32
    %38 = arith.extui %37 : i1 to i32
    %c0_i32_27 = arith.constant 0 : i32
    %39 = arith.cmpi ne, %38, %c0_i32_27 : i32
    scf.if %39 {
      %cst_34 = arith.constant 0xFF800000 : f32
      %46 = vector.broadcast %cst_34 : f32 to vector<1x1024xf32>
      %c0_35 = arith.constant 0 : index
      %c0_36 = arith.constant 0 : index
      %47 = vector.load %arg18[%c0_35, %c0_36] : memref<1x1024xf32, #tpu.memory_space<vmem>>, vector<1x1024xf32>
      tpu.vector_store %arg18[%c0_35, %c0_36], %46 {strides = array<i32>} : memref<1x1024xf32, #tpu.memory_space<vmem>>, vector<1x1024xf32>,
    } else {
    }
    %c0_28 = arith.constant 0 : index
    %c0_29 = arith.constant 0 : index
    %40 = vector.load %arg18[%c0_28, %c0_29] : memref<1x1024xf32, #tpu.memory_space<vmem>>, vector<1x1024xf32>
    %41 = arith.maximumf %40, %36 : vector<1x1024xf32>
    %c0_30 = arith.constant 0 : index
    %c0_31 = arith.constant 0 : index
    %42 = vector.load %arg18[%c0_30, %c0_31] : memref<1x1024xf32, #tpu.memory_space<vmem>>, vector<1x1024xf32>
    tpu.vector_store %arg18[%c0_30, %c0_31], %41 {strides = array<i32>} : memref<1x1024xf32, #tpu.memory_space<vmem>>, vector<1x1024xf32>,
    %c0_i32_32 = arith.constant 0 : i32
    %43 = arith.cmpi eq, %arg1, %c0_i32_32 : i32
    %44 = arith.extui %43 : i1 to i32
    %c0_i32_33 = arith.constant 0 : i32
    %45 = arith.cmpi ne, %44, %c0_i32_33 : i32
    scf.if %45 {
      %c0_34 = arith.constant 0 : index
      %c0_35 = arith.constant 0 : index
      %46 = vector.load %arg18[%c0_34, %c0_35] : memref<1x1024xf32, #tpu.memory_space<vmem>>, vector<1x1024xf32>
      %c0_36 = arith.constant 0 : index
      %c0_37 = arith.constant 0 : index
      %47 = vector.load %arg11[%c0_36, %c0_37] : memref<1024x512xbf16, #tpu.memory_space<vmem>>, vector<1024x512xbf16>
      %c0_38 = arith.constant 0 : index
      %c0_39 = arith.constant 0 : index
      %48 = vector.load %arg12[%c0_38, %c0_39] : memref<1x512xf32, #tpu.memory_space<vmem>>, vector<1x512xf32>
      %c0_40 = arith.constant 0 : index
      %c0_41 = arith.constant 0 : index
      %49 = vector.load %arg13[%c0_40, %c0_41] : memref<512x256xbf16, #tpu.memory_space<vmem>>, vector<512x256xbf16>
      %c0_42 = arith.constant 0 : index
      %c0_43 = arith.constant 0 : index
      %50 = vector.load %arg14[%c0_42, %c0_43] : memref<1x256xf32, #tpu.memory_space<vmem>>, vector<1x256xf32>
      %c0_44 = arith.constant 0 : index
      %c0_45 = arith.constant 0 : index
      %51 = vector.load %arg15[%c0_44, %c0_45] : memref<256x4096xbf16, #tpu.memory_space<vmem>>, vector<256x4096xbf16>
      %c0_46 = arith.constant 0 : index
      %c0_47 = arith.constant 0 : index
      %52 = vector.load %arg16[%c0_46, %c0_47] : memref<1x4096xf32, #tpu.memory_space<vmem>>, vector<1x4096xf32>
      %53 = arith.truncf %46 : vector<1x1024xf32> to vector<1x1024xbf16>
      %cst_48 = arith.constant dense<0.000000e+00> : vector<1x512xf32>
      %54 = tpu.matmul %53, %47, %cst_48 {dimension_numbers = #tpu.dot_dimension_numbers<[1], [0], [0], [1], [0, 0, 1, 1], [], []>} : vector<1x1024xbf16>, vector<1024x512xbf16>, vector<1x512xf32> -> vector<1x512xf32>
      %55 = arith.addf %54, %48 : vector<1x512xf32>
      %cst_49 = arith.constant 0.000000e+00 : f32
      %56 = vector.broadcast %cst_49 : f32 to vector<1x512xf32>
      %57 = arith.maximumf %55, %56 : vector<1x512xf32>
      %58 = arith.truncf %57 : vector<1x512xf32> to vector<1x512xbf16>
      %cst_50 = arith.constant dense<0.000000e+00> : vector<1x256xf32>
      %59 = tpu.matmul %58, %49, %cst_50 {dimension_numbers = #tpu.dot_dimension_numbers<[1], [0], [0], [1], [0, 0, 1, 1], [], []>} : vector<1x512xbf16>, vector<512x256xbf16>, vector<1x256xf32> -> vector<1x256xf32>
      %60 = arith.addf %59, %50 : vector<1x256xf32>
      %cst_51 = arith.constant 0.000000e+00 : f32
      %61 = vector.broadcast %cst_51 : f32 to vector<1x256xf32>
      %62 = arith.maximumf %60, %61 : vector<1x256xf32>
      %63 = arith.truncf %62 : vector<1x256xf32> to vector<1x256xbf16>
      %cst_52 = arith.constant dense<0.000000e+00> : vector<1x4096xf32>
      %64 = tpu.matmul %63, %51, %cst_52 {dimension_numbers = #tpu.dot_dimension_numbers<[1], [0], [0], [1], [0, 0, 1, 1], [], []>} : vector<1x256xbf16>, vector<256x4096xbf16>, vector<1x4096xf32> -> vector<1x4096xf32>
      %65 = arith.addf %64, %52 : vector<1x4096xf32>
      %c0_53 = arith.constant 0 : index
      %c0_54 = arith.constant 0 : index
      %c0_55 = arith.constant 0 : index
      %66 = vector.load %arg17[%c0_53, %c0_54, %c0_55] : memref<1x1x4096xf32, #tpu.memory_space<vmem>>, vector<1x1x4096xf32>
      %67 = vector.shape_cast %66 : vector<1x1x4096xf32> to vector<1x4096xf32>
      %68 = vector.shape_cast %65 : vector<1x4096xf32> to vector<1x1x4096xf32>
      tpu.vector_store %arg17[%c0_53, %c0_54, %c0_55], %68 {strides = array<i32>} : memref<1x1x4096xf32, #tpu.memory_space<vmem>>, vector<1x1x4096xf32>,
    } else {
    }
    return
  }
  func.func @transform_0(%arg0: i32, %arg1: i32) -> (i32, i32, i32) {
    %c0_i32 = arith.constant 0 : i32
    %c0_i32_0 = arith.constant 0 : i32
    return %arg0, %arg1, %c0_i32 : i32, i32, i32
  }
  func.func @transform_1(%arg0: i32, %arg1: i32) -> (i32, i32, i32) {
    %c0_i32 = arith.constant 0 : i32
    %c0_i32_0 = arith.constant 0 : i32
    %c0_i32_1 = arith.constant 0 : i32
    return %arg0, %c0_i32, %c0_i32_0 : i32, i32, i32
  }
  func.func @transform_2(%arg0: i32, %arg1: i32) -> (i32, i32) {
    %c0_i32 = arith.constant 0 : i32
    %c0_i32_0 = arith.constant 0 : i32
    %c0_i32_1 = arith.constant 0 : i32
    return %c0_i32, %c0_i32_0 : i32, i32
  }
  func.func @transform_3(%arg0: i32, %arg1: i32) -> (i32, i32) {
    %c0_i32 = arith.constant 0 : i32
    %c0_i32_0 = arith.constant 0 : i32
    %c0_i32_1 = arith.constant 0 : i32
    return %c0_i32, %c0_i32_0 : i32, i32
  }
  func.func @transform_4(%arg0: i32, %arg1: i32) -> (i32, i32) {
    %c0_i32 = arith.constant 0 : i32
    %c0_i32_0 = arith.constant 0 : i32
    %c0_i32_1 = arith.constant 0 : i32
    return %c0_i32, %c0_i32_0 : i32, i32
  }
  func.func @transform_5(%arg0: i32, %arg1: i32) -> (i32, i32) {
    %c0_i32 = arith.constant 0 : i32
    %c0_i32_0 = arith.constant 0 : i32
    %c0_i32_1 = arith.constant 0 : i32
    return %c0_i32, %c0_i32_0 : i32, i32
  }
  func.func @transform_6(%arg0: i32, %arg1: i32) -> (i32, i32) {
    %c0_i32 = arith.constant 0 : i32
    %c0_i32_0 = arith.constant 0 : i32
    %c0_i32_1 = arith.constant 0 : i32
    return %c0_i32, %c0_i32_0 : i32, i32
  }
  func.func @transform_7(%arg0: i32, %arg1: i32) -> (i32, i32) {
    %c0_i32 = arith.constant 0 : i32
    %c0_i32_0 = arith.constant 0 : i32
    %c0_i32_1 = arith.constant 0 : i32
    return %c0_i32, %c0_i32_0 : i32, i32
  }
  func.func @transform_8(%arg0: i32, %arg1: i32) -> (i32, i32) {
    %c0_i32 = arith.constant 0 : i32
    %c0_i32_0 = arith.constant 0 : i32
    %c0_i32_1 = arith.constant 0 : i32
    return %c0_i32, %c0_i32_0 : i32, i32
  }
  func.func @transform_9(%arg0: i32, %arg1: i32) -> (i32, i32) {
    %c0_i32 = arith.constant 0 : i32
    %c0_i32_0 = arith.constant 0 : i32
    %c0_i32_1 = arith.constant 0 : i32
    return %c0_i32, %c0_i32_0 : i32, i32
  }
  func.func @transform_10(%arg0: i32, %arg1: i32) -> (i32, i32) {
    %c0_i32 = arith.constant 0 : i32
    %c0_i32_0 = arith.constant 0 : i32
    %c0_i32_1 = arith.constant 0 : i32
    return %c0_i32, %c0_i32_0 : i32, i32
  }
  func.func @transform_11(%arg0: i32, %arg1: i32) -> (i32, i32) {
    %c0_i32 = arith.constant 0 : i32
    %c0_i32_0 = arith.constant 0 : i32
    %c0_i32_1 = arith.constant 0 : i32
    return %c0_i32, %c0_i32_0 : i32, i32
  }
  func.func @transform_12(%arg0: i32, %arg1: i32) -> (i32, i32) {
    %c0_i32 = arith.constant 0 : i32
    %c0_i32_0 = arith.constant 0 : i32
    %c0_i32_1 = arith.constant 0 : i32
    return %c0_i32, %c0_i32_0 : i32, i32
  }
  func.func @transform_13(%arg0: i32, %arg1: i32) -> (i32, i32) {
    %c0_i32 = arith.constant 0 : i32
    %c0_i32_0 = arith.constant 0 : i32
    %c0_i32_1 = arith.constant 0 : i32
    return %c0_i32, %c0_i32_0 : i32, i32
  }
  func.func @transform_14(%arg0: i32, %arg1: i32) -> (i32, i32) {
    %c0_i32 = arith.constant 0 : i32
    %c0_i32_0 = arith.constant 0 : i32
    %c0_i32_1 = arith.constant 0 : i32
    return %c0_i32, %c0_i32_0 : i32, i32
  }
  func.func @transform_15(%arg0: i32, %arg1: i32) -> (i32, i32, i32) {
    %c0_i32 = arith.constant 0 : i32
    %c0_i32_0 = arith.constant 0 : i32
    %c0_i32_1 = arith.constant 0 : i32
    return %arg0, %c0_i32, %c0_i32_0 : i32, i32, i32
  }
}

module attributes {stable_mosaic.version = 11 : i64} {
  func.func @_trunk_kernel(%arg0: i32, %arg1: i32, %arg2: memref<1x64x3xf32, #tpu.memory_space<vmem>>, %arg3: memref<1x3x64xbf16, #tpu.memory_space<vmem>>, %arg4: memref<1x64xf32, #tpu.memory_space<vmem>>, %arg5: memref<1x64x128xbf16, #tpu.memory_space<vmem>>, %arg6: memref<1x128xf32, #tpu.memory_space<vmem>>, %arg7: memref<128x1024xbf16, #tpu.memory_space<vmem>>, %arg8: memref<1x1024xf32, #tpu.memory_space<vmem>>, %arg9: memref<1024x512xbf16, #tpu.memory_space<vmem>>, %arg10: memref<1x512xf32, #tpu.memory_space<vmem>>, %arg11: memref<512x256xbf16, #tpu.memory_space<vmem>>, %arg12: memref<1x256xf32, #tpu.memory_space<vmem>>, %arg13: memref<256x40xbf16, #tpu.memory_space<vmem>>, %arg14: memref<1x40xf32, #tpu.memory_space<vmem>>, %arg15: memref<1x1x40xf32, #tpu.memory_space<vmem>>, %arg16: memref<1x1024xf32, #tpu.memory_space<vmem>>) attributes {dimension_semantics = [#tpu.dimension_semantics<parallel>, #tpu.dimension_semantics<arbitrary>], iteration_bounds = array<i64: 2, 1>, scalar_prefetch = 0 : i64, scratch_operands = 1 : i64, tpu.core_type = #tpu.core_type<tc>, window_params = [{transform_indices = @transform_0, window_bounds = array<i64: 1, 64, 3>}, {transform_indices = @transform_1, window_bounds = array<i64: 1, 3, 64>}, {pipeline_mode = #tpu.pipeline_mode<synchronous>, transform_indices = @transform_2, window_bounds = array<i64: 1, 64>}, {transform_indices = @transform_3, window_bounds = array<i64: 1, 64, 128>}, {pipeline_mode = #tpu.pipeline_mode<synchronous>, transform_indices = @transform_4, window_bounds = array<i64: 1, 128>}, {pipeline_mode = #tpu.pipeline_mode<synchronous>, transform_indices = @transform_5, window_bounds = array<i64: 128, 1024>}, {pipeline_mode = #tpu.pipeline_mode<synchronous>, transform_indices = @transform_6, window_bounds = array<i64: 1, 1024>}, {pipeline_mode = #tpu.pipeline_mode<synchronous>, transform_indices = @transform_7, window_bounds = array<i64: 1024, 512>}, {pipeline_mode = #tpu.pipeline_mode<synchronous>, transform_indices = @transform_8, window_bounds = array<i64: 1, 512>}, {pipeline_mode = #tpu.pipeline_mode<synchronous>, transform_indices = @transform_9, window_bounds = array<i64: 512, 256>}, {pipeline_mode = #tpu.pipeline_mode<synchronous>, transform_indices = @transform_10, window_bounds = array<i64: 1, 256>}, {pipeline_mode = #tpu.pipeline_mode<synchronous>, transform_indices = @transform_11, window_bounds = array<i64: 256, 40>}, {pipeline_mode = #tpu.pipeline_mode<synchronous>, transform_indices = @transform_12, window_bounds = array<i64: 1, 40>}, {transform_indices = @transform_13, window_bounds = array<i64: 1, 1, 40>}]} {
    %c0 = arith.constant 0 : index
    %c0_0 = arith.constant 0 : index
    %c0_1 = arith.constant 0 : index
    %0 = vector.load %arg2[%c0, %c0_0, %c0_1] : memref<1x64x3xf32, #tpu.memory_space<vmem>>, vector<1x64x3xf32>
    %1 = vector.shape_cast %0 : vector<1x64x3xf32> to vector<64x3xf32>
    %2 = arith.truncf %1 : vector<64x3xf32> to vector<64x3xbf16>
    %c0_2 = arith.constant 0 : index
    %c0_3 = arith.constant 0 : index
    %c0_4 = arith.constant 0 : index
    %3 = vector.load %arg3[%c0_2, %c0_3, %c0_4] : memref<1x3x64xbf16, #tpu.memory_space<vmem>>, vector<1x3x64xbf16>
    %4 = vector.shape_cast %3 : vector<1x3x64xbf16> to vector<3x64xbf16>
    %cst = arith.constant dense<0.000000e+00> : vector<64x64xf32>
    %5 = tpu.matmul %2, %4, %cst {dimension_numbers = #tpu.dot_dimension_numbers<[1], [0], [0], [1], [0, 0, 1, 1], [], []>} : vector<64x3xbf16>, vector<3x64xbf16>, vector<64x64xf32> -> vector<64x64xf32>
    %c0_5 = arith.constant 0 : index
    %c0_6 = arith.constant 0 : index
    %6 = vector.load %arg4[%c0_5, %c0_6] : memref<1x64xf32, #tpu.memory_space<vmem>>, vector<1x64xf32>
    %7 = vector.broadcast %6 : vector<1x64xf32> to vector<64x64xf32>
    %8 = arith.addf %5, %7 : vector<64x64xf32>
    %cst_7 = arith.constant 0.000000e+00 : f32
    %9 = vector.broadcast %cst_7 : f32 to vector<64x64xf32>
    %10 = arith.maximumf %8, %9 : vector<64x64xf32>
    %11 = arith.truncf %10 : vector<64x64xf32> to vector<64x64xbf16>
    %c0_8 = arith.constant 0 : index
    %c0_9 = arith.constant 0 : index
    %c0_10 = arith.constant 0 : index
    %12 = vector.load %arg5[%c0_8, %c0_9, %c0_10] : memref<1x64x128xbf16, #tpu.memory_space<vmem>>, vector<1x64x128xbf16>
    %13 = vector.shape_cast %12 : vector<1x64x128xbf16> to vector<64x128xbf16>
    %cst_11 = arith.constant dense<0.000000e+00> : vector<64x128xf32>
    %14 = tpu.matmul %11, %13, %cst_11 {dimension_numbers = #tpu.dot_dimension_numbers<[1], [0], [0], [1], [0, 0, 1, 1], [], []>} : vector<64x64xbf16>, vector<64x128xbf16>, vector<64x128xf32> -> vector<64x128xf32>
    %c0_12 = arith.constant 0 : index
    %c0_13 = arith.constant 0 : index
    %15 = vector.load %arg6[%c0_12, %c0_13] : memref<1x128xf32, #tpu.memory_space<vmem>>, vector<1x128xf32>
    %16 = vector.broadcast %15 : vector<1x128xf32> to vector<64x128xf32>
    %17 = arith.addf %14, %16 : vector<64x128xf32>
    %cst_14 = arith.constant 0.000000e+00 : f32
    %18 = vector.broadcast %cst_14 : f32 to vector<64x128xf32>
    %19 = arith.maximumf %17, %18 : vector<64x128xf32>
    %20 = arith.truncf %19 : vector<64x128xf32> to vector<64x128xbf16>
    %c0_15 = arith.constant 0 : index
    %c0_16 = arith.constant 0 : index
    %21 = vector.load %arg7[%c0_15, %c0_16] : memref<128x1024xbf16, #tpu.memory_space<vmem>>, vector<128x1024xbf16>
    %cst_17 = arith.constant dense<0.000000e+00> : vector<64x1024xf32>
    %22 = tpu.matmul %20, %21, %cst_17 {dimension_numbers = #tpu.dot_dimension_numbers<[1], [0], [0], [1], [0, 0, 1, 1], [], []>} : vector<64x128xbf16>, vector<128x1024xbf16>, vector<64x1024xf32> -> vector<64x1024xf32>
    %c0_18 = arith.constant 0 : index
    %c0_19 = arith.constant 0 : index
    %23 = vector.load %arg8[%c0_18, %c0_19] : memref<1x1024xf32, #tpu.memory_space<vmem>>, vector<1x1024xf32>
    %24 = vector.broadcast %23 : vector<1x1024xf32> to vector<64x1024xf32>
    %25 = arith.addf %22, %24 : vector<64x1024xf32>
    %cst_20 = arith.constant dense<0xFF800000> : vector<1024xf32>
    %26 = vector.multi_reduction <maximumf>, %25, %cst_20 [0] : vector<64x1024xf32> to vector<1024xf32>
    %27 = vector.shape_cast %26 : vector<1024xf32> to vector<1x1024xf32>
    %c0_i32 = arith.constant 0 : i32
    %28 = arith.cmpi eq, %arg1, %c0_i32 : i32
    %29 = arith.extui %28 : i1 to i32
    %c0_i32_21 = arith.constant 0 : i32
    %30 = arith.cmpi ne, %29, %c0_i32_21 : i32
    scf.if %30 {
      %cst_28 = arith.constant 0xFF800000 : f32
      %37 = vector.broadcast %cst_28 : f32 to vector<1x1024xf32>
      %c0_29 = arith.constant 0 : index
      %c0_30 = arith.constant 0 : index
      %38 = vector.load %arg16[%c0_29, %c0_30] : memref<1x1024xf32, #tpu.memory_space<vmem>>, vector<1x1024xf32>
      tpu.vector_store %arg16[%c0_29, %c0_30], %37 {strides = array<i32>} : memref<1x1024xf32, #tpu.memory_space<vmem>>, vector<1x1024xf32>,
    } else {
    }
    %c0_22 = arith.constant 0 : index
    %c0_23 = arith.constant 0 : index
    %31 = vector.load %arg16[%c0_22, %c0_23] : memref<1x1024xf32, #tpu.memory_space<vmem>>, vector<1x1024xf32>
    %32 = arith.maximumf %31, %27 : vector<1x1024xf32>
    %c0_24 = arith.constant 0 : index
    %c0_25 = arith.constant 0 : index
    %33 = vector.load %arg16[%c0_24, %c0_25] : memref<1x1024xf32, #tpu.memory_space<vmem>>, vector<1x1024xf32>
    tpu.vector_store %arg16[%c0_24, %c0_25], %32 {strides = array<i32>} : memref<1x1024xf32, #tpu.memory_space<vmem>>, vector<1x1024xf32>,
    %c0_i32_26 = arith.constant 0 : i32
    %34 = arith.cmpi eq, %arg1, %c0_i32_26 : i32
    %35 = arith.extui %34 : i1 to i32
    %c0_i32_27 = arith.constant 0 : i32
    %36 = arith.cmpi ne, %35, %c0_i32_27 : i32
    scf.if %36 {
      %c0_28 = arith.constant 0 : index
      %c0_29 = arith.constant 0 : index
      %37 = vector.load %arg16[%c0_28, %c0_29] : memref<1x1024xf32, #tpu.memory_space<vmem>>, vector<1x1024xf32>
      %c0_30 = arith.constant 0 : index
      %c0_31 = arith.constant 0 : index
      %38 = vector.load %arg9[%c0_30, %c0_31] : memref<1024x512xbf16, #tpu.memory_space<vmem>>, vector<1024x512xbf16>
      %c0_32 = arith.constant 0 : index
      %c0_33 = arith.constant 0 : index
      %39 = vector.load %arg10[%c0_32, %c0_33] : memref<1x512xf32, #tpu.memory_space<vmem>>, vector<1x512xf32>
      %c0_34 = arith.constant 0 : index
      %c0_35 = arith.constant 0 : index
      %40 = vector.load %arg11[%c0_34, %c0_35] : memref<512x256xbf16, #tpu.memory_space<vmem>>, vector<512x256xbf16>
      %c0_36 = arith.constant 0 : index
      %c0_37 = arith.constant 0 : index
      %41 = vector.load %arg12[%c0_36, %c0_37] : memref<1x256xf32, #tpu.memory_space<vmem>>, vector<1x256xf32>
      %c0_38 = arith.constant 0 : index
      %c0_39 = arith.constant 0 : index
      %42 = vector.load %arg13[%c0_38, %c0_39] : memref<256x40xbf16, #tpu.memory_space<vmem>>, vector<256x40xbf16>
      %c0_40 = arith.constant 0 : index
      %c0_41 = arith.constant 0 : index
      %43 = vector.load %arg14[%c0_40, %c0_41] : memref<1x40xf32, #tpu.memory_space<vmem>>, vector<1x40xf32>
      %44 = arith.truncf %37 : vector<1x1024xf32> to vector<1x1024xbf16>
      %cst_42 = arith.constant dense<0.000000e+00> : vector<1x512xf32>
      %45 = tpu.matmul %44, %38, %cst_42 {dimension_numbers = #tpu.dot_dimension_numbers<[1], [0], [0], [1], [0, 0, 1, 1], [], []>} : vector<1x1024xbf16>, vector<1024x512xbf16>, vector<1x512xf32> -> vector<1x512xf32>
      %46 = arith.addf %45, %39 : vector<1x512xf32>
      %cst_43 = arith.constant 0.000000e+00 : f32
      %47 = vector.broadcast %cst_43 : f32 to vector<1x512xf32>
      %48 = arith.maximumf %46, %47 : vector<1x512xf32>
      %49 = arith.truncf %48 : vector<1x512xf32> to vector<1x512xbf16>
      %cst_44 = arith.constant dense<0.000000e+00> : vector<1x256xf32>
      %50 = tpu.matmul %49, %40, %cst_44 {dimension_numbers = #tpu.dot_dimension_numbers<[1], [0], [0], [1], [0, 0, 1, 1], [], []>} : vector<1x512xbf16>, vector<512x256xbf16>, vector<1x256xf32> -> vector<1x256xf32>
      %51 = arith.addf %50, %41 : vector<1x256xf32>
      %cst_45 = arith.constant 0.000000e+00 : f32
      %52 = vector.broadcast %cst_45 : f32 to vector<1x256xf32>
      %53 = arith.maximumf %51, %52 : vector<1x256xf32>
      %54 = arith.truncf %53 : vector<1x256xf32> to vector<1x256xbf16>
      %cst_46 = arith.constant dense<0.000000e+00> : vector<1x40xf32>
      %55 = tpu.matmul %54, %42, %cst_46 {dimension_numbers = #tpu.dot_dimension_numbers<[1], [0], [0], [1], [0, 0, 1, 1], [], []>} : vector<1x256xbf16>, vector<256x40xbf16>, vector<1x40xf32> -> vector<1x40xf32>
      %56 = arith.addf %55, %43 : vector<1x40xf32>
      %cst_47 = arith.constant dense<0xFF800000> : vector<1xf32>
      %57 = vector.multi_reduction <maximumf>, %56, %cst_47 [1] : vector<1x40xf32> to vector<1xf32>
      %58 = vector.shape_cast %57 : vector<1xf32> to vector<1x1xf32>
      %59 = vector.broadcast %58 : vector<1x1xf32> to vector<1x40xf32>
      %60 = arith.subf %56, %59 : vector<1x40xf32>
      %61 = math.exp %60 : vector<1x40xf32>
      %cst_48 = arith.constant dense<0.000000e+00> : vector<1xf32>
      %62 = vector.multi_reduction <add>, %61, %cst_48 [1] : vector<1x40xf32> to vector<1xf32>
      %63 = vector.shape_cast %62 : vector<1xf32> to vector<1x1xf32>
      %64 = math.log %63 : vector<1x1xf32>
      %65 = vector.broadcast %64 : vector<1x1xf32> to vector<1x40xf32>
      %66 = arith.subf %60, %65 : vector<1x40xf32>
      %c0_49 = arith.constant 0 : index
      %c0_50 = arith.constant 0 : index
      %c0_51 = arith.constant 0 : index
      %67 = vector.load %arg15[%c0_49, %c0_50, %c0_51] : memref<1x1x40xf32, #tpu.memory_space<vmem>>, vector<1x1x40xf32>
      %68 = vector.shape_cast %67 : vector<1x1x40xf32> to vector<1x40xf32>
      %69 = vector.shape_cast %66 : vector<1x40xf32> to vector<1x1x40xf32>
      tpu.vector_store %arg15[%c0_49, %c0_50, %c0_51], %69 {strides = array<i32>} : memref<1x1x40xf32, #tpu.memory_space<vmem>>, vector<1x1x40xf32>,
    } else {
    }
    return
  }
  func.func @transform_0(%arg0: i32, %arg1: i32) -> (i32, i32, i32) {
    %c0_i32 = arith.constant 0 : i32
    %c0_i32_0 = arith.constant 0 : i32
    return %arg0, %arg1, %c0_i32 : i32, i32, i32
  }
  func.func @transform_1(%arg0: i32, %arg1: i32) -> (i32, i32, i32) {
    %c0_i32 = arith.constant 0 : i32
    %c0_i32_0 = arith.constant 0 : i32
    %c0_i32_1 = arith.constant 0 : i32
    return %arg0, %c0_i32, %c0_i32_0 : i32, i32, i32
  }
  func.func @transform_2(%arg0: i32, %arg1: i32) -> (i32, i32) {
    %c0_i32 = arith.constant 0 : i32
    %c0_i32_0 = arith.constant 0 : i32
    %c0_i32_1 = arith.constant 0 : i32
    return %c0_i32, %c0_i32_0 : i32, i32
  }
  func.func @transform_3(%arg0: i32, %arg1: i32) -> (i32, i32, i32) {
    %c0_i32 = arith.constant 0 : i32
    %c0_i32_0 = arith.constant 0 : i32
    %c0_i32_1 = arith.constant 0 : i32
    return %arg0, %c0_i32, %c0_i32_0 : i32, i32, i32
  }
  func.func @transform_4(%arg0: i32, %arg1: i32) -> (i32, i32) {
    %c0_i32 = arith.constant 0 : i32
    %c0_i32_0 = arith.constant 0 : i32
    %c0_i32_1 = arith.constant 0 : i32
    return %c0_i32, %c0_i32_0 : i32, i32
  }
  func.func @transform_5(%arg0: i32, %arg1: i32) -> (i32, i32) {
    %c0_i32 = arith.constant 0 : i32
    %c0_i32_0 = arith.constant 0 : i32
    %c0_i32_1 = arith.constant 0 : i32
    return %c0_i32, %c0_i32_0 : i32, i32
  }
  func.func @transform_6(%arg0: i32, %arg1: i32) -> (i32, i32) {
    %c0_i32 = arith.constant 0 : i32
    %c0_i32_0 = arith.constant 0 : i32
    %c0_i32_1 = arith.constant 0 : i32
    return %c0_i32, %c0_i32_0 : i32, i32
  }
  func.func @transform_7(%arg0: i32, %arg1: i32) -> (i32, i32) {
    %c0_i32 = arith.constant 0 : i32
    %c0_i32_0 = arith.constant 0 : i32
    %c0_i32_1 = arith.constant 0 : i32
    return %c0_i32, %c0_i32_0 : i32, i32
  }
  func.func @transform_8(%arg0: i32, %arg1: i32) -> (i32, i32) {
    %c0_i32 = arith.constant 0 : i32
    %c0_i32_0 = arith.constant 0 : i32
    %c0_i32_1 = arith.constant 0 : i32
    return %c0_i32, %c0_i32_0 : i32, i32
  }
  func.func @transform_9(%arg0: i32, %arg1: i32) -> (i32, i32) {
    %c0_i32 = arith.constant 0 : i32
    %c0_i32_0 = arith.constant 0 : i32
    %c0_i32_1 = arith.constant 0 : i32
    return %c0_i32, %c0_i32_0 : i32, i32
  }
  func.func @transform_10(%arg0: i32, %arg1: i32) -> (i32, i32) {
    %c0_i32 = arith.constant 0 : i32
    %c0_i32_0 = arith.constant 0 : i32
    %c0_i32_1 = arith.constant 0 : i32
    return %c0_i32, %c0_i32_0 : i32, i32
  }
  func.func @transform_11(%arg0: i32, %arg1: i32) -> (i32, i32) {
    %c0_i32 = arith.constant 0 : i32
    %c0_i32_0 = arith.constant 0 : i32
    %c0_i32_1 = arith.constant 0 : i32
    return %c0_i32, %c0_i32_0 : i32, i32
  }
  func.func @transform_12(%arg0: i32, %arg1: i32) -> (i32, i32) {
    %c0_i32 = arith.constant 0 : i32
    %c0_i32_0 = arith.constant 0 : i32
    %c0_i32_1 = arith.constant 0 : i32
    return %c0_i32, %c0_i32_0 : i32, i32
  }
  func.func @transform_13(%arg0: i32, %arg1: i32) -> (i32, i32, i32) {
    %c0_i32 = arith.constant 0 : i32
    %c0_i32_0 = arith.constant 0 : i32
    %c0_i32_1 = arith.constant 0 : i32
    return %arg0, %c0_i32, %c0_i32_0 : i32, i32, i32
  }
}

</mosaic_0001>

<bundles_post_ra>
// kernel: pointnet_forward.3
= control target key start
LH: loop header
LB: loop body
LE: loop exit
PB: predicated region body
PF: predicated region fallthrough
CT: control target
= control target key end

     0   :  { %s6670_s0 = inlined_call_operand.vmem [shape: f32[2,64,3], index: 0, kind: input, shape index: {}]   ;;  %s6671_s1 = inlined_call_operand.hbm [shape: bf16[3,64], index: 1, kind: input, shape index: {}]   ;;  %s6672_s2 = inlined_call_operand.hbm [shape: f32[1,64], index: 2, kind: input, shape index: {}]   ;;  %s6673_s3 = inlined_call_operand.hbm [shape: bf16[64,128], index: 3, kind: input, shape index: {}]   ;;  %s6674_s4 = inlined_call_operand.hbm [shape: f32[1,128], index: 4, kind: input, shape index: {}]   ;;  %s6675_s5 = inlined_call_operand.hbm [shape: bf16[128,1024], index: 5, kind: input, shape index: {}]   ;;  %s6676_s6 = inlined_call_operand.hbm [shape: f32[1,1024], index: 6, kind: input, shape index: {}]   ;;  %s6677_s7 = inlined_call_operand.hbm [shape: bf16[1024,512], index: 7, kind: input, shape index: {}]   ;;  %s6678_s8 = inlined_call_operand.hbm [shape: f32[1,512], index: 8, kind: input, shape index: {}]   ;;  %s6679_s9 = inlined_call_operand.hbm [shape: bf16[512,256], index: 9, kind: input, shape index: {}]   ;;  %s6680_s10 = inlined_call_operand.hbm [shape: f32[1,256], index: 10, kind: input, shape index: {}]   ;;  %s6681_s11 = inlined_call_operand.vmem [shape: bf16[256,9], index: 11, kind: input, shape index: {}]   ;;  %s6682_s12 = inlined_call_operand.hbm [shape: f32[1,9], index: 12, kind: input, shape index: {}]   ;;  %s6683_s13 = inlined_call_operand.vmem [shape: f32[2,1,9], index: 13, kind: output, shape index: {}]  }
   0x1   :  { %6684 = sst [smem:[#allocation26_spill]] %s6671_s1 }
   0x2   :  { %6685 = sst [smem:[#allocation27_spill]] %s6672_s2 }
   0x3   :  { %18 = vsyncpa [#allocation4], 0 }
   0x4   :  { %19 = vsyncpa [#allocation6], 0 }
   0x5   :  { %20 = vsyncpa [#allocation9], 0 }
   0x6   :  { %21 = vsyncpa [#allocation12], 0 }
   0x7   :  { %22 = vsyncpa [#allocation15], 0 }
   0x8   :  { %23 = vsyncpa [#allocation18], 0  ;;  %s6158_s25 = smov 0   ;;  %s6160_s26 = smov 0  }
   0x9   :  { %s6162_s27 = smov 0  }
   0xa LB: > { %s6066_s28 = smov [#allocation5]   ;;  %s4579_s30 = sadd.s32 4294967295, %s6064_s27   ;;  %s6064_s27 = sphi %s6162_s27, %s29_s27   ;;  %s6060_s26 = sphi %s6160_s26, %s6693_s26   ;;  %s6056_s25 = sphi %s6158_s25, %s6692_s25  }
   0xb   : > { %s376_s29 = sshll.u32 %s6066_s28, 4  ;;  %p4581_p0 = scmp.ge.s32.totalorder %s6064_s27, 1  ;;  %s377_s29 = int_to_ptr.vmem [resolvable:$true] %s376_s29 }
   0xc   : > { %p352_p1 = scmp.lt.s32.totalorder %s6064_s27, 3  ;;  %p6176_p2 = scmp.eq.s32.totalorder %s4579_s30, 0 }
   0xd   : > { %s6067_s16 = smov [#allocation8]   ;;  %s6068_s18 = smov [#allocation11]  }
   0xe   : > { %p6180_p3 = pnand %p4581_p0, %p352_p1  ;;  %s400_s17 = sshll.u32 %s6067_s16, 4  ;;  %s6186_s17 = int_to_ptr.vmem [resolvable:$true] %s400_s17 }
   0xf   : > { %s424_s19 = sshll.u32 %s6068_s18, 4  ;;  %s6069_s21 = smov [#allocation14]   ;;  %s6194_s19 = int_to_ptr.vmem [resolvable:$true] %s424_s19 }
  0x10   : > { %p5130_p4 = pneg %p6180_p3  ;;  %s448_s22 = sshll.u32 %s6069_s21, 4  ;;  %s6196_s22 = int_to_ptr.vmem [resolvable:$true] %s448_s22 }
  0x11   : > { %s5743_s24 = scalar_lea.vmem %s377_s29, 16  ;;  %s5750_s28 = scalar_lea.vmem %s377_s29, 32 }
  0x12   : > { %p6190_p5 = pnand %p6176_p2, %p5130_p4  ;;  %p5744_p7 = scmp.ne.s32.totalorder %s377_s29, %s5743_s24 }
  0x13   : > { %p5751_p10 = scmp.lt.s32.totalorder %s377_s29, %s377_s29  ;;  %p5752_p11 = scmp.lt.s32.totalorder %s5750_s28, %s5743_s24 }
  0x14   : > { %p6200_p6 = pneg %p6190_p5 }
  0x15   : > { %p5753_p12 = por %p5752_p11, %p5751_p10 }
  0x16   : > { %p5746_p8 = pnand %p5744_p7, %p6200_p6 }
  0x18   : > { %p5747_p9 = pneg %p5746_p8 }
  0x1a   : > { %p5754_p13 = pnand %p5753_p12, %p5747_p9 }
  0x1c   : > { %5757 = shalt.err (!%p5754_p13)
}
  0x1d   : > { %s6690_s2 = sld [smem:[#allocation27_spill]]  ;;  %s5769_s18 = scalar_lea.vmem %s6186_s17, 16 }
  0x1e   : > { %p5770_p0 = scmp.ne.s32.totalorder %s6186_s17, %s5769_s18  ;;  %s5776_s21 = scalar_lea.vmem %s6186_s17, 32 }
  0x1f   : > { %p5777_p7 = scmp.lt.s32.totalorder %s6186_s17, %s6186_s17  ;;  %p5778_p8 = scmp.lt.s32.totalorder %s5776_s21, %s5769_s18 }
  0x20   : > { %p5772_p1 = pnand %p5770_p0, %p6200_p6 }
  0x21   : > { %p5779_p9 = por %p5778_p8, %p5777_p7 }
  0x22   : > { %p5773_p4 = pneg %p5772_p1 }
  0x23   : > { %5136 = dma.hbm_to_vmem [thread:$0]  (!%p6190_p5), %s6690_s2, 16, %s377_s29, [#allocation6]  }
  0x24   : > { %p5780_p10 = pnand %p5779_p9, %p5773_p4 }
  0x26   : > { %5783 = shalt.err (!%p5780_p10)
}
  0x27   : > { %5142 = dma.hbm_to_vmem [thread:$0]  (!%p6190_p5), %s6674_s4, 16, %s6186_s17, [#allocation9]  }
  0x28   : > { %s5795_s29 = scalar_lea.vmem %s6194_s19, 128  ;;  %p5803_p0 = scmp.lt.s32.totalorder %s6194_s19, %s6194_s19 }
  0x29   : > { %p5796_p11 = scmp.ne.s32.totalorder %s6194_s19, %s5795_s29  ;;  %p5804_p1 = scmp.lt.s32.totalorder %s5795_s29, %s5795_s29 }
  0x2b   : > { %p5798_p12 = pnand %p5796_p11, %p6200_p6  ;;  %p5805_p4 = por %p5804_p1, %p5803_p0 }
  0x2d   : > { %p5799_p13 = pneg %p5798_p12 }
  0x2f   : > { %p5806_p7 = pnand %p5805_p4, %p5799_p13 }
  0x31   : > { %5809 = shalt.err (!%p5806_p7)
}
  0x32   : > { %5148 = dma.hbm_to_vmem [thread:$0]  (!%p6190_p5), %s6676_s6, 128, %s6194_s19, [#allocation12]  }
  0x33   : > { %s5821_s17 = scalar_lea.vmem %s6196_s22, 64  ;;  %p5829_p11 = scmp.lt.s32.totalorder %s6196_s22, %s6196_s22 }
  0x34   : > { %p5822_p8 = scmp.ne.s32.totalorder %s6196_s22, %s5821_s17  ;;  %p5830_p12 = scmp.lt.s32.totalorder %s5821_s17, %s5821_s17 }
  0x36   : > { %p5824_p9 = pnand %p5822_p8, %p6200_p6  ;;  %p5831_p13 = por %p5830_p12, %p5829_p11 }
  0x38   : > { %p5825_p10 = pneg %p5824_p9 }
  0x3a   : > { %p5832_p0 = pnand %p5831_p13, %p5825_p10 }
  0x3c   : > { %5835 = shalt.err (!%p5832_p0)
}
  0x3d   : > { %5154 = dma.hbm_to_vmem [thread:$0]  (!%p6190_p5), %s6678_s8, 64, %s6196_s22, [#allocation15]  }
  0x3e   : > { %s6070_s19 = smov [#allocation17]  }
  0x3f   : > { %s472_s24 = sshll.u32 %s6070_s19, 4  ;;  %s473_s24 = int_to_ptr.vmem [resolvable:$true] %s472_s24 }
  0x40   : > { %s5847_s28 = scalar_lea.vmem %s473_s24, 32  ;;  %p5855_p8 = scmp.lt.s32.totalorder %s473_s24, %s473_s24 }
  0x41   : > { %p5848_p1 = scmp.ne.s32.totalorder %s473_s24, %s5847_s28  ;;  %p5856_p9 = scmp.lt.s32.totalorder %s5847_s28, %s5847_s28 }
  0x43   : > { %p5850_p4 = pnand %p5848_p1, %p6200_p6  ;;  %p5857_p10 = por %p5856_p9, %p5855_p8 }
  0x45   : > { %p5851_p7 = pneg %p5850_p4 }
  0x47   : > { %p5858_p11 = pnand %p5857_p10, %p5851_p7 }
  0x49   : > { %5861 = shalt.err (!%p5858_p11)
}
  0x4a   : > { %5160 = dma.hbm_to_vmem [thread:$0]  (!%p6190_p5), %s6680_s10, 32, %s473_s24, [#allocation18]  }
  0x4b   : > { %s41_s22 = sadd.s32 1, %s6060_s26  ;;  %s6071_s16 = smov [#allocation3]  }
  0x4c   : > { %p43_p12 = scmp.ge.s32.totalorder %s41_s22, 2  ;;  %s365_s17 = sshll.u32 %s6071_s16, 4  ;;  %s366_s17 = int_to_ptr.vmem [resolvable:$true] %s365_s17 }
  0x4d   : > { %s5873_s18 = scalar_lea.vmem %s366_s17, 32  ;;  %p5881_p4 = scmp.lt.s32.totalorder %s366_s17, %s366_s17 }
  0x4e   : > { %s6695_s22 = smov (%p43_p12, %s41_s22), 0  ;;  %p5874_p13 = scmp.ne.s32.totalorder %s366_s17, %s5873_s18 }
  0x4f   : > { %p5882_p7 = scmp.lt.s32.totalorder %s5873_s18, %s5873_s18 }
  0x50   : > { %p5876_p0 = pnand %p5874_p13, %p6200_p6 }
  0x51   : > { %p5883_p8 = por %p5882_p7, %p5881_p4 }
  0x52   : > { %p5877_p1 = pneg %p5876_p0 }
  0x54   : > { %p5884_p9 = pnand %p5883_p8, %p5877_p1 }
  0x56   : > { %5887 = shalt.err (!%p5884_p9)
}
  0x57   : > { %s6691_s1 = sld [smem:[#allocation26_spill]]  ;;  %s6072_s24 = smov [#allocation7]  }
  0x58   : > { %s386_s28 = sshll.u32 %s6072_s24, 4  ;;  %s387_s28 = int_to_ptr.vmem [resolvable:$true] %s386_s28 }
  0x59   : > { %s5899_s29 = scalar_lea.vmem %s387_s28, 512  ;;  %p5907_p13 = scmp.lt.s32.totalorder %s387_s28, %s387_s28 }
  0x5a   : > { %p5900_p10 = scmp.ne.s32.totalorder %s387_s28, %s5899_s29  ;;  %p5908_p0 = scmp.lt.s32.totalorder %s5899_s29, %s5899_s29 }
  0x5c   : > { %p5902_p11 = pnand %p5900_p10, %p6200_p6  ;;  %p5909_p4 = por %p5908_p0, %p5907_p13 }
  0x5d   : > { %5133 = dma.hbm_to_vmem [thread:$0]  (!%p6190_p5), %s6691_s1, 32, %s366_s17, [#allocation4]  }
  0x5e   : > { %p5903_p12 = pneg %p5902_p11 }
  0x60   : > { %p5910_p1 = pnand %p5909_p4, %p5903_p12 }
  0x62   : > { %5913 = shalt.err (!%p5910_p1)
}
  0x63   : > { %s6073_s30 = smov 64   ;;  %s6074_s16 = smov 4  }
  0x64   : > { %5139 = dma.hbm_to_vmem [thread:$0]  (!%p6190_p5), %s6673_s3, 512, %s387_s28, [#allocation6], %s6073_s30, %s6073_s30, %s6074_s16  }
  0x65   : > { %s6075_s21 = smov [#allocation10]  }
  0x66   : > { %s410_s19 = sshll.u32 %s6075_s21, 4  ;;  %s411_s19 = int_to_ptr.vmem [resolvable:$true] %s410_s19 }
  0x67   : > { %s5925_s24 = scalar_lea.vmem %s411_s19, 8192  ;;  %p5933_p10 = scmp.lt.s32.totalorder %s411_s19, %s411_s19 }
  0x68   : > { %p5926_p7 = scmp.ne.s32.totalorder %s411_s19, %s5925_s24  ;;  %p5934_p11 = scmp.lt.s32.totalorder %s5925_s24, %s5925_s24 }
  0x6a   : > { %p5928_p8 = pnand %p5926_p7, %p6200_p6  ;;  %p5935_p12 = por %p5934_p11, %p5933_p10 }
  0x6c   : > { %p5929_p9 = pneg %p5928_p8 }
  0x6e   : > { %p5936_p13 = pnand %p5935_p12, %p5929_p9 }
  0x70   : > { %5939 = shalt.err (!%p5936_p13)
}
  0x71   : > { %s6076_s29 = smov 512   ;;  %s6077_s1 = smov 32  }
  0x72   : > { %5145 = dma.hbm_to_vmem [thread:$0]  (!%p6190_p5), %s6675_s5, 8192, %s411_s19, [#allocation9], %s6076_s29, %s6076_s29, %s6077_s1  }
  0x73   : > { %s6078_s30 = smov [#allocation13]  }
  0x74   : > { %s434_s16 = sshll.u32 %s6078_s30, 4  ;;  %s435_s16 = int_to_ptr.vmem [resolvable:$true] %s434_s16 }
  0x75   : > { %s5951_s17 = scalar_lea.vmem %s435_s16, 32768  ;;  %p5959_p7 = scmp.lt.s32.totalorder %s435_s16, %s435_s16 }
  0x76   : > { %p5952_p0 = scmp.ne.s32.totalorder %s435_s16, %s5951_s17  ;;  %p5960_p8 = scmp.lt.s32.totalorder %s5951_s17, %s5951_s17 }
  0x78   : > { %p5954_p4 = pnand %p5952_p0, %p6200_p6  ;;  %p5961_p9 = por %p5960_p8, %p5959_p7 }
  0x7a   : > { %p5955_p1 = pneg %p5954_p4 }
  0x7c   : > { %p5962_p10 = pnand %p5961_p9, %p5955_p1 }
  0x7e   : > { %5965 = shalt.err (!%p5962_p10)
}
  0x7f   : > { %s6079_s21 = smov 256   ;;  %s6080_s24 = smov 16  }
  0x80   : > { %5151 = dma.hbm_to_vmem [thread:$0]  (!%p6190_p5), %s6677_s7, 32768, %s435_s16, [#allocation12], %s6079_s21, %s6079_s21, %s6080_s24  }
  0x81   : > { %s6081_s19 = smov [#allocation16]  }
  0x82   : > { %s458_s29 = sshll.u32 %s6081_s19, 4  ;;  %s459_s29 = int_to_ptr.vmem [resolvable:$true] %s458_s29 }
  0x83   : > { %s5977_s28 = scalar_lea.vmem %s459_s29, 8192  ;;  %p5985_p0 = scmp.lt.s32.totalorder %s459_s29, %s459_s29 }
  0x84   : > { %p5978_p11 = scmp.ne.s32.totalorder %s459_s29, %s5977_s28  ;;  %p5986_p4 = scmp.lt.s32.totalorder %s5977_s28, %s5977_s28 }
  0x86   : > { %p5980_p12 = pnand %p5978_p11, %p6200_p6  ;;  %p5987_p1 = por %p5986_p4, %p5985_p0 }
  0x88   : > { %p5981_p13 = pneg %p5980_p12 }
  0x8a   : > { %p5988_p7 = pnand %p5987_p1, %p5981_p13 }
  0x8c   : > { %5991 = shalt.err (!%p5988_p7)
}
  0x8d   : > { %s6082_s30 = smov 128   ;;  %s6083_s17 = smov 8  }
  0x8e   : > { %5157 = dma.hbm_to_vmem [thread:$0]  (!%p6190_p5), %s6679_s9, 8192, %s459_s29, [#allocation15], %s6082_s30, %s6082_s30, %s6083_s17  }
  0x8f   : > { %s6084_s21 = smov [#allocation19]  }
  0x90   : > { %s486_s24 = sshll.u32 %s6084_s21, 4  ;;  %s487_s24 = int_to_ptr.vmem [resolvable:$true] %s486_s24 }
  0x91   : > { %s6003_s1 = scalar_lea.vmem %s487_s24, 16  ;;  %s6010_s19 = scalar_lea.vmem %s487_s24, 32 }
  0x92   : > { %p6004_p8 = scmp.ne.s32.totalorder %s487_s24, %s6003_s1  ;;  %p6011_p11 = scmp.lt.s32.totalorder %s487_s24, %s487_s24 }
  0x93   : > { %p6012_p12 = scmp.lt.s32.totalorder %s6010_s19, %s6003_s1 }
  0x94   : > { %p6006_p9 = pnand %p6004_p8, %p6200_p6 }
  0x95   : > { %p6013_p13 = por %p6012_p12, %p6011_p11 }
  0x96   : > { %p6007_p10 = pneg %p6006_p9 }
  0x98   : > { %p6014_p0 = pnand %p6013_p13, %p6007_p10 }
  0x9a   : > { %6017 = shalt.err (!%p6014_p0)
}
  0x9b   : > { %5163 = dma.hbm_to_vmem [thread:$0]  (!%p6190_p5), %s6682_s12, 16, %s487_s24, [#allocation18]  }
  0x9c   : > { %512 = sbr.rel (%p6180_p3) target bundleno = 1678 (0x68e), region = 72 }
  0xa1   : > { %6031 = dma.done.wait (%p6176_p2), [#allocation4], 32  }
  0xa2   : > { %6033 = vsyncadd (%p6176_p2), [#allocation4], 4294967264 }
  0xa3   : > { %6035 = dma.done.wait (%p6176_p2), [#allocation6], 528  }
  0xa4   : > { %6037 = vsyncadd (%p6176_p2), [#allocation6], 4294966768 }
  0xa5   : > { %6039 = dma.done.wait (%p6176_p2), [#allocation9], 8208  }
  0xa6   : > { %6041 = vsyncadd (%p6176_p2), [#allocation9], 4294959088 }
  0xa7   : > { %6043 = dma.done.wait (%p6176_p2), [#allocation12], 32896  }
  0xa8   : > { %6045 = vsyncadd (%p6176_p2), [#allocation12], 4294934400 }
  0xa9   : > { %6047 = dma.done.wait (%p6176_p2), [#allocation15], 8256  }
  0xaa   : > { %6049 = vsyncadd (%p6176_p2), [#allocation15], 4294959040 }
  0xab   : > { %6051 = dma.done.wait (%p6176_p2), [#allocation18], 48  }
  0xac   : > { %6053 = vsyncadd (%p6176_p2), [#allocation18], 4294967248  ;;  %vm645_vm0 = vcmask 1040384   ;;  %p599_p3 = scmp.lt.s32.totalorder %s6056_s25, 1  ;;  %vm646_vm1 = vcmask 1041408   ;;  %v6085_v0 = vmov 65535  }
  0xad   : > { %v647_v1 = vsel %vm645_vm0, 4294967295, %v6085_v0  ;;  %v624_v3 = vld [vmem:[#allocation3] sm:$0x3]  ;;  %vm632_vm2 = vcmask 23552   ;;  %v5233_v18 = vld [vmem:[#allocation7 + $0x10] sm:$0xff]   ;;  %v5234_v19 = vld [vmem:[#allocation7 + $0x8] sm:$0xff]  }
  0xae   : > { %s6697_s25 = smov (!%p599_p3, %s6056_s25), 1  ;;  %v648_v2 = vsel %vm646_vm1, %v647_v1, 0  ;;  %v5232_v13 = vld [vmem:[#allocation7 + $0x18] sm:$0xff]   ;;  %v5235_v20 = vld [vmem:[#allocation7] sm:$0xff]   ;;  %v6338_v23 = vld [vmem:[#allocation10 + $0x1c8] sm:$0xff]  ;;  %vm768_vm3 = vcmask 523264  }
  0xaf   : > { %s5024_s2 = sshll.u32 %s6697_s25, 6  ;;  %v650_v6 = vand.u32 %v648_v2, %v624_v3  ;;  %v914_v21 = vld [vmem:[#allocation10 + $0x1c0] sm:$0xff]  ;;  %v6340_v25 = vld [vmem:[#allocation10 + $0x1e8] sm:$0xff]  ;;  %v4608_v47 = vld [vmem:[#allocation5] ss:$0 sm:$0xff]  ;;  %s610_s18 = scalar_lea.vmem %s6683_s13, %s6697_s25  ;;  %vm4408_vm4 = vcmask 65536  }
  0xb0   : > { %s606_s23 = scalar_lea.vmem %s6670_s0, %s5024_s2  ;;  %v918_v22 = vld [vmem:[#allocation10 + $0x1e0] sm:$0xff]  ;;  %v4680_v29 = vcombine.low %v6338_v23, %v6340_v25  ;;  %v4681_v30 = vcombine.high %v6338_v23, %v6340_v25  ;;  %v907_v58 = vld [vmem:[#allocation10 + $0x188] sm:$0xff] }
  0xb1   : > { %v612_v4 = vld [vmem:[%s606_s23] sm:$0xff]  ;;  %v613_v5 = vld [vmem:[%s606_s23 + $0x8] sm:$0xff]  ;;  %v614_v8 = vld [vmem:[%s606_s23 + $0x10] sm:$0xff]  ;;  %5060 = vmatprep.subr.bf16.mxu1 %v650_v6  ;;  %v4679_v24 = vcombine.high %v914_v21, %v918_v22  ;;  %v4678_v26 = vcombine.low %v914_v21, %v918_v22 }
  0xb2   : > { %v620_v7 = vpack.c.bf16 %v613_v5, %v612_v4  ;;  %v615_v9 = vld [vmem:[%s606_s23 + $0x18] sm:$0xff]  ;;  %v616_v10 = vld [vmem:[%s606_s23 + $0x20] sm:$0xff]  ;;  %v617_v11 = vld [vmem:[%s606_s23 + $0x28] sm:$0xff]  ;;  %5061 = vmatpush3.bf16.msra.mxu1 %v650_v6 }
  0xb3   : > { %v621_v12 = vpack.c.bf16 %v615_v9, %v614_v8  ;;  %v622_v14 = vpack.c.bf16 %v617_v11, %v616_v10  ;;  %5070 = vmatprep.subr.bf16.mxu1 %v5232_v13  ;;  %v618_v15 = vld [vmem:[%s606_s23 + $0x30] sm:$0xff]  ;;  %v619_v16 = vld [vmem:[%s606_s23 + $0x38] sm:$0xff]  ;;  %v906_v27 = vld [vmem:[#allocation10 + $0x180] sm:$0xff]  ;;  %1284 = vmatprep.subr.bf16.mxu0 %v4679_v24 }
  0xb4   : > { %5062 = vmatprep.mubr.msk.bf16.mxu1 %vm632_vm2, %v620_v7  ;;  %v623_v17 = vpack.c.bf16 %v619_v16, %v618_v15  ;;  %v910_v28 = vld [vmem:[#allocation10 + $0x1a0] sm:$0xff]  ;;  %1285 = vmatpush1.bf16.msra.mxu0 %v4678_v26  ;;  %v911_v59 = vld [vmem:[#allocation10 + $0x1a8] sm:$0xff] }
  0xb5   : > { %5063 = vmatmul.mubr.msk.bf16.vlgmr.msra.gmra.mxu1 %vm632_vm2, %v621_v12  ;;  %v4671_v31 = vcombine.high %v906_v27, %v910_v28  ;;  %v898_v32 = vld [vmem:[#allocation10 + $0x140] sm:$0xff]  ;;  %v4670_v34 = vcombine.low %v906_v27, %v910_v28  ;;  %v4673_v3 = vcombine.high %v907_v58, %v911_v59  ;;  %v899_v5 = vld [vmem:[#allocation10 + $0x148] sm:$0xff]  ;;  %v4672_v12 = vcombine.low %v907_v58, %v911_v59 }
  0xb6   : > { %5066 = vmatprep.mubr.msk.bf16.mxu1 %vm632_vm2, %v622_v14  ;;  %5071 = vmatpush3.bf16.msra.mxu1 %v5232_v13  ;;  %v902_v33 = vld [vmem:[#allocation10 + $0x160] sm:$0xff]  ;;  %v903_v6 = vld [vmem:[#allocation10 + $0x168] sm:$0xff] }
  0xb7   : > { %5072 = vmatprep.subr.bf16.mxu1 %v5233_v18  ;;  %1286 = vmatprep.subr.bf16.mxu0 %v4671_v31  ;;  %v4663_v35 = vcombine.high %v898_v32, %v902_v33  ;;  %v890_v36 = vld [vmem:[#allocation10 + $0x100] sm:$0xff]  ;;  %v4662_v38 = vcombine.low %v898_v32, %v902_v33  ;;  %v4665_v13 = vcombine.high %v899_v5, %v903_v6  ;;  %v891_v15 = vld [vmem:[#allocation10 + $0x108] sm:$0xff] }
  0xb8   : > { %v894_v37 = vld [vmem:[#allocation10 + $0x120] sm:$0xff]  ;;  %1287 = vmatpush1.bf16.msra.mxu0 %v4670_v34  ;;  %v895_v16 = vld [vmem:[#allocation10 + $0x128] sm:$0xff] }
  0xb9   : > { %v882_v39 = vld [vmem:[#allocation10 + $0xc0] sm:$0xff]  ;;  %1288 = vmatprep.subr.bf16.mxu0 %v4663_v35  ;;  %v4655_v41 = vcombine.high %v890_v36, %v894_v37  ;;  %v4654_v42 = vcombine.low %v890_v36, %v894_v37  ;;  %v883_v21 = vld [vmem:[#allocation10 + $0xc8] sm:$0xff]  ;;  %v4656_v23 = vcombine.low %v891_v15, %v895_v16 }
  0xba   : > { %5073 = vmatpush3.bf16.msra.mxu1 %v5233_v18  ;;  %v886_v40 = vld [vmem:[#allocation10 + $0xe0] sm:$0xff]  ;;  %v887_v22 = vld [vmem:[#allocation10 + $0xe8] sm:$0xff] }
  0xbb   : > { %5074 = vmatprep.subr.bf16.mxu1 %v5234_v19  ;;  %v4647_v43 = vcombine.high %v882_v39, %v886_v40  ;;  %v4646_v44 = vcombine.low %v882_v39, %v886_v40  ;;  %v4649_v24 = vcombine.high %v883_v21, %v887_v22  ;;  %v4648_v25 = vcombine.low %v883_v21, %v887_v22  ;;  %v874_v26 = vld [vmem:[#allocation10 + $0x80] sm:$0xff]  ;;  %v875_v28 = vld [vmem:[#allocation10 + $0x88] sm:$0xff] }
  0xbc   : > { %1289 = vmatpush1.bf16.msra.mxu0 %v4662_v38  ;;  %v878_v27 = vld [vmem:[#allocation10 + $0xa0] sm:$0xff]  ;;  %v867_v36 = vld [vmem:[#allocation10 + $0x48] sm:$0xff] }
  0xbd   : > { %5067 = vmatmul.mubr.msk.bf16.gmra.mxu1 %vm632_vm2, %v623_v17  ;;  %1290 = vmatprep.subr.bf16.mxu0 %v4655_v41  ;;  %v4638_v33 = vcombine.low %v874_v26, %v878_v27  ;;  %v866_v34 = vld [vmem:[#allocation10 + $0x40] sm:$0xff]  ;;  %v871_v38 = vld [vmem:[#allocation10 + $0x68] sm:$0xff] }
  0xbe   : > { %5075 = vmatpush3.bf16.msra.mxu1 %v5234_v19  ;;  %v4664_v19 = vcombine.low %v899_v5, %v903_v6  ;;  %v870_v35 = vld [vmem:[#allocation10 + $0x60] sm:$0xff]  ;;  %v4632_v39 = vcombine.low %v867_v36, %v871_v38  ;;  %v4633_v40 = vcombine.high %v867_v36, %v871_v38  ;;  %v909_v5 = vld [vmem:[#allocation10 + $0x198] sm:$0xff]  ;;  %v888_v38 = vld [vmem:[#allocation10 + $0xf0] sm:$0xff] }
  0xbf   : > { %5076 = vmatprep.subr.bf16.mxu1 %v5235_v20  ;;  %v4631_v37 = vcombine.high %v866_v34, %v870_v35  ;;  %v4630_v41 = vcombine.low %v866_v34, %v870_v35  ;;  %v913_v6 = vld [vmem:[#allocation10 + $0x1b8] sm:$0xff] }
  0xc0   : > { %1291 = vmatpush1.bf16.msra.mxu0 %v4654_v42  ;;  %v858_v42 = vld [vmem:[#allocation10] sm:$0xff]  ;;  %v4676_v21 = vcombine.low %v909_v5, %v913_v6 }
  0xc1   : > { %1292 = vmatprep.subr.bf16.mxu0 %v4647_v43  ;;  %v862_v43 = vld [vmem:[#allocation10 + $0x20] sm:$0xff] }
  0xc2   : > { %5077 = vmatpush3.bf16.msra.mxu1 %v5235_v20  ;;  %v4657_v20 = vcombine.high %v891_v15, %v895_v16  ;;  %v904_v16 = vld [vmem:[#allocation10 + $0x170] sm:$0xff] }
  0xc3   : > { %1357 = vmatprep.subr.bf16.mxu1 %v4681_v30  ;;  %v879_v30 = vld [vmem:[#allocation10 + $0xa8] sm:$0xff] }
  0xc4   : > { %1293 = vmatpush1.bf16.msra.mxu0 %v4646_v44  ;;  %v4640_v31 = vcombine.low %v875_v28, %v879_v30  ;;  %v4641_v32 = vcombine.high %v875_v28, %v879_v30  ;;  %v859_v44 = vld [vmem:[#allocation10 + $0x8] sm:$0xff]  ;;  %v893_v28 = vld [vmem:[#allocation10 + $0x118] sm:$0xff] }
 0x175   : > { %v5064_v45 = vpop.f32.mrf.mxu1 }
 0x176   : > { %v695_v51 = vadd.f32 %v5064_v45, %v4608_v47  ;;  %v4623_v45 = vcombine.high %v858_v42, %v862_v43 }
 0x177   : > { %v686_v46 = vpop.f32.mrf.mxu1 }
 0x178   : > { %v687_v49 = vadd.f32 %v4608_v47, %v686_v46  ;;  %v719_v60 = vmax.f32 %v695_v51, 0.0  ;;  %v863_v46 = vld [vmem:[#allocation10 + $0x28] sm:$0xff]  ;;  %v920_v51 = vld [vmem:[#allocation10 + $0x1f0] sm:$0xff] }
 0x179   : > { %v5065_v48 = vpop.f32.mrf.mxu1 }
 0x17a   : > { %v698_v50 = vadd.f32 %v5065_v48, %v4608_v47  ;;  %v717_v56 = vmax.f32 %v687_v49, 0.0  ;;  %v4625_v48 = vcombine.high %v859_v44, %v863_v46  ;;  %v4622_v49 = vcombine.low %v858_v42, %v862_v43 }
 0x17b   : > { %v689_v52 = vpop.f32.mrf.mxu1 }
 0x17c   : > { %v690_v53 = vadd.f32 %v4608_v47, %v689_v52  ;;  %v720_v54 = vmax.f32 %v698_v50, 0.0  ;;  %v916_v50 = vld [vmem:[#allocation10 + $0x1d0] sm:$0xff]  ;;  %v917_v52 = vld [vmem:[#allocation10 + $0x1d8] sm:$0xff] }
 0x17d   : > { %v5068_v55 = vpop.f32.mrf.mxu1 }
 0x17e   : > { %v718_v57 = vmax.f32 %v690_v53, 0.0  ;;  %v711_v61 = vadd.f32 %v5068_v55, %v4608_v47  ;;  %v726_v1 = vpack.c.bf16 %v720_v54, %v719_v60  ;;  %v4683_v53 = vcombine.high %v916_v50, %v920_v51  ;;  %v921_v54 = vld [vmem:[#allocation10 + $0x1f8] sm:$0xff] }
 0x17f   : > { %v702_v62 = vpop.f32.mrf.mxu1  ;;  %v6086_v55 = vmov 0   ;;  %v4685_v58 = vcombine.high %v917_v52, %v921_v54 }
 0x180   : > { %v725_v63 = vpack.c.bf16 %v718_v57, %v717_v56  ;;  %v703_v0 = vadd.f32 %v4608_v47, %v702_v62  ;;  %v723_v7 = vmax.f32 %v711_v61, 0.0  ;;  %1316 = vmatprep.mubr.bf16.mxu0 %v6086_v55  ;;  %v4682_v56 = vcombine.low %v916_v50, %v920_v51  ;;  %v6352_v61 = vld [vmem:[#allocation8] ss:$0 sm:$0xff] }
 0x181   : > { %v5069_v2 = vpop.f32.mrf.mxu1  ;;  %v4684_v57 = vcombine.low %v917_v52, %v921_v54  ;;  %v881_v50 = vld [vmem:[#allocation10 + $0xb8] sm:$0xff] }
 0x182   : > { %v714_v4 = vadd.f32 %v5069_v2, %v4608_v47  ;;  %5078 = vmatprep.mubr.msk.bf16.mxu1 %vm768_vm3, %v725_v63  ;;  %v721_v9 = vmax.f32 %v703_v0, 0.0  ;;  %v908_v2 = vld [vmem:[#allocation10 + $0x190] sm:$0xff] }
 0x183   : > { %v705_v8 = vpop.f32.mrf.mxu1  ;;  %5079 = vmatmul.mubr.msk.bf16.vlgmr.msra.gmra.mxu1 %vm768_vm3, %v726_v1 }
 0x184   : > { %v724_v10 = vmax.f32 %v714_v4, 0.0  ;;  %v706_v11 = vadd.f32 %v4608_v47, %v705_v8  ;;  %1358 = vmatpush1.bf16.msra.mxu1 %v4680_v29  ;;  %v4639_v29 = vcombine.high %v874_v26, %v878_v27  ;;  %v4624_v47 = vcombine.low %v859_v44, %v863_v46  ;;  %v912_v4 = vld [vmem:[#allocation10 + $0x1b0] sm:$0xff] }
 0x185   : > { %1359 = vmatprep.subr.bf16.mxu1 %v4673_v3  ;;  %v896_v26 = vld [vmem:[#allocation10 + $0x130] sm:$0xff] }
 0x186   : > { %v722_v14 = vmax.f32 %v706_v11, 0.0  ;;  %v728_v17 = vpack.c.bf16 %v724_v10, %v723_v7  ;;  %1294 = vmatprep.subr.bf16.mxu0 %v4639_v29  ;;  %v897_v29 = vld [vmem:[#allocation10 + $0x138] sm:$0xff] }
 0x187   : > { %1295 = vmatpush1.bf16.msra.mxu0 %v4638_v33  ;;  %v4661_v36 = vcombine.high %v893_v28, %v897_v29  ;;  %v4660_v43 = vcombine.low %v893_v28, %v897_v29  ;;  %v5256_v28 = vld [vmem:[#allocation13 + $0x84] ss:$16 sps:$4 sm:$0xff]  }
 0x188   : > { %v727_v18 = vpack.c.bf16 %v722_v14, %v721_v9  ;;  %1360 = vmatpush1.bf16.msra.mxu1 %v4672_v12  ;;  %1296 = vmatprep.subr.bf16.mxu0 %v4631_v37  ;;  %v4675_v12 = vcombine.high %v908_v2, %v912_v4  ;;  %v900_v14 = vld [vmem:[#allocation10 + $0x150] sm:$0xff]  ;;  %v5259_v29 = vld [vmem:[#allocation13 + $0x284] ss:$16 sps:$4 sm:$0xff]  }
 0x189   : > { %1361 = vmatprep.subr.bf16.mxu1 %v4665_v13  ;;  %v4677_v13 = vcombine.high %v909_v5, %v913_v6  ;;  %v884_v37 = vld [vmem:[#allocation10 + $0xd0] sm:$0xff] }
 0x18a   : > { %5082 = vmatprep.mubr.msk.bf16.mxu1 %vm768_vm3, %v727_v18  ;;  %v905_v18 = vld [vmem:[#allocation10 + $0x178] sm:$0xff]  ;;  %v4650_v52 = vcombine.low %v884_v37, %v888_v38 }
 0x18b   : > { %5083 = vmatmul.mubr.msk.bf16.gmra.mxu1 %vm768_vm3, %v728_v17  ;;  %1297 = vmatpush1.bf16.msra.mxu0 %v4630_v41  ;;  %v901_v17 = vld [vmem:[#allocation10 + $0x158] sm:$0xff] }
 0x18c   : > { %1362 = vmatpush1.bf16.msra.mxu1 %v4664_v19  ;;  %1298 = vmatprep.subr.bf16.mxu0 %v4623_v45  ;;  %v4651_v45 = vcombine.high %v884_v37, %v888_v38  ;;  %v5271_v37 = vld [vmem:[#allocation13 + $0x244] ss:$16 sps:$4 sm:$0xff]   ;;  %v5266_v38 = vld [vmem:[#allocation13 + $0x40] ss:$16 sps:$4 sm:$0xff]  }
 0x18d   : > { %1363 = vmatprep.subr.bf16.mxu1 %v4657_v20  ;;  %1389 = vmatprep.mubr.bf16.mxu1 %v6086_v55  ;;  %v4674_v20 = vcombine.low %v908_v2, %v912_v4 }
 0x18f   : > { %1299 = vmatpush1.bf16.msra.mxu0 %v4622_v49  ;;  %v877_v49 = vld [vmem:[#allocation10 + $0x98] sm:$0xff] }
 0x190   : > { %1364 = vmatpush1.bf16.msra.mxu1 %v4656_v23  ;;  %1430 = vmatprep.subr.bf16.mxu0 %v4683_v53  ;;  %v4667_v23 = vcombine.high %v900_v14, %v904_v16  ;;  %v4644_v2 = vcombine.low %v877_v49, %v881_v50 }
 0x191   : > { %1365 = vmatprep.subr.bf16.mxu1 %v4649_v24  ;;  %v4669_v24 = vcombine.high %v901_v17, %v905_v18 }
 0x194   : > { %1366 = vmatpush1.bf16.msra.mxu1 %v4648_v25  ;;  %v892_v25 = vld [vmem:[#allocation10 + $0x110] sm:$0xff] }
 0x195   : > { %1367 = vmatprep.subr.bf16.mxu1 %v4641_v32  ;;  %v4668_v32 = vcombine.low %v901_v17, %v905_v18  ;;  %v4659_v33 = vcombine.high %v892_v25, %v896_v26  ;;  %v4658_v42 = vcombine.low %v892_v25, %v896_v26  ;;  %v5241_v18 = vld [vmem:[#allocation13 + $0x2e4] ss:$16 sps:$4 sm:$0xff]   ;;  %v5248_v26 = vld [vmem:[#allocation13 + $0xa0] ss:$16 sps:$4 sm:$0xff]  }
 0x196   : > { %v5250_v25 = vld [vmem:[#allocation13 + $0xa4] ss:$16 sps:$4 sm:$0xff]  }
 0x198   : > { %1368 = vmatpush1.bf16.msra.mxu1 %v4640_v31  ;;  %v4666_v31 = vcombine.low %v900_v14, %v904_v16 }
 0x199   : > { %1369 = vmatprep.subr.bf16.mxu1 %v4633_v40  ;;  %v889_v40 = vld [vmem:[#allocation10 + $0xf8] sm:$0xff] }
 0x19c   : > { %1370 = vmatpush1.bf16.msra.mxu1 %v4632_v39  ;;  %v885_v39 = vld [vmem:[#allocation10 + $0xd8] sm:$0xff] }
 0x19d   : > { %1371 = vmatprep.subr.bf16.mxu1 %v4625_v48  ;;  %v4653_v46 = vcombine.high %v885_v39, %v889_v40  ;;  %v880_v48 = vld [vmem:[#allocation10 + $0xb0] sm:$0xff]  ;;  %v4652_v53 = vcombine.low %v885_v39, %v889_v40  ;;  %v5269_v39 = vld [vmem:[#allocation13 + $0x240] ss:$16 sps:$4 sm:$0xff]   ;;  %v5274_v40 = vld [vmem:[#allocation13 + $0x24] ss:$16 sps:$4 sm:$0xff]  }
 0x1a0   : > { %1372 = vmatpush1.bf16.msra.mxu1 %v4624_v47  ;;  %v876_v47 = vld [vmem:[#allocation10 + $0x90] sm:$0xff] }
 0x1a1   : > { %1503 = vmatprep.subr.bf16.mxu1 %v4685_v58  ;;  %v4643_v54 = vcombine.high %v876_v47, %v880_v48  ;;  %v4645_v58 = vcombine.high %v877_v49, %v881_v50  ;;  %v5289_v49 = vld [vmem:[#allocation13 + $0x3e4] ss:$16 sps:$4 sm:$0xff]   ;;  %v5284_v50 = vld [vmem:[#allocation13 + $0x1e0] ss:$16 sps:$4 sm:$0xff]  }
 0x243   : > { %v5080_v59 = vpop.f32.mrf.mxu1 }
 0x244   : > { %v824_v19 = vadd.f32 %v5080_v59, %v6352_v61  ;;  %v868_v59 = vld [vmem:[#allocation10 + $0x50] sm:$0xff] }
 0x245   : > { %v815_v60 = vpop.f32.mrf.mxu1 }
 0x246   : > { %v816_v63 = vadd.f32 %v6352_v61, %v815_v60  ;;  %v848_v30 = vmax.f32 %v824_v19, 0.0  ;;  %v872_v60 = vld [vmem:[#allocation10 + $0x70] sm:$0xff]  ;;  %v5236_v19 = vld [vmem:[#allocation13 + $0xe0] ss:$16 sps:$4 sm:$0xff]  }
 0x247   : > { %v5081_v62 = vpop.f32.mrf.mxu1  ;;  %v4635_v5 = vcombine.high %v868_v59, %v872_v60 }
 0x248   : > { %v846_v7 = vmax.f32 %v816_v63, 0.0  ;;  %v827_v10 = vadd.f32 %v5081_v62, %v6352_v61  ;;  %v869_v62 = vld [vmem:[#allocation10 + $0x58] sm:$0xff] }
 0x249   : > { %v818_v0 = vpop.f32.mrf.mxu1  ;;  %v873_v63 = vld [vmem:[#allocation10 + $0x78] sm:$0xff] }
 0x24a   : > { %v819_v1 = vadd.f32 %v6352_v61, %v818_v0  ;;  %v849_v22 = vmax.f32 %v827_v10, 0.0  ;;  %v4637_v6 = vcombine.high %v869_v62, %v873_v63  ;;  %v865_v10 = vld [vmem:[#allocation10 + $0x38] sm:$0xff] }
 0x24b   : > { %v6356_v3 = vpop.f32.mrf.mxu1 }
 0x24c   : > { %v847_v8 = vmax.f32 %v819_v1, 0.0  ;;  %v6366_v34 = vpack.c.bf16 %v849_v22, %v848_v30  ;;  %v840_v0 = vadd.f32 %v6356_v3, %v6352_v61  ;;  %v4642_v1 = vcombine.low %v876_v47, %v880_v48  ;;  %v5247_v22 = vld [vmem:[#allocation13 + $0x2c4] ss:$16 sps:$4 sm:$0xff]   ;;  %v5254_v30 = vld [vmem:[#allocation13 + $0x80] ss:$16 sps:$4 sm:$0xff]  }
 0x24d   : > { %v831_v9 = vpop.f32.mrf.mxu1  ;;  %v4634_v3 = vcombine.low %v868_v59, %v872_v60  ;;  %v5281_v47 = vld [vmem:[#allocation13 + $0x200] ss:$16 sps:$4 sm:$0xff]   ;;  %v5286_v48 = vld [vmem:[#allocation13 + $0x1e4] ss:$16 sps:$4 sm:$0xff]  }
 0x24e   : > { %v6359_v11 = vpack.c.bf16 %v847_v8, %v846_v7  ;;  %v832_v41 = vadd.f32 %v6352_v61, %v831_v9  ;;  %v860_v7 = vld [vmem:[#allocation10 + $0x10] sm:$0xff]  ;;  %v861_v9 = vld [vmem:[#allocation10 + $0x18] sm:$0xff] }
 0x24f   : > { %v5085_v15 = vpop.f32.mrf.mxu1  ;;  %v864_v8 = vld [vmem:[#allocation10 + $0x30] sm:$0xff]  ;;  %v4628_v17 = vcombine.low %v861_v9, %v865_v10  ;;  %v5296_v59 = vld [vmem:[#allocation13 + $0x1a0] ss:$16 sps:$4 sm:$0xff]  }
 0x250   : > { %1317 = vmatmul.mubr.bf16.vlgmr.msra.gmra.mxu0 %v6359_v11  ;;  %1390 = vmatmul.mubr.bf16.vlgmr.msra.gmra.mxu1 %v6359_v11  ;;  %v850_v51 = vmax.f32 %v832_v41, 0.0  ;;  %v4627_v14 = vcombine.high %v860_v7, %v864_v8  ;;  %v4626_v16 = vcombine.low %v860_v7, %v864_v8  ;;  %v5277_v41 = vld [vmem:[#allocation13 + $0x224] ss:$16 sps:$4 sm:$0xff]   ;;  %v5299_v60 = vld [vmem:[#allocation13 + $0x3a0] ss:$16 sps:$4 sm:$0xff]  }
 0x251   : > { %1431 = vmatpush1.bf16.msra.mxu0 %v4682_v56  ;;  %1504 = vmatpush1.bf16.msra.mxu1 %v4684_v57  ;;  %v834_v27 = vpop.f32.mrf.mxu1  ;;  %v843_v56 = vadd.f32 %v5085_v15, %v6352_v61  ;;  %v4629_v15 = vcombine.high %v861_v9, %v865_v10  ;;  %v5316_v7 = vld [vmem:[#allocation13 + $0x144] ss:$16 sps:$4 sm:$0xff]   ;;  %v5314_v9 = vld [vmem:[#allocation13 + $0x140] ss:$16 sps:$4 sm:$0xff]  }
 0x252   : > { %1432 = vmatprep.subr.bf16.mxu0 %v4675_v12  ;;  %1505 = vmatprep.subr.bf16.mxu1 %v4677_v13  ;;  %v835_v35 = vadd.f32 %v6352_v61, %v834_v27  ;;  %v852_v61 = vmax.f32 %v840_v0, 0.0  ;;  %v4636_v12 = vcombine.low %v869_v62, %v873_v63  ;;  %v5251_v27 = vld [vmem:[#allocation13 + $0x2a0] ss:$16 sps:$4 sm:$0xff]   ;;  %v5304_v62 = vld [vmem:[#allocation13 + $0x184] ss:$16 sps:$4 sm:$0xff]  }
 0x253   : > { %1326 = vmatprep.mubr.bf16.mxu0 %v6086_v55  ;;  %1399 = vmatprep.mubr.bf16.mxu1 %v6086_v55  ;;  %v853_v4 = vmax.f32 %v843_v56, 0.0  ;;  %v5293_v56 = vld [vmem:[#allocation13 + $0x3c0] ss:$16 sps:$4 sm:$0xff]   ;;  %v5307_v63 = vld [vmem:[#allocation13 + $0x384] ss:$16 sps:$4 sm:$0xff]  }
 0x254   : > { %v851_v44 = vmax.f32 %v835_v35, 0.0  ;;  %v5263_v35 = vld [vmem:[#allocation13 + $0x260] ss:$16 sps:$4 sm:$0xff]   ;;  %v5319_v8 = vld [vmem:[#allocation13 + $0x344] ss:$16 sps:$4 sm:$0xff]  }
 0x255   : > { %1433 = vmatpush1.bf16.msra.mxu0 %v4674_v20  ;;  %1506 = vmatpush1.bf16.msra.mxu1 %v4676_v21  ;;  %v857_v13 = vpack.c.bf16 %v853_v4, %v852_v61  ;;  %v5239_v20 = vld [vmem:[#allocation13 + $0x2e0] ss:$16 sps:$4 sm:$0xff]   ;;  %v5244_v21 = vld [vmem:[#allocation13 + $0xc4] ss:$16 sps:$4 sm:$0xff]  }
 0x256   : > { %1434 = vmatprep.subr.bf16.mxu0 %v4667_v23  ;;  %1507 = vmatprep.subr.bf16.mxu1 %v4669_v24  ;;  %v856_v57 = vpack.c.bf16 %v851_v44, %v850_v51  ;;  %v5242_v23 = vld [vmem:[#allocation13 + $0xc0] ss:$16 sps:$4 sm:$0xff]   ;;  %v5280_v44 = vld [vmem:[#allocation13 + $0x4] ss:$16 sps:$4 sm:$0xff]  }
 0x257   : > { %v5245_v24 = vld [vmem:[#allocation13 + $0x2c0] ss:$16 sps:$4 sm:$0xff]   ;;  %v5313_v4 = vld [vmem:[#allocation13 + $0x364] ss:$16 sps:$4 sm:$0xff]  }
 0x258   : > { %1327 = vmatmul.mubr.bf16.gmra.mxu0 %v6366_v34  ;;  %1400 = vmatmul.mubr.bf16.gmra.mxu1 %v6366_v34  ;;  %v5287_v51 = vld [vmem:[#allocation13 + $0x3e0] ss:$16 sps:$4 sm:$0xff]   ;;  %v5322_v61 = vld [vmem:[#allocation13 + $0x124] ss:$16 sps:$4 sm:$0xff]  }
 0x259   : > { %1435 = vmatpush1.bf16.msra.mxu0 %v4666_v31  ;;  %1508 = vmatpush1.bf16.msra.mxu1 %v4668_v32  ;;  %v5257_v31 = vld [vmem:[#allocation13 + $0x280] ss:$16 sps:$4 sm:$0xff]   ;;  %v5262_v32 = vld [vmem:[#allocation13 + $0x64] ss:$16 sps:$4 sm:$0xff]  }
 0x25a   : > { %1436 = vmatprep.subr.bf16.mxu0 %v4659_v33  ;;  %1509 = vmatprep.subr.bf16.mxu1 %v4661_v36  ;;  %v5265_v33 = vld [vmem:[#allocation13 + $0x264] ss:$16 sps:$4 sm:$0xff]   ;;  %v5302_v0 = vld [vmem:[#allocation13 + $0x180] ss:$16 sps:$4 sm:$0xff]  }
 0x25b   : > { %1336 = vmatprep.mubr.bf16.mxu0 %v6086_v55  ;;  %1409 = vmatprep.mubr.bf16.mxu1 %v6086_v55  ;;  %v5268_v36 = vld [vmem:[#allocation13 + $0x44] ss:$16 sps:$4 sm:$0xff]   ;;  %v5317_v10 = vld [vmem:[#allocation13 + $0x340] ss:$16 sps:$4 sm:$0xff]  }
 0x25d   : > { %1437 = vmatpush1.bf16.msra.mxu0 %v4658_v42  ;;  %1510 = vmatpush1.bf16.msra.mxu1 %v4660_v43  ;;  %v5272_v42 = vld [vmem:[#allocation13 + $0x20] ss:$16 sps:$4 sm:$0xff]  }
 0x25e   : > { %1438 = vmatprep.subr.bf16.mxu0 %v4651_v45  ;;  %1511 = vmatprep.subr.bf16.mxu1 %v4653_v46  ;;  %v5275_v43 = vld [vmem:[#allocation13 + $0x220] ss:$16 sps:$4 sm:$0xff]   ;;  %v5283_v45 = vld [vmem:[#allocation13 + $0x204] ss:$16 sps:$4 sm:$0xff]  }
 0x25f   : > { %v5278_v46 = vld [vmem:[#allocation13] ss:$16 sps:$4 sm:$0xff]  }
 0x260   : > { %1337 = vmatmul.mubr.bf16.gmra.mxu0 %v856_v57  ;;  %1410 = vmatmul.mubr.bf16.gmra.mxu1 %v856_v57 }
 0x261   : > { %1439 = vmatpush1.bf16.msra.mxu0 %v4650_v52  ;;  %1512 = vmatpush1.bf16.msra.mxu1 %v4652_v53  ;;  %v5292_v52 = vld [vmem:[#allocation13 + $0x1c4] ss:$16 sps:$4 sm:$0xff]  }
 0x262   : > { %1440 = vmatprep.subr.bf16.mxu0 %v4643_v54  ;;  %1513 = vmatprep.subr.bf16.mxu1 %v4645_v58  ;;  %v5295_v53 = vld [vmem:[#allocation13 + $0x3c4] ss:$16 sps:$4 sm:$0xff]   ;;  %v5290_v54 = vld [vmem:[#allocation13 + $0x1c0] ss:$16 sps:$4 sm:$0xff]  }
 0x263   : > { %1346 = vmatprep.mubr.bf16.mxu0 %v6086_v55  ;;  %1419 = vmatprep.mubr.bf16.mxu1 %v6086_v55  ;;  %v5301_v58 = vld [vmem:[#allocation13 + $0x3a4] ss:$16 sps:$4 sm:$0xff]  }
 0x265   : > { %1441 = vmatpush1.bf16.msra.mxu0 %v4642_v1  ;;  %1514 = vmatpush1.bf16.msra.mxu1 %v4644_v2  ;;  %v5305_v1 = vld [vmem:[#allocation13 + $0x380] ss:$16 sps:$4 sm:$0xff]   ;;  %v5310_v2 = vld [vmem:[#allocation13 + $0x164] ss:$16 sps:$4 sm:$0xff]  }
 0x266   : > { %1442 = vmatprep.subr.bf16.mxu0 %v4635_v5  ;;  %1515 = vmatprep.subr.bf16.mxu1 %v4637_v6  ;;  %v5308_v5 = vld [vmem:[#allocation13 + $0x160] ss:$16 sps:$4 sm:$0xff]  }
 0x267   : > { %v5311_v6 = vld [vmem:[#allocation13 + $0x360] ss:$16 sps:$4 sm:$0xff]  }
 0x268   : > { %1347 = vmatmul.mubr.bf16.gmra.mxu0 %v857_v13  ;;  %1420 = vmatmul.mubr.bf16.gmra.mxu1 %v857_v13 }
 0x269   : > { %1443 = vmatpush1.bf16.msra.mxu0 %v4634_v3  ;;  %1516 = vmatpush1.bf16.msra.mxu1 %v4636_v12  ;;  %v5325_v3 = vld [vmem:[#allocation13 + $0x324] ss:$16 sps:$4 sm:$0xff]   ;;  %v5320_v12 = vld [vmem:[#allocation13 + $0x120] ss:$16 sps:$4 sm:$0xff]  }
 0x26a   : > { %1444 = vmatprep.subr.bf16.mxu0 %v4627_v14  ;;  %1517 = vmatprep.subr.bf16.mxu1 %v4629_v15  ;;  %v5328_v14 = vld [vmem:[#allocation13 + $0x104] ss:$16 sps:$4 sm:$0xff]  }
 0x26b   : > { %1462 = vmatprep.mubr.bf16.mxu0 %v6086_v55  ;;  %1535 = vmatprep.mubr.bf16.mxu1 %v6086_v55  ;;  %v5331_v15 = vld [vmem:[#allocation13 + $0x304] ss:$16 sps:$4 sm:$0xff]  }
 0x26d   : > { %1445 = vmatpush1.bf16.msra.mxu0 %v4626_v16  ;;  %1518 = vmatpush1.bf16.msra.mxu1 %v4628_v17  ;;  %v5326_v16 = vld [vmem:[#allocation13 + $0x100] ss:$16 sps:$4 sm:$0xff]  }
 0x26e   : > { %3560 = vmatprep.subr.bf16.mxu1 %v5241_v18  ;;  %v5329_v17 = vld [vmem:[#allocation13 + $0x300] ss:$16 sps:$4 sm:$0xff]   ;;  %v5337_v18 = vld [vmem:[#allocation13 + $0x6e4] ss:$16 sps:$4 sm:$0xff]  }
 0x270   : > { %1463 = vmatmul.mubr.bf16.vlgmr.msra.gmra.mxu0 %v6359_v11  ;;  %1536 = vmatmul.mubr.bf16.vlgmr.msra.gmra.mxu1 %v6359_v11  ;;  %v5238_v11 = vld [vmem:[#allocation13 + $0xe4] ss:$16 sps:$4 sm:$0xff]  }
 0x271   : > { %1472 = vmatprep.mubr.bf16.mxu0 %v6086_v55  ;;  %1545 = vmatprep.mubr.bf16.mxu1 %v6086_v55 }
 0x272   : > { %3519 = vmatprep.subr.bf16.mxu0 %v5238_v11  ;;  %3561 = vmatpush1.bf16.msra.mxu1 %v5239_v20  ;;  %v5334_v11 = vld [vmem:[#allocation13 + $0x4e4] ss:$16 sps:$4 sm:$0xff]  }
 0x273   : > { %3520 = vmatpush1.bf16.msra.mxu0 %v5236_v19  ;;  %3562 = vmatprep.subr.bf16.mxu1 %v5247_v22  ;;  %v924_v19 = vlaneseq }
 0x274   : > { %3521 = vmatprep.subr.bf16.mxu0 %v5244_v21 }
 0x275   : > { %v6391_v20 = vshrl.u32 %v924_v19, 7 }
 0x276   : > { %3563 = vmatpush1.bf16.msra.mxu1 %v5245_v24 }
 0x277   : > { %3522 = vmatpush1.bf16.msra.mxu0 %v5242_v23  ;;  %v6394_v23 = vsub.s32 0, %v6391_v20  ;;  %v6397_v24 = vsub.s32 2, %v6391_v20 }
 0x278   : > { %1473 = vmatmul.mubr.bf16.gmra.mxu0 %v6366_v34  ;;  %1546 = vmatmul.mubr.bf16.gmra.mxu1 %v6366_v34  ;;  %v5260_v34 = vld [vmem:[#allocation13 + $0x60] ss:$16 sps:$4 sm:$0xff]  }
 0x279   : > { %1482 = vmatprep.mubr.bf16.mxu0 %v6086_v55  ;;  %1555 = vmatprep.mubr.bf16.mxu1 %v6086_v55 }
 0x27a   : > { %3523 = vmatprep.subr.bf16.mxu0 %v5250_v25 }
 0x27b   : > { %3524 = vmatpush1.bf16.msra.mxu0 %v5248_v26  ;;  %v6399_v26 = vld [vmem:[#allocation11] sm:$0xff] }
 0x27c   : > { %3525 = vmatprep.subr.bf16.mxu0 %v5256_v28 }
 0x27f   : > { %3526 = vmatpush1.bf16.msra.mxu0 %v5254_v30  ;;  %v6405_v30 = vsub.s32 3, %v6391_v20 }
 0x280   : > { %1483 = vmatmul.mubr.bf16.gmra.mxu0 %v856_v57  ;;  %1556 = vmatmul.mubr.bf16.gmra.mxu1 %v856_v57  ;;  %v5298_v57 = vld [vmem:[#allocation13 + $0x1a4] ss:$16 sps:$4 sm:$0xff]  }
 0x281   : > { %1492 = vmatprep.mubr.bf16.mxu0 %v6086_v55  ;;  %1565 = vmatprep.mubr.bf16.mxu1 %v6086_v55  ;;  %v5253_v55 = vld [vmem:[#allocation13 + $0x2a4] ss:$16 sps:$4 sm:$0xff]  }
 0x282   : > { %3564 = vmatprep.subr.bf16.mxu1 %v5253_v55  ;;  %3527 = vmatprep.subr.bf16.mxu0 %v5262_v32  ;;  %v6413_v32 = vrot.slane %v6399_v26, %v6397_v24 }
 0x283   : > { %3565 = vmatpush1.bf16.msra.mxu1 %v5251_v27  ;;  %3528 = vmatpush1.bf16.msra.mxu0 %v5260_v34 }
 0x284   : > { %3566 = vmatprep.subr.bf16.mxu1 %v5259_v29  ;;  %3529 = vmatprep.subr.bf16.mxu0 %v5268_v36  ;;  %v6402_v29 = vsub.s32 1, %v6391_v20 }
 0x287   : > { %3567 = vmatpush1.bf16.msra.mxu1 %v5257_v31  ;;  %3530 = vmatpush1.bf16.msra.mxu0 %v5266_v38  ;;  %v6409_v31 = vrot.slane %v6399_v26, %v6394_v23  ;;  %v6421_v38 = vrot.slane %v6399_v26, %v6405_v30 }
 0x288   : > { %1493 = vmatmul.mubr.bf16.gmra.mxu0 %v857_v13  ;;  %1566 = vmatmul.mubr.bf16.gmra.mxu1 %v857_v13  ;;  %v5323_v13 = vld [vmem:[#allocation13 + $0x320] ss:$16 sps:$4 sm:$0xff]  }
 0x289   : > { %3568 = vmatprep.subr.bf16.mxu1 %v5265_v33  ;;  %3531 = vmatprep.subr.bf16.mxu0 %v5274_v40 }
 0x28b   : > { %3569 = vmatpush1.bf16.msra.mxu1 %v5263_v35  ;;  %3532 = vmatpush1.bf16.msra.mxu0 %v5272_v42 }
 0x28c   : > { %3570 = vmatprep.subr.bf16.mxu1 %v5271_v37  ;;  %3533 = vmatprep.subr.bf16.mxu0 %v5280_v44  ;;  %v6417_v37 = vrot.slane %v6399_v26, %v6402_v29 }
 0x28f   : > { %3571 = vmatpush1.bf16.msra.mxu1 %v5269_v39  ;;  %3534 = vmatpush1.bf16.msra.mxu0 %v5278_v46 }
 0x290   : > { %3572 = vmatprep.subr.bf16.mxu1 %v5277_v41  ;;  %3535 = vmatprep.subr.bf16.mxu0 %v5286_v48 }
 0x293   : > { %3573 = vmatpush1.bf16.msra.mxu1 %v5275_v43  ;;  %3536 = vmatpush2.bf16.msra.mxu0 %v5284_v50 }
 0x294   : > { %3574 = vmatprep.subr.bf16.mxu1 %v5283_v45  ;;  %3537 = vmatprep.subr.bf16.mxu0 %v5292_v52 }
 0x297   : > { %3575 = vmatpush1.bf16.msra.mxu1 %v5281_v47  ;;  %3538 = vmatpush2.bf16.msra.mxu0 %v5290_v54  ;;  %v950_v54 = vsub.s32 6, %v6391_v20 }
 0x298   : > { %3576 = vmatprep.subr.bf16.mxu1 %v5289_v49  ;;  %3539 = vmatprep.subr.bf16.mxu0 %v5298_v57 }
 0x29b   : > { %3577 = vmatpush2.bf16.msra.mxu1 %v5287_v51  ;;  %3540 = vmatpush2.bf16.msra.mxu0 %v5296_v59 }
 0x29c   : > { %3578 = vmatprep.subr.bf16.mxu1 %v5295_v53  ;;  %3541 = vmatprep.subr.bf16.mxu0 %v5304_v62  ;;  %v942_v53 = vsub.s32 4, %v6391_v20 }
 0x29f   : > { %3579 = vmatpush2.bf16.msra.mxu1 %v5293_v56  ;;  %3542 = vmatpush2.bf16.msra.mxu0 %v5302_v0 }
 0x2a0   : > { %3580 = vmatprep.subr.bf16.mxu1 %v5301_v58  ;;  %3543 = vmatprep.subr.bf16.mxu0 %v5310_v2 }
 0x2a3   : > { %3581 = vmatpush2.bf16.msra.mxu1 %v5299_v60  ;;  %3544 = vmatpush2.bf16.msra.mxu0 %v5308_v5 }
 0x2a4   : > { %3582 = vmatprep.subr.bf16.mxu1 %v5307_v63  ;;  %3545 = vmatprep.subr.bf16.mxu0 %v5316_v7 }
 0x2a7   : > { %3583 = vmatpush2.bf16.msra.mxu1 %v5305_v1  ;;  %3546 = vmatpush2.bf16.msra.mxu0 %v5314_v9 }
 0x2a8   : > { %3584 = vmatprep.subr.bf16.mxu1 %v5313_v4  ;;  %3547 = vmatprep.subr.bf16.mxu0 %v5322_v61 }
 0x2ab   : > { %3585 = vmatpush2.bf16.msra.mxu1 %v5311_v6  ;;  %3548 = vmatpush2.bf16.msra.mxu0 %v5320_v12 }
 0x2ac   : > { %3586 = vmatprep.subr.bf16.mxu1 %v5319_v8  ;;  %3549 = vmatprep.subr.bf16.mxu0 %v5328_v14 }
 0x2af   : > { %3587 = vmatpush2.bf16.msra.mxu1 %v5317_v10  ;;  %3550 = vmatpush2.bf16.msra.mxu0 %v5326_v16 }
 0x2b0   : > { %3588 = vmatprep.subr.bf16.mxu1 %v5325_v3  ;;  %3601 = vmatprep.subr.bf16.mxu0 %v5334_v11 }
 0x2b3   : > { %3589 = vmatpush2.bf16.msra.mxu1 %v5323_v13 }
 0x2b4   : > { %3590 = vmatprep.subr.bf16.mxu1 %v5331_v15 }
 0x2b7   : > { %3591 = vmatpush2.bf16.msra.mxu1 %v5329_v17 }
 0x2b8   : > { %3642 = vmatprep.subr.bf16.mxu1 %v5337_v18 }
 0x310   : > { %v1318_v21 = vpop.f32.mrf.mxu0  ;;  %v1391_v22 = vpop.f32.mrf.mxu1 }
 0x311   : > { %v1319_v39 = vadd.f32 %v1318_v21, %v6409_v31  ;;  %v1392_v40 = vadd.f32 %v1391_v22, %v6413_v32 }
 0x312   : > { %v1320_v25 = vpop.f32.mrf.mxu0  ;;  %v1393_v55 = vpop.f32.mrf.mxu1 }
 0x313   : > { %v1321_v51 = vadd.f32 %v1320_v25, %v6417_v37  ;;  %v1394_v52 = vadd.f32 %v1393_v55, %v6421_v38  ;;  %v1576_v56 = vmax.f32 %v1319_v39, 0.0  ;;  %v1578_v57 = vmax.f32 %v1392_v40, 0.0 }
 0x314   : > { %v1322_v27 = vpop.f32.mrf.mxu0  ;;  %v1395_v28 = vpop.f32.mrf.mxu1 }
 0x315   : > { %v1323_v41 = vadd.f32 %v1322_v27, %v6409_v31  ;;  %v1396_v42 = vadd.f32 %v1395_v28, %v6413_v32  ;;  %v1577_v10 = vmax.f32 %v1321_v51, 0.0  ;;  %v1579_v61 = vmax.f32 %v1394_v52, 0.0 }
 0x316   : > { %v1324_v33 = vpop.f32.mrf.mxu0  ;;  %v1397_v34 = vpop.f32.mrf.mxu1 }
 0x317   : > { %v1325_v45 = vadd.f32 %v1324_v33, %v6417_v37  ;;  %v1398_v46 = vadd.f32 %v1397_v34, %v6421_v38  ;;  %v1584_v58 = vmax.f32 %v1323_v41, 0.0  ;;  %v1586_v59 = vmax.f32 %v1396_v42, 0.0 }
 0x318   : > { %v1328_v35 = vpop.f32.mrf.mxu0  ;;  %v1401_v36 = vpop.f32.mrf.mxu1 }
 0x319   : > { %v1329_v47 = vadd.f32 %v1328_v35, %v6409_v31  ;;  %v1402_v48 = vadd.f32 %v1401_v36, %v6413_v32  ;;  %v1585_v63 = vmax.f32 %v1325_v45, 0.0  ;;  %v1587_v0 = vmax.f32 %v1398_v46, 0.0 }
 0x31a   : > { %v1330_v43 = vpop.f32.mrf.mxu0  ;;  %v1403_v44 = vpop.f32.mrf.mxu1  ;;  %v1640_v13 = vmax.f32 %v1576_v56, %v1584_v58  ;;  %v1666_v14 = vmax.f32 %v1578_v57, %v1586_v59 }
 0x31b   : > { %v1331_v1 = vadd.f32 %v1330_v43, %v6417_v37  ;;  %v1404_v2 = vadd.f32 %v1403_v44, %v6421_v38  ;;  %v1592_v4 = vmax.f32 %v1329_v47, 0.0  ;;  %v1594_v5 = vmax.f32 %v1402_v48, 0.0 }
 0x31c   : > { %v1332_v49 = vpop.f32.mrf.mxu0  ;;  %v1405_v50 = vpop.f32.mrf.mxu1  ;;  %v1653_v18 = vmax.f32 %v1577_v10, %v1585_v63  ;;  %v1679_v19 = vmax.f32 %v1579_v61, %v1587_v0 }
 0x31d   : > { %v1333_v6 = vadd.f32 %v1332_v49, %v6409_v31  ;;  %v1406_v7 = vadd.f32 %v1405_v50, %v6413_v32  ;;  %v1593_v21 = vmax.f32 %v1331_v1, 0.0  ;;  %v1595_v22 = vmax.f32 %v1404_v2, 0.0 }
 0x31e   : > { %v1334_v60 = vpop.f32.mrf.mxu0  ;;  %v1407_v62 = vpop.f32.mrf.mxu1  ;;  %v1641_v25 = vmax.f32 %v1640_v13, %v1592_v4  ;;  %v1667_v55 = vmax.f32 %v1666_v14, %v1594_v5 }
 0x31f   : > { %v1335_v3 = vadd.f32 %v1334_v60, %v6417_v37  ;;  %v1408_v12 = vadd.f32 %v1407_v62, %v6421_v38  ;;  %v1600_v27 = vmax.f32 %v1333_v6, 0.0  ;;  %v1602_v28 = vmax.f32 %v1406_v7, 0.0 }
 0x320   : > { %v1338_v8 = vpop.f32.mrf.mxu0  ;;  %v1411_v9 = vpop.f32.mrf.mxu1  ;;  %v1654_v47 = vmax.f32 %v1653_v18, %v1593_v21  ;;  %v1680_v48 = vmax.f32 %v1679_v19, %v1595_v22 }
 0x321   : > { %v1339_v15 = vadd.f32 %v1338_v8, %v6409_v31  ;;  %v1412_v16 = vadd.f32 %v1411_v9, %v6413_v32  ;;  %v1601_v35 = vmax.f32 %v1335_v3, 0.0  ;;  %v1603_v36 = vmax.f32 %v1408_v12, 0.0 }
 0x322   : > { %v1340_v17 = vpop.f32.mrf.mxu0  ;;  %v1413_v11 = vpop.f32.mrf.mxu1  ;;  %v1642_v51 = vmax.f32 %v1641_v25, %v1600_v27  ;;  %v1668_v52 = vmax.f32 %v1667_v55, %v1602_v28 }
 0x323   : > { %v1341_v39 = vadd.f32 %v1340_v17, %v6417_v37  ;;  %v1414_v40 = vadd.f32 %v1413_v11, %v6421_v38  ;;  %v1608_v41 = vmax.f32 %v1339_v15, 0.0  ;;  %v1610_v42 = vmax.f32 %v1412_v16, 0.0 }
 0x324   : > { %v1342_v33 = vpop.f32.mrf.mxu0  ;;  %v1415_v34 = vpop.f32.mrf.mxu1  ;;  %v1655_v1 = vmax.f32 %v1654_v47, %v1601_v35  ;;  %v1681_v2 = vmax.f32 %v1680_v48, %v1603_v36  ;;  %v954_v48 = vsub.s32 7, %v6391_v20 }
 0x325   : > { %v1343_v43 = vadd.f32 %v1342_v33, %v6409_v31  ;;  %v1416_v44 = vadd.f32 %v1415_v34, %v6413_v32  ;;  %v1609_v60 = vmax.f32 %v1341_v39, 0.0  ;;  %v1611_v62 = vmax.f32 %v1414_v40, 0.0 }
 0x326   : > { %v1344_v45 = vpop.f32.mrf.mxu0  ;;  %v1417_v46 = vpop.f32.mrf.mxu1  ;;  %v1643_v4 = vmax.f32 %v1642_v51, %v1608_v41  ;;  %v1669_v5 = vmax.f32 %v1668_v52, %v1610_v42 }
 0x327   : > { %v1345_v49 = vadd.f32 %v1344_v45, %v6417_v37  ;;  %v1418_v50 = vadd.f32 %v1417_v46, %v6421_v38  ;;  %v1616_v56 = vmax.f32 %v1343_v43, 0.0  ;;  %v1618_v57 = vmax.f32 %v1416_v44, 0.0 }
 0x328   : > { %v1348_v58 = vpop.f32.mrf.mxu0  ;;  %v1421_v59 = vpop.f32.mrf.mxu1  ;;  %v1656_v17 = vmax.f32 %v1655_v1, %v1609_v60  ;;  %v1682_v11 = vmax.f32 %v1681_v2, %v1611_v62  ;;  %v6477_v62 = vrot.slane %v6399_v26, %v954_v48 }
 0x329   : > { %v1349_v63 = vadd.f32 %v1348_v58, %v6409_v31  ;;  %v1422_v0 = vadd.f32 %v1421_v59, %v6413_v32  ;;  %v1617_v8 = vmax.f32 %v1345_v49, 0.0  ;;  %v1619_v9 = vmax.f32 %v1418_v50, 0.0 }
 0x32a   : > { %v1350_v6 = vpop.f32.mrf.mxu0  ;;  %v1423_v7 = vpop.f32.mrf.mxu1  ;;  %v1644_v3 = vmax.f32 %v1643_v4, %v1616_v56  ;;  %v1670_v12 = vmax.f32 %v1669_v5, %v1618_v57 }
 0x32b   : > { %v1624_v10 = vmax.f32 %v1349_v63, 0.0  ;;  %v1626_v61 = vmax.f32 %v1422_v0, 0.0  ;;  %v1351_v13 = vadd.f32 %v1350_v6, %v6417_v37  ;;  %v1424_v14 = vadd.f32 %v1423_v7, %v6421_v38 }
 0x32c   : > { %v1352_v15 = vpop.f32.mrf.mxu0  ;;  %v1425_v16 = vpop.f32.mrf.mxu1  ;;  %v1657_v39 = vmax.f32 %v1656_v17, %v1617_v8  ;;  %v1683_v40 = vmax.f32 %v1682_v11, %v1619_v9 }
 0x32d   : > { %v1353_v18 = vadd.f32 %v1352_v15, %v6409_v31  ;;  %v1426_v19 = vadd.f32 %v1425_v16, %v6413_v32  ;;  %v1645_v21 = vmax.f32 %v1644_v3, %v1624_v10  ;;  %v1671_v22 = vmax.f32 %v1670_v12, %v1626_v61 }
 0x32e   : > { %v1625_v25 = vmax.f32 %v1351_v13, 0.0  ;;  %v1627_v55 = vmax.f32 %v1424_v14, 0.0  ;;  %v1354_v27 = vpop.f32.mrf.mxu0  ;;  %v1427_v28 = vpop.f32.mrf.mxu1  ;;  %v946_v31 = vsub.s32 5, %v6391_v20  ;;  %v6087_v15 = vmov 1966171168  }
 0x32f   : > { %v1632_v33 = vmax.f32 %v1353_v18, 0.0  ;;  %v1634_v34 = vmax.f32 %v1426_v19, 0.0  ;;  %v1355_v35 = vadd.f32 %v1354_v27, %v6417_v37  ;;  %v1428_v36 = vadd.f32 %v1427_v28, %v6421_v38 }
 0x330   : > { %v1464_v41 = vpop.f32.mrf.mxu0  ;;  %v1537_v42 = vpop.f32.mrf.mxu1  ;;  %v1658_v46 = vmax.f32 %v1657_v39, %v1625_v25  ;;  %v1684_v50 = vmax.f32 %v1683_v40, %v1627_v55  ;;  %v6462_v37 = vrot.slane %v6399_v26, %v942_v53  ;;  %v6467_v38 = vrot.slane %v6399_v26, %v950_v54 }
 0x331   : > { %v1646_v43 = vmax.f32 %v1645_v21, %v1632_v33  ;;  %v1672_v32 = vmax.f32 %v1671_v22, %v1634_v34  ;;  %v1633_v44 = vmax.f32 %v1355_v35, 0.0  ;;  %v1635_v45 = vmax.f32 %v1428_v36, 0.0 }
 0x332   : > { %v1466_v47 = vpop.f32.mrf.mxu0  ;;  %v1539_v49 = vpop.f32.mrf.mxu1  ;;  %v6472_v60 = vrot.slane %v6399_v26, %v946_v31  ;;  %v1465_v1 = vadd.f32 %v1464_v41, %v6462_v37  ;;  %v1538_v2 = vadd.f32 %v1537_v42, %v6467_v38  ;;  %v6486_v16 = vunpack.c.l.s4 %v6087_v15 }
 0x333   : > { %v1647_v51 = vrot.slane %v1646_v43, 4  ;;  %v1673_v52 = vrot.slane %v1672_v32, 4  ;;  %v1659_v56 = vmax.f32 %v1658_v46, %v1633_v44  ;;  %v1685_v59 = vmax.f32 %v1684_v50, %v1635_v45 }
 0x334   : > { %v1468_v57 = vpop.f32.mrf.mxu0  ;;  %v1541_v58 = vpop.f32.mrf.mxu1  ;;  %v1467_v10 = vadd.f32 %v1466_v47, %v6472_v60  ;;  %v1540_v3 = vadd.f32 %v1539_v49, %v6477_v62  ;;  %v1580_v17 = vmax.f32 %v1465_v1, 0.0  ;;  %v1582_v11 = vmax.f32 %v1538_v2, 0.0 }
 0x335   : > { %v1648_v4 = vmax.f32 %v1646_v43, %v1647_v51  ;;  %v1674_v5 = vmax.f32 %v1672_v32, %v1673_v52  ;;  %v1660_v6 = vrot.slane %v1659_v56, 4  ;;  %v1686_v9 = vrot.slane %v1685_v59, 4 }
 0x336   : > { %v1470_v63 = vpop.f32.mrf.mxu0  ;;  %v1543_v0 = vpop.f32.mrf.mxu1  ;;  %v1469_v61 = vadd.f32 %v1468_v57, %v6462_v37  ;;  %v1542_v26 = vadd.f32 %v1541_v58, %v6467_v38  ;;  %v1581_v33 = vmax.f32 %v1467_v10, 0.0  ;;  %v1583_v36 = vmax.f32 %v1540_v3, 0.0 }
 0x337   : > { %v1471_v12 = vadd.f32 %v1470_v63, %v6472_v60  ;;  %v1544_v18 = vadd.f32 %v1543_v0, %v6477_v62  ;;  %v1649_v19 = vrot.slane %v1648_v4, 2  ;;  %v1675_v21 = vrot.slane %v1674_v5, 2 }
 0x338   : > { %v1474_v7 = vpop.f32.mrf.mxu0  ;;  %v1547_v8 = vpop.f32.mrf.mxu1  ;;  %v1661_v22 = vmax.f32 %v1659_v56, %v1660_v6  ;;  %v1687_v28 = vmax.f32 %v1685_v59, %v1686_v9  ;;  %v1588_v34 = vmax.f32 %v1469_v61, 0.0  ;;  %v1590_v39 = vmax.f32 %v1542_v26, 0.0 }
 0x339   : > { %v1475_v25 = vadd.f32 %v1474_v7, %v6462_v37  ;;  %v1548_v35 = vadd.f32 %v1547_v8, %v6467_v38  ;;  %v1589_v40 = vmax.f32 %v1471_v12, 0.0  ;;  %v1591_v32 = vmax.f32 %v1544_v18, 0.0 }
 0x33a   : > { %v1476_v13 = vpop.f32.mrf.mxu0  ;;  %v1549_v14 = vpop.f32.mrf.mxu1  ;;  %v6495_v47 = vmax.f32 %v1648_v4, %v1649_v19  ;;  %v6497_v49 = vmax.f32 %v1674_v5, %v1675_v21  ;;  %v1662_v50 = vrot.slane %v1661_v22, 2  ;;  %v1688_v57 = vrot.slane %v1687_v28, 2 }
 0x33b   : > { %v1477_v41 = vadd.f32 %v1476_v13, %v6472_v60  ;;  %v1550_v44 = vadd.f32 %v1549_v14, %v6477_v62  ;;  %v1596_v51 = vmax.f32 %v1475_v25, 0.0  ;;  %v1692_v58 = vmax.f32 %v1580_v17, %v1588_v34 }
 0x33c   : > { %v1478_v55 = vpop.f32.mrf.mxu0  ;;  %v1551_v27 = vpop.f32.mrf.mxu1  ;;  %v1598_v59 = vmax.f32 %v1548_v35, 0.0  ;;  %v1718_v0 = vmax.f32 %v1582_v11, %v1590_v39  ;;  %v1705_v1 = vmax.f32 %v1581_v33, %v1589_v40  ;;  %v1731_v4 = vmax.f32 %v1583_v36, %v1591_v32 }
 0x33d   : > { %v1479_v45 = vadd.f32 %v1478_v55, %v6462_v37  ;;  %v1552_v46 = vadd.f32 %v1551_v27, %v6467_v38  ;;  %v1597_v63 = vmax.f32 %v1477_v41, 0.0  ;;  %v1599_v9 = vmax.f32 %v1550_v44, 0.0 }
 0x33e   : > { %v1480_v42 = vpop.f32.mrf.mxu0  ;;  %v1553_v43 = vpop.f32.mrf.mxu1  ;;  %v1693_v61 = vmax.f32 %v1692_v58, %v1596_v51  ;;  %v1719_v15 = vmax.f32 %v1718_v0, %v1598_v59  ;;  %v6505_v19 = vmax.f32 %v1661_v22, %v1662_v50  ;;  %v6507_v21 = vmax.f32 %v1687_v28, %v1688_v57 }
 0x33f   : > { %v1481_v2 = vadd.f32 %v1480_v42, %v6472_v60  ;;  %v1554_v6 = vadd.f32 %v1553_v43, %v6477_v62  ;;  %v1604_v5 = vmax.f32 %v1479_v45, 0.0  ;;  %v1606_v10 = vmax.f32 %v1552_v46, 0.0 }
 0x340   : > { %v1484_v52 = vpop.f32.mrf.mxu0  ;;  %v1557_v56 = vpop.f32.mrf.mxu1  ;;  %v1706_v17 = vmax.f32 %v1705_v1, %v1597_v63  ;;  %v1732_v34 = vmax.f32 %v1731_v4, %v1599_v9 }
 0x341   : > { %v1605_v3 = vmax.f32 %v1481_v2, 0.0  ;;  %v1485_v26 = vadd.f32 %v1484_v52, %v6462_v37  ;;  %v1558_v12 = vadd.f32 %v1557_v56, %v6467_v38  ;;  %v1607_v25 = vmax.f32 %v1554_v6, 0.0 }
 0x342   : > { %v1486_v7 = vpop.f32.mrf.mxu0  ;;  %v1559_v8 = vpop.f32.mrf.mxu1  ;;  %v1694_v35 = vmax.f32 %v1693_v61, %v1604_v5  ;;  %v1720_v36 = vmax.f32 %v1719_v15, %v1606_v10 }
 0x343   : > { %v1487_v11 = vadd.f32 %v1486_v7, %v6472_v60  ;;  %v1560_v18 = vadd.f32 %v1559_v8, %v6477_v62  ;;  %v1707_v39 = vmax.f32 %v1706_v17, %v1605_v3  ;;  %v1612_v40 = vmax.f32 %v1485_v26, 0.0 }
 0x344   : > { %v1488_v13 = vpop.f32.mrf.mxu0  ;;  %v1561_v14 = vpop.f32.mrf.mxu1  ;;  %v1614_v41 = vmax.f32 %v1558_v12, 0.0  ;;  %v1733_v50 = vmax.f32 %v1732_v34, %v1607_v25 }
 0x345   : > { %v1489_v55 = vadd.f32 %v1488_v13, %v6462_v37  ;;  %v1562_v42 = vadd.f32 %v1561_v14, %v6467_v38  ;;  %v1613_v44 = vmax.f32 %v1487_v11, 0.0  ;;  %v1615_v28 = vmax.f32 %v1560_v18, 0.0 }
 0x346   : > { %v1490_v27 = vpop.f32.mrf.mxu0  ;;  %v1563_v33 = vpop.f32.mrf.mxu1  ;;  %v1695_v2 = vmax.f32 %v1694_v35, %v1612_v40  ;;  %v1721_v6 = vmax.f32 %v1720_v36, %v1614_v41 }
 0x347   : > { %v1491_v43 = vadd.f32 %v1490_v27, %v6472_v60  ;;  %v1564_v45 = vadd.f32 %v1563_v33, %v6477_v62  ;;  %v1620_v51 = vmax.f32 %v1489_v55, 0.0  ;;  %v1622_v52 = vmax.f32 %v1562_v42, 0.0 }
 0x348   : > { %v1494_v32 = vpop.f32.mrf.mxu0  ;;  %v1567_v22 = vpop.f32.mrf.mxu1  ;;  %v1708_v5 = vmax.f32 %v1707_v39, %v1613_v44  ;;  %v1734_v10 = vmax.f32 %v1733_v50, %v1615_v28 }
 0x349   : > { %v1495_v46 = vadd.f32 %v1494_v32, %v6462_v37  ;;  %v1568_v56 = vadd.f32 %v1567_v22, %v6467_v38  ;;  %v1621_v59 = vmax.f32 %v1491_v43, 0.0  ;;  %v1623_v63 = vmax.f32 %v1564_v45, 0.0 }
 0x34a   : > { %v1496_v57 = vpop.f32.mrf.mxu0  ;;  %v1569_v58 = vpop.f32.mrf.mxu1  ;;  %v1696_v26 = vmax.f32 %v1695_v2, %v1620_v51  ;;  %v1722_v12 = vmax.f32 %v1721_v6, %v1622_v52  ;;  %v1764_v45 = vunpack.c.0.s8 %v6486_v16 }
 0x34b   : > { %v1497_v0 = vadd.f32 %v1496_v57, %v6472_v60  ;;  %v1570_v1 = vadd.f32 %v1569_v58, %v6477_v62  ;;  %v1628_v7 = vmax.f32 %v1495_v46, 0.0  ;;  %v1630_v8 = vmax.f32 %v1568_v56, 0.0 }
 0x34c   : > { %v1498_v4 = vpop.f32.mrf.mxu0  ;;  %v1571_v9 = vpop.f32.mrf.mxu1  ;;  %v1709_v11 = vmax.f32 %v1708_v5, %v1621_v59  ;;  %v1735_v18 = vmax.f32 %v1734_v10, %v1623_v63  ;;  %v1767_v6 = vsub.s32 %v1764_v45, %v6391_v20  ;;  %v5338_v45 = vld [vmem:[#allocation13 + $0x4c0] ss:$16 sps:$4 sm:$0xff]   ;;  %v5434_v20 = vld [vmem:[#allocation13 + $0xc8] ss:$16 sps:$4 sm:$0xff]  }
 0x34d   : > { %v1629_v61 = vmax.f32 %v1497_v0, 0.0  ;;  %v1631_v3 = vmax.f32 %v1570_v1, 0.0  ;;  %v1499_v13 = vadd.f32 %v1498_v4, %v6462_v37  ;;  %v1572_v14 = vadd.f32 %v1571_v9, %v6467_v38 }
 0x34e   : > { %v1500_v15 = vpop.f32.mrf.mxu0  ;;  %v1573_v17 = vpop.f32.mrf.mxu1  ;;  %v1697_v27 = vmax.f32 %v1696_v26, %v1628_v7  ;;  %v1723_v33 = vmax.f32 %v1722_v12, %v1630_v8  ;;  %v1664_v37 = vrot.slane %v6505_v19, 1  ;;  %v1690_v38 = vrot.slane %v6507_v21, 1 }
 0x34f   : > { %v1501_v25 = vadd.f32 %v1500_v15, %v6472_v60  ;;  %v1574_v55 = vadd.f32 %v1573_v17, %v6477_v62  ;;  %v1636_v34 = vmax.f32 %v1499_v13, 0.0  ;;  %v1638_v35 = vmax.f32 %v1572_v14, 0.0 }
 0x350   : > { %v1710_v36 = vmax.f32 %v1709_v11, %v1629_v61  ;;  %v1736_v39 = vmax.f32 %v1735_v18, %v1631_v3  ;;  %v1651_v60 = vrot.slane %v6495_v47, 1  ;;  %v1677_v62 = vrot.slane %v6497_v49, 1 }
 0x351   : > { %v1637_v40 = vmax.f32 %v1501_v25, 0.0  ;;  %v1639_v41 = vmax.f32 %v1574_v55, 0.0  ;;  %v1698_v42 = vmax.f32 %v1697_v27, %v1636_v34  ;;  %v1724_v43 = vmax.f32 %v1723_v33, %v1638_v35 }
 0x352   : > { %v1665_v51 = vmax.f32 %v6505_v19, %v1664_v37  ;;  %v1691_v52 = vmax.f32 %v6507_v21, %v1690_v38  ;;  %v1652_v63 = vmax.f32 %v6495_v47, %v1651_v60  ;;  %v1678_v0 = vmax.f32 %v6497_v49, %v1677_v62 }
 0x353   : > { %v1711_v32 = vmax.f32 %v1710_v36, %v1637_v40  ;;  %v1737_v22 = vmax.f32 %v1736_v39, %v1639_v41  ;;  %v1699_v44 = vrot.slane %v1698_v42, 4  ;;  %v1725_v28 = vrot.slane %v1724_v43, 4 }
 0x354   : > { %v1758_v8 = vcombine.low %v1652_v63, %v1665_v51  ;;  %v1759_v4 = vcombine.low %v1678_v0, %v1691_v52  ;;  %v5349_v51 = vld [vmem:[#allocation13 + $0x6a4] ss:$16 sps:$4 sm:$0xff]   ;;  %v5344_v52 = vld [vmem:[#allocation13 + $0x4a0] ss:$16 sps:$4 sm:$0xff]  }
 0x355   : > { %v1712_v46 = vrot.slane %v1711_v32, 4  ;;  %v1738_v50 = vrot.slane %v1737_v22, 4  ;;  %v1700_v56 = vmax.f32 %v1698_v42, %v1699_v44  ;;  %v1726_v57 = vmax.f32 %v1724_v43, %v1725_v28  ;;  %v5340_v44 = vld [vmem:[#allocation13 + $0x4c4] ss:$16 sps:$4 sm:$0xff]   ;;  %v5353_v63 = vld [vmem:[#allocation13 + $0x680] ss:$16 sps:$4 sm:$0xff]  }
 0x356   : > { %v1768_v12 = vrot.slane %v1758_v8, %v1767_v6  ;;  %v1775_v47 = vrot.slane %v1759_v4, %v1767_v6  ;;  %v5358_v0 = vld [vmem:[#allocation13 + $0x464] ss:$16 sps:$4 sm:$0xff]   ;;  %v5362_v8 = vld [vmem:[#allocation13 + $0x440] ss:$16 sps:$4 sm:$0xff]  }
 0x357   : > { %v1713_v58 = vmax.f32 %v1711_v32, %v1712_v46  ;;  %v1739_v59 = vmax.f32 %v1737_v22, %v1738_v50  ;;  %v1701_v1 = vrot.slane %v1700_v56, 2  ;;  %v1727_v2 = vrot.slane %v1726_v57, 2  ;;  %v5332_v32 = vld [vmem:[#allocation13 + $0x4e0] ss:$16 sps:$4 sm:$0xff]   ;;  %v5346_v50 = vld [vmem:[#allocation13 + $0x4a4] ss:$16 sps:$4 sm:$0xff]  }
 0x358   : > { %v1790_v18 = vcombine.low %v1768_v12, %v1775_v47  ;;  %v5335_v22 = vld [vmem:[#allocation13 + $0x6e0] ss:$16 sps:$4 sm:$0xff]   ;;  %v5382_v12 = vld [vmem:[#allocation13 + $0x5e4] ss:$16 sps:$4 sm:$0xff]  }
 0x359   : > { %v1714_v7 = vrot.slane %v1713_v58, 2  ;;  %v1740_v16 = vrot.slane %v1739_v59, 2  ;;  %v1702_v9 = vmax.f32 %v1700_v56, %v1701_v1  ;;  %v1728_v19 = vmax.f32 %v1726_v57, %v1727_v2  ;;  %v5341_v46 = vld [vmem:[#allocation13 + $0x6c0] ss:$16 sps:$4 sm:$0xff]   ;;  %v5352_v57 = vld [vmem:[#allocation13 + $0x484] ss:$16 sps:$4 sm:$0xff]  }
 0x35a   : > { %v1798_v33 = vrot.slane %v1790_v18, %v1767_v6  ;;  %v5347_v56 = vld [vmem:[#allocation13 + $0x6a0] ss:$16 sps:$4 sm:$0xff]   ;;  %v5361_v1 = vld [vmem:[#allocation13 + $0x664] ss:$16 sps:$4 sm:$0xff]  }
 0x35b   : > { %v1715_v5 = vmax.f32 %v1713_v58, %v1714_v7  ;;  %v1741_v21 = vmax.f32 %v1739_v59, %v1740_v16  ;;  %v1703_v10 = vrot.slane %v1702_v9, 1  ;;  %v1729_v61 = vrot.slane %v1728_v19, 1  ;;  %v5355_v58 = vld [vmem:[#allocation13 + $0x684] ss:$16 sps:$4 sm:$0xff]   ;;  %v5350_v59 = vld [vmem:[#allocation13 + $0x480] ss:$16 sps:$4 sm:$0xff]  }
 0x35c   : > { %v5356_v2 = vld [vmem:[#allocation13 + $0x460] ss:$16 sps:$4 sm:$0xff]   ;;  %v5364_v7 = vld [vmem:[#allocation13 + $0x444] ss:$16 sps:$4 sm:$0xff]  }
 0x35d   : > { %v1716_v3 = vrot.slane %v1715_v5, 1  ;;  %v1742_v26 = vrot.slane %v1741_v21, 1  ;;  %v1704_v13 = vmax.f32 %v1702_v9, %v1703_v10  ;;  %v1730_v49 = vmax.f32 %v1728_v19, %v1729_v61  ;;  %v5367_v16 = vld [vmem:[#allocation13 + $0x644] ss:$16 sps:$4 sm:$0xff]   ;;  %v5365_v4 = vld [vmem:[#allocation13 + $0x640] ss:$16 sps:$4 sm:$0xff]  }
 0x35e   : > { %v5370_v9 = vld [vmem:[#allocation13 + $0x424] ss:$16 sps:$4 sm:$0xff]  }
 0x35f   : > { %v1717_v14 = vmax.f32 %v1715_v5, %v1716_v3  ;;  %v1743_v15 = vmax.f32 %v1741_v21, %v1742_v26  ;;  %v5373_v19 = vld [vmem:[#allocation13 + $0x624] ss:$16 sps:$4 sm:$0xff]   ;;  %v5368_v5 = vld [vmem:[#allocation13 + $0x420] ss:$16 sps:$4 sm:$0xff]  }
 0x360   : > { %v5371_v21 = vld [vmem:[#allocation13 + $0x620] ss:$16 sps:$4 sm:$0xff]   ;;  %v5376_v10 = vld [vmem:[#allocation13 + $0x404] ss:$16 sps:$4 sm:$0xff]  }
 0x361   : > { %v1760_v17 = vcombine.low %v1704_v13, %v1717_v14  ;;  %v1761_v11 = vcombine.low %v1730_v49, %v1743_v15  ;;  %v5379_v61 = vld [vmem:[#allocation13 + $0x604] ss:$16 sps:$4 sm:$0xff]   ;;  %v5374_v3 = vld [vmem:[#allocation13 + $0x400] ss:$16 sps:$4 sm:$0xff]  }
 0x362   : > { %v5377_v26 = vld [vmem:[#allocation13 + $0x600] ss:$16 sps:$4 sm:$0xff]   ;;  %v5385_v47 = vld [vmem:[#allocation13 + $0x7e4] ss:$16 sps:$4 sm:$0xff]  }
 0x363   : > { %v1782_v25 = vrot.slane %v1760_v17, %v1767_v6  ;;  %v1789_v55 = vrot.slane %v1761_v11, %v1767_v6  ;;  %v5380_v13 = vld [vmem:[#allocation13 + $0x5e0] ss:$16 sps:$4 sm:$0xff]   ;;  %v5388_v14 = vld [vmem:[#allocation13 + $0x5c4] ss:$16 sps:$4 sm:$0xff]  }
 0x364   : > { %v5383_v49 = vld [vmem:[#allocation13 + $0x7e0] ss:$16 sps:$4 sm:$0xff]   ;;  %v5391_v15 = vld [vmem:[#allocation13 + $0x7c4] ss:$16 sps:$4 sm:$0xff]  }
 0x365   : > { %v1791_v27 = vcombine.low %v1782_v25, %v1789_v55  ;;  %v5386_v17 = vld [vmem:[#allocation13 + $0x5c0] ss:$16 sps:$4 sm:$0xff]   ;;  %v5394_v18 = vld [vmem:[#allocation13 + $0x5a4] ss:$16 sps:$4 sm:$0xff]  }
 0x366   : > { %v5389_v11 = vld [vmem:[#allocation13 + $0x7c0] ss:$16 sps:$4 sm:$0xff]   ;;  %v5397_v25 = vld [vmem:[#allocation13 + $0x7a4] ss:$16 sps:$4 sm:$0xff]  }
 0x367   : > { %v1805_v34 = vrot.slane %v1791_v27, %v1767_v6  ;;  %v5359_v6 = vld [vmem:[#allocation13 + $0x660] ss:$16 sps:$4 sm:$0xff]  }
 0x368   : > { %v5392_v55 = vld [vmem:[#allocation13 + $0x5a0] ss:$16 sps:$4 sm:$0xff]  }
 0x369   : > { %v6531_v35 = vcombine.low %v1798_v33, %v1805_v34  ;;  %v5395_v27 = vld [vmem:[#allocation13 + $0x7a0] ss:$16 sps:$4 sm:$0xff]   ;;  %v5400_v33 = vld [vmem:[#allocation13 + $0x584] ss:$16 sps:$4 sm:$0xff]  }
 0x36a   : > { %v5403_v34 = vld [vmem:[#allocation13 + $0x784] ss:$16 sps:$4 sm:$0xff]  }
 0x36b   : > { %v2177_v36 = vrot.slane %v6531_v35, %v6402_v29  ;;  %v2185_v39 = vrot.slane %v6531_v35, %v6405_v30  ;;  %v2173_v40 = vrot.slane %v6531_v35, %v6394_v23  ;;  %v2181_v41 = vrot.slane %v6531_v35, %v6397_v24 }
 0x36c   : > { %v2193_v37 = vrot.slane %v6531_v35, %v946_v31  ;;  %v2201_v38 = vrot.slane %v6531_v35, %v954_v48  ;;  %v5343_v31 = vld [vmem:[#allocation13 + $0x6c4] ss:$16 sps:$4 sm:$0xff]  }
 0x36d   : > { %v6547_v42 = vpack.c.bf16 %v2177_v36, %v2177_v36  ;;  %v6549_v43 = vpack.c.bf16 %v2185_v39, %v2185_v39  ;;  %v6551_v60 = vpack.c.bf16 %v2173_v40, %v2173_v40  ;;  %v6553_v62 = vpack.c.bf16 %v2181_v41, %v2181_v41  ;;  %v5398_v36 = vld [vmem:[#allocation13 + $0x580] ss:$16 sps:$4 sm:$0xff]   ;;  %v5406_v40 = vld [vmem:[#allocation13 + $0x564] ss:$16 sps:$4 sm:$0xff]  }
 0x36e   : > { %v6559_v48 = vpack.c.bf16 %v2193_v37, %v2193_v37  ;;  %v6561_v28 = vpack.c.bf16 %v2201_v38, %v2201_v38  ;;  %v5401_v39 = vld [vmem:[#allocation13 + $0x780] ss:$16 sps:$4 sm:$0xff]   ;;  %v5409_v41 = vld [vmem:[#allocation13 + $0x764] ss:$16 sps:$4 sm:$0xff]  }
 0x36f   : > { %3551 = vmatprep.mubr.bf16.mxu0 %v6547_v42  ;;  %3592 = vmatprep.mubr.bf16.mxu1 %v6549_v43  ;;  %v5404_v37 = vld [vmem:[#allocation13 + $0x560] ss:$16 sps:$4 sm:$0xff]  }
 0x370   : > { %3552 = vmatmul.mubr.bf16.vlgmr.msra.gmra.mxu0 %v6551_v60  ;;  %3593 = vmatmul.mubr.bf16.vlgmr.msra.gmra.mxu1 %v6553_v62  ;;  %v5407_v38 = vld [vmem:[#allocation13 + $0x760] ss:$16 sps:$4 sm:$0xff]  }
 0x371   : > { %3602 = vmatpush1.bf16.msra.mxu0 %v5332_v32  ;;  %3643 = vmatpush1.bf16.msra.mxu1 %v5335_v22  ;;  %v5412_v32 = vld [vmem:[#allocation13 + $0x544] ss:$16 sps:$4 sm:$0xff]  }
 0x372   : > { %3633 = vmatprep.mubr.bf16.mxu0 %v6559_v48  ;;  %3674 = vmatprep.mubr.bf16.mxu1 %v6561_v28  ;;  %v5415_v22 = vld [vmem:[#allocation13 + $0x744] ss:$16 sps:$4 sm:$0xff]  }
 0x373   : > { %3603 = vmatprep.subr.bf16.mxu0 %v5340_v44  ;;  %3644 = vmatprep.subr.bf16.mxu1 %v5343_v31  ;;  %v5410_v44 = vld [vmem:[#allocation13 + $0x540] ss:$16 sps:$4 sm:$0xff]  }
 0x374   : > { %v5413_v31 = vld [vmem:[#allocation13 + $0x740] ss:$16 sps:$4 sm:$0xff]  }
 0x375   : > { %3604 = vmatpush1.bf16.msra.mxu0 %v5338_v45  ;;  %3645 = vmatpush1.bf16.msra.mxu1 %v5341_v46  ;;  %v5418_v45 = vld [vmem:[#allocation13 + $0x524] ss:$16 sps:$4 sm:$0xff]  }
 0x376   : > { %3605 = vmatprep.subr.bf16.mxu0 %v5346_v50  ;;  %3646 = vmatprep.subr.bf16.mxu1 %v5349_v51  ;;  %v5421_v46 = vld [vmem:[#allocation13 + $0x724] ss:$16 sps:$4 sm:$0xff]   ;;  %v5416_v50 = vld [vmem:[#allocation13 + $0x520] ss:$16 sps:$4 sm:$0xff]  }
 0x377   : > { %v5419_v51 = vld [vmem:[#allocation13 + $0x720] ss:$16 sps:$4 sm:$0xff]  }
 0x379   : > { %3606 = vmatpush1.bf16.msra.mxu0 %v5344_v52  ;;  %3647 = vmatpush1.bf16.msra.mxu1 %v5347_v56  ;;  %v5424_v52 = vld [vmem:[#allocation13 + $0x504] ss:$16 sps:$4 sm:$0xff]  }
 0x37a   : > { %3607 = vmatprep.subr.bf16.mxu0 %v5352_v57  ;;  %3648 = vmatprep.subr.bf16.mxu1 %v5355_v58  ;;  %v5427_v56 = vld [vmem:[#allocation13 + $0x704] ss:$16 sps:$4 sm:$0xff]   ;;  %v5422_v57 = vld [vmem:[#allocation13 + $0x500] ss:$16 sps:$4 sm:$0xff]  }
 0x37b   : > { %v5425_v58 = vld [vmem:[#allocation13 + $0x700] ss:$16 sps:$4 sm:$0xff]  }
 0x37d   : > { %3608 = vmatpush1.bf16.msra.mxu0 %v5350_v59  ;;  %3649 = vmatpush1.bf16.msra.mxu1 %v5353_v63  ;;  %v2189_v59 = vrot.slane %v6531_v35, %v942_v53  ;;  %v2197_v63 = vrot.slane %v6531_v35, %v950_v54  ;;  %v5437_v53 = vld [vmem:[#allocation13 + $0x2c8] ss:$16 sps:$4 sm:$0xff]   ;;  %v5442_v54 = vld [vmem:[#allocation13 + $0xac] ss:$16 sps:$4 sm:$0xff]  }
 0x37e   : > { %3609 = vmatprep.subr.bf16.mxu0 %v5358_v0  ;;  %3650 = vmatprep.subr.bf16.mxu1 %v5361_v1  ;;  %v5430_v0 = vld [vmem:[#allocation13 + $0xec] ss:$16 sps:$4 sm:$0xff]  }
 0x37f   : > { %v5433_v1 = vld [vmem:[#allocation13 + $0x2ec] ss:$16 sps:$4 sm:$0xff]  }
 0x380   : > { %v5445_v35 = vld [vmem:[#allocation13 + $0x2ac] ss:$16 sps:$4 sm:$0xff]  }
 0x381   : > { %3610 = vmatpush1.bf16.msra.mxu0 %v5356_v2  ;;  %3651 = vmatpush1.bf16.msra.mxu1 %v5359_v6  ;;  %v5428_v2 = vld [vmem:[#allocation13 + $0xe8] ss:$16 sps:$4 sm:$0xff]   ;;  %v6571_v6 = vpack.c.bf16 %v2189_v59, %v2189_v59  ;;  %v5508_v59 = vld [vmem:[#allocation13 + $0x14c] ss:$16 sps:$4 sm:$0xff]  }
 0x382   : > { %3611 = vmatprep.subr.bf16.mxu0 %v5364_v7  ;;  %3652 = vmatprep.subr.bf16.mxu1 %v5367_v16  ;;  %v6573_v7 = vpack.c.bf16 %v2197_v63, %v2197_v63  ;;  %v5431_v16 = vld [vmem:[#allocation13 + $0x2e8] ss:$16 sps:$4 sm:$0xff]   ;;  %v5511_v63 = vld [vmem:[#allocation13 + $0x34c] ss:$16 sps:$4 sm:$0xff]  }
 0x385   : > { %3612 = vmatpush1.bf16.msra.mxu0 %v5362_v8  ;;  %3653 = vmatpush1.bf16.msra.mxu1 %v5365_v4  ;;  %v5436_v8 = vld [vmem:[#allocation13 + $0xcc] ss:$16 sps:$4 sm:$0xff]  }
 0x386   : > { %3613 = vmatprep.subr.bf16.mxu0 %v5370_v9  ;;  %3654 = vmatprep.subr.bf16.mxu1 %v5373_v19  ;;  %v5439_v4 = vld [vmem:[#allocation13 + $0x2cc] ss:$16 sps:$4 sm:$0xff]   ;;  %v5440_v9 = vld [vmem:[#allocation13 + $0xa8] ss:$16 sps:$4 sm:$0xff]  }
 0x387   : > { %v5443_v19 = vld [vmem:[#allocation13 + $0x2a8] ss:$16 sps:$4 sm:$0xff]  }
 0x389   : > { %3614 = vmatpush1.bf16.msra.mxu0 %v5368_v5  ;;  %3655 = vmatpush1.bf16.msra.mxu1 %v5371_v21  ;;  %v5448_v5 = vld [vmem:[#allocation13 + $0x8c] ss:$16 sps:$4 sm:$0xff]  }
 0x38a   : > { %3615 = vmatprep.subr.bf16.mxu0 %v5376_v10  ;;  %3656 = vmatprep.subr.bf16.mxu1 %v5379_v61  ;;  %v5451_v21 = vld [vmem:[#allocation13 + $0x28c] ss:$16 sps:$4 sm:$0xff]   ;;  %v5446_v10 = vld [vmem:[#allocation13 + $0x88] ss:$16 sps:$4 sm:$0xff]  }
 0x38b   : > { %v5454_v61 = vld [vmem:[#allocation13 + $0x6c] ss:$16 sps:$4 sm:$0xff]  }
 0x38d   : > { %3616 = vmatpush1.bf16.msra.mxu0 %v5374_v3  ;;  %3657 = vmatpush1.bf16.msra.mxu1 %v5377_v26  ;;  %v5452_v3 = vld [vmem:[#allocation13 + $0x68] ss:$16 sps:$4 sm:$0xff]  }
 0x38e   : > { %3617 = vmatprep.subr.bf16.mxu0 %v5382_v12  ;;  %3658 = vmatprep.subr.bf16.mxu1 %v5385_v47  ;;  %v5455_v26 = vld [vmem:[#allocation13 + $0x268] ss:$16 sps:$4 sm:$0xff]   ;;  %v5460_v12 = vld [vmem:[#allocation13 + $0x4c] ss:$16 sps:$4 sm:$0xff]  }
 0x38f   : > { %v5463_v47 = vld [vmem:[#allocation13 + $0x24c] ss:$16 sps:$4 sm:$0xff]  }
 0x391   : > { %3618 = vmatpush2.bf16.msra.mxu0 %v5380_v13  ;;  %3659 = vmatpush2.bf16.msra.mxu1 %v5383_v49  ;;  %v5458_v13 = vld [vmem:[#allocation13 + $0x48] ss:$16 sps:$4 sm:$0xff]  }
 0x392   : > { %3619 = vmatprep.subr.bf16.mxu0 %v5388_v14  ;;  %3660 = vmatprep.subr.bf16.mxu1 %v5391_v15  ;;  %v5461_v49 = vld [vmem:[#allocation13 + $0x248] ss:$16 sps:$4 sm:$0xff]   ;;  %v5466_v14 = vld [vmem:[#allocation13 + $0x2c] ss:$16 sps:$4 sm:$0xff]  }
 0x393   : > { %v5469_v15 = vld [vmem:[#allocation13 + $0x22c] ss:$16 sps:$4 sm:$0xff]  }
 0x395   : > { %3620 = vmatpush2.bf16.msra.mxu0 %v5386_v17  ;;  %3661 = vmatpush2.bf16.msra.mxu1 %v5389_v11  ;;  %v5464_v17 = vld [vmem:[#allocation13 + $0x28] ss:$16 sps:$4 sm:$0xff]  }
 0x396   : > { %3621 = vmatprep.subr.bf16.mxu0 %v5394_v18  ;;  %3662 = vmatprep.subr.bf16.mxu1 %v5397_v25  ;;  %v5467_v11 = vld [vmem:[#allocation13 + $0x228] ss:$16 sps:$4 sm:$0xff]   ;;  %v5472_v18 = vld [vmem:[#allocation13 + $0xc] ss:$16 sps:$4 sm:$0xff]  }
 0x397   : > { %v5475_v25 = vld [vmem:[#allocation13 + $0x20c] ss:$16 sps:$4 sm:$0xff]  }
 0x399   : > { %3622 = vmatpush2.bf16.msra.mxu0 %v5392_v55  ;;  %3663 = vmatpush2.bf16.msra.mxu1 %v5395_v27  ;;  %v5470_v55 = vld [vmem:[#allocation13 + $0x8] ss:$16 sps:$4 sm:$0xff]  }
 0x39a   : > { %3623 = vmatprep.subr.bf16.mxu0 %v5400_v33  ;;  %3664 = vmatprep.subr.bf16.mxu1 %v5403_v34  ;;  %v5473_v27 = vld [vmem:[#allocation13 + $0x208] ss:$16 sps:$4 sm:$0xff]   ;;  %v5478_v33 = vld [vmem:[#allocation13 + $0x1ec] ss:$16 sps:$4 sm:$0xff]  }
 0x39b   : > { %v5481_v34 = vld [vmem:[#allocation13 + $0x3ec] ss:$16 sps:$4 sm:$0xff]  }
 0x39d   : > { %3624 = vmatpush2.bf16.msra.mxu0 %v5398_v36  ;;  %3665 = vmatpush2.bf16.msra.mxu1 %v5401_v39  ;;  %v5476_v36 = vld [vmem:[#allocation13 + $0x1e8] ss:$16 sps:$4 sm:$0xff]  }
 0x39e   : > { %3625 = vmatprep.subr.bf16.mxu0 %v5406_v40  ;;  %3666 = vmatprep.subr.bf16.mxu1 %v5409_v41  ;;  %v5479_v39 = vld [vmem:[#allocation13 + $0x3e8] ss:$16 sps:$4 sm:$0xff]   ;;  %v5484_v40 = vld [vmem:[#allocation13 + $0x1cc] ss:$16 sps:$4 sm:$0xff]  }
 0x39f   : > { %v5487_v41 = vld [vmem:[#allocation13 + $0x3cc] ss:$16 sps:$4 sm:$0xff]  }
 0x3a1   : > { %3626 = vmatpush2.bf16.msra.mxu0 %v5404_v37  ;;  %3667 = vmatpush2.bf16.msra.mxu1 %v5407_v38  ;;  %v5482_v37 = vld [vmem:[#allocation13 + $0x1c8] ss:$16 sps:$4 sm:$0xff]  }
 0x3a2   : > { %3627 = vmatprep.subr.bf16.mxu0 %v5412_v32  ;;  %3668 = vmatprep.subr.bf16.mxu1 %v5415_v22  ;;  %v5485_v38 = vld [vmem:[#allocation13 + $0x3c8] ss:$16 sps:$4 sm:$0xff]   ;;  %v5490_v32 = vld [vmem:[#allocation13 + $0x1ac] ss:$16 sps:$4 sm:$0xff]  }
 0x3a3   : > { %v5493_v22 = vld [vmem:[#allocation13 + $0x3ac] ss:$16 sps:$4 sm:$0xff]  }
 0x3a5   : > { %3628 = vmatpush2.bf16.msra.mxu0 %v5410_v44  ;;  %3669 = vmatpush2.bf16.msra.mxu1 %v5413_v31  ;;  %v5488_v44 = vld [vmem:[#allocation13 + $0x1a8] ss:$16 sps:$4 sm:$0xff]  }
 0x3a6   : > { %3629 = vmatprep.subr.bf16.mxu0 %v5418_v45  ;;  %3670 = vmatprep.subr.bf16.mxu1 %v5421_v46  ;;  %v5491_v31 = vld [vmem:[#allocation13 + $0x3a8] ss:$16 sps:$4 sm:$0xff]   ;;  %v5496_v45 = vld [vmem:[#allocation13 + $0x18c] ss:$16 sps:$4 sm:$0xff]  }
 0x3a7   : > { %v5499_v46 = vld [vmem:[#allocation13 + $0x38c] ss:$16 sps:$4 sm:$0xff]  }
 0x3a9   : > { %3630 = vmatpush2.bf16.msra.mxu0 %v5416_v50  ;;  %3671 = vmatpush2.bf16.msra.mxu1 %v5419_v51  ;;  %v5494_v50 = vld [vmem:[#allocation13 + $0x188] ss:$16 sps:$4 sm:$0xff]  }
 0x3aa   : > { %3631 = vmatprep.subr.bf16.mxu0 %v5424_v52  ;;  %3672 = vmatprep.subr.bf16.mxu1 %v5427_v56  ;;  %v5497_v51 = vld [vmem:[#allocation13 + $0x388] ss:$16 sps:$4 sm:$0xff]   ;;  %v5502_v52 = vld [vmem:[#allocation13 + $0x16c] ss:$16 sps:$4 sm:$0xff]  }
 0x3ab   : > { %v5505_v56 = vld [vmem:[#allocation13 + $0x36c] ss:$16 sps:$4 sm:$0xff]  }
 0x3ad   : > { %3632 = vmatpush2.bf16.msra.mxu0 %v5422_v57  ;;  %3673 = vmatpush2.bf16.msra.mxu1 %v5425_v58  ;;  %v5500_v57 = vld [vmem:[#allocation13 + $0x168] ss:$16 sps:$4 sm:$0xff]  }
 0x3ae   : > { %3683 = vmatprep.subr.bf16.mxu0 %v5430_v0  ;;  %3724 = vmatprep.subr.bf16.mxu1 %v5433_v1  ;;  %v5503_v58 = vld [vmem:[#allocation13 + $0x368] ss:$16 sps:$4 sm:$0xff]  }
 0x3af   : > { %v5506_v0 = vld [vmem:[#allocation13 + $0x148] ss:$16 sps:$4 sm:$0xff]  }
 0x3b0   : > { %3634 = vmatmul.mubr.bf16.vlgmr.msra.gmra.mxu0 %v6571_v6  ;;  %3675 = vmatmul.mubr.bf16.vlgmr.msra.gmra.mxu1 %v6573_v7  ;;  %v5509_v1 = vld [vmem:[#allocation13 + $0x348] ss:$16 sps:$4 sm:$0xff]  }
 0x3b1   : > { %3684 = vmatpush1.bf16.msra.mxu0 %v5428_v2  ;;  %3715 = vmatprep.mubr.bf16.mxu0 %v6547_v42  ;;  %v5449_v42 = vld [vmem:[#allocation13 + $0x288] ss:$16 sps:$4 sm:$0xff]   ;;  %v5514_v2 = vld [vmem:[#allocation13 + $0x12c] ss:$16 sps:$4 sm:$0xff]  }
 0x3b2   : > { %3725 = vmatpush1.bf16.msra.mxu1 %v5431_v16  ;;  %3756 = vmatprep.mubr.bf16.mxu1 %v6549_v43  ;;  %v5457_v43 = vld [vmem:[#allocation13 + $0x26c] ss:$16 sps:$4 sm:$0xff]  }
 0x3b3   : > { %3685 = vmatprep.subr.bf16.mxu0 %v5436_v8  ;;  %3726 = vmatprep.subr.bf16.mxu1 %v5439_v4  ;;  %v5517_v16 = vld [vmem:[#allocation13 + $0x32c] ss:$16 sps:$4 sm:$0xff]   ;;  %v5512_v8 = vld [vmem:[#allocation13 + $0x128] ss:$16 sps:$4 sm:$0xff]  }
 0x3b4   : > { %v5515_v4 = vld [vmem:[#allocation13 + $0x328] ss:$16 sps:$4 sm:$0xff]  }
 0x3b5   : > { %3686 = vmatpush1.bf16.msra.mxu0 %v5434_v20  ;;  %v5520_v20 = vld [vmem:[#allocation13 + $0x10c] ss:$16 sps:$4 sm:$0xff]  }
 0x3b6   : > { %3727 = vmatpush1.bf16.msra.mxu1 %v5437_v53  ;;  %3687 = vmatprep.subr.bf16.mxu0 %v5442_v54  ;;  %v5523_v53 = vld [vmem:[#allocation13 + $0x30c] ss:$16 sps:$4 sm:$0xff]   ;;  %v5518_v54 = vld [vmem:[#allocation13 + $0x108] ss:$16 sps:$4 sm:$0xff]  }
 0x3b7   : > { %3728 = vmatprep.subr.bf16.mxu1 %v5445_v35  ;;  %v5521_v35 = vld [vmem:[#allocation13 + $0x308] ss:$16 sps:$4 sm:$0xff]  }
 0x3b9   : > { %3688 = vmatpush1.bf16.msra.mxu0 %v5440_v9  ;;  %v5526_v9 = vld [vmem:[#allocation13 + $0x4ec] ss:$16 sps:$4 sm:$0xff]  }
 0x3ba   : > { %3729 = vmatpush1.bf16.msra.mxu1 %v5443_v19  ;;  %3689 = vmatprep.subr.bf16.mxu0 %v5448_v5  ;;  %v5529_v19 = vld [vmem:[#allocation13 + $0x6ec] ss:$16 sps:$4 sm:$0xff]   ;;  %v5524_v5 = vld [vmem:[#allocation13 + $0x4e8] ss:$16 sps:$4 sm:$0xff]  }
 0x3bb   : > { %3730 = vmatprep.subr.bf16.mxu1 %v5451_v21  ;;  %v5527_v21 = vld [vmem:[#allocation13 + $0x6e8] ss:$16 sps:$4 sm:$0xff]  }
 0x3bd   : > { %3690 = vmatpush1.bf16.msra.mxu0 %v5446_v10  ;;  %v5532_v10 = vld [vmem:[#allocation13 + $0x4cc] ss:$16 sps:$4 sm:$0xff]  }
 0x3be   : > { %3731 = vmatpush1.bf16.msra.mxu1 %v5449_v42  ;;  %3691 = vmatprep.subr.bf16.mxu0 %v5454_v61  ;;  %v5535_v42 = vld [vmem:[#allocation13 + $0x6cc] ss:$16 sps:$4 sm:$0xff]   ;;  %v5530_v61 = vld [vmem:[#allocation13 + $0x4c8] ss:$16 sps:$4 sm:$0xff]  }
 0x3bf   : > { %3732 = vmatprep.subr.bf16.mxu1 %v5457_v43  ;;  %v5533_v43 = vld [vmem:[#allocation13 + $0x6c8] ss:$16 sps:$4 sm:$0xff]  }
 0x3c1   : > { %3692 = vmatpush1.bf16.msra.mxu0 %v5452_v3  ;;  %v5538_v3 = vld [vmem:[#allocation13 + $0x4ac] ss:$16 sps:$4 sm:$0xff]  }
 0x3c2   : > { %3733 = vmatpush1.bf16.msra.mxu1 %v5455_v26  ;;  %3693 = vmatprep.subr.bf16.mxu0 %v5460_v12  ;;  %v5541_v26 = vld [vmem:[#allocation13 + $0x6ac] ss:$16 sps:$4 sm:$0xff]   ;;  %v5536_v12 = vld [vmem:[#allocation13 + $0x4a8] ss:$16 sps:$4 sm:$0xff]  }
 0x3c3   : > { %3734 = vmatprep.subr.bf16.mxu1 %v5463_v47  ;;  %v5544_v47 = vld [vmem:[#allocation13 + $0x48c] ss:$16 sps:$4 sm:$0xff]  }
 0x3c5   : > { %3694 = vmatpush1.bf16.msra.mxu0 %v5458_v13  ;;  %v5542_v13 = vld [vmem:[#allocation13 + $0x488] ss:$16 sps:$4 sm:$0xff]  }
 0x3c6   : > { %3735 = vmatpush1.bf16.msra.mxu1 %v5461_v49  ;;  %3695 = vmatprep.subr.bf16.mxu0 %v5466_v14  ;;  %v5550_v49 = vld [vmem:[#allocation13 + $0x46c] ss:$16 sps:$4 sm:$0xff]  }
 0x3c7   : > { %3736 = vmatprep.subr.bf16.mxu1 %v5469_v15  ;;  %v5553_v14 = vld [vmem:[#allocation13 + $0x66c] ss:$16 sps:$4 sm:$0xff]   ;;  %v5551_v15 = vld [vmem:[#allocation13 + $0x668] ss:$16 sps:$4 sm:$0xff]  }
 0x3c9   : > { %3696 = vmatpush1.bf16.msra.mxu0 %v5464_v17  ;;  %v5556_v17 = vld [vmem:[#allocation13 + $0x44c] ss:$16 sps:$4 sm:$0xff]  }
 0x3ca   : > { %3737 = vmatpush1.bf16.msra.mxu1 %v5467_v11  ;;  %3697 = vmatprep.subr.bf16.mxu0 %v5472_v18  ;;  %v5559_v11 = vld [vmem:[#allocation13 + $0x64c] ss:$16 sps:$4 sm:$0xff]   ;;  %v5554_v18 = vld [vmem:[#allocation13 + $0x448] ss:$16 sps:$4 sm:$0xff]  }
 0x3cb   : > { %3738 = vmatprep.subr.bf16.mxu1 %v5475_v25  ;;  %v5557_v25 = vld [vmem:[#allocation13 + $0x648] ss:$16 sps:$4 sm:$0xff]  }
 0x3cd   : > { %3698 = vmatpush1.bf16.msra.mxu0 %v5470_v55  ;;  %v5562_v55 = vld [vmem:[#allocation13 + $0x42c] ss:$16 sps:$4 sm:$0xff]  }
 0x3ce   : > { %3739 = vmatpush1.bf16.msra.mxu1 %v5473_v27  ;;  %3699 = vmatprep.subr.bf16.mxu0 %v5478_v33  ;;  %v5565_v27 = vld [vmem:[#allocation13 + $0x62c] ss:$16 sps:$4 sm:$0xff]   ;;  %v5560_v33 = vld [vmem:[#allocation13 + $0x428] ss:$16 sps:$4 sm:$0xff]  }
 0x3cf   : > { %3740 = vmatprep.subr.bf16.mxu1 %v5481_v34  ;;  %v5563_v34 = vld [vmem:[#allocation13 + $0x628] ss:$16 sps:$4 sm:$0xff]  }
 0x3d1   : > { %3700 = vmatpush2.bf16.msra.mxu0 %v5476_v36  ;;  %v5568_v36 = vld [vmem:[#allocation13 + $0x40c] ss:$16 sps:$4 sm:$0xff]  }
 0x3d2   : > { %3741 = vmatpush2.bf16.msra.mxu1 %v5479_v39  ;;  %3701 = vmatprep.subr.bf16.mxu0 %v5484_v40  ;;  %v5571_v39 = vld [vmem:[#allocation13 + $0x60c] ss:$16 sps:$4 sm:$0xff]   ;;  %v5566_v40 = vld [vmem:[#allocation13 + $0x408] ss:$16 sps:$4 sm:$0xff]  }
 0x3d3   : > { %3742 = vmatprep.subr.bf16.mxu1 %v5487_v41  ;;  %v5569_v41 = vld [vmem:[#allocation13 + $0x608] ss:$16 sps:$4 sm:$0xff]  }
 0x3d5   : > { %3702 = vmatpush2.bf16.msra.mxu0 %v5482_v37  ;;  %v5574_v37 = vld [vmem:[#allocation13 + $0x5ec] ss:$16 sps:$4 sm:$0xff]  }
 0x3d6   : > { %3743 = vmatpush2.bf16.msra.mxu1 %v5485_v38  ;;  %3703 = vmatprep.subr.bf16.mxu0 %v5490_v32  ;;  %v5577_v38 = vld [vmem:[#allocation13 + $0x7ec] ss:$16 sps:$4 sm:$0xff]   ;;  %v5572_v32 = vld [vmem:[#allocation13 + $0x5e8] ss:$16 sps:$4 sm:$0xff]  }
 0x3d7   : > { %3744 = vmatprep.subr.bf16.mxu1 %v5493_v22  ;;  %v5575_v22 = vld [vmem:[#allocation13 + $0x7e8] ss:$16 sps:$4 sm:$0xff]  }
 0x3d9   : > { %3704 = vmatpush2.bf16.msra.mxu0 %v5488_v44  ;;  %v5580_v44 = vld [vmem:[#allocation13 + $0x5cc] ss:$16 sps:$4 sm:$0xff]  }
 0x3da   : > { %3745 = vmatpush2.bf16.msra.mxu1 %v5491_v31  ;;  %3705 = vmatprep.subr.bf16.mxu0 %v5496_v45  ;;  %v5583_v31 = vld [vmem:[#allocation13 + $0x7cc] ss:$16 sps:$4 sm:$0xff]   ;;  %v5578_v45 = vld [vmem:[#allocation13 + $0x5c8] ss:$16 sps:$4 sm:$0xff]  }
 0x3db   : > { %3746 = vmatprep.subr.bf16.mxu1 %v5499_v46  ;;  %v5581_v46 = vld [vmem:[#allocation13 + $0x7c8] ss:$16 sps:$4 sm:$0xff]  }
 0x3dd   : > { %3706 = vmatpush2.bf16.msra.mxu0 %v5494_v50  ;;  %v5586_v50 = vld [vmem:[#allocation13 + $0x5ac] ss:$16 sps:$4 sm:$0xff]  }
 0x3de   : > { %3747 = vmatpush2.bf16.msra.mxu1 %v5497_v51  ;;  %3707 = vmatprep.subr.bf16.mxu0 %v5502_v52  ;;  %v5589_v51 = vld [vmem:[#allocation13 + $0x7ac] ss:$16 sps:$4 sm:$0xff]   ;;  %v5584_v52 = vld [vmem:[#allocation13 + $0x5a8] ss:$16 sps:$4 sm:$0xff]  }
 0x3df   : > { %3748 = vmatprep.subr.bf16.mxu1 %v5505_v56  ;;  %v5587_v56 = vld [vmem:[#allocation13 + $0x7a8] ss:$16 sps:$4 sm:$0xff]  }
 0x3e1   : > { %3708 = vmatpush2.bf16.msra.mxu0 %v5500_v57  ;;  %v5592_v57 = vld [vmem:[#allocation13 + $0x58c] ss:$16 sps:$4 sm:$0xff]  }
 0x3e2   : > { %3749 = vmatpush2.bf16.msra.mxu1 %v5503_v58  ;;  %3709 = vmatprep.subr.bf16.mxu0 %v5508_v59  ;;  %v5595_v58 = vld [vmem:[#allocation13 + $0x78c] ss:$16 sps:$4 sm:$0xff]   ;;  %v5590_v59 = vld [vmem:[#allocation13 + $0x588] ss:$16 sps:$4 sm:$0xff]  }
 0x3e3   : > { %3750 = vmatprep.subr.bf16.mxu1 %v5511_v63  ;;  %v5593_v63 = vld [vmem:[#allocation13 + $0x788] ss:$16 sps:$4 sm:$0xff]  }
 0x3e5   : > { %3710 = vmatpush2.bf16.msra.mxu0 %v5506_v0  ;;  %v5598_v0 = vld [vmem:[#allocation13 + $0x56c] ss:$16 sps:$4 sm:$0xff]  }
 0x3e6   : > { %3751 = vmatpush2.bf16.msra.mxu1 %v5509_v1  ;;  %3711 = vmatprep.subr.bf16.mxu0 %v5514_v2  ;;  %v5601_v1 = vld [vmem:[#allocation13 + $0x76c] ss:$16 sps:$4 sm:$0xff]   ;;  %v5596_v2 = vld [vmem:[#allocation13 + $0x568] ss:$16 sps:$4 sm:$0xff]  }
 0x3e7   : > { %3752 = vmatprep.subr.bf16.mxu1 %v5517_v16  ;;  %v5599_v16 = vld [vmem:[#allocation13 + $0x768] ss:$16 sps:$4 sm:$0xff]  }
 0x3e9   : > { %3712 = vmatpush2.bf16.msra.mxu0 %v5512_v8  ;;  %v5604_v8 = vld [vmem:[#allocation13 + $0x54c] ss:$16 sps:$4 sm:$0xff]  }
 0x3ea   : > { %3753 = vmatpush2.bf16.msra.mxu1 %v5515_v4  ;;  %3713 = vmatprep.subr.bf16.mxu0 %v5520_v20  ;;  %v5607_v4 = vld [vmem:[#allocation13 + $0x74c] ss:$16 sps:$4 sm:$0xff]   ;;  %v5602_v20 = vld [vmem:[#allocation13 + $0x548] ss:$16 sps:$4 sm:$0xff]  }
 0x3eb   : > { %3754 = vmatprep.subr.bf16.mxu1 %v5523_v53  ;;  %v5605_v53 = vld [vmem:[#allocation13 + $0x748] ss:$16 sps:$4 sm:$0xff]  }
 0x3ed   : > { %3714 = vmatpush2.bf16.msra.mxu0 %v5518_v54  ;;  %v5610_v54 = vld [vmem:[#allocation13 + $0x52c] ss:$16 sps:$4 sm:$0xff]  }
 0x3ee   : > { %3755 = vmatpush2.bf16.msra.mxu1 %v5521_v35  ;;  %3765 = vmatprep.subr.bf16.mxu0 %v5526_v9  ;;  %v5613_v35 = vld [vmem:[#allocation13 + $0x72c] ss:$16 sps:$4 sm:$0xff]   ;;  %v5608_v9 = vld [vmem:[#allocation13 + $0x528] ss:$16 sps:$4 sm:$0xff]  }
 0x3ef   : > { %3806 = vmatprep.subr.bf16.mxu1 %v5529_v19  ;;  %v5611_v19 = vld [vmem:[#allocation13 + $0x728] ss:$16 sps:$4 sm:$0xff]  }
 0x3f0   : > { %3716 = vmatmul.mubr.bf16.vlgmr.msra.gmra.mxu0 %v6551_v60  ;;  %v5539_v60 = vld [vmem:[#allocation13 + $0x6a8] ss:$16 sps:$4 sm:$0xff]  }
 0x3f1   : > { %3757 = vmatmul.mubr.bf16.vlgmr.msra.gmra.mxu1 %v6553_v62  ;;  %3766 = vmatpush1.bf16.msra.mxu0 %v5524_v5  ;;  %v5547_v62 = vld [vmem:[#allocation13 + $0x68c] ss:$16 sps:$4 sm:$0xff]  }
 0x3f2   : > { %3797 = vmatprep.mubr.bf16.mxu0 %v6559_v48  ;;  %3807 = vmatpush1.bf16.msra.mxu1 %v5527_v21  ;;  %v5545_v48 = vld [vmem:[#allocation13 + $0x688] ss:$16 sps:$4 sm:$0xff]   ;;  %v5616_v5 = vld [vmem:[#allocation13 + $0x50c] ss:$16 sps:$4 sm:$0xff]  }
 0x3f3   : > { %3838 = vmatprep.mubr.bf16.mxu1 %v6561_v28  ;;  %3767 = vmatprep.subr.bf16.mxu0 %v5532_v10  ;;  %v5548_v28 = vld [vmem:[#allocation13 + $0x468] ss:$16 sps:$4 sm:$0xff]   ;;  %v5619_v21 = vld [vmem:[#allocation13 + $0x70c] ss:$16 sps:$4 sm:$0xff]  }
 0x3f4   : > { %3808 = vmatprep.subr.bf16.mxu1 %v5535_v42  ;;  %v5614_v10 = vld [vmem:[#allocation13 + $0x508] ss:$16 sps:$4 sm:$0xff]  }
 0x3f5   : > { %3768 = vmatpush1.bf16.msra.mxu0 %v5530_v61  ;;  %v5617_v42 = vld [vmem:[#allocation13 + $0x708] ss:$16 sps:$4 sm:$0xff]  }
 0x3f6   : > { %3809 = vmatpush1.bf16.msra.mxu1 %v5533_v43  ;;  %3769 = vmatprep.subr.bf16.mxu0 %v5538_v3  ;;  %v5622_v61 = vld [vmem:[#allocation16 + $0x74] ss:$8 sps:$4 sm:$0xff]   ;;  %v5620_v43 = vld [vmem:[#allocation16 + $0x70] ss:$8 sps:$4 sm:$0xff]   ;;  %v5625_v3 = vld [vmem:[#allocation16 + $0x64] ss:$8 sps:$4 sm:$0xff]  }
 0x3f7   : > { %3810 = vmatprep.subr.bf16.mxu1 %v5541_v26 }
 0x3f9   : > { %3770 = vmatpush1.bf16.msra.mxu0 %v5536_v12 }
 0x3fa   : > { %3811 = vmatpush1.bf16.msra.mxu1 %v5539_v60  ;;  %3771 = vmatprep.subr.bf16.mxu0 %v5544_v47  ;;  %v5623_v60 = vld [vmem:[#allocation16 + $0x60] ss:$8 sps:$4 sm:$0xff]  }
 0x3fb   : > { %3812 = vmatprep.subr.bf16.mxu1 %v5547_v62 }
 0x3fd   : > { %3772 = vmatpush1.bf16.msra.mxu0 %v5542_v13  ;;  %v5628_v13 = vld [vmem:[#allocation16 + $0x54] ss:$8 sps:$4 sm:$0xff]  }
 0x3fe   : > { %3813 = vmatpush1.bf16.msra.mxu1 %v5545_v48  ;;  %3773 = vmatprep.subr.bf16.mxu0 %v5550_v49 }
 0x3ff   : > { %3814 = vmatprep.subr.bf16.mxu1 %v5553_v14  ;;  %v5626_v14 = vld [vmem:[#allocation16 + $0x50] ss:$8 sps:$4 sm:$0xff]  }
 0x401   : > { %3774 = vmatpush1.bf16.msra.mxu0 %v5548_v28 }
 0x402   : > { %3815 = vmatpush1.bf16.msra.mxu1 %v5551_v15  ;;  %3775 = vmatprep.subr.bf16.mxu0 %v5556_v17  ;;  %v5631_v15 = vld [vmem:[#allocation16 + $0x44] ss:$8 sps:$4 sm:$0xff]   ;;  %v5668_v17 = vld [vmem:[#allocation16 + $0x170] ss:$8 sps:$4 sm:$0xff]  }
 0x403   : > { %3816 = vmatprep.subr.bf16.mxu1 %v5559_v11  ;;  %v5670_v11 = vld [vmem:[#allocation16 + $0x174] ss:$8 sps:$4 sm:$0xff]  }
 0x405   : > { %3776 = vmatpush1.bf16.msra.mxu0 %v5554_v18  ;;  %v5673_v18 = vld [vmem:[#allocation16 + $0x164] ss:$8 sps:$4 sm:$0xff]  }
 0x406   : > { %3817 = vmatpush1.bf16.msra.mxu1 %v5557_v25  ;;  %3777 = vmatprep.subr.bf16.mxu0 %v5562_v55  ;;  %v5634_v25 = vld [vmem:[#allocation16 + $0x34] ss:$8 sps:$4 sm:$0xff]   ;;  %v5671_v55 = vld [vmem:[#allocation16 + $0x160] ss:$8 sps:$4 sm:$0xff]  }
 0x407   : > { %3818 = vmatprep.subr.bf16.mxu1 %v5565_v27  ;;  %v5676_v27 = vld [vmem:[#allocation16 + $0x154] ss:$8 sps:$4 sm:$0xff]  }
 0x409   : > { %3778 = vmatpush1.bf16.msra.mxu0 %v5560_v33  ;;  %v5632_v33 = vld [vmem:[#allocation16 + $0x30] ss:$8 sps:$4 sm:$0xff]  }
 0x40a   : > { %3819 = vmatpush1.bf16.msra.mxu1 %v5563_v34  ;;  %3779 = vmatprep.subr.bf16.mxu0 %v5568_v36  ;;  %v5637_v34 = vld [vmem:[#allocation16 + $0x24] ss:$8 sps:$4 sm:$0xff]   ;;  %v5674_v36 = vld [vmem:[#allocation16 + $0x150] ss:$8 sps:$4 sm:$0xff]  }
 0x40b   : > { %3820 = vmatprep.subr.bf16.mxu1 %v5571_v39  ;;  %v5679_v39 = vld [vmem:[#allocation16 + $0x144] ss:$8 sps:$4 sm:$0xff]  }
 0x40d   : > { %3780 = vmatpush1.bf16.msra.mxu0 %v5566_v40  ;;  %v5635_v40 = vld [vmem:[#allocation16 + $0x20] ss:$8 sps:$4 sm:$0xff]  }
 0x40e   : > { %3821 = vmatpush1.bf16.msra.mxu1 %v5569_v41  ;;  %3781 = vmatprep.subr.bf16.mxu0 %v5574_v37  ;;  %v5640_v41 = vld [vmem:[#allocation16 + $0x14] ss:$8 sps:$4 sm:$0xff]   ;;  %v5677_v37 = vld [vmem:[#allocation16 + $0x140] ss:$8 sps:$4 sm:$0xff]  }
 0x40f   : > { %3822 = vmatprep.subr.bf16.mxu1 %v5577_v38  ;;  %v5682_v38 = vld [vmem:[#allocation16 + $0x134] ss:$8 sps:$4 sm:$0xff]  }
 0x411   : > { %3782 = vmatpush2.bf16.msra.mxu0 %v5572_v32  ;;  %v5638_v32 = vld [vmem:[#allocation16 + $0x10] ss:$8 sps:$4 sm:$0xff]  }
 0x412   : > { %3823 = vmatpush2.bf16.msra.mxu1 %v5575_v22  ;;  %3783 = vmatprep.subr.bf16.mxu0 %v5580_v44  ;;  %v5643_v22 = vld [vmem:[#allocation16 + $0x4] ss:$8 sps:$4 sm:$0xff]   ;;  %v5680_v44 = vld [vmem:[#allocation16 + $0x130] ss:$8 sps:$4 sm:$0xff]  }
 0x413   : > { %3824 = vmatprep.subr.bf16.mxu1 %v5583_v31  ;;  %v5685_v31 = vld [vmem:[#allocation16 + $0x124] ss:$8 sps:$4 sm:$0xff]  }
 0x415   : > { %3784 = vmatpush2.bf16.msra.mxu0 %v5578_v45  ;;  %v5641_v45 = vld [vmem:[#allocation16] ss:$8 sps:$4 sm:$0xff]  }
 0x416   : > { %3825 = vmatpush2.bf16.msra.mxu1 %v5581_v46  ;;  %3785 = vmatprep.subr.bf16.mxu0 %v5586_v50  ;;  %v5646_v46 = vld [vmem:[#allocation16 + $0xf4] ss:$8 sps:$4 sm:$0xff]   ;;  %v5683_v50 = vld [vmem:[#allocation16 + $0x120] ss:$8 sps:$4 sm:$0xff]  }
 0x417   : > { %3826 = vmatprep.subr.bf16.mxu1 %v5589_v51  ;;  %v5688_v51 = vld [vmem:[#allocation16 + $0x114] ss:$8 sps:$4 sm:$0xff]  }
 0x419   : > { %3786 = vmatpush2.bf16.msra.mxu0 %v5584_v52  ;;  %v5644_v52 = vld [vmem:[#allocation16 + $0xf0] ss:$8 sps:$4 sm:$0xff]  }
 0x41a   : > { %3827 = vmatpush2.bf16.msra.mxu1 %v5587_v56  ;;  %3787 = vmatprep.subr.bf16.mxu0 %v5592_v57  ;;  %v5649_v56 = vld [vmem:[#allocation16 + $0xe4] ss:$8 sps:$4 sm:$0xff]   ;;  %v5686_v57 = vld [vmem:[#allocation16 + $0x110] ss:$8 sps:$4 sm:$0xff]  }
 0x41b   : > { %3828 = vmatprep.subr.bf16.mxu1 %v5595_v58  ;;  %v5691_v58 = vld [vmem:[#allocation16 + $0x104] ss:$8 sps:$4 sm:$0xff]  }
 0x41d   : > { %3788 = vmatpush2.bf16.msra.mxu0 %v5590_v59  ;;  %v5647_v59 = vld [vmem:[#allocation16 + $0xe0] ss:$8 sps:$4 sm:$0xff]  }
 0x41e   : > { %3829 = vmatpush2.bf16.msra.mxu1 %v5593_v63  ;;  %3789 = vmatprep.subr.bf16.mxu0 %v5598_v0  ;;  %v5652_v63 = vld [vmem:[#allocation16 + $0xd4] ss:$8 sps:$4 sm:$0xff]   ;;  %v5689_v0 = vld [vmem:[#allocation16 + $0x100] ss:$8 sps:$4 sm:$0xff]  }
 0x41f   : > { %3830 = vmatprep.subr.bf16.mxu1 %v5601_v1  ;;  %v5694_v1 = vld [vmem:[#allocation16 + $0x1f4] ss:$8 sps:$4 sm:$0xff]  }
 0x421   : > { %3790 = vmatpush2.bf16.msra.mxu0 %v5596_v2  ;;  %v5650_v2 = vld [vmem:[#allocation16 + $0xd0] ss:$8 sps:$4 sm:$0xff]  }
 0x422   : > { %3831 = vmatpush2.bf16.msra.mxu1 %v5599_v16  ;;  %3791 = vmatprep.subr.bf16.mxu0 %v5604_v8  ;;  %v5655_v16 = vld [vmem:[#allocation16 + $0xc4] ss:$8 sps:$4 sm:$0xff]   ;;  %v5692_v8 = vld [vmem:[#allocation16 + $0x1f0] ss:$8 sps:$4 sm:$0xff]  }
 0x423   : > { %3832 = vmatprep.subr.bf16.mxu1 %v5607_v4  ;;  %v5697_v4 = vld [vmem:[#allocation16 + $0x1e4] ss:$8 sps:$4 sm:$0xff]  }
 0x425   : > { %3792 = vmatpush2.bf16.msra.mxu0 %v5602_v20  ;;  %v5653_v20 = vld [vmem:[#allocation16 + $0xc0] ss:$8 sps:$4 sm:$0xff]  }
 0x426   : > { %3833 = vmatpush2.bf16.msra.mxu1 %v5605_v53  ;;  %3793 = vmatprep.subr.bf16.mxu0 %v5610_v54  ;;  %v5658_v53 = vld [vmem:[#allocation16 + $0xb4] ss:$8 sps:$4 sm:$0xff]   ;;  %v5695_v54 = vld [vmem:[#allocation16 + $0x1e0] ss:$8 sps:$4 sm:$0xff]  }
 0x427   : > { %3834 = vmatprep.subr.bf16.mxu1 %v5613_v35  ;;  %v5700_v35 = vld [vmem:[#allocation16 + $0x1d4] ss:$8 sps:$4 sm:$0xff]  }
 0x429   : > { %3794 = vmatpush2.bf16.msra.mxu0 %v5608_v9  ;;  %v5656_v9 = vld [vmem:[#allocation16 + $0xb0] ss:$8 sps:$4 sm:$0xff]  }
 0x42a   : > { %3835 = vmatpush2.bf16.msra.mxu1 %v5611_v19  ;;  %3795 = vmatprep.subr.bf16.mxu0 %v5616_v5  ;;  %v5661_v19 = vld [vmem:[#allocation16 + $0xa4] ss:$8 sps:$4 sm:$0xff]   ;;  %v5698_v5 = vld [vmem:[#allocation16 + $0x1d0] ss:$8 sps:$4 sm:$0xff]  }
 0x42b   : > { %3836 = vmatprep.subr.bf16.mxu1 %v5619_v21  ;;  %v5703_v21 = vld [vmem:[#allocation16 + $0x1c4] ss:$8 sps:$4 sm:$0xff]  }
 0x42d   : > { %3796 = vmatpush2.bf16.msra.mxu0 %v5614_v10  ;;  %v5659_v10 = vld [vmem:[#allocation16 + $0xa0] ss:$8 sps:$4 sm:$0xff]  }
 0x42e   : > { %3837 = vmatpush2.bf16.msra.mxu1 %v5617_v42  ;;  %4186 = vmatprep.subr.bf16.mxu0 %v5622_v61  ;;  %v5664_v42 = vld [vmem:[#allocation16 + $0x94] ss:$8 sps:$4 sm:$0xff]   ;;  %v5701_v61 = vld [vmem:[#allocation16 + $0x1c0] ss:$8 sps:$4 sm:$0xff]  }
 0x42f   : > { %4227 = vmatprep.subr.bf16.mxu1 %v5670_v11 }
 0x430   : > { %3798 = vmatmul.mubr.bf16.vlgmr.msra.gmra.mxu0 %v6571_v6  ;;  %v6584_v26 = vpop.f32.mrf.mxu0  ;;  %v6586_v12 = vpop.f32.mrf.mxu1 }
 0x431   : > { %3839 = vmatmul.mubr.bf16.vlgmr.msra.gmra.mxu1 %v6573_v7  ;;  %4187 = vmatpush1.bf16.msra.mxu0 %v5620_v43  ;;  %v5629_v7 = vld [vmem:[#allocation16 + $0x40] ss:$8 sps:$4 sm:$0xff]   ;;  %v5706_v43 = vld [vmem:[#allocation16 + $0x1b4] ss:$8 sps:$4 sm:$0xff]  }
 0x432   : > { %v6589_v47 = vpop.f32.mrf.mxu0  ;;  %v6591_v62 = vpop.f32.mrf.mxu1  ;;  %4188 = vmatprep.subr.bf16.mxu0 %v5625_v3  ;;  %4228 = vmatpush1.bf16.msra.mxu1 %v5668_v17  ;;  %v6593_v3 = vld [vmem:[#allocation14] sm:$0xf] }
 0x433   : > { %4229 = vmatprep.subr.bf16.mxu1 %v5673_v18 }
 0x434   : > { %v3557_v48 = vpop.f32.mrf.mxu0  ;;  %v3598_v49 = vpop.f32.mrf.mxu1 }
 0x435   : > { %4189 = vmatpush1.bf16.msra.mxu0 %v5623_v60  ;;  %v5662_v60 = vld [vmem:[#allocation16 + $0x90] ss:$8 sps:$4 sm:$0xff]   ;;  %v3502_v49 = vrot.slane %v6593_v3, %v6394_v23 }
 0x436   : > { %v3558_v28 = vpop.f32.mrf.mxu0  ;;  %v3599_v6 = vpop.f32.mrf.mxu1  ;;  %4190 = vmatprep.subr.bf16.mxu0 %v5628_v13  ;;  %4230 = vmatpush1.bf16.msra.mxu1 %v5671_v55  ;;  %v5667_v13 = vld [vmem:[#allocation16 + $0x84] ss:$8 sps:$4 sm:$0xff]   ;;  %v5704_v48 = vld [vmem:[#allocation16 + $0x1b0] ss:$8 sps:$4 sm:$0xff]  }
 0x437   : > { %4231 = vmatprep.subr.bf16.mxu1 %v5676_v27  ;;  %v5665_v28 = vld [vmem:[#allocation16 + $0x80] ss:$8 sps:$4 sm:$0xff]   ;;  %v3554_v6 = vadd.f32 %v6584_v26, %v3502_v49 }
 0x438   : > { %v5707_v27 = vld [vmem:[#allocation16 + $0x1a0] ss:$8 sps:$4 sm:$0xff]  }
 0x439   : > { %4191 = vmatpush1.bf16.msra.mxu0 %v5626_v14  ;;  %v3506_v14 = vrot.slane %v6593_v3, %v6402_v29  ;;  %v3595_v17 = vadd.f32 %v6586_v12, %v3554_v6 }
 0x43a   : > { %4192 = vmatprep.subr.bf16.mxu0 %v5631_v15  ;;  %4232 = vmatpush1.bf16.msra.mxu1 %v5674_v36 }
 0x43b   : > { %4233 = vmatprep.subr.bf16.mxu1 %v5679_v39  ;;  %v3556_v15 = vadd.f32 %v6589_v47, %v3506_v14 }
 0x43d   : > { %4193 = vmatpush1.bf16.msra.mxu0 %v5629_v7  ;;  %v5709_v7 = vld [vmem:[#allocation16 + $0x1a4] ss:$8 sps:$4 sm:$0xff]  }
 0x43e   : > { %4194 = vmatprep.subr.bf16.mxu0 %v5634_v25  ;;  %4234 = vmatpush1.bf16.msra.mxu1 %v5677_v37  ;;  %v3597_v25 = vadd.f32 %v6591_v62, %v3556_v15  ;;  %v5710_v37 = vld [vmem:[#allocation16 + $0x190] ss:$8 sps:$4 sm:$0xff]   ;;  %v5715_v62 = vld [vmem:[#allocation16 + $0x184] ss:$8 sps:$4 sm:$0xff]  }
 0x43f   : > { %4235 = vmatprep.subr.bf16.mxu1 %v5682_v38 }
 0x441   : > { %4195 = vmatpush1.bf16.msra.mxu0 %v5632_v33 }
 0x442   : > { %4196 = vmatprep.subr.bf16.mxu0 %v5637_v34  ;;  %4236 = vmatpush1.bf16.msra.mxu1 %v5680_v44 }
 0x443   : > { %4237 = vmatprep.subr.bf16.mxu1 %v5685_v31  ;;  %v5713_v31 = vld [vmem:[#allocation16 + $0x180] ss:$8 sps:$4 sm:$0xff]  }
 0x445   : > { %4197 = vmatpush1.bf16.msra.mxu0 %v5635_v40 }
 0x446   : > { %4198 = vmatprep.subr.bf16.mxu0 %v5640_v41  ;;  %4238 = vmatpush1.bf16.msra.mxu1 %v5683_v50  ;;  %v5712_v41 = vld [vmem:[#allocation16 + $0x194] ss:$8 sps:$4 sm:$0xff]  }
 0x447   : > { %4239 = vmatprep.subr.bf16.mxu1 %v5688_v51 }
 0x449   : > { %4199 = vmatpush1.bf16.msra.mxu0 %v5638_v32 }
 0x44a   : > { %4200 = vmatprep.subr.bf16.mxu0 %v5643_v22  ;;  %4240 = vmatpush1.bf16.msra.mxu1 %v5686_v57 }
 0x44b   : > { %4241 = vmatprep.subr.bf16.mxu1 %v5691_v58 }
 0x44d   : > { %4201 = vmatpush1.bf16.msra.mxu0 %v5641_v45 }
 0x44e   : > { %4202 = vmatprep.subr.bf16.mxu0 %v5646_v46  ;;  %4242 = vmatpush1.bf16.msra.mxu1 %v5689_v0  ;;  %v5717_v0 = vld [vmem:[%s6681_s11 + $0x38] sm:$0xff]  }
 0x44f   : > { %4243 = vmatprep.subr.bf16.mxu1 %v5694_v1  ;;  %v5718_v1 = vld [vmem:[%s6681_s11 + $0x70] sm:$0xff]  }
 0x451   : > { %4203 = vmatpush2.bf16.msra.mxu0 %v5644_v52 }
 0x452   : > { %4204 = vmatprep.subr.bf16.mxu0 %v5649_v56  ;;  %4244 = vmatpush2.bf16.msra.mxu1 %v5692_v8  ;;  %v5721_v8 = vld [vmem:[%s6681_s11 + $0x28] sm:$0xff]  }
 0x453   : > { %4245 = vmatprep.subr.bf16.mxu1 %v5697_v4  ;;  %v5722_v4 = vld [vmem:[%s6681_s11 + $0x60] sm:$0xff]  }
 0x455   : > { %4205 = vmatpush2.bf16.msra.mxu0 %v5647_v59 }
 0x456   : > { %4206 = vmatprep.subr.bf16.mxu0 %v5652_v63  ;;  %4246 = vmatpush2.bf16.msra.mxu1 %v5695_v54  ;;  %v5716_v63 = vld [vmem:[%s6681_s11 + $0x78] sm:$0xff]  }
 0x457   : > { %4247 = vmatprep.subr.bf16.mxu1 %v5700_v35  ;;  %v5725_v54 = vld [vmem:[%s6681_s11 + $0x18] sm:$0xff]   ;;  %v5726_v35 = vld [vmem:[%s6681_s11 + $0x50] sm:$0xff]  }
 0x459   : > { %4207 = vmatpush2.bf16.msra.mxu0 %v5650_v2  ;;  %v5719_v2 = vld [vmem:[%s6681_s11 + $0x30] sm:$0xff]  }
 0x45a   : > { %4208 = vmatprep.subr.bf16.mxu0 %v5655_v16  ;;  %4248 = vmatpush2.bf16.msra.mxu1 %v5698_v5  ;;  %v5720_v16 = vld [vmem:[%s6681_s11 + $0x68] sm:$0xff]   ;;  %v3514_v5 = vrot.slane %v6593_v3, %v6405_v30 }
 0x45b   : > { %4249 = vmatprep.subr.bf16.mxu1 %v5703_v21 }
 0x45d   : > { %4209 = vmatpush2.bf16.msra.mxu0 %v5653_v20  ;;  %v5723_v20 = vld [vmem:[%s6681_s11 + $0x20] sm:$0xff]  }
 0x45e   : > { %4210 = vmatprep.subr.bf16.mxu0 %v5658_v53  ;;  %4250 = vmatpush2.bf16.msra.mxu1 %v5701_v61  ;;  %v5724_v53 = vld [vmem:[%s6681_s11 + $0x58] sm:$0xff]  }
 0x45f   : > { %4251 = vmatprep.subr.bf16.mxu1 %v5706_v43 }
 0x461   : > { %4211 = vmatpush2.bf16.msra.mxu0 %v5656_v9  ;;  %v5727_v9 = vld [vmem:[%s6681_s11 + $0x10] sm:$0xff]  }
 0x462   : > { %4212 = vmatprep.subr.bf16.mxu0 %v5661_v19  ;;  %4252 = vmatpush2.bf16.msra.mxu1 %v5704_v48  ;;  %v3510_v19 = vrot.slane %v6593_v3, %v6397_v24 }
 0x463   : > { %4253 = vmatprep.subr.bf16.mxu1 %v5709_v7 }
 0x465   : > { %4213 = vmatpush2.bf16.msra.mxu0 %v5659_v10 }
 0x466   : > { %4214 = vmatprep.subr.bf16.mxu0 %v5664_v42  ;;  %4254 = vmatpush2.bf16.msra.mxu1 %v5707_v27  ;;  %v5728_v27 = vld [vmem:[%s6681_s11 + $0x48] sm:$0xff]  }
 0x467   : > { %4255 = vmatprep.subr.bf16.mxu1 %v5712_v41 }
 0x469   : > { %4215 = vmatpush2.bf16.msra.mxu0 %v5662_v60 }
 0x46a   : > { %4216 = vmatprep.subr.bf16.mxu0 %v5667_v13  ;;  %4256 = vmatpush2.bf16.msra.mxu1 %v5710_v37 }
 0x46b   : > { %4257 = vmatprep.subr.bf16.mxu1 %v5715_v62 }
 0x46d   : > { %4217 = vmatpush2.bf16.msra.mxu0 %v5665_v28 }
 0x46e   : > { %4258 = vmatpush2.bf16.msra.mxu1 %v5713_v31  ;;  %5038 = vmatprep.subr.bf16.mxu0 %v5716_v63 }
 0x470   : > { %v3635_v11 = vpop.f32.mrf.mxu0  ;;  %v3676_v18 = vpop.f32.mrf.mxu1 }
 0x471   : > { %v3636_v55 = vadd.f32 %v3635_v11, %v3595_v17 }
 0x472   : > { %v3637_v33 = vpop.f32.mrf.mxu0  ;;  %v3678_v34 = vpop.f32.mrf.mxu1 }
 0x473   : > { %v3677_v36 = vadd.f32 %v3676_v18, %v3636_v55  ;;  %v3638_v39 = vadd.f32 %v3637_v33, %v3597_v25  ;;  %v5729_v33 = vld [vmem:[%s6681_s11 + $0x8] sm:$0xff]  }
 0x474   : > { %v3639_v40 = vpop.f32.mrf.mxu0  ;;  %v3680_v26 = vpop.f32.mrf.mxu1 }
 0x475   : > { %v3679_v47 = vadd.f32 %v3678_v34, %v3638_v39  ;;  %v3847_v38 = vmax.f32 %v3677_v36, 0.0  ;;  %v5730_v39 = vld [vmem:[%s6681_s11 + $0x40] sm:$0xff]   ;;  %v2135_v26 = vld [vmem:[#allocation17] sm:$0x3] }
 0x476   : > { %v3640_v12 = vpop.f32.mrf.mxu0  ;;  %v3681_v32 = vpop.f32.mrf.mxu1  ;;  %v5731_v40 = vld [vmem:[%s6681_s11] sm:$0xff]   ;;  %v4179_v41 = vrot.slane %v2135_v26, %v6394_v23 }
 0x477   : > { %v3848_v22 = vmax.f32 %v3679_v47, 0.0  ;;  %v3851_v45 = vpack.c.bf16 %v3847_v38, %v3847_v38  ;;  %v4183_v47 = vrot.slane %v2135_v26, %v6402_v29 }
 0x479   : > { %v3852_v44 = vpack.c.bf16 %v3848_v22, %v3848_v22 }
 0x47b   : > { %4218 = vmatprep.mubr.bf16.mxu0 %v3852_v44 }
 0x47c   : > { %4219 = vmatmul.mubr.bf16.vlgmr.msra.gmra.mxu0 %v3851_v45 }
 0x47d   : > { %5039 = vmatpush3.bf16.msra.mxu0 %v5717_v0 }
 0x47e   : > { %5040 = vmatprep.subr.bf16.mxu0 %v5718_v1 }
 0x481   : > { %5041 = vmatpush3.bf16.msra.mxu0 %v5719_v2 }
 0x482   : > { %5042 = vmatprep.subr.bf16.mxu0 %v5720_v16 }
 0x485   : > { %5043 = vmatpush3.bf16.msra.mxu0 %v5721_v8 }
 0x486   : > { %5044 = vmatprep.subr.bf16.mxu0 %v5722_v4 }
 0x489   : > { %5045 = vmatpush3.bf16.msra.mxu0 %v5723_v20 }
 0x48a   : > { %5046 = vmatprep.subr.bf16.mxu0 %v5724_v53 }
 0x48d   : > { %5047 = vmatpush3.bf16.msra.mxu0 %v5725_v54 }
 0x48e   : > { %5048 = vmatprep.subr.bf16.mxu0 %v5726_v35 }
 0x491   : > { %5049 = vmatpush3.bf16.msra.mxu0 %v5727_v9 }
 0x492   : > { %5050 = vmatprep.subr.bf16.mxu0 %v5728_v27 }
 0x495   : > { %5051 = vmatpush3.bf16.msra.mxu0 %v5729_v33 }
 0x496   : > { %5052 = vmatprep.subr.bf16.mxu0 %v5730_v39 }
 0x499   : > { %5053 = vmatpush3.bf16.msra.mxu0 %v5731_v40 }
 0x4b0   : > { %v3717_v46 = vpop.f32.mrf.mxu0 }
 0x4b1   : > { %v3758_v50 = vpop.f32.mrf.mxu1  ;;  %v3718_v21 = vadd.f32 %v3717_v46, %v3510_v19 }
 0x4b2   : > { %v3719_v51 = vpop.f32.mrf.mxu0 }
 0x4b3   : > { %v3760_v52 = vpop.f32.mrf.mxu1  ;;  %v3720_v10 = vadd.f32 %v3719_v51, %v3514_v5  ;;  %v3759_v42 = vadd.f32 %v3758_v50, %v3718_v21 }
 0x4b4   : > { %v3721_v56 = vpop.f32.mrf.mxu0 }
 0x4b5   : > { %v3762_v57 = vpop.f32.mrf.mxu1  ;;  %v3761_v43 = vadd.f32 %v3760_v52, %v3720_v10  ;;  %v2168_v56 = vld [vmem:[#allocation19] sm:$0x1] }
 0x4b6   : > { %v3722_v58 = vpop.f32.mrf.mxu0 }
 0x4b7   : > { %v3763_v59 = vpop.f32.mrf.mxu1 }
 0x4f0   : > { %v3799_v61 = vpop.f32.mrf.mxu0 }
 0x4f1   : > { %v3800_v60 = vadd.f32 %v3799_v61, %v3759_v42  ;;  %v3840_v13 = vpop.f32.mrf.mxu1 }
 0x4f2   : > { %v3801_v48 = vpop.f32.mrf.mxu0 }
 0x4f3   : > { %v3841_v49 = vadd.f32 %v3840_v13, %v3800_v60  ;;  %v3802_v14 = vadd.f32 %v3801_v48, %v3761_v43  ;;  %v3842_v28 = vpop.f32.mrf.mxu1 }
 0x4f4   : > { %v3803_v6 = vpop.f32.mrf.mxu0 }
 0x4f5   : > { %v3843_v15 = vadd.f32 %v3842_v28, %v3802_v14  ;;  %v3844_v17 = vpop.f32.mrf.mxu1  ;;  %v3849_v11 = vmax.f32 %v3841_v49, 0.0 }
 0x4f6   : > { %v3804_v18 = vpop.f32.mrf.mxu0 }
 0x4f7   : > { %v3850_v24 = vmax.f32 %v3843_v15, 0.0  ;;  %v3845_v7 = vpop.f32.mrf.mxu1  ;;  %v3853_v30 = vpack.c.bf16 %v3849_v11, %v3849_v11 }
 0x4f9   : > { %v3854_v25 = vpack.c.bf16 %v3850_v24, %v3850_v24 }
 0x4fb   : > { %4259 = vmatprep.mubr.bf16.mxu1 %v3854_v25 }
 0x4fc   : > { %4260 = vmatmul.mubr.bf16.vlgmr.msra.gmra.mxu1 %v3853_v30 }
 0x53c   : > { %v4220_v3 = vpop.f32.mrf.mxu0 }
 0x53d   : > { %v4221_v37 = vadd.f32 %v4220_v3, %v4179_v41 }
 0x53e   : > { %v4222_v55 = vpop.f32.mrf.mxu0 }
 0x53f   : > { %v4223_v12 = vadd.f32 %v4222_v55, %v4183_v47 }
 0x540   : > { %v4224_v34 = vpop.f32.mrf.mxu0 }
 0x542   : > { %v4225_v36 = vpop.f32.mrf.mxu0 }
 0x5bc   : > { %v4261_v38 = vpop.f32.mrf.mxu1 }
 0x5bd   : > { %v4262_v32 = vadd.f32 %v4261_v38, %v4221_v37 }
 0x5be   : > { %v4263_v22 = vpop.f32.mrf.mxu1 }
 0x5bf   : > { %v4264_v62 = vadd.f32 %v4263_v22, %v4223_v12  ;;  %v4268_v44 = vmax.f32 %v4262_v32, 0.0 }
 0x5c0   : > { %v4265_v31 = vpop.f32.mrf.mxu1 }
 0x5c1   : > { %v4269_v45 = vmax.f32 %v4264_v62, 0.0  ;;  %v4270_v51 = vpack.c.bf16 %v4268_v44, %v4268_v44 }
 0x5c2   : > { %v4266_v46 = vpop.f32.mrf.mxu1 }
 0x5c3   : > { %v4271_v50 = vpack.c.bf16 %v4269_v45, %v4269_v45 }
 0x5c5   : > { %4400 = vmatprep.mubr.bf16.mxu0 %v4271_v50 }
 0x5c6   : > { %4401 = vmatmul.mubr.bf16.vlgmr.msra.gmra.mxu0 %v4270_v51 }
 0x686   : > { %v5054_v52 = vpop.f32.mrf.mxu0 }
 0x688   : > { %v5055_v23 = vpop.f32.mrf.mxu0 }
 0x689   : > { %v5056_v57 = vadd.f32 %v5055_v23, %v5054_v52 }
 0x68a   : > { %v5057_v29 = vpop.f32.mrf.mxu0 }
 0x68b   : > { %v4403_v58 = vadd.f32 %v5056_v57, %v2168_v56 }
 0x68c   : > { %v5058_v59 = vpop.f32.mrf.mxu0 }
 0x68d   : > { %4409 = vst.msk [vmem:[%s610_s18] sm:$0x1] %vm4408_vm4, %v4403_v58 }
 0x68e PF: > { %s29_s27 = sadd.s32 1, %s6064_s27   ;;  %s6692_s25 = smov %s6060_s26 }
 0x68f   : > { %p26_p2 = scmp.ge.s32.totalorder %s29_s27, 4   ;;  %s6693_s26 = smov %s6695_s22 }
 0x691   :  { %28 = sbr.rel (!%p26_p2) target bundleno = 10 (0xa), region = 155 }
 0x696   :  { %4427 = vsyncpa [#allocation4], 1 }
 0x697   :  { %4429 = vsyncpa [#allocation4 + $0x1], 1 }
 0x698   :  { %4430 = vsyncpa [#allocation6], 1 }
 0x699   :  { %4431 = vsyncpa [#allocation9], 1 }
 0x69a   :  { %4432 = vsyncpa [#allocation12], 1 }
 0x69b   :  { %4433 = vsyncpa [#allocation15], 1 }
 0x69c   :  { %4434 = vsyncpa [#allocation18], 1 }

// kernel: pointnet_forward.5
= control target key start
LH: loop header
LB: loop body
LE: loop exit
PB: predicated region body
PF: predicated region fallthrough
CT: control target
= control target key end

     0   :  { %18 = vsyncpa [#allocation4], 0  ;;  %s7158_s0 = inlined_call_operand.vmem [shape: f32[2,64,3], index: 0, kind: input, shape index: {}]   ;;  %s7159_s1 = inlined_call_operand.vmem [shape: bf16[2,3,64], index: 1, kind: input, shape index: {}]   ;;  %s7160_s2 = inlined_call_operand.vmem [shape: f32[1,64], index: 2, kind: input, shape index: {}]   ;;  %s7161_s3 = inlined_call_operand.vmem [shape: bf16[2,64,128], index: 3, kind: input, shape index: {}]   ;;  %s7162_s4 = inlined_call_operand.vmem [shape: f32[1,128], index: 4, kind: input, shape index: {}]   ;;  %s7163_s5 = inlined_call_operand.vmem [shape: bf16[128,1024], index: 5, kind: input, shape index: {}]   ;;  %s7164_s6 = inlined_call_operand.vmem [shape: f32[1,1024], index: 6, kind: input, shape index: {}]   ;;  %s7165_s7 = inlined_call_operand.vmem [shape: bf16[1024,512], index: 7, kind: input, shape index: {}]   ;;  %s7166_s8 = inlined_call_operand.vmem [shape: f32[1,512], index: 8, kind: input, shape index: {}]   ;;  %s7167_s9 = inlined_call_operand.vmem [shape: bf16[512,256], index: 9, kind: input, shape index: {}]   ;;  %s7168_s10 = inlined_call_operand.vmem [shape: f32[1,256], index: 10, kind: input, shape index: {}]   ;;  %s7169_s11 = inlined_call_operand.vmem [shape: bf16[256,40], index: 11, kind: input, shape index: {}]   ;;  %s7170_s12 = inlined_call_operand.vmem [shape: f32[1,40], index: 12, kind: input, shape index: {}]   ;;  %s7171_s13 = inlined_call_operand.hbm [shape: f32[2,1,40], index: 13, kind: output, shape index: {}]  }
   0x1   :  { %20 = vsyncpa [#allocation4 + $0x1], 0  ;;  %s5560_s25 = smov 0   ;;  %s5562_s26 = smov 0  }
   0x2   :  { %s5564_s27 = smov 0   ;;  %s5566_s28 = smov 0  }
   0x3   :  { %s5568_s29 = smov 0   ;;  %s5570_s30 = smov 0  }
   0x4 LB: > { %7177 = sst [smem:[#allocation6_spill]] %s5464_s25  ;;  %s4356_s14 = sadd.s32 4294967295, %s5484_s30   ;;  %s5484_s30 = sphi %s5570_s30, %s26_s30   ;;  %s5480_s29 = sphi %s5568_s29, %s7190_s29   ;;  %s5476_s28 = sphi %s5566_s28, %s7193_s28   ;;  %s5472_s27 = sphi %s5564_s27, %s7188_s27   ;;  %s5468_s26 = sphi %s5562_s26, %s7192_s26   ;;  %s5464_s25 = sphi %s5560_s25, %s7191_s25  }
   0x5   : > { %7178 = sst [smem:[#allocation7_spill]] %s5472_s27  ;;  %s4357_s15 = sadd.s32 4294967294, %s5484_s30  }
   0x6   : > { %7179 = sst [smem:[#allocation8_spill]] %s5480_s29  ;;  %s38_s16 = sadd.s32 1, %s5480_s29 }
   0x7   : > { %s335_s17 = sadd.s32 1, %s5472_s27  ;;  %p40_p0 = scmp.ge.s32.totalorder %s38_s16, 2 }
   0x8   : > { %p345_p1 = scmp.ne.s32.totalorder %s5472_s27, %s5468_s26  ;;  %p346_p2 = scmp.eq.s32.totalorder %s4356_s14, 1 }
   0x9   : > { %p351_p3 = scmp.ne.s32.totalorder %s5468_s26, %s5464_s25  ;;  %s7195_s16 = smov (%p40_p0, %s38_s16), 0 }
   0xa   : > { %7180 = sst [smem:[#allocation9_spill]] %s7195_s16  ;;  %p5600_p4 = por %p346_p2, %p345_p1 }
   0xb   : > { %p352_p5 = scmp.eq.s32.totalorder %s4357_s15, 1  ;;  %s332_s19 = ssub.s32 %s5480_s29, %s7195_s16 }
   0xc   : > { %p4360_p6 = scmp.ge.s32.totalorder %s5484_s30, 1  ;;  %p333_p7 = scmp.eq.s32.totalorder %s332_s19, 0 }
   0xd   : > { %p5607_p8 = por %p352_p5, %p351_p3  ;;  %p428_p9 = scmp.lt.s32.totalorder %s5484_s30, 3 }
   0xe   : > { %s5613_s21 = scalar_select %p333_p7, %s5472_s27, %s335_s17  }
   0xf   : > { %s7182_s20 = scalar_select %p5607_p8, 1, 0 }
  0x10   : > { %7184 = sst [smem:[#allocation11_spill]] %s5613_s21  ;;  %p429_p10 = pnand %p4360_p6, %p428_p9 }
  0x11   : > { %7183 = sst [smem:[#allocation10_spill]] %s7182_s20  ;;  %p485_p11 = scmp.lt.s32.totalorder (!%p429_p10), %s5476_s28, 1 }
  0x12   : > { %432 = sbr.rel (%p429_p10) target bundleno = 1855 (0x73f), region = 72  ;;  %s5489_s16 = smov (!%p429_p10), [#allocation3]  }
  0x13   : > { %s5412_s20 = sshll.u32 (!%p429_p10), %s5489_s16, 4  ;;  %s5413_s20 = int_to_ptr.vmem [resolvable:$false] %s5412_s20 }
  0x17   : > { %vm537_vm0 = vcmask 1040384   ;;  %vm538_vm1 = vcmask 1041408   ;;  %v5486_v0 = vmov 65535   ;;  %s486_s22 = scalar_select %p485_p11, %s5476_s28, 1  ;;  %vm524_vm2 = vcmask 23552   ;;  %v806_v21 = vld [vmem:[%s7163_s5 + $0x1c0] sm:$0xff] }
  0x18   : > { %v539_v1 = vsel %vm537_vm0, 4294967295, %v5486_v0  ;;  %v810_v22 = vld [vmem:[%s7163_s5 + $0x1e0] sm:$0xff]  ;;  %v5639_v23 = vld [vmem:[%s7163_s5 + $0x1c8] sm:$0xff]  ;;  %vm660_vm3 = vcmask 523264   ;;  %vm4236_vm4 = vcmask 319488  }
  0x19   : > { %s4783_s23 = sshll.u32 %s486_s22, 6  ;;  %s4363_s24 = sshll.u32 %s486_s22, 1  ;;  %v540_v2 = vsel %vm538_vm1, %v539_v1, 0  ;;  %v4437_v24 = vcombine.high %v806_v21, %v810_v22  ;;  %v5644_v25 = vld [vmem:[%s7163_s5 + $0x1e8] sm:$0xff]  ;;  %v4436_v26 = vcombine.low %v806_v21, %v810_v22  ;;  %v798_v27 = vld [vmem:[%s7163_s5 + $0x180] sm:$0xff] }
  0x1a   : > { %s492_s19 = scalar_lea.vmem %s7158_s0, %s4783_s23  ;;  %s497_s29 = scalar_lea.vmem %s7159_s1, %s4363_s24  ;;  %v802_v28 = vld [vmem:[%s7163_s5 + $0x1a0] sm:$0xff]  ;;  %v4438_v29 = vcombine.low %v5639_v23, %v5644_v25  ;;  %v4439_v30 = vcombine.high %v5639_v23, %v5644_v25  ;;  %v799_v58 = vld [vmem:[%s7163_s5 + $0x188] sm:$0xff] }
  0x1b   : > { %s4784_s21 = sshll.u32 %s486_s22, 5  ;;  %v516_v3 = vld [vmem:[%s497_s29] sm:$0x3]  ;;  %v505_v5 = vld [vmem:[%s492_s19 + $0x8] sm:$0xff]  ;;  %v506_v8 = vld [vmem:[%s492_s19 + $0x10] sm:$0xff]  ;;  %v4429_v31 = vcombine.high %v798_v27, %v802_v28  ;;  %1176 = vmatprep.subr.bf16.mxu0 %v4437_v24  ;;  %v4428_v34 = vcombine.low %v798_v27, %v802_v28  ;;  %s482_s23 = sand.u32 1, %s5468_s26  }
  0x1c   : > { %v504_v4 = vld [vmem:[%s492_s19] sm:$0xff]  ;;  %s502_s25 = scalar_lea.vmem %s7161_s3, %s4784_s21  ;;  %v542_v6 = vand.u32 %v540_v2, %v516_v3  ;;  %v507_v9 = vld [vmem:[%s492_s19 + $0x18] sm:$0xff]  ;;  %v509_v11 = vld [vmem:[%s492_s19 + $0x28] sm:$0xff]  ;;  %1177 = vmatpush1.bf16.msra.mxu0 %v4436_v26  ;;  %s4780_s24 = sshll.u32 %s5476_s28, 4 }
  0x1d   : > { %v512_v7 = vpack.c.bf16 %v505_v5, %v504_v4  ;;  %v508_v10 = vld [vmem:[%s492_s19 + $0x20] sm:$0xff]  ;;  %v513_v12 = vpack.c.bf16 %v507_v9, %v506_v8  ;;  %v4904_v13 = vld [vmem:[%s502_s25 + $0x18] sm:$0xff]   ;;  %v510_v15 = vld [vmem:[%s492_s19 + $0x30] sm:$0xff]  ;;  %1178 = vmatprep.subr.bf16.mxu0 %v4429_v31  ;;  %s4261_s17 = scalar_lea.hbm %s7171_s13, %s4780_s24  ;;  %s4251_s27 = scalar_lea.sflag [#allocation4], %s482_s23 }
  0x1e   : > { %4820 = vmatprep.subr.bf16.mxu1 %v542_v6  ;;  %v514_v14 = vpack.c.bf16 %v509_v11, %v508_v10  ;;  %v511_v16 = vld [vmem:[%s492_s19 + $0x38] sm:$0xff]  ;;  %v4905_v18 = vld [vmem:[%s502_s25 + $0x10] sm:$0xff]   ;;  %v4906_v19 = vld [vmem:[%s502_s25 + $0x8] sm:$0xff]   ;;  %s5414_s28 = scalar_lea.vmem %s5413_s20, 32 }
  0x1f   : > { %4822 = vmatprep.mubr.msk.bf16.mxu1 %vm524_vm2, %v512_v7  ;;  %4821 = vmatpush3.bf16.msra.mxu1 %v542_v6  ;;  %v515_v17 = vpack.c.bf16 %v511_v16, %v510_v15  ;;  %v4907_v20 = vld [vmem:[%s502_s25] sm:$0xff]   ;;  %v803_v59 = vld [vmem:[%s7163_s5 + $0x1a8] sm:$0xff]  ;;  %s483_s25 = scalar_lea.vmem [#allocation3], %s482_s23 }
  0x20   : > { %4830 = vmatprep.subr.bf16.mxu1 %v4904_v13  ;;  %v790_v32 = vld [vmem:[%s7163_s5 + $0x140] sm:$0xff]  ;;  %1179 = vmatpush1.bf16.msra.mxu0 %v4428_v34  ;;  %v4431_v3 = vcombine.high %v799_v58, %v803_v59  ;;  %v791_v5 = vld [vmem:[%s7163_s5 + $0x148] sm:$0xff]  ;;  %s4263_s14 = sshll.u32 %s483_s25, 4  ;;  %s4264_s14 = int_to_ptr.vmem [resolvable:$true] %s4263_s14 }
  0x21   : > { %v794_v33 = vld [vmem:[%s7163_s5 + $0x160] sm:$0xff]  ;;  %v795_v6 = vld [vmem:[%s7163_s5 + $0x168] sm:$0xff]  ;;  %s5408_s29 = scalar_lea.vmem %s4264_s14, 16  ;;  %p5415_p1 = scmp.lt.s32.totalorder %s4264_s14, %s5413_s20 }
  0x22   : > { %4823 = vmatmul.mubr.msk.bf16.vlgmr.msra.gmra.mxu1 %vm524_vm2, %v513_v12  ;;  %v4421_v35 = vcombine.high %v790_v32, %v794_v33  ;;  %v782_v36 = vld [vmem:[%s7163_s5 + $0x100] sm:$0xff]  ;;  %v4420_v38 = vcombine.low %v790_v32, %v794_v33  ;;  %v4430_v12 = vcombine.low %v799_v58, %v803_v59  ;;  %v783_v15 = vld [vmem:[%s7163_s5 + $0x108] sm:$0xff]  ;;  %p5409_p12 = scmp.ne.s32.totalorder %s4264_s14, %s5408_s29  ;;  %p5416_p2 = scmp.lt.s32.totalorder %s5414_s28, %s5408_s29 }
  0x23   : > { %4826 = vmatprep.mubr.msk.bf16.mxu1 %vm524_vm2, %v514_v14  ;;  %4831 = vmatpush3.bf16.msra.mxu1 %v4904_v13  ;;  %v786_v37 = vld [vmem:[%s7163_s5 + $0x120] sm:$0xff]  ;;  %v4423_v13 = vcombine.high %v791_v5, %v795_v6  ;;  %v787_v16 = vld [vmem:[%s7163_s5 + $0x128] sm:$0xff] }
  0x24   : > { %4832 = vmatprep.subr.bf16.mxu1 %v4905_v18  ;;  %v774_v39 = vld [vmem:[%s7163_s5 + $0xc0] sm:$0xff]  ;;  %1180 = vmatprep.subr.bf16.mxu0 %v4421_v35  ;;  %v4413_v41 = vcombine.high %v782_v36, %v786_v37  ;;  %v4412_v42 = vcombine.low %v782_v36, %v786_v37  ;;  %v775_v21 = vld [vmem:[%s7163_s5 + $0xc8] sm:$0xff]  ;;  %v4414_v23 = vcombine.low %v783_v15, %v787_v16  ;;  %p5410_p13 = pnand %p5409_p12, %p5600_p4  ;;  %p5417_p3 = por %p5416_p2, %p5415_p1 }
  0x25   : > { %v778_v40 = vld [vmem:[%s7163_s5 + $0xe0] sm:$0xff]  ;;  %1181 = vmatpush1.bf16.msra.mxu0 %v4420_v38  ;;  %v779_v22 = vld [vmem:[%s7163_s5 + $0xe8] sm:$0xff] }
  0x26   : > { %1182 = vmatprep.subr.bf16.mxu0 %v4413_v41  ;;  %v4405_v43 = vcombine.high %v774_v39, %v778_v40  ;;  %v4404_v44 = vcombine.low %v774_v39, %v778_v40  ;;  %v4366_v47 = vld [vmem:[%s7160_s2] ss:$0 sm:$0xff]  ;;  %v4407_v24 = vcombine.high %v775_v21, %v779_v22  ;;  %v4406_v25 = vcombine.low %v775_v21, %v779_v22  ;;  %v767_v28 = vld [vmem:[%s7163_s5 + $0x88] sm:$0xff]  ;;  %p5411_p0 = pneg %p5410_p13 }
  0x27   : > { %4833 = vmatpush3.bf16.msra.mxu1 %v4905_v18  ;;  %v766_v26 = vld [vmem:[%s7163_s5 + $0x80] sm:$0xff]  ;;  %v759_v36 = vld [vmem:[%s7163_s5 + $0x48] sm:$0xff] }
  0x28   : > { %4834 = vmatprep.subr.bf16.mxu1 %v4906_v19  ;;  %v770_v27 = vld [vmem:[%s7163_s5 + $0xa0] sm:$0xff]  ;;  %v763_v38 = vld [vmem:[%s7163_s5 + $0x68] sm:$0xff]  ;;  %p5418_p5 = pnand %p5417_p3, %p5411_p0 }
  0x29   : > { %1183 = vmatpush1.bf16.msra.mxu0 %v4412_v42  ;;  %v4396_v33 = vcombine.low %v766_v26, %v770_v27  ;;  %v758_v34 = vld [vmem:[%s7163_s5 + $0x40] sm:$0xff]  ;;  %v4390_v39 = vcombine.low %v759_v36, %v763_v38  ;;  %v4391_v40 = vcombine.high %v759_v36, %v763_v38  ;;  %v780_v38 = vld [vmem:[%s7163_s5 + $0xf0] sm:$0xff] }
  0x2a   : > { %4827 = vmatmul.mubr.msk.bf16.gmra.mxu1 %vm524_vm2, %v515_v17  ;;  %1184 = vmatprep.subr.bf16.mxu0 %v4405_v43  ;;  %v762_v35 = vld [vmem:[%s7163_s5 + $0x60] sm:$0xff] }
  0x2b   : > { %4835 = vmatpush3.bf16.msra.mxu1 %v4906_v19  ;;  %v4422_v19 = vcombine.low %v791_v5, %v795_v6  ;;  %v4389_v37 = vcombine.high %v758_v34, %v762_v35  ;;  %v4388_v41 = vcombine.low %v758_v34, %v762_v35  ;;  %v750_v42 = vld [vmem:[%s7163_s5] sm:$0xff]  ;;  %v801_v5 = vld [vmem:[%s7163_s5 + $0x198] sm:$0xff] }
  0x2c   : > { %4836 = vmatprep.subr.bf16.mxu1 %v4907_v20  ;;  %v754_v43 = vld [vmem:[%s7163_s5 + $0x20] sm:$0xff]  ;;  %v805_v6 = vld [vmem:[%s7163_s5 + $0x1b8] sm:$0xff] }
  0x2d   : > { %1185 = vmatpush1.bf16.msra.mxu0 %v4404_v44  ;;  %v751_v44 = vld [vmem:[%s7163_s5 + $0x8] sm:$0xff]  ;;  %v4434_v21 = vcombine.low %v801_v5, %v805_v6 }
  0x2f   : > { %4837 = vmatpush3.bf16.msra.mxu1 %v4907_v20  ;;  %v4415_v20 = vcombine.high %v783_v15, %v787_v16  ;;  %v796_v16 = vld [vmem:[%s7163_s5 + $0x170] sm:$0xff] }
  0x30   : > { %1249 = vmatprep.subr.bf16.mxu1 %v4439_v30  ;;  %v771_v30 = vld [vmem:[%s7163_s5 + $0xa8] sm:$0xff] }
  0x31   : > { %v4398_v31 = vcombine.low %v767_v28, %v771_v30  ;;  %v4399_v32 = vcombine.high %v767_v28, %v771_v30  ;;  %v785_v28 = vld [vmem:[%s7163_s5 + $0x118] sm:$0xff] }
  0xe2   : > { %v4824_v45 = vpop.f32.mrf.mxu1 }
  0xe3   : > { %v587_v51 = vadd.f32 %v4824_v45, %v4366_v47  ;;  %v4381_v45 = vcombine.high %v750_v42, %v754_v43 }
  0xe4   : > { %v578_v46 = vpop.f32.mrf.mxu1 }
  0xe5   : > { %v579_v49 = vadd.f32 %v4366_v47, %v578_v46  ;;  %v611_v60 = vmax.f32 %v587_v51, 0.0  ;;  %v755_v46 = vld [vmem:[%s7163_s5 + $0x28] sm:$0xff]  ;;  %v812_v51 = vld [vmem:[%s7163_s5 + $0x1f0] sm:$0xff] }
  0xe6   : > { %v4825_v48 = vpop.f32.mrf.mxu1 }
  0xe7   : > { %v590_v50 = vadd.f32 %v4825_v48, %v4366_v47  ;;  %v609_v56 = vmax.f32 %v579_v49, 0.0  ;;  %v4383_v48 = vcombine.high %v751_v44, %v755_v46  ;;  %v4380_v49 = vcombine.low %v750_v42, %v754_v43 }
  0xe8   : > { %v581_v52 = vpop.f32.mrf.mxu1 }
  0xe9   : > { %v582_v53 = vadd.f32 %v4366_v47, %v581_v52  ;;  %v612_v54 = vmax.f32 %v590_v50, 0.0  ;;  %v808_v50 = vld [vmem:[%s7163_s5 + $0x1d0] sm:$0xff]  ;;  %v809_v52 = vld [vmem:[%s7163_s5 + $0x1d8] sm:$0xff] }
  0xea   : > { %v4828_v55 = vpop.f32.mrf.mxu1 }
  0xeb   : > { %v610_v57 = vmax.f32 %v582_v53, 0.0  ;;  %v603_v61 = vadd.f32 %v4828_v55, %v4366_v47  ;;  %v618_v1 = vpack.c.bf16 %v612_v54, %v611_v60  ;;  %v4441_v53 = vcombine.high %v808_v50, %v812_v51  ;;  %v813_v54 = vld [vmem:[%s7163_s5 + $0x1f8] sm:$0xff] }
  0xec   : > { %v594_v62 = vpop.f32.mrf.mxu1  ;;  %v5487_v55 = vmov 0   ;;  %v4443_v58 = vcombine.high %v809_v52, %v813_v54 }
  0xed   : > { %v617_v63 = vpack.c.bf16 %v610_v57, %v609_v56  ;;  %v595_v0 = vadd.f32 %v4366_v47, %v594_v62  ;;  %v615_v7 = vmax.f32 %v603_v61, 0.0  ;;  %1208 = vmatprep.mubr.bf16.mxu0 %v5487_v55  ;;  %v4440_v56 = vcombine.low %v808_v50, %v812_v51  ;;  %v5758_v61 = vld [vmem:[%s7162_s4] ss:$0 sm:$0xff]  ;;  %v773_v50 = vld [vmem:[%s7163_s5 + $0xb8] sm:$0xff] }
  0xee   : > { %v4829_v2 = vpop.f32.mrf.mxu1  ;;  %v4442_v57 = vcombine.low %v809_v52, %v813_v54 }
  0xef   : > { %v606_v4 = vadd.f32 %v4829_v2, %v4366_v47  ;;  %4838 = vmatprep.mubr.msk.bf16.mxu1 %vm660_vm3, %v617_v63  ;;  %v613_v9 = vmax.f32 %v595_v0, 0.0  ;;  %v800_v2 = vld [vmem:[%s7163_s5 + $0x190] sm:$0xff] }
  0xf0   : > { %v597_v8 = vpop.f32.mrf.mxu1  ;;  %4839 = vmatmul.mubr.msk.bf16.vlgmr.msra.gmra.mxu1 %vm660_vm3, %v618_v1 }
  0xf1   : > { %v616_v10 = vmax.f32 %v606_v4, 0.0  ;;  %v598_v11 = vadd.f32 %v4366_v47, %v597_v8  ;;  %1250 = vmatpush1.bf16.msra.mxu1 %v4438_v29  ;;  %v4397_v29 = vcombine.high %v766_v26, %v770_v27  ;;  %v4382_v47 = vcombine.low %v751_v44, %v755_v46  ;;  %v804_v4 = vld [vmem:[%s7163_s5 + $0x1b0] sm:$0xff] }
  0xf2   : > { %1251 = vmatprep.subr.bf16.mxu1 %v4431_v3  ;;  %v788_v26 = vld [vmem:[%s7163_s5 + $0x130] sm:$0xff] }
  0xf3   : > { %v614_v14 = vmax.f32 %v598_v11, 0.0  ;;  %v620_v17 = vpack.c.bf16 %v616_v10, %v615_v7  ;;  %1186 = vmatprep.subr.bf16.mxu0 %v4397_v29  ;;  %v789_v29 = vld [vmem:[%s7163_s5 + $0x138] sm:$0xff] }
  0xf4   : > { %1187 = vmatpush1.bf16.msra.mxu0 %v4396_v33  ;;  %v4419_v36 = vcombine.high %v785_v28, %v789_v29  ;;  %v4418_v43 = vcombine.low %v785_v28, %v789_v29  ;;  %v4928_v28 = vld [vmem:[%s7165_s7 + $0x84] ss:$16 sps:$4 sm:$0xff]  }
  0xf5   : > { %v619_v18 = vpack.c.bf16 %v614_v14, %v613_v9  ;;  %1252 = vmatpush1.bf16.msra.mxu1 %v4430_v12  ;;  %1188 = vmatprep.subr.bf16.mxu0 %v4389_v37  ;;  %v4433_v12 = vcombine.high %v800_v2, %v804_v4  ;;  %v792_v14 = vld [vmem:[%s7163_s5 + $0x150] sm:$0xff] }
  0xf6   : > { %1253 = vmatprep.subr.bf16.mxu1 %v4423_v13  ;;  %v4435_v13 = vcombine.high %v801_v5, %v805_v6  ;;  %v776_v37 = vld [vmem:[%s7163_s5 + $0xd0] sm:$0xff] }
  0xf7   : > { %4842 = vmatprep.mubr.msk.bf16.mxu1 %vm660_vm3, %v619_v18  ;;  %v797_v18 = vld [vmem:[%s7163_s5 + $0x178] sm:$0xff]  ;;  %v4408_v52 = vcombine.low %v776_v37, %v780_v38  ;;  %v4931_v29 = vld [vmem:[%s7165_s7 + $0x284] ss:$16 sps:$4 sm:$0xff]  }
  0xf8   : > { %4843 = vmatmul.mubr.msk.bf16.gmra.mxu1 %vm660_vm3, %v620_v17  ;;  %1189 = vmatpush1.bf16.msra.mxu0 %v4388_v41  ;;  %v793_v17 = vld [vmem:[%s7163_s5 + $0x158] sm:$0xff] }
  0xf9   : > { %1254 = vmatpush1.bf16.msra.mxu1 %v4422_v19  ;;  %1190 = vmatprep.subr.bf16.mxu0 %v4381_v45  ;;  %v4409_v45 = vcombine.high %v776_v37, %v780_v38  ;;  %v4943_v37 = vld [vmem:[%s7165_s7 + $0x244] ss:$16 sps:$4 sm:$0xff]   ;;  %v4938_v38 = vld [vmem:[%s7165_s7 + $0x40] ss:$16 sps:$4 sm:$0xff]  }
  0xfa   : > { %1255 = vmatprep.subr.bf16.mxu1 %v4415_v20  ;;  %1281 = vmatprep.mubr.bf16.mxu1 %v5487_v55  ;;  %v4432_v20 = vcombine.low %v800_v2, %v804_v4 }
  0xfc   : > { %1191 = vmatpush1.bf16.msra.mxu0 %v4380_v49  ;;  %v769_v49 = vld [vmem:[%s7163_s5 + $0x98] sm:$0xff] }
  0xfd   : > { %1256 = vmatpush1.bf16.msra.mxu1 %v4414_v23  ;;  %1322 = vmatprep.subr.bf16.mxu0 %v4441_v53  ;;  %v4425_v23 = vcombine.high %v792_v14, %v796_v16  ;;  %v4402_v2 = vcombine.low %v769_v49, %v773_v50 }
  0xfe   : > { %1257 = vmatprep.subr.bf16.mxu1 %v4407_v24  ;;  %v4427_v24 = vcombine.high %v793_v17, %v797_v18 }
 0x101   : > { %1258 = vmatpush1.bf16.msra.mxu1 %v4406_v25  ;;  %v784_v25 = vld [vmem:[%s7163_s5 + $0x110] sm:$0xff] }
 0x102   : > { %1259 = vmatprep.subr.bf16.mxu1 %v4399_v32  ;;  %v4426_v32 = vcombine.low %v793_v17, %v797_v18  ;;  %v4417_v33 = vcombine.high %v784_v25, %v788_v26  ;;  %v4416_v42 = vcombine.low %v784_v25, %v788_v26  ;;  %v4913_v18 = vld [vmem:[%s7165_s7 + $0x2e4] ss:$16 sps:$4 sm:$0xff]   ;;  %v4920_v26 = vld [vmem:[%s7165_s7 + $0xa0] ss:$16 sps:$4 sm:$0xff]  }
 0x103   : > { %v4925_v25 = vld [vmem:[%s7165_s7 + $0x2a4] ss:$16 sps:$4 sm:$0xff]  }
 0x105   : > { %1260 = vmatpush1.bf16.msra.mxu1 %v4398_v31  ;;  %v4424_v31 = vcombine.low %v792_v14, %v796_v16 }
 0x106   : > { %1261 = vmatprep.subr.bf16.mxu1 %v4391_v40  ;;  %v781_v40 = vld [vmem:[%s7163_s5 + $0xf8] sm:$0xff] }
 0x109   : > { %1262 = vmatpush1.bf16.msra.mxu1 %v4390_v39  ;;  %v777_v39 = vld [vmem:[%s7163_s5 + $0xd8] sm:$0xff] }
 0x10a   : > { %1263 = vmatprep.subr.bf16.mxu1 %v4383_v48  ;;  %v4411_v46 = vcombine.high %v777_v39, %v781_v40  ;;  %v772_v48 = vld [vmem:[%s7163_s5 + $0xb0] sm:$0xff]  ;;  %v4410_v53 = vcombine.low %v777_v39, %v781_v40 }
 0x10b   : > { %v4941_v39 = vld [vmem:[%s7165_s7 + $0x240] ss:$16 sps:$4 sm:$0xff]   ;;  %v4946_v40 = vld [vmem:[%s7165_s7 + $0x24] ss:$16 sps:$4 sm:$0xff]  }
 0x10d   : > { %1264 = vmatpush1.bf16.msra.mxu1 %v4382_v47  ;;  %v768_v47 = vld [vmem:[%s7163_s5 + $0x90] sm:$0xff] }
 0x10e   : > { %1395 = vmatprep.subr.bf16.mxu1 %v4443_v58  ;;  %v4401_v54 = vcombine.high %v768_v47, %v772_v48  ;;  %v4403_v58 = vcombine.high %v769_v49, %v773_v50  ;;  %v4961_v49 = vld [vmem:[%s7165_s7 + $0x3e4] ss:$16 sps:$4 sm:$0xff]   ;;  %v4956_v50 = vld [vmem:[%s7165_s7 + $0x1e0] ss:$16 sps:$4 sm:$0xff]  }
 0x1b0   : > { %v4840_v59 = vpop.f32.mrf.mxu1 }
 0x1b1   : > { %v716_v19 = vadd.f32 %v4840_v59, %v5758_v61  ;;  %v760_v59 = vld [vmem:[%s7163_s5 + $0x50] sm:$0xff] }
 0x1b2   : > { %v707_v60 = vpop.f32.mrf.mxu1 }
 0x1b3   : > { %v708_v63 = vadd.f32 %v5758_v61, %v707_v60  ;;  %v740_v30 = vmax.f32 %v716_v19, 0.0  ;;  %v764_v60 = vld [vmem:[%s7163_s5 + $0x70] sm:$0xff] }
 0x1b4   : > { %v4841_v62 = vpop.f32.mrf.mxu1  ;;  %v4393_v5 = vcombine.high %v760_v59, %v764_v60  ;;  %v4908_v19 = vld [vmem:[%s7165_s7 + $0xe0] ss:$16 sps:$4 sm:$0xff]  }
 0x1b5   : > { %v738_v7 = vmax.f32 %v708_v63, 0.0  ;;  %v719_v10 = vadd.f32 %v4841_v62, %v5758_v61  ;;  %v761_v62 = vld [vmem:[%s7163_s5 + $0x58] sm:$0xff] }
 0x1b6   : > { %v710_v0 = vpop.f32.mrf.mxu1  ;;  %v765_v63 = vld [vmem:[%s7163_s5 + $0x78] sm:$0xff] }
 0x1b7   : > { %v711_v1 = vadd.f32 %v5758_v61, %v710_v0  ;;  %v741_v22 = vmax.f32 %v719_v10, 0.0  ;;  %v4395_v6 = vcombine.high %v761_v62, %v765_v63  ;;  %v4392_v10 = vcombine.low %v760_v59, %v764_v60  ;;  %v4968_v59 = vld [vmem:[%s7165_s7 + $0x1a0] ss:$16 sps:$4 sm:$0xff]  }
 0x1b8   : > { %v5765_v3 = vpop.f32.mrf.mxu1  ;;  %v4971_v60 = vld [vmem:[%s7165_s7 + $0x3a0] ss:$16 sps:$4 sm:$0xff]  }
 0x1b9   : > { %v739_v8 = vmax.f32 %v711_v1, 0.0  ;;  %v5808_v34 = vpack.c.bf16 %v741_v22, %v740_v30  ;;  %v732_v0 = vadd.f32 %v5765_v3, %v5758_v61  ;;  %v4400_v1 = vcombine.low %v768_v47, %v772_v48  ;;  %v753_v3 = vld [vmem:[%s7163_s5 + $0x18] sm:$0xff]  ;;  %v4914_v22 = vld [vmem:[%s7165_s7 + $0xc0] ss:$16 sps:$4 sm:$0xff]   ;;  %v4958_v48 = vld [vmem:[%s7165_s7 + $0x1e4] ss:$16 sps:$4 sm:$0xff]  }
 0x1ba   : > { %v723_v9 = vpop.f32.mrf.mxu1  ;;  %v4926_v30 = vld [vmem:[%s7165_s7 + $0x80] ss:$16 sps:$4 sm:$0xff]  }
 0x1bb   : > { %v5777_v11 = vpack.c.bf16 %v739_v8, %v738_v7  ;;  %v724_v41 = vadd.f32 %v5758_v61, %v723_v9  ;;  %v752_v7 = vld [vmem:[%s7163_s5 + $0x10] sm:$0xff]  ;;  %v757_v8 = vld [vmem:[%s7163_s5 + $0x38] sm:$0xff]  ;;  %v744_v9 = vmax.f32 %v732_v0, 0.0 }
 0x1bc   : > { %v4845_v15 = vpop.f32.mrf.mxu1  ;;  %v4386_v17 = vcombine.low %v753_v3, %v757_v8  ;;  %v4953_v47 = vld [vmem:[%s7165_s7 + $0x200] ss:$16 sps:$4 sm:$0xff]  }
 0x1bd   : > { %1209 = vmatmul.mubr.bf16.vlgmr.msra.gmra.mxu0 %v5777_v11  ;;  %1282 = vmatmul.mubr.bf16.vlgmr.msra.gmra.mxu1 %v5777_v11  ;;  %v742_v51 = vmax.f32 %v724_v41, 0.0  ;;  %v4949_v41 = vld [vmem:[%s7165_s7 + $0x224] ss:$16 sps:$4 sm:$0xff]   ;;  %v4974_v0 = vld [vmem:[%s7165_s7 + $0x180] ss:$16 sps:$4 sm:$0xff]  }
 0x1be   : > { %1323 = vmatpush1.bf16.msra.mxu0 %v4440_v56  ;;  %1396 = vmatpush1.bf16.msra.mxu1 %v4442_v57  ;;  %v726_v27 = vpop.f32.mrf.mxu1  ;;  %v735_v56 = vadd.f32 %v4845_v15, %v5758_v61  ;;  %v4387_v15 = vcombine.high %v753_v3, %v757_v8  ;;  %v4986_v3 = vld [vmem:[%s7165_s7 + $0x140] ss:$16 sps:$4 sm:$0xff]  }
 0x1bf   : > { %1324 = vmatprep.subr.bf16.mxu0 %v4433_v12  ;;  %1397 = vmatprep.subr.bf16.mxu1 %v4435_v13  ;;  %v727_v35 = vadd.f32 %v5758_v61, %v726_v27  ;;  %v756_v61 = vld [vmem:[%s7163_s5 + $0x30] sm:$0xff]  ;;  %v4394_v12 = vcombine.low %v761_v62, %v765_v63 }
 0x1c0   : > { %1218 = vmatprep.mubr.bf16.mxu0 %v5487_v55  ;;  %1291 = vmatprep.mubr.bf16.mxu1 %v5487_v55  ;;  %v745_v4 = vmax.f32 %v735_v56, 0.0  ;;  %v4385_v14 = vcombine.high %v752_v7, %v756_v61  ;;  %v4384_v16 = vcombine.low %v752_v7, %v756_v61  ;;  %v4923_v27 = vld [vmem:[%s7165_s7 + $0x2a0] ss:$16 sps:$4 sm:$0xff]   ;;  %v4976_v62 = vld [vmem:[%s7165_s7 + $0x184] ss:$16 sps:$4 sm:$0xff]  }
 0x1c1   : > { %v743_v44 = vmax.f32 %v727_v35, 0.0  ;;  %v4935_v35 = vld [vmem:[%s7165_s7 + $0x260] ss:$16 sps:$4 sm:$0xff]   ;;  %v4979_v63 = vld [vmem:[%s7165_s7 + $0x384] ss:$16 sps:$4 sm:$0xff]  }
 0x1c2   : > { %1325 = vmatpush1.bf16.msra.mxu0 %v4432_v20  ;;  %1398 = vmatpush1.bf16.msra.mxu1 %v4434_v21  ;;  %v749_v13 = vpack.c.bf16 %v745_v4, %v744_v9  ;;  %v4911_v20 = vld [vmem:[%s7165_s7 + $0x2e0] ss:$16 sps:$4 sm:$0xff]   ;;  %v4919_v21 = vld [vmem:[%s7165_s7 + $0x2c4] ss:$16 sps:$4 sm:$0xff]  }
 0x1c3   : > { %1326 = vmatprep.subr.bf16.mxu0 %v4425_v23  ;;  %1399 = vmatprep.subr.bf16.mxu1 %v4427_v24  ;;  %v748_v57 = vpack.c.bf16 %v743_v44, %v742_v51  ;;  %v4917_v23 = vld [vmem:[%s7165_s7 + $0x2c0] ss:$16 sps:$4 sm:$0xff]   ;;  %v4922_v24 = vld [vmem:[%s7165_s7 + $0xa4] ss:$16 sps:$4 sm:$0xff]  }
 0x1c4   : > { %v4952_v44 = vld [vmem:[%s7165_s7 + $0x4] ss:$16 sps:$4 sm:$0xff]   ;;  %v4959_v51 = vld [vmem:[%s7165_s7 + $0x3e0] ss:$16 sps:$4 sm:$0xff]  }
 0x1c5   : > { %1219 = vmatmul.mubr.bf16.gmra.mxu0 %v5808_v34  ;;  %1292 = vmatmul.mubr.bf16.gmra.mxu1 %v5808_v34  ;;  %v4965_v56 = vld [vmem:[%s7165_s7 + $0x3c0] ss:$16 sps:$4 sm:$0xff]   ;;  %v4985_v4 = vld [vmem:[%s7165_s7 + $0x364] ss:$16 sps:$4 sm:$0xff]  }
 0x1c6   : > { %1327 = vmatpush1.bf16.msra.mxu0 %v4424_v31  ;;  %1400 = vmatpush1.bf16.msra.mxu1 %v4426_v32  ;;  %v4929_v31 = vld [vmem:[%s7165_s7 + $0x280] ss:$16 sps:$4 sm:$0xff]   ;;  %v4934_v32 = vld [vmem:[%s7165_s7 + $0x64] ss:$16 sps:$4 sm:$0xff]  }
 0x1c7   : > { %1328 = vmatprep.subr.bf16.mxu0 %v4417_v33  ;;  %1401 = vmatprep.subr.bf16.mxu1 %v4419_v36  ;;  %v4937_v33 = vld [vmem:[%s7165_s7 + $0x264] ss:$16 sps:$4 sm:$0xff]   ;;  %v4989_v8 = vld [vmem:[%s7165_s7 + $0x340] ss:$16 sps:$4 sm:$0xff]  }
 0x1c8   : > { %1228 = vmatprep.mubr.bf16.mxu0 %v5487_v55  ;;  %1301 = vmatprep.mubr.bf16.mxu1 %v5487_v55  ;;  %v4940_v36 = vld [vmem:[%s7165_s7 + $0x44] ss:$16 sps:$4 sm:$0xff]  }
 0x1c9   : > { %v4988_v7 = vld [vmem:[%s7165_s7 + $0x144] ss:$16 sps:$4 sm:$0xff]  }
 0x1ca   : > { %1329 = vmatpush1.bf16.msra.mxu0 %v4416_v42  ;;  %1402 = vmatpush1.bf16.msra.mxu1 %v4418_v43  ;;  %v4944_v42 = vld [vmem:[%s7165_s7 + $0x20] ss:$16 sps:$4 sm:$0xff]   ;;  %v4991_v61 = vld [vmem:[%s7165_s7 + $0x344] ss:$16 sps:$4 sm:$0xff]  }
 0x1cb   : > { %1330 = vmatprep.subr.bf16.mxu0 %v4409_v45  ;;  %1403 = vmatprep.subr.bf16.mxu1 %v4411_v46  ;;  %v4947_v43 = vld [vmem:[%s7165_s7 + $0x220] ss:$16 sps:$4 sm:$0xff]   ;;  %v4955_v45 = vld [vmem:[%s7165_s7 + $0x204] ss:$16 sps:$4 sm:$0xff]  }
 0x1cc   : > { %v4950_v46 = vld [vmem:[%s7165_s7] ss:$16 sps:$4 sm:$0xff]   ;;  %v4994_v9 = vld [vmem:[%s7165_s7 + $0x124] ss:$16 sps:$4 sm:$0xff]  }
 0x1cd   : > { %1229 = vmatmul.mubr.bf16.gmra.mxu0 %v748_v57  ;;  %1302 = vmatmul.mubr.bf16.gmra.mxu1 %v748_v57 }
 0x1ce   : > { %1331 = vmatpush1.bf16.msra.mxu0 %v4408_v52  ;;  %1404 = vmatpush1.bf16.msra.mxu1 %v4410_v53  ;;  %v4964_v52 = vld [vmem:[%s7165_s7 + $0x1c4] ss:$16 sps:$4 sm:$0xff]  }
 0x1cf   : > { %1332 = vmatprep.subr.bf16.mxu0 %v4401_v54  ;;  %1405 = vmatprep.subr.bf16.mxu1 %v4403_v58  ;;  %v4967_v53 = vld [vmem:[%s7165_s7 + $0x3c4] ss:$16 sps:$4 sm:$0xff]   ;;  %v4962_v54 = vld [vmem:[%s7165_s7 + $0x1c0] ss:$16 sps:$4 sm:$0xff]  }
 0x1d0   : > { %1238 = vmatprep.mubr.bf16.mxu0 %v5487_v55  ;;  %1311 = vmatprep.mubr.bf16.mxu1 %v5487_v55  ;;  %v4973_v58 = vld [vmem:[%s7165_s7 + $0x3a4] ss:$16 sps:$4 sm:$0xff]  }
 0x1d2   : > { %1333 = vmatpush1.bf16.msra.mxu0 %v4400_v1  ;;  %1406 = vmatpush1.bf16.msra.mxu1 %v4402_v2  ;;  %v4977_v1 = vld [vmem:[%s7165_s7 + $0x380] ss:$16 sps:$4 sm:$0xff]   ;;  %v4982_v2 = vld [vmem:[%s7165_s7 + $0x164] ss:$16 sps:$4 sm:$0xff]  }
 0x1d3   : > { %1334 = vmatprep.subr.bf16.mxu0 %v4393_v5  ;;  %1407 = vmatprep.subr.bf16.mxu1 %v4395_v6  ;;  %v4980_v5 = vld [vmem:[%s7165_s7 + $0x160] ss:$16 sps:$4 sm:$0xff]  }
 0x1d4   : > { %v4983_v6 = vld [vmem:[%s7165_s7 + $0x360] ss:$16 sps:$4 sm:$0xff]  }
 0x1d5   : > { %1239 = vmatmul.mubr.bf16.gmra.mxu0 %v749_v13  ;;  %1312 = vmatmul.mubr.bf16.gmra.mxu1 %v749_v13 }
 0x1d6   : > { %1335 = vmatpush1.bf16.msra.mxu0 %v4392_v10  ;;  %1408 = vmatpush1.bf16.msra.mxu1 %v4394_v12  ;;  %v4997_v10 = vld [vmem:[%s7165_s7 + $0x324] ss:$16 sps:$4 sm:$0xff]   ;;  %v4992_v12 = vld [vmem:[%s7165_s7 + $0x120] ss:$16 sps:$4 sm:$0xff]  }
 0x1d7   : > { %1336 = vmatprep.subr.bf16.mxu0 %v4385_v14  ;;  %1409 = vmatprep.subr.bf16.mxu1 %v4387_v15  ;;  %v4998_v14 = vld [vmem:[%s7165_s7 + $0x100] ss:$16 sps:$4 sm:$0xff]   ;;  %v5000_v15 = vld [vmem:[%s7165_s7 + $0x104] ss:$16 sps:$4 sm:$0xff]  }
 0x1d8   : > { %1354 = vmatprep.mubr.bf16.mxu0 %v5487_v55  ;;  %1427 = vmatprep.mubr.bf16.mxu1 %v5487_v55 }
 0x1da   : > { %1337 = vmatpush1.bf16.msra.mxu0 %v4384_v16  ;;  %1410 = vmatpush1.bf16.msra.mxu1 %v4386_v17  ;;  %v5001_v16 = vld [vmem:[%s7165_s7 + $0x300] ss:$16 sps:$4 sm:$0xff]   ;;  %v5003_v17 = vld [vmem:[%s7165_s7 + $0x304] ss:$16 sps:$4 sm:$0xff]  }
 0x1db   : > { %3388 = vmatprep.subr.bf16.mxu1 %v4913_v18  ;;  %v5009_v18 = vld [vmem:[%s7165_s7 + $0x6e4] ss:$16 sps:$4 sm:$0xff]  }
 0x1dd   : > { %1355 = vmatmul.mubr.bf16.vlgmr.msra.gmra.mxu0 %v5777_v11  ;;  %1428 = vmatmul.mubr.bf16.vlgmr.msra.gmra.mxu1 %v5777_v11  ;;  %v4910_v11 = vld [vmem:[%s7165_s7 + $0xe4] ss:$16 sps:$4 sm:$0xff]  }
 0x1de   : > { %1364 = vmatprep.mubr.bf16.mxu0 %v5487_v55  ;;  %1437 = vmatprep.mubr.bf16.mxu1 %v5487_v55 }
 0x1df   : > { %3347 = vmatprep.subr.bf16.mxu0 %v4910_v11  ;;  %3389 = vmatpush1.bf16.msra.mxu1 %v4911_v20  ;;  %v5006_v11 = vld [vmem:[%s7165_s7 + $0x4e4] ss:$16 sps:$4 sm:$0xff]  }
 0x1e0   : > { %3348 = vmatpush1.bf16.msra.mxu0 %v4908_v19  ;;  %3390 = vmatprep.subr.bf16.mxu1 %v4919_v21 }
 0x1e3   : > { %3391 = vmatpush1.bf16.msra.mxu1 %v4917_v23 }
 0x1e4   : > { %3392 = vmatprep.subr.bf16.mxu1 %v4925_v25 }
 0x1e5   : > { %1365 = vmatmul.mubr.bf16.gmra.mxu0 %v5808_v34  ;;  %1438 = vmatmul.mubr.bf16.gmra.mxu1 %v5808_v34  ;;  %v4932_v34 = vld [vmem:[%s7165_s7 + $0x60] ss:$16 sps:$4 sm:$0xff]  }
 0x1e6   : > { %1374 = vmatprep.mubr.bf16.mxu0 %v5487_v55  ;;  %1447 = vmatprep.mubr.bf16.mxu1 %v5487_v55 }
 0x1e7   : > { %3393 = vmatpush1.bf16.msra.mxu1 %v4923_v27 }
 0x1e8   : > { %3394 = vmatprep.subr.bf16.mxu1 %v4931_v29 }
 0x1eb   : > { %3395 = vmatpush1.bf16.msra.mxu1 %v4929_v31 }
 0x1ec   : > { %3396 = vmatprep.subr.bf16.mxu1 %v4937_v33 }
 0x1ed   : > { %1375 = vmatmul.mubr.bf16.gmra.mxu0 %v748_v57  ;;  %1448 = vmatmul.mubr.bf16.gmra.mxu1 %v748_v57  ;;  %v4970_v57 = vld [vmem:[%s7165_s7 + $0x1a4] ss:$16 sps:$4 sm:$0xff]  }
 0x1ee   : > { %1384 = vmatprep.mubr.bf16.mxu0 %v5487_v55  ;;  %1457 = vmatprep.mubr.bf16.mxu1 %v5487_v55  ;;  %v4916_v55 = vld [vmem:[%s7165_s7 + $0xc4] ss:$16 sps:$4 sm:$0xff]  }
 0x1ef   : > { %3349 = vmatprep.subr.bf16.mxu0 %v4916_v55  ;;  %3397 = vmatpush1.bf16.msra.mxu1 %v4935_v35 }
 0x1f0   : > { %3350 = vmatpush1.bf16.msra.mxu0 %v4914_v22  ;;  %3398 = vmatprep.subr.bf16.mxu1 %v4943_v37 }
 0x1f1   : > { %3351 = vmatprep.subr.bf16.mxu0 %v4922_v24 }
 0x1f3   : > { %3399 = vmatpush1.bf16.msra.mxu1 %v4941_v39 }
 0x1f4   : > { %3352 = vmatpush1.bf16.msra.mxu0 %v4920_v26  ;;  %3400 = vmatprep.subr.bf16.mxu1 %v4949_v41  ;;  %v816_v26 = vlaneseq }
 0x1f5   : > { %1385 = vmatmul.mubr.bf16.gmra.mxu0 %v749_v13  ;;  %1458 = vmatmul.mubr.bf16.gmra.mxu1 %v749_v13  ;;  %v4995_v13 = vld [vmem:[%s7165_s7 + $0x320] ss:$16 sps:$4 sm:$0xff]  }
 0x1f6   : > { %3353 = vmatprep.subr.bf16.mxu0 %v4928_v28  ;;  %v6079_v31 = vshrl.u32 %v816_v26, 7 }
 0x1f7   : > { %3401 = vmatpush1.bf16.msra.mxu1 %v4947_v43 }
 0x1f8   : > { %3354 = vmatpush1.bf16.msra.mxu0 %v4926_v30  ;;  %3402 = vmatprep.subr.bf16.mxu1 %v4955_v45  ;;  %v6085_v35 = vsub.s32 3, %v6079_v31  ;;  %v6091_v39 = vsub.s32 2, %v6079_v31 }
 0x1f9   : > { %3355 = vmatprep.subr.bf16.mxu0 %v4934_v32 }
 0x1fb   : > { %3403 = vmatpush1.bf16.msra.mxu1 %v4953_v47 }
 0x1fc   : > { %3356 = vmatpush1.bf16.msra.mxu0 %v4932_v34  ;;  %3404 = vmatprep.subr.bf16.mxu1 %v4961_v49  ;;  %v6082_v34 = vsub.s32 1, %v6079_v31 }
 0x1fd   : > { %3357 = vmatprep.subr.bf16.mxu0 %v4940_v36 }
 0x1ff   : > { %3405 = vmatpush2.bf16.msra.mxu1 %v4959_v51 }
 0x200   : > { %3358 = vmatpush1.bf16.msra.mxu0 %v4938_v38  ;;  %3406 = vmatprep.subr.bf16.mxu1 %v4967_v53  ;;  %v6088_v38 = vsub.s32 0, %v6079_v31 }
 0x201   : > { %3359 = vmatprep.subr.bf16.mxu0 %v4946_v40  ;;  %v6096_v40 = vld [vmem:[%s7164_s6] sm:$0xff] }
 0x202   : > { %v6100_v43 = vrot.slane %v6096_v40, %v6082_v34  ;;  %v6108_v47 = vrot.slane %v6096_v40, %v6088_v38 }
 0x203   : > { %3407 = vmatpush2.bf16.msra.mxu1 %v4965_v56 }
 0x204   : > { %3360 = vmatpush1.bf16.msra.mxu0 %v4944_v42  ;;  %3408 = vmatprep.subr.bf16.mxu1 %v4973_v58 }
 0x205   : > { %3361 = vmatprep.subr.bf16.mxu0 %v4952_v44  ;;  %v6104_v44 = vrot.slane %v6096_v40, %v6085_v35 }
 0x207   : > { %3409 = vmatpush2.bf16.msra.mxu1 %v4971_v60 }
 0x208   : > { %3362 = vmatpush1.bf16.msra.mxu0 %v4950_v46  ;;  %3410 = vmatprep.subr.bf16.mxu1 %v4979_v63 }
 0x209   : > { %3363 = vmatprep.subr.bf16.mxu0 %v4958_v48  ;;  %v6112_v48 = vrot.slane %v6096_v40, %v6091_v39 }
 0x20b   : > { %3411 = vmatpush2.bf16.msra.mxu1 %v4977_v1 }
 0x20c   : > { %3364 = vmatpush2.bf16.msra.mxu0 %v4956_v50  ;;  %3412 = vmatprep.subr.bf16.mxu1 %v4985_v4 }
 0x20d   : > { %3365 = vmatprep.subr.bf16.mxu0 %v4964_v52 }
 0x20f   : > { %3413 = vmatpush2.bf16.msra.mxu1 %v4983_v6 }
 0x210   : > { %3366 = vmatpush2.bf16.msra.mxu0 %v4962_v54  ;;  %3414 = vmatprep.subr.bf16.mxu1 %v4991_v61 }
 0x211   : > { %3367 = vmatprep.subr.bf16.mxu0 %v4970_v57 }
 0x213   : > { %3415 = vmatpush2.bf16.msra.mxu1 %v4989_v8 }
 0x214   : > { %3368 = vmatpush2.bf16.msra.mxu0 %v4968_v59  ;;  %3416 = vmatprep.subr.bf16.mxu1 %v4997_v10 }
 0x215   : > { %3369 = vmatprep.subr.bf16.mxu0 %v4976_v62 }
 0x217   : > { %3417 = vmatpush2.bf16.msra.mxu1 %v4995_v13 }
 0x218   : > { %3370 = vmatpush2.bf16.msra.mxu0 %v4974_v0  ;;  %3418 = vmatprep.subr.bf16.mxu1 %v5003_v17 }
 0x219   : > { %3371 = vmatprep.subr.bf16.mxu0 %v4982_v2 }
 0x21b   : > { %3419 = vmatpush2.bf16.msra.mxu1 %v5001_v16 }
 0x21c   : > { %3372 = vmatpush2.bf16.msra.mxu0 %v4980_v5  ;;  %3470 = vmatprep.subr.bf16.mxu1 %v5009_v18 }
 0x21d   : > { %3373 = vmatprep.subr.bf16.mxu0 %v4988_v7 }
 0x220   : > { %3374 = vmatpush2.bf16.msra.mxu0 %v4986_v3 }
 0x221   : > { %3375 = vmatprep.subr.bf16.mxu0 %v4994_v9 }
 0x224   : > { %3376 = vmatpush2.bf16.msra.mxu0 %v4992_v12 }
 0x225   : > { %3377 = vmatprep.subr.bf16.mxu0 %v5000_v15 }
 0x228   : > { %3378 = vmatpush2.bf16.msra.mxu0 %v4998_v14 }
 0x229   : > { %3429 = vmatprep.subr.bf16.mxu0 %v5006_v11 }
 0x27d   : > { %v1210_v19 = vpop.f32.mrf.mxu0  ;;  %v1283_v20 = vpop.f32.mrf.mxu1 }
 0x27e   : > { %v1211_v63 = vadd.f32 %v1210_v19, %v6108_v47  ;;  %v1284_v0 = vadd.f32 %v1283_v20, %v6112_v48 }
 0x27f   : > { %v1212_v55 = vpop.f32.mrf.mxu0  ;;  %v1285_v21 = vpop.f32.mrf.mxu1 }
 0x280   : > { %v1213_v53 = vadd.f32 %v1212_v55, %v6100_v43  ;;  %v1286_v54 = vadd.f32 %v1285_v21, %v6104_v44 }
 0x281   : > { %v1214_v22 = vpop.f32.mrf.mxu0  ;;  %v1287_v23 = vpop.f32.mrf.mxu1 }
 0x282   : > { %v1215_v56 = vadd.f32 %v1214_v22, %v6108_v47  ;;  %v1288_v57 = vadd.f32 %v1287_v23, %v6112_v48 }
 0x283   : > { %v1216_v24 = vpop.f32.mrf.mxu0  ;;  %v1289_v25 = vpop.f32.mrf.mxu1 }
 0x284   : > { %v1217_v49 = vadd.f32 %v1216_v24, %v6100_v43  ;;  %v1290_v50 = vadd.f32 %v1289_v25, %v6104_v44  ;;  %v1468_v8 = vmax.f32 %v1211_v63, %v1215_v56  ;;  %v1494_v9 = vmax.f32 %v1284_v0, %v1288_v57 }
 0x285   : > { %v1220_v27 = vpop.f32.mrf.mxu0  ;;  %v1293_v28 = vpop.f32.mrf.mxu1 }
 0x286   : > { %v1481_v1 = vmax.f32 %v1213_v53, %v1217_v49  ;;  %v1507_v2 = vmax.f32 %v1286_v54, %v1290_v50  ;;  %v1221_v4 = vadd.f32 %v1220_v27, %v6108_v47  ;;  %v1294_v5 = vadd.f32 %v1293_v28, %v6112_v48 }
 0x287   : > { %v1222_v29 = vpop.f32.mrf.mxu0  ;;  %v1295_v30 = vpop.f32.mrf.mxu1 }
 0x288   : > { %v1223_v58 = vadd.f32 %v1222_v29, %v6100_v43  ;;  %v1296_v59 = vadd.f32 %v1295_v30, %v6104_v44  ;;  %v1469_v18 = vmax.f32 %v1468_v8, %v1221_v4  ;;  %v1495_v19 = vmax.f32 %v1494_v9, %v1294_v5 }
 0x289   : > { %v1224_v32 = vpop.f32.mrf.mxu0  ;;  %v1297_v33 = vpop.f32.mrf.mxu1  ;;  %v842_v9 = vsub.s32 6, %v6079_v31 }
 0x28a   : > { %v1482_v10 = vmax.f32 %v1481_v1, %v1223_v58  ;;  %v1508_v12 = vmax.f32 %v1507_v2, %v1296_v59  ;;  %v1225_v13 = vadd.f32 %v1224_v32, %v6108_v47  ;;  %v1298_v14 = vadd.f32 %v1297_v33, %v6112_v48 }
 0x28b   : > { %v1226_v36 = vpop.f32.mrf.mxu0  ;;  %v1299_v37 = vpop.f32.mrf.mxu1 }
 0x28c   : > { %v1227_v6 = vadd.f32 %v1226_v36, %v6100_v43  ;;  %v1300_v7 = vadd.f32 %v1299_v37, %v6104_v44  ;;  %v1470_v27 = vmax.f32 %v1469_v18, %v1225_v13  ;;  %v1496_v28 = vmax.f32 %v1495_v19, %v1298_v14 }
 0x28d   : > { %v1230_v41 = vpop.f32.mrf.mxu0  ;;  %v1303_v42 = vpop.f32.mrf.mxu1  ;;  %v6158_v19 = vrot.slane %v6096_v40, %v842_v9 }
 0x28e   : > { %v1483_v20 = vmax.f32 %v1482_v10, %v1227_v6  ;;  %v1509_v55 = vmax.f32 %v1508_v12, %v1300_v7  ;;  %v1231_v23 = vadd.f32 %v1230_v41, %v6108_v47  ;;  %v1304_v24 = vadd.f32 %v1303_v42, %v6112_v48 }
 0x28f   : > { %v1232_v45 = vpop.f32.mrf.mxu0  ;;  %v1305_v46 = vpop.f32.mrf.mxu1 }
 0x290   : > { %v1233_v17 = vadd.f32 %v1232_v45, %v6100_v43  ;;  %v1306_v11 = vadd.f32 %v1305_v46, %v6104_v44  ;;  %v1471_v49 = vmax.f32 %v1470_v27, %v1231_v23  ;;  %v1497_v50 = vmax.f32 %v1496_v28, %v1304_v24 }
 0x291   : > { %v1234_v51 = vpop.f32.mrf.mxu0  ;;  %v1307_v52 = vpop.f32.mrf.mxu1 }
 0x292   : > { %v1484_v32 = vmax.f32 %v1483_v20, %v1233_v17  ;;  %v1510_v33 = vmax.f32 %v1509_v55, %v1306_v11  ;;  %v1235_v36 = vadd.f32 %v1234_v51, %v6108_v47  ;;  %v1308_v37 = vadd.f32 %v1307_v52, %v6112_v48 }
 0x293   : > { %v1236_v60 = vpop.f32.mrf.mxu0  ;;  %v1309_v62 = vpop.f32.mrf.mxu1 }
 0x294   : > { %v1237_v25 = vadd.f32 %v1236_v60, %v6100_v43  ;;  %v1310_v26 = vadd.f32 %v1309_v62, %v6104_v44  ;;  %v1472_v60 = vmax.f32 %v1471_v49, %v1235_v36  ;;  %v1498_v62 = vmax.f32 %v1497_v50, %v1308_v37 }
 0x295   : > { %v1240_v61 = vpop.f32.mrf.mxu0  ;;  %v1313_v3 = vpop.f32.mrf.mxu1 }
 0x296   : > { %v1485_v53 = vmax.f32 %v1484_v32, %v1237_v25  ;;  %v1511_v54 = vmax.f32 %v1510_v33, %v1310_v26  ;;  %v1241_v56 = vadd.f32 %v1240_v61, %v6108_v47  ;;  %v1314_v57 = vadd.f32 %v1313_v3, %v6112_v48 }
 0x297   : > { %v1242_v15 = vpop.f32.mrf.mxu0  ;;  %v1315_v16 = vpop.f32.mrf.mxu1 }
 0x298   : > { %v1243_v45 = vadd.f32 %v1242_v15, %v6100_v43  ;;  %v1316_v41 = vadd.f32 %v1315_v16, %v6104_v44  ;;  %v1473_v6 = vmax.f32 %v1472_v60, %v1241_v56  ;;  %v1499_v7 = vmax.f32 %v1498_v62, %v1314_v57 }
 0x299   : > { %v1244_v21 = vpop.f32.mrf.mxu0  ;;  %v1317_v22 = vpop.f32.mrf.mxu1 }
 0x29a   : > { %v1486_v63 = vmax.f32 %v1485_v53, %v1243_v45  ;;  %v1512_v0 = vmax.f32 %v1511_v54, %v1316_v41  ;;  %v1245_v1 = vadd.f32 %v1244_v21, %v6108_v47  ;;  %v1318_v2 = vadd.f32 %v1317_v22, %v6112_v48 }
 0x29b   : > { %v1246_v29 = vpop.f32.mrf.mxu0  ;;  %v1319_v30 = vpop.f32.mrf.mxu1  ;;  %v838_v47 = vsub.s32 5, %v6079_v31  ;;  %v846_v48 = vsub.s32 7, %v6079_v31 }
 0x29c   : > { %v1247_v58 = vadd.f32 %v1246_v29, %v6100_v43  ;;  %v1320_v51 = vadd.f32 %v1319_v30, %v6104_v44  ;;  %v834_v44 = vsub.s32 4, %v6079_v31  ;;  %v1474_v10 = vmax.f32 %v1473_v6, %v1245_v1 }
 0x29d   : > { %v1356_v46 = vpop.f32.mrf.mxu0  ;;  %v1429_v42 = vpop.f32.mrf.mxu1  ;;  %v1500_v12 = vmax.f32 %v1499_v7, %v1318_v2  ;;  %v6163_v23 = vrot.slane %v6096_v40, %v838_v47  ;;  %v6168_v24 = vrot.slane %v6096_v40, %v846_v48 }
 0x29e   : > { %v1487_v61 = vmax.f32 %v1486_v63, %v1247_v58  ;;  %v1513_v3 = vmax.f32 %v1512_v0, %v1320_v51  ;;  %v6153_v18 = vrot.slane %v6096_v40, %v834_v44  ;;  %v1475_v20 = vrot.slane %v1474_v10, 4 }
 0x29f   : > { %v1358_v59 = vpop.f32.mrf.mxu0  ;;  %v1431_v52 = vpop.f32.mrf.mxu1  ;;  %v1501_v55 = vrot.slane %v1500_v12, 4  ;;  %v1430_v30 = vadd.f32 %v1429_v42, %v6158_v19 }
 0x2a0   : > { %v1488_v15 = vrot.slane %v1487_v61, 4  ;;  %v1514_v16 = vrot.slane %v1513_v3, 4  ;;  %v1357_v29 = vadd.f32 %v1356_v46, %v6153_v18  ;;  %v6178_v36 = vmax.f32 %v1474_v10, %v1475_v20 }
 0x2a1   : > { %v1360_v4 = vpop.f32.mrf.mxu0  ;;  %v1433_v5 = vpop.f32.mrf.mxu1  ;;  %v6180_v37 = vmax.f32 %v1500_v12, %v1501_v55  ;;  %v1359_v50 = vadd.f32 %v1358_v59, %v6163_v23  ;;  %v1432_v46 = vadd.f32 %v1431_v52, %v6168_v24 }
 0x2a2   : > { %v6170_v25 = vmax.f32 %v1487_v61, %v1488_v15  ;;  %v6172_v26 = vmax.f32 %v1513_v3, %v1514_v16  ;;  %v1361_v32 = vadd.f32 %v1360_v4, %v6153_v18  ;;  %v1434_v33 = vadd.f32 %v1433_v5, %v6158_v19 }
 0x2a3   : > { %v1362_v8 = vpop.f32.mrf.mxu0  ;;  %v1435_v43 = vpop.f32.mrf.mxu1 }
 0x2a4   : > { %v1363_v40 = vadd.f32 %v1362_v8, %v6163_v23  ;;  %v1436_v45 = vadd.f32 %v1435_v43, %v6168_v24  ;;  %v1490_v54 = vrot.slane %v6170_v25, 2  ;;  %v1516_v56 = vrot.slane %v6172_v26, 2 }
 0x2a5   : > { %v1366_v13 = vpop.f32.mrf.mxu0  ;;  %v1439_v14 = vpop.f32.mrf.mxu1  ;;  %v1520_v62 = vmax.f32 %v1357_v29, %v1361_v32  ;;  %v1546_v63 = vmax.f32 %v1430_v30, %v1434_v33 }
 0x2a6   : > { %v1367_v42 = vadd.f32 %v1366_v13, %v6153_v18  ;;  %v1440_v53 = vadd.f32 %v1439_v14, %v6158_v19  ;;  %v1533_v0 = vmax.f32 %v1359_v50, %v1363_v40  ;;  %v1559_v1 = vmax.f32 %v1432_v46, %v1436_v45 }
 0x2a7   : > { %v1368_v17 = vpop.f32.mrf.mxu0  ;;  %v1441_v11 = vpop.f32.mrf.mxu1  ;;  %v1477_v45 = vrot.slane %v6178_v36, 2 }
 0x2a8   : > { %v1369_v57 = vadd.f32 %v1368_v17, %v6163_v23  ;;  %v1442_v58 = vadd.f32 %v1441_v11, %v6168_v24  ;;  %v1521_v7 = vmax.f32 %v1520_v62, %v1367_v42  ;;  %v1547_v61 = vmax.f32 %v1546_v63, %v1440_v53 }
 0x2a9   : > { %v1370_v21 = vpop.f32.mrf.mxu0  ;;  %v1443_v22 = vpop.f32.mrf.mxu1  ;;  %v1517_v62 = vmax.f32 %v6172_v26, %v1516_v56 }
 0x2aa   : > { %v1371_v59 = vadd.f32 %v1370_v21, %v6153_v18  ;;  %v1444_v52 = vadd.f32 %v1443_v22, %v6158_v19  ;;  %v1534_v43 = vmax.f32 %v1533_v0, %v1369_v57  ;;  %v1560_v10 = vmax.f32 %v1559_v1, %v1442_v58 }
 0x2ab   : > { %v1372_v27 = vpop.f32.mrf.mxu0  ;;  %v1445_v28 = vpop.f32.mrf.mxu1 }
 0x2ac   : > { %v1373_v2 = vadd.f32 %v1372_v27, %v6163_v23  ;;  %v1446_v4 = vadd.f32 %v1445_v28, %v6168_v24  ;;  %v1522_v16 = vmax.f32 %v1521_v7, %v1371_v59  ;;  %v1548_v17 = vmax.f32 %v1547_v61, %v1444_v52 }
 0x2ad   : > { %v1376_v41 = vpop.f32.mrf.mxu0  ;;  %v1449_v49 = vpop.f32.mrf.mxu1 }
 0x2ae   : > { %v1377_v3 = vadd.f32 %v1376_v41, %v6153_v18  ;;  %v1450_v8 = vadd.f32 %v1449_v49, %v6158_v19  ;;  %v1535_v55 = vmax.f32 %v1534_v43, %v1373_v2  ;;  %v1561_v21 = vmax.f32 %v1560_v10, %v1446_v4 }
 0x2af   : > { %v1378_v51 = vpop.f32.mrf.mxu0  ;;  %v1451_v60 = vpop.f32.mrf.mxu1  ;;  %v1503_v41 = vrot.slane %v6180_v37, 2 }
 0x2b0   : > { %v1379_v12 = vadd.f32 %v1378_v51, %v6163_v23  ;;  %v1452_v13 = vadd.f32 %v1451_v60, %v6168_v24  ;;  %v1523_v30 = vmax.f32 %v1522_v16, %v1377_v3  ;;  %v1549_v32 = vmax.f32 %v1548_v17, %v1450_v8 }
 0x2b1   : > { %v1380_v5 = vpop.f32.mrf.mxu0  ;;  %v1453_v6 = vpop.f32.mrf.mxu1  ;;  %v1491_v60 = vmax.f32 %v6170_v25, %v1490_v54  ;;  %v1504_v7 = vmax.f32 %v6180_v37, %v1503_v41 }
 0x2b2   : > { %v1381_v11 = vadd.f32 %v1380_v5, %v6153_v18  ;;  %v1454_v20 = vadd.f32 %v1453_v6, %v6158_v19  ;;  %v1536_v49 = vmax.f32 %v1535_v55, %v1379_v12  ;;  %v1562_v50 = vmax.f32 %v1561_v21, %v1452_v13 }
 0x2b3   : > { %v1382_v14 = vpop.f32.mrf.mxu0  ;;  %v1455_v15 = vpop.f32.mrf.mxu1  ;;  %v1478_v6 = vmax.f32 %v6178_v36, %v1477_v45  ;;  %v1492_v10 = vrot.slane %v1491_v60, 1  ;;  %v5488_v12 = vmov 1966171168   ;;  %v1505_v37 = vrot.slane %v1504_v7, 1 }
 0x2b4   : > { %v1383_v22 = vadd.f32 %v1382_v14, %v6163_v23  ;;  %v1456_v27 = vadd.f32 %v1455_v15, %v6168_v24  ;;  %v1524_v53 = vmax.f32 %v1523_v30, %v1381_v11  ;;  %v1550_v57 = vmax.f32 %v1549_v32, %v1454_v20 }
 0x2b5   : > { %v1386_v28 = vpop.f32.mrf.mxu0  ;;  %v1459_v29 = vpop.f32.mrf.mxu1  ;;  %v1591_v13 = vunpack.c.l.s4 %v5488_v12  ;;  %v1479_v16 = vrot.slane %v1478_v6, 1  ;;  %v1493_v21 = vmax.f32 %v1491_v60, %v1492_v10  ;;  %v1506_v32 = vmax.f32 %v1504_v7, %v1505_v37 }
 0x2b6   : > { %v1387_v33 = vadd.f32 %v1386_v28, %v6153_v18  ;;  %v1460_v40 = vadd.f32 %v1459_v29, %v6158_v19  ;;  %v1537_v63 = vmax.f32 %v1536_v49, %v1383_v22  ;;  %v1563_v59 = vmax.f32 %v1562_v50, %v1456_v27 }
 0x2b7   : > { %v1388_v46 = vpop.f32.mrf.mxu0  ;;  %v1461_v42 = vpop.f32.mrf.mxu1  ;;  %v1592_v22 = vunpack.c.0.s8 %v1591_v13  ;;  %v1480_v30 = vmax.f32 %v1478_v6, %v1479_v16 }
 0x2b8   : > { %v1389_v58 = vadd.f32 %v1388_v46, %v6163_v23  ;;  %v1462_v51 = vadd.f32 %v1461_v42, %v6168_v24  ;;  %v1525_v1 = vmax.f32 %v1524_v53, %v1387_v33  ;;  %v1551_v2 = vmax.f32 %v1550_v57, %v1460_v40 }
 0x2b9   : > { %v1390_v52 = vpop.f32.mrf.mxu0  ;;  %v1463_v0 = vpop.f32.mrf.mxu1  ;;  %v1586_v49 = vcombine.low %v1480_v30, %v1493_v21  ;;  %v1595_v50 = vsub.s32 %v1592_v22, %v6079_v31  ;;  %v5016_v21 = vld [vmem:[%s7165_s7 + $0x4a0] ss:$16 sps:$4 sm:$0xff]   ;;  %v5033_v30 = vld [vmem:[%s7165_s7 + $0x664] ss:$16 sps:$4 sm:$0xff]   ;;  %v5103_v31 = vld [vmem:[%s7165_s7 + $0x2e8] ss:$16 sps:$4 sm:$0xff]  }
 0x2ba   : > { %v1391_v4 = vadd.f32 %v1390_v52, %v6153_v18  ;;  %v1464_v5 = vadd.f32 %v1463_v0, %v6158_v19  ;;  %v1538_v61 = vmax.f32 %v1537_v63, %v1389_v58  ;;  %v1564_v3 = vmax.f32 %v1563_v59, %v1462_v51  ;;  %v5019_v22 = vld [vmem:[%s7165_s7 + $0x6a0] ss:$16 sps:$4 sm:$0xff]  }
 0x2bb   : > { %v1392_v8 = vpop.f32.mrf.mxu0  ;;  %v1465_v25 = vpop.f32.mrf.mxu1  ;;  %v1518_v18 = vrot.slane %v1517_v62, 1 }
 0x2bc   : > { %v1526_v54 = vmax.f32 %v1525_v1, %v1391_v4  ;;  %v1552_v26 = vmax.f32 %v1551_v2, %v1464_v5  ;;  %v1393_v56 = vadd.f32 %v1392_v8, %v6163_v23  ;;  %v1466_v43 = vadd.f32 %v1465_v25, %v6168_v24 }
 0x2bd   : > { %v1519_v27 = vmax.f32 %v1517_v62, %v1518_v18  ;;  %v1596_v62 = vrot.slane %v1586_v49, %v1595_v50  ;;  %v5037_v49 = vld [vmem:[%s7165_s7 + $0x640] ss:$16 sps:$4 sm:$0xff]  }
 0x2be   : > { %v1527_v14 = vrot.slane %v1526_v54, 4  ;;  %v1553_v19 = vrot.slane %v1552_v26, 4  ;;  %v1539_v15 = vmax.f32 %v1538_v61, %v1393_v56  ;;  %v1565_v36 = vmax.f32 %v1564_v3, %v1466_v43 }
 0x2bf   : > { %v1587_v46 = vcombine.low %v1506_v32, %v1519_v27  ;;  %v5024_v27 = vld [vmem:[%s7165_s7 + $0x484] ss:$16 sps:$4 sm:$0xff]   ;;  %v5028_v32 = vld [vmem:[%s7165_s7 + $0x460] ss:$16 sps:$4 sm:$0xff]  }
 0x2c0   : > { %v1528_v17 = vmax.f32 %v1526_v54, %v1527_v14  ;;  %v1554_v11 = vmax.f32 %v1552_v26, %v1553_v19  ;;  %v1540_v20 = vrot.slane %v1539_v15, 4  ;;  %v1566_v55 = vrot.slane %v1565_v36, 4  ;;  %v5004_v14 = vld [vmem:[%s7165_s7 + $0x4e0] ss:$16 sps:$4 sm:$0xff]  }
 0x2c1   : > { %v1603_v63 = vrot.slane %v1587_v46, %v1595_v50  ;;  %v5007_v19 = vld [vmem:[%s7165_s7 + $0x6e0] ss:$16 sps:$4 sm:$0xff]   ;;  %v5045_v46 = vld [vmem:[%s7165_s7 + $0x624] ss:$16 sps:$4 sm:$0xff]  }
 0x2c2   : > { %v1529_v23 = vrot.slane %v1528_v17, 2  ;;  %v1555_v28 = vrot.slane %v1554_v11, 2  ;;  %v1541_v24 = vmax.f32 %v1539_v15, %v1540_v20  ;;  %v1567_v29 = vmax.f32 %v1565_v36, %v1566_v55  ;;  %v5018_v20 = vld [vmem:[%s7165_s7 + $0x4a4] ss:$16 sps:$4 sm:$0xff]  }
 0x2c3   : > { %v1618_v5 = vcombine.low %v1596_v62, %v1603_v63  ;;  %v5021_v55 = vld [vmem:[%s7165_s7 + $0x6a4] ss:$16 sps:$4 sm:$0xff]  }
 0x2c4   : > { %v1530_v33 = vmax.f32 %v1528_v17, %v1529_v23  ;;  %v1556_v40 = vmax.f32 %v1554_v11, %v1555_v28  ;;  %v1542_v45 = vrot.slane %v1541_v24, 2  ;;  %v1568_v41 = vrot.slane %v1567_v29, 2  ;;  %v5010_v17 = vld [vmem:[%s7165_s7 + $0x4c0] ss:$16 sps:$4 sm:$0xff]   ;;  %v5027_v23 = vld [vmem:[%s7165_s7 + $0x684] ss:$16 sps:$4 sm:$0xff]  }
 0x2c5   : > { %v1626_v3 = vrot.slane %v1618_v5, %v1595_v50  ;;  %v5013_v11 = vld [vmem:[%s7165_s7 + $0x6c0] ss:$16 sps:$4 sm:$0xff]   ;;  %v5054_v62 = vld [vmem:[%s7165_s7 + $0x5e4] ss:$16 sps:$4 sm:$0xff]  }
 0x2c6   : > { %v1531_v42 = vrot.slane %v1530_v33, 1  ;;  %v1557_v53 = vrot.slane %v1556_v40, 1  ;;  %v1543_v57 = vmax.f32 %v1541_v24, %v1542_v45  ;;  %v1569_v58 = vmax.f32 %v1567_v29, %v1568_v41  ;;  %v5022_v28 = vld [vmem:[%s7165_s7 + $0x480] ss:$16 sps:$4 sm:$0xff]   ;;  %v5030_v29 = vld [vmem:[%s7165_s7 + $0x464] ss:$16 sps:$4 sm:$0xff]  }
 0x2c7   : > { %v5025_v24 = vld [vmem:[%s7165_s7 + $0x680] ss:$16 sps:$4 sm:$0xff]   ;;  %v5039_v45 = vld [vmem:[%s7165_s7 + $0x644] ss:$16 sps:$4 sm:$0xff]  }
 0x2c8   : > { %v1544_v51 = vrot.slane %v1543_v57, 1  ;;  %v1570_v60 = vrot.slane %v1569_v58, 1  ;;  %v1532_v59 = vmax.f32 %v1530_v33, %v1531_v42  ;;  %v1558_v52 = vmax.f32 %v1556_v40, %v1557_v53  ;;  %v5031_v33 = vld [vmem:[%s7165_s7 + $0x660] ss:$16 sps:$4 sm:$0xff]   ;;  %v5036_v40 = vld [vmem:[%s7165_s7 + $0x444] ss:$16 sps:$4 sm:$0xff]  }
 0x2c9   : > { %v5034_v41 = vld [vmem:[%s7165_s7 + $0x440] ss:$16 sps:$4 sm:$0xff]   ;;  %v5057_v63 = vld [vmem:[%s7165_s7 + $0x7e4] ss:$16 sps:$4 sm:$0xff]  }
 0x2ca   : > { %v1545_v0 = vmax.f32 %v1543_v57, %v1544_v51  ;;  %v1571_v1 = vmax.f32 %v1569_v58, %v1570_v60  ;;  %v5040_v42 = vld [vmem:[%s7165_s7 + $0x420] ss:$16 sps:$4 sm:$0xff]   ;;  %v5048_v57 = vld [vmem:[%s7165_s7 + $0x404] ss:$16 sps:$4 sm:$0xff]  }
 0x2cb   : > { %v5043_v53 = vld [vmem:[%s7165_s7 + $0x620] ss:$16 sps:$4 sm:$0xff]   ;;  %v5051_v58 = vld [vmem:[%s7165_s7 + $0x604] ss:$16 sps:$4 sm:$0xff]  }
 0x2cc   : > { %v1588_v2 = vcombine.low %v1532_v59, %v1545_v0  ;;  %v1589_v4 = vcombine.low %v1558_v52, %v1571_v1  ;;  %v5046_v51 = vld [vmem:[%s7165_s7 + $0x400] ss:$16 sps:$4 sm:$0xff]   ;;  %v5060_v0 = vld [vmem:[%s7165_s7 + $0x5c4] ss:$16 sps:$4 sm:$0xff]  }
 0x2cd   : > { %v5049_v60 = vld [vmem:[%s7165_s7 + $0x600] ss:$16 sps:$4 sm:$0xff]   ;;  %v5063_v1 = vld [vmem:[%s7165_s7 + $0x7c4] ss:$16 sps:$4 sm:$0xff]  }
 0x2ce   : > { %v1610_v6 = vrot.slane %v1588_v2, %v1595_v50  ;;  %v1617_v7 = vrot.slane %v1589_v4, %v1595_v50  ;;  %v5052_v59 = vld [vmem:[%s7165_s7 + $0x5e0] ss:$16 sps:$4 sm:$0xff]   ;;  %v5066_v5 = vld [vmem:[%s7165_s7 + $0x5a4] ss:$16 sps:$4 sm:$0xff]  }
 0x2cf   : > { %v5055_v52 = vld [vmem:[%s7165_s7 + $0x7e0] ss:$16 sps:$4 sm:$0xff]  }
 0x2d0   : > { %v1619_v61 = vcombine.low %v1610_v6, %v1617_v7  ;;  %v5058_v2 = vld [vmem:[%s7165_s7 + $0x5c0] ss:$16 sps:$4 sm:$0xff]   ;;  %v5069_v6 = vld [vmem:[%s7165_s7 + $0x7a4] ss:$16 sps:$4 sm:$0xff]  }
 0x2d1   : > { %v5061_v4 = vld [vmem:[%s7165_s7 + $0x7c0] ss:$16 sps:$4 sm:$0xff]  }
 0x2d2   : > { %v1633_v8 = vrot.slane %v1619_v61, %v1595_v50  ;;  %v5042_v50 = vld [vmem:[%s7165_s7 + $0x424] ss:$16 sps:$4 sm:$0xff]   ;;  %v5064_v7 = vld [vmem:[%s7165_s7 + $0x5a0] ss:$16 sps:$4 sm:$0xff]  }
 0x2d3   : > { %v5067_v61 = vld [vmem:[%s7165_s7 + $0x7a0] ss:$16 sps:$4 sm:$0xff]  }
 0x2d4   : > { %v6219_v25 = vcombine.low %v1626_v3, %v1633_v8  ;;  %v5072_v3 = vld [vmem:[%s7165_s7 + $0x584] ss:$16 sps:$4 sm:$0xff]  }
 0x2d5   : > { %v5075_v8 = vld [vmem:[%s7165_s7 + $0x784] ss:$16 sps:$4 sm:$0xff]  }
 0x2d6   : > { %v2005_v54 = vrot.slane %v6219_v25, %v6082_v34  ;;  %v2013_v26 = vrot.slane %v6219_v25, %v6085_v35  ;;  %v2001_v56 = vrot.slane %v6219_v25, %v6088_v38  ;;  %v2009_v43 = vrot.slane %v6219_v25, %v6091_v39 }
 0x2d7   : > { %v2021_v10 = vrot.slane %v6219_v25, %v838_v47  ;;  %v2029_v12 = vrot.slane %v6219_v25, %v846_v48  ;;  %v5012_v47 = vld [vmem:[%s7165_s7 + $0x4c4] ss:$16 sps:$4 sm:$0xff]  }
 0x2d8   : > { %v6235_v13 = vpack.c.bf16 %v2005_v54, %v2005_v54  ;;  %v6237_v18 = vpack.c.bf16 %v2013_v26, %v2013_v26  ;;  %v6245_v15 = vpack.c.bf16 %v2001_v56, %v2001_v56  ;;  %v6247_v36 = vpack.c.bf16 %v2009_v43, %v2009_v43  ;;  %v5015_v48 = vld [vmem:[%s7165_s7 + $0x6c4] ss:$16 sps:$4 sm:$0xff]   ;;  %v5070_v54 = vld [vmem:[%s7165_s7 + $0x580] ss:$16 sps:$4 sm:$0xff]  }
 0x2d9   : > { %v6259_v16 = vpack.c.bf16 %v2021_v10, %v2021_v10  ;;  %v6261_v37 = vpack.c.bf16 %v2029_v12, %v2029_v12  ;;  %v5073_v26 = vld [vmem:[%s7165_s7 + $0x780] ss:$16 sps:$4 sm:$0xff]   ;;  %v5078_v56 = vld [vmem:[%s7165_s7 + $0x564] ss:$16 sps:$4 sm:$0xff]  }
 0x2da   : > { %3379 = vmatprep.mubr.bf16.mxu0 %v6235_v13  ;;  %3420 = vmatprep.mubr.bf16.mxu1 %v6237_v18  ;;  %v5081_v43 = vld [vmem:[%s7165_s7 + $0x764] ss:$16 sps:$4 sm:$0xff]   ;;  %v5076_v10 = vld [vmem:[%s7165_s7 + $0x560] ss:$16 sps:$4 sm:$0xff]  }
 0x2db   : > { %3380 = vmatmul.mubr.bf16.vlgmr.msra.gmra.mxu0 %v6245_v15  ;;  %3421 = vmatmul.mubr.bf16.vlgmr.msra.gmra.mxu1 %v6247_v36  ;;  %v5079_v12 = vld [vmem:[%s7165_s7 + $0x760] ss:$16 sps:$4 sm:$0xff]  }
 0x2dc   : > { %3430 = vmatpush1.bf16.msra.mxu0 %v5004_v14  ;;  %3471 = vmatpush1.bf16.msra.mxu1 %v5007_v19  ;;  %v5084_v14 = vld [vmem:[%s7165_s7 + $0x544] ss:$16 sps:$4 sm:$0xff]  }
 0x2dd   : > { %3461 = vmatprep.mubr.bf16.mxu0 %v6259_v16  ;;  %3502 = vmatprep.mubr.bf16.mxu1 %v6261_v37  ;;  %v5087_v19 = vld [vmem:[%s7165_s7 + $0x744] ss:$16 sps:$4 sm:$0xff]  }
 0x2de   : > { %3431 = vmatprep.subr.bf16.mxu0 %v5012_v47  ;;  %3472 = vmatprep.subr.bf16.mxu1 %v5015_v48  ;;  %v5082_v47 = vld [vmem:[%s7165_s7 + $0x540] ss:$16 sps:$4 sm:$0xff]  }
 0x2df   : > { %v5085_v48 = vld [vmem:[%s7165_s7 + $0x740] ss:$16 sps:$4 sm:$0xff]  }
 0x2e0   : > { %3432 = vmatpush1.bf16.msra.mxu0 %v5010_v17  ;;  %3473 = vmatpush1.bf16.msra.mxu1 %v5013_v11  ;;  %v5090_v17 = vld [vmem:[%s7165_s7 + $0x524] ss:$16 sps:$4 sm:$0xff]  }
 0x2e1   : > { %3433 = vmatprep.subr.bf16.mxu0 %v5018_v20  ;;  %3474 = vmatprep.subr.bf16.mxu1 %v5021_v55  ;;  %v5093_v11 = vld [vmem:[%s7165_s7 + $0x724] ss:$16 sps:$4 sm:$0xff]   ;;  %v5088_v20 = vld [vmem:[%s7165_s7 + $0x520] ss:$16 sps:$4 sm:$0xff]  }
 0x2e2   : > { %v5091_v55 = vld [vmem:[%s7165_s7 + $0x720] ss:$16 sps:$4 sm:$0xff]  }
 0x2e4   : > { %3434 = vmatpush1.bf16.msra.mxu0 %v5016_v21  ;;  %3475 = vmatpush1.bf16.msra.mxu1 %v5019_v22  ;;  %v5096_v21 = vld [vmem:[%s7165_s7 + $0x504] ss:$16 sps:$4 sm:$0xff]  }
 0x2e5   : > { %3435 = vmatprep.subr.bf16.mxu0 %v5024_v27  ;;  %3476 = vmatprep.subr.bf16.mxu1 %v5027_v23  ;;  %v5099_v22 = vld [vmem:[%s7165_s7 + $0x704] ss:$16 sps:$4 sm:$0xff]   ;;  %v5094_v27 = vld [vmem:[%s7165_s7 + $0x500] ss:$16 sps:$4 sm:$0xff]  }
 0x2e6   : > { %v5097_v23 = vld [vmem:[%s7165_s7 + $0x700] ss:$16 sps:$4 sm:$0xff]  }
 0x2e8   : > { %3436 = vmatpush1.bf16.msra.mxu0 %v5022_v28  ;;  %3477 = vmatpush1.bf16.msra.mxu1 %v5025_v24  ;;  %v2017_v28 = vrot.slane %v6219_v25, %v834_v44  ;;  %v2025_v24 = vrot.slane %v6219_v25, %v842_v9  ;;  %v5108_v9 = vld [vmem:[%s7165_s7 + $0xcc] ss:$16 sps:$4 sm:$0xff]  }
 0x2e9   : > { %3437 = vmatprep.subr.bf16.mxu0 %v5030_v29  ;;  %3478 = vmatprep.subr.bf16.mxu1 %v5033_v30  ;;  %v5102_v29 = vld [vmem:[%s7165_s7 + $0xec] ss:$16 sps:$4 sm:$0xff]  }
 0x2ea   : > { %v5105_v30 = vld [vmem:[%s7165_s7 + $0x2ec] ss:$16 sps:$4 sm:$0xff]   ;;  %v6456_v44 = vpack.c.bf16 %v2025_v24, %v2025_v24 }
 0x2eb   : > { %v5111_v25 = vld [vmem:[%s7165_s7 + $0x2cc] ss:$16 sps:$4 sm:$0xff]  }
 0x2ec   : > { %3438 = vmatpush1.bf16.msra.mxu0 %v5028_v32  ;;  %3479 = vmatpush1.bf16.msra.mxu1 %v5031_v33  ;;  %v5100_v32 = vld [vmem:[%s7165_s7 + $0xe8] ss:$16 sps:$4 sm:$0xff]   ;;  %v6454_v33 = vpack.c.bf16 %v2017_v28, %v2017_v28  ;;  %v5180_v28 = vld [vmem:[%s7165_s7 + $0x14c] ss:$16 sps:$4 sm:$0xff]  }
 0x2ed   : > { %3439 = vmatprep.subr.bf16.mxu0 %v5036_v40  ;;  %3480 = vmatprep.subr.bf16.mxu1 %v5039_v45  ;;  %v5106_v40 = vld [vmem:[%s7165_s7 + $0xc8] ss:$16 sps:$4 sm:$0xff]   ;;  %v5183_v24 = vld [vmem:[%s7165_s7 + $0x34c] ss:$16 sps:$4 sm:$0xff]  }
 0x2ee   : > { %v5109_v45 = vld [vmem:[%s7165_s7 + $0x2c8] ss:$16 sps:$4 sm:$0xff]  }
 0x2f0   : > { %3440 = vmatpush1.bf16.msra.mxu0 %v5034_v41  ;;  %3481 = vmatpush1.bf16.msra.mxu1 %v5037_v49  ;;  %v5114_v41 = vld [vmem:[%s7165_s7 + $0xac] ss:$16 sps:$4 sm:$0xff]   ;;  %v5112_v49 = vld [vmem:[%s7165_s7 + $0xa8] ss:$16 sps:$4 sm:$0xff]  }
 0x2f1   : > { %3441 = vmatprep.subr.bf16.mxu0 %v5042_v50  ;;  %3482 = vmatprep.subr.bf16.mxu1 %v5045_v46  ;;  %v5120_v50 = vld [vmem:[%s7165_s7 + $0x8c] ss:$16 sps:$4 sm:$0xff]  }
 0x2f2   : > { %v5123_v46 = vld [vmem:[%s7165_s7 + $0x28c] ss:$16 sps:$4 sm:$0xff]  }
 0x2f4   : > { %3442 = vmatpush1.bf16.msra.mxu0 %v5040_v42  ;;  %3483 = vmatpush1.bf16.msra.mxu1 %v5043_v53  ;;  %v5118_v42 = vld [vmem:[%s7165_s7 + $0x88] ss:$16 sps:$4 sm:$0xff]  }
 0x2f5   : > { %3443 = vmatprep.subr.bf16.mxu0 %v5048_v57  ;;  %3484 = vmatprep.subr.bf16.mxu1 %v5051_v58  ;;  %v5121_v53 = vld [vmem:[%s7165_s7 + $0x288] ss:$16 sps:$4 sm:$0xff]   ;;  %v5126_v57 = vld [vmem:[%s7165_s7 + $0x6c] ss:$16 sps:$4 sm:$0xff]  }
 0x2f6   : > { %v5129_v58 = vld [vmem:[%s7165_s7 + $0x26c] ss:$16 sps:$4 sm:$0xff]  }
 0x2f8   : > { %3444 = vmatpush1.bf16.msra.mxu0 %v5046_v51  ;;  %3485 = vmatpush1.bf16.msra.mxu1 %v5049_v60  ;;  %v5124_v51 = vld [vmem:[%s7165_s7 + $0x68] ss:$16 sps:$4 sm:$0xff]  }
 0x2f9   : > { %3445 = vmatprep.subr.bf16.mxu0 %v5054_v62  ;;  %3486 = vmatprep.subr.bf16.mxu1 %v5057_v63  ;;  %v5127_v60 = vld [vmem:[%s7165_s7 + $0x268] ss:$16 sps:$4 sm:$0xff]   ;;  %v5132_v62 = vld [vmem:[%s7165_s7 + $0x4c] ss:$16 sps:$4 sm:$0xff]  }
 0x2fa   : > { %v5135_v63 = vld [vmem:[%s7165_s7 + $0x24c] ss:$16 sps:$4 sm:$0xff]  }
 0x2fc   : > { %3446 = vmatpush2.bf16.msra.mxu0 %v5052_v59  ;;  %3487 = vmatpush2.bf16.msra.mxu1 %v5055_v52  ;;  %v5130_v59 = vld [vmem:[%s7165_s7 + $0x48] ss:$16 sps:$4 sm:$0xff]  }
 0x2fd   : > { %3447 = vmatprep.subr.bf16.mxu0 %v5060_v0  ;;  %3488 = vmatprep.subr.bf16.mxu1 %v5063_v1  ;;  %v5133_v52 = vld [vmem:[%s7165_s7 + $0x248] ss:$16 sps:$4 sm:$0xff]   ;;  %v5138_v0 = vld [vmem:[%s7165_s7 + $0x2c] ss:$16 sps:$4 sm:$0xff]  }
 0x2fe   : > { %v5141_v1 = vld [vmem:[%s7165_s7 + $0x22c] ss:$16 sps:$4 sm:$0xff]  }
 0x300   : > { %3448 = vmatpush2.bf16.msra.mxu0 %v5058_v2  ;;  %3489 = vmatpush2.bf16.msra.mxu1 %v5061_v4  ;;  %v5136_v2 = vld [vmem:[%s7165_s7 + $0x28] ss:$16 sps:$4 sm:$0xff]  }
 0x301   : > { %3449 = vmatprep.subr.bf16.mxu0 %v5066_v5  ;;  %3490 = vmatprep.subr.bf16.mxu1 %v5069_v6  ;;  %v5139_v4 = vld [vmem:[%s7165_s7 + $0x228] ss:$16 sps:$4 sm:$0xff]   ;;  %v5144_v5 = vld [vmem:[%s7165_s7 + $0xc] ss:$16 sps:$4 sm:$0xff]  }
 0x302   : > { %v5147_v6 = vld [vmem:[%s7165_s7 + $0x20c] ss:$16 sps:$4 sm:$0xff]  }
 0x304   : > { %3450 = vmatpush2.bf16.msra.mxu0 %v5064_v7  ;;  %3491 = vmatpush2.bf16.msra.mxu1 %v5067_v61  ;;  %v5142_v7 = vld [vmem:[%s7165_s7 + $0x8] ss:$16 sps:$4 sm:$0xff]  }
 0x305   : > { %3451 = vmatprep.subr.bf16.mxu0 %v5072_v3  ;;  %3492 = vmatprep.subr.bf16.mxu1 %v5075_v8  ;;  %v5145_v61 = vld [vmem:[%s7165_s7 + $0x208] ss:$16 sps:$4 sm:$0xff]   ;;  %v5150_v3 = vld [vmem:[%s7165_s7 + $0x1ec] ss:$16 sps:$4 sm:$0xff]  }
 0x306   : > { %v5153_v8 = vld [vmem:[%s7165_s7 + $0x3ec] ss:$16 sps:$4 sm:$0xff]  }
 0x308   : > { %3452 = vmatpush2.bf16.msra.mxu0 %v5070_v54  ;;  %3493 = vmatpush2.bf16.msra.mxu1 %v5073_v26  ;;  %v5148_v54 = vld [vmem:[%s7165_s7 + $0x1e8] ss:$16 sps:$4 sm:$0xff]  }
 0x309   : > { %3453 = vmatprep.subr.bf16.mxu0 %v5078_v56  ;;  %3494 = vmatprep.subr.bf16.mxu1 %v5081_v43  ;;  %v5151_v26 = vld [vmem:[%s7165_s7 + $0x3e8] ss:$16 sps:$4 sm:$0xff]   ;;  %v5156_v56 = vld [vmem:[%s7165_s7 + $0x1cc] ss:$16 sps:$4 sm:$0xff]  }
 0x30a   : > { %v5159_v43 = vld [vmem:[%s7165_s7 + $0x3cc] ss:$16 sps:$4 sm:$0xff]  }
 0x30c   : > { %3454 = vmatpush2.bf16.msra.mxu0 %v5076_v10  ;;  %3495 = vmatpush2.bf16.msra.mxu1 %v5079_v12  ;;  %v5154_v10 = vld [vmem:[%s7165_s7 + $0x1c8] ss:$16 sps:$4 sm:$0xff]  }
 0x30d   : > { %3455 = vmatprep.subr.bf16.mxu0 %v5084_v14  ;;  %3496 = vmatprep.subr.bf16.mxu1 %v5087_v19  ;;  %v5157_v12 = vld [vmem:[%s7165_s7 + $0x3c8] ss:$16 sps:$4 sm:$0xff]   ;;  %v5162_v14 = vld [vmem:[%s7165_s7 + $0x1ac] ss:$16 sps:$4 sm:$0xff]  }
 0x30e   : > { %v5165_v19 = vld [vmem:[%s7165_s7 + $0x3ac] ss:$16 sps:$4 sm:$0xff]  }
 0x310   : > { %3456 = vmatpush2.bf16.msra.mxu0 %v5082_v47  ;;  %3497 = vmatpush2.bf16.msra.mxu1 %v5085_v48  ;;  %v5160_v47 = vld [vmem:[%s7165_s7 + $0x1a8] ss:$16 sps:$4 sm:$0xff]  }
 0x311   : > { %3457 = vmatprep.subr.bf16.mxu0 %v5090_v17  ;;  %3498 = vmatprep.subr.bf16.mxu1 %v5093_v11  ;;  %v5163_v48 = vld [vmem:[%s7165_s7 + $0x3a8] ss:$16 sps:$4 sm:$0xff]   ;;  %v5168_v17 = vld [vmem:[%s7165_s7 + $0x18c] ss:$16 sps:$4 sm:$0xff]  }
 0x312   : > { %v5171_v11 = vld [vmem:[%s7165_s7 + $0x38c] ss:$16 sps:$4 sm:$0xff]  }
 0x314   : > { %3458 = vmatpush2.bf16.msra.mxu0 %v5088_v20  ;;  %3499 = vmatpush2.bf16.msra.mxu1 %v5091_v55  ;;  %v5166_v20 = vld [vmem:[%s7165_s7 + $0x188] ss:$16 sps:$4 sm:$0xff]  }
 0x315   : > { %3459 = vmatprep.subr.bf16.mxu0 %v5096_v21  ;;  %3500 = vmatprep.subr.bf16.mxu1 %v5099_v22  ;;  %v5169_v55 = vld [vmem:[%s7165_s7 + $0x388] ss:$16 sps:$4 sm:$0xff]   ;;  %v5174_v21 = vld [vmem:[%s7165_s7 + $0x16c] ss:$16 sps:$4 sm:$0xff]  }
 0x316   : > { %v5177_v22 = vld [vmem:[%s7165_s7 + $0x36c] ss:$16 sps:$4 sm:$0xff]  }
 0x318   : > { %3460 = vmatpush2.bf16.msra.mxu0 %v5094_v27  ;;  %3501 = vmatpush2.bf16.msra.mxu1 %v5097_v23  ;;  %v5172_v27 = vld [vmem:[%s7165_s7 + $0x168] ss:$16 sps:$4 sm:$0xff]  }
 0x319   : > { %3511 = vmatprep.subr.bf16.mxu0 %v5102_v29  ;;  %3552 = vmatprep.subr.bf16.mxu1 %v5105_v30  ;;  %v5175_v23 = vld [vmem:[%s7165_s7 + $0x368] ss:$16 sps:$4 sm:$0xff]  }
 0x31a   : > { %v5178_v29 = vld [vmem:[%s7165_s7 + $0x148] ss:$16 sps:$4 sm:$0xff]  }
 0x31b   : > { %3462 = vmatmul.mubr.bf16.vlgmr.msra.gmra.mxu0 %v6454_v33  ;;  %3503 = vmatmul.mubr.bf16.vlgmr.msra.gmra.mxu1 %v6456_v44  ;;  %v5181_v30 = vld [vmem:[%s7165_s7 + $0x348] ss:$16 sps:$4 sm:$0xff]  }
 0x31c   : > { %3512 = vmatpush1.bf16.msra.mxu0 %v5100_v32  ;;  %3543 = vmatprep.mubr.bf16.mxu0 %v6235_v13  ;;  %v5117_v13 = vld [vmem:[%s7165_s7 + $0x2ac] ss:$16 sps:$4 sm:$0xff]  }
 0x31d   : > { %3553 = vmatpush1.bf16.msra.mxu1 %v5103_v31  ;;  %3584 = vmatprep.mubr.bf16.mxu1 %v6237_v18  ;;  %v5115_v18 = vld [vmem:[%s7165_s7 + $0x2a8] ss:$16 sps:$4 sm:$0xff]   ;;  %v5186_v32 = vld [vmem:[%s7165_s7 + $0x12c] ss:$16 sps:$4 sm:$0xff]  }
 0x31e   : > { %3513 = vmatprep.subr.bf16.mxu0 %v5108_v9  ;;  %3554 = vmatprep.subr.bf16.mxu1 %v5111_v25  ;;  %v5189_v31 = vld [vmem:[%s7165_s7 + $0x32c] ss:$16 sps:$4 sm:$0xff]   ;;  %v5184_v9 = vld [vmem:[%s7165_s7 + $0x128] ss:$16 sps:$4 sm:$0xff]  }
 0x31f   : > { %v5187_v25 = vld [vmem:[%s7165_s7 + $0x328] ss:$16 sps:$4 sm:$0xff]  }
 0x320   : > { %3514 = vmatpush1.bf16.msra.mxu0 %v5106_v40  ;;  %v5192_v40 = vld [vmem:[%s7165_s7 + $0x10c] ss:$16 sps:$4 sm:$0xff]  }
 0x321   : > { %3555 = vmatpush1.bf16.msra.mxu1 %v5109_v45  ;;  %3515 = vmatprep.subr.bf16.mxu0 %v5114_v41  ;;  %v5195_v45 = vld [vmem:[%s7165_s7 + $0x30c] ss:$16 sps:$4 sm:$0xff]   ;;  %v5190_v41 = vld [vmem:[%s7165_s7 + $0x108] ss:$16 sps:$4 sm:$0xff]  }
 0x322   : > { %3556 = vmatprep.subr.bf16.mxu1 %v5117_v13  ;;  %v5193_v13 = vld [vmem:[%s7165_s7 + $0x308] ss:$16 sps:$4 sm:$0xff]  }
 0x324   : > { %3516 = vmatpush1.bf16.msra.mxu0 %v5112_v49  ;;  %v5198_v49 = vld [vmem:[%s7165_s7 + $0x4ec] ss:$16 sps:$4 sm:$0xff]  }
 0x325   : > { %3557 = vmatpush1.bf16.msra.mxu1 %v5115_v18  ;;  %3517 = vmatprep.subr.bf16.mxu0 %v5120_v50  ;;  %v5201_v18 = vld [vmem:[%s7165_s7 + $0x6ec] ss:$16 sps:$4 sm:$0xff]   ;;  %v5196_v50 = vld [vmem:[%s7165_s7 + $0x4e8] ss:$16 sps:$4 sm:$0xff]  }
 0x326   : > { %3558 = vmatprep.subr.bf16.mxu1 %v5123_v46  ;;  %v5199_v46 = vld [vmem:[%s7165_s7 + $0x6e8] ss:$16 sps:$4 sm:$0xff]  }
 0x328   : > { %3518 = vmatpush1.bf16.msra.mxu0 %v5118_v42  ;;  %v5204_v42 = vld [vmem:[%s7165_s7 + $0x4cc] ss:$16 sps:$4 sm:$0xff]  }
 0x329   : > { %3559 = vmatpush1.bf16.msra.mxu1 %v5121_v53  ;;  %3519 = vmatprep.subr.bf16.mxu0 %v5126_v57  ;;  %v5207_v53 = vld [vmem:[%s7165_s7 + $0x6cc] ss:$16 sps:$4 sm:$0xff]   ;;  %v5202_v57 = vld [vmem:[%s7165_s7 + $0x4c8] ss:$16 sps:$4 sm:$0xff]  }
 0x32a   : > { %3560 = vmatprep.subr.bf16.mxu1 %v5129_v58  ;;  %v5205_v58 = vld [vmem:[%s7165_s7 + $0x6c8] ss:$16 sps:$4 sm:$0xff]  }
 0x32c   : > { %3520 = vmatpush1.bf16.msra.mxu0 %v5124_v51  ;;  %v5211_v51 = vld [vmem:[%s7165_s7 + $0x6a8] ss:$16 sps:$4 sm:$0xff]  }
 0x32d   : > { %3561 = vmatpush1.bf16.msra.mxu1 %v5127_v60  ;;  %3521 = vmatprep.subr.bf16.mxu0 %v5132_v62  ;;  %v5219_v60 = vld [vmem:[%s7165_s7 + $0x68c] ss:$16 sps:$4 sm:$0xff]   ;;  %v5214_v62 = vld [vmem:[%s7165_s7 + $0x488] ss:$16 sps:$4 sm:$0xff]  }
 0x32e   : > { %3562 = vmatprep.subr.bf16.mxu1 %v5135_v63  ;;  %v5217_v63 = vld [vmem:[%s7165_s7 + $0x688] ss:$16 sps:$4 sm:$0xff]  }
 0x330   : > { %3522 = vmatpush1.bf16.msra.mxu0 %v5130_v59  ;;  %v5222_v59 = vld [vmem:[%s7165_s7 + $0x46c] ss:$16 sps:$4 sm:$0xff]  }
 0x331   : > { %3563 = vmatpush1.bf16.msra.mxu1 %v5133_v52  ;;  %3523 = vmatprep.subr.bf16.mxu0 %v5138_v0  ;;  %v5225_v52 = vld [vmem:[%s7165_s7 + $0x66c] ss:$16 sps:$4 sm:$0xff]   ;;  %v5220_v0 = vld [vmem:[%s7165_s7 + $0x468] ss:$16 sps:$4 sm:$0xff]  }
 0x332   : > { %3564 = vmatprep.subr.bf16.mxu1 %v5141_v1  ;;  %v5223_v1 = vld [vmem:[%s7165_s7 + $0x668] ss:$16 sps:$4 sm:$0xff]  }
 0x334   : > { %3524 = vmatpush1.bf16.msra.mxu0 %v5136_v2  ;;  %v5228_v2 = vld [vmem:[%s7165_s7 + $0x44c] ss:$16 sps:$4 sm:$0xff]  }
 0x335   : > { %3565 = vmatpush1.bf16.msra.mxu1 %v5139_v4  ;;  %3525 = vmatprep.subr.bf16.mxu0 %v5144_v5  ;;  %v5231_v4 = vld [vmem:[%s7165_s7 + $0x64c] ss:$16 sps:$4 sm:$0xff]   ;;  %v5226_v5 = vld [vmem:[%s7165_s7 + $0x448] ss:$16 sps:$4 sm:$0xff]  }
 0x336   : > { %3566 = vmatprep.subr.bf16.mxu1 %v5147_v6  ;;  %v5229_v6 = vld [vmem:[%s7165_s7 + $0x648] ss:$16 sps:$4 sm:$0xff]  }
 0x338   : > { %3526 = vmatpush1.bf16.msra.mxu0 %v5142_v7  ;;  %v5234_v7 = vld [vmem:[%s7165_s7 + $0x42c] ss:$16 sps:$4 sm:$0xff]  }
 0x339   : > { %3567 = vmatpush1.bf16.msra.mxu1 %v5145_v61  ;;  %3527 = vmatprep.subr.bf16.mxu0 %v5150_v3  ;;  %v5237_v61 = vld [vmem:[%s7165_s7 + $0x62c] ss:$16 sps:$4 sm:$0xff]   ;;  %v5232_v3 = vld [vmem:[%s7165_s7 + $0x428] ss:$16 sps:$4 sm:$0xff]  }
 0x33a   : > { %3568 = vmatprep.subr.bf16.mxu1 %v5153_v8  ;;  %v5235_v8 = vld [vmem:[%s7165_s7 + $0x628] ss:$16 sps:$4 sm:$0xff]  }
 0x33c   : > { %3528 = vmatpush2.bf16.msra.mxu0 %v5148_v54  ;;  %v5240_v54 = vld [vmem:[%s7165_s7 + $0x40c] ss:$16 sps:$4 sm:$0xff]  }
 0x33d   : > { %3569 = vmatpush2.bf16.msra.mxu1 %v5151_v26  ;;  %3529 = vmatprep.subr.bf16.mxu0 %v5156_v56  ;;  %v5243_v26 = vld [vmem:[%s7165_s7 + $0x60c] ss:$16 sps:$4 sm:$0xff]   ;;  %v5238_v56 = vld [vmem:[%s7165_s7 + $0x408] ss:$16 sps:$4 sm:$0xff]  }
 0x33e   : > { %3570 = vmatprep.subr.bf16.mxu1 %v5159_v43  ;;  %v5241_v43 = vld [vmem:[%s7165_s7 + $0x608] ss:$16 sps:$4 sm:$0xff]  }
 0x340   : > { %3530 = vmatpush2.bf16.msra.mxu0 %v5154_v10  ;;  %v5246_v10 = vld [vmem:[%s7165_s7 + $0x5ec] ss:$16 sps:$4 sm:$0xff]  }
 0x341   : > { %3571 = vmatpush2.bf16.msra.mxu1 %v5157_v12  ;;  %3531 = vmatprep.subr.bf16.mxu0 %v5162_v14  ;;  %v5249_v12 = vld [vmem:[%s7165_s7 + $0x7ec] ss:$16 sps:$4 sm:$0xff]   ;;  %v5244_v14 = vld [vmem:[%s7165_s7 + $0x5e8] ss:$16 sps:$4 sm:$0xff]  }
 0x342   : > { %3572 = vmatprep.subr.bf16.mxu1 %v5165_v19  ;;  %v5247_v19 = vld [vmem:[%s7165_s7 + $0x7e8] ss:$16 sps:$4 sm:$0xff]  }
 0x344   : > { %3532 = vmatpush2.bf16.msra.mxu0 %v5160_v47  ;;  %v5252_v47 = vld [vmem:[%s7165_s7 + $0x5cc] ss:$16 sps:$4 sm:$0xff]  }
 0x345   : > { %3573 = vmatpush2.bf16.msra.mxu1 %v5163_v48  ;;  %3533 = vmatprep.subr.bf16.mxu0 %v5168_v17  ;;  %v5255_v48 = vld [vmem:[%s7165_s7 + $0x7cc] ss:$16 sps:$4 sm:$0xff]   ;;  %v5250_v17 = vld [vmem:[%s7165_s7 + $0x5c8] ss:$16 sps:$4 sm:$0xff]  }
 0x346   : > { %3574 = vmatprep.subr.bf16.mxu1 %v5171_v11  ;;  %v5253_v11 = vld [vmem:[%s7165_s7 + $0x7c8] ss:$16 sps:$4 sm:$0xff]  }
 0x348   : > { %3534 = vmatpush2.bf16.msra.mxu0 %v5166_v20  ;;  %v5258_v20 = vld [vmem:[%s7165_s7 + $0x5ac] ss:$16 sps:$4 sm:$0xff]  }
 0x349   : > { %3575 = vmatpush2.bf16.msra.mxu1 %v5169_v55  ;;  %3535 = vmatprep.subr.bf16.mxu0 %v5174_v21  ;;  %v5261_v55 = vld [vmem:[%s7165_s7 + $0x7ac] ss:$16 sps:$4 sm:$0xff]   ;;  %v5256_v21 = vld [vmem:[%s7165_s7 + $0x5a8] ss:$16 sps:$4 sm:$0xff]  }
 0x34a   : > { %3576 = vmatprep.subr.bf16.mxu1 %v5177_v22  ;;  %v5259_v22 = vld [vmem:[%s7165_s7 + $0x7a8] ss:$16 sps:$4 sm:$0xff]  }
 0x34c   : > { %3536 = vmatpush2.bf16.msra.mxu0 %v5172_v27  ;;  %v5264_v27 = vld [vmem:[%s7165_s7 + $0x58c] ss:$16 sps:$4 sm:$0xff]  }
 0x34d   : > { %3577 = vmatpush2.bf16.msra.mxu1 %v5175_v23  ;;  %3537 = vmatprep.subr.bf16.mxu0 %v5180_v28  ;;  %v5267_v23 = vld [vmem:[%s7165_s7 + $0x78c] ss:$16 sps:$4 sm:$0xff]   ;;  %v5262_v28 = vld [vmem:[%s7165_s7 + $0x588] ss:$16 sps:$4 sm:$0xff]  }
 0x34e   : > { %3578 = vmatprep.subr.bf16.mxu1 %v5183_v24  ;;  %v5265_v24 = vld [vmem:[%s7165_s7 + $0x788] ss:$16 sps:$4 sm:$0xff]  }
 0x350   : > { %3538 = vmatpush2.bf16.msra.mxu0 %v5178_v29  ;;  %v5270_v29 = vld [vmem:[%s7165_s7 + $0x56c] ss:$16 sps:$4 sm:$0xff]  }
 0x351   : > { %3579 = vmatpush2.bf16.msra.mxu1 %v5181_v30  ;;  %3539 = vmatprep.subr.bf16.mxu0 %v5186_v32  ;;  %v5273_v30 = vld [vmem:[%s7165_s7 + $0x76c] ss:$16 sps:$4 sm:$0xff]   ;;  %v5268_v32 = vld [vmem:[%s7165_s7 + $0x568] ss:$16 sps:$4 sm:$0xff]  }
 0x352   : > { %3580 = vmatprep.subr.bf16.mxu1 %v5189_v31  ;;  %v5271_v31 = vld [vmem:[%s7165_s7 + $0x768] ss:$16 sps:$4 sm:$0xff]  }
 0x354   : > { %3540 = vmatpush2.bf16.msra.mxu0 %v5184_v9  ;;  %v5276_v9 = vld [vmem:[%s7165_s7 + $0x54c] ss:$16 sps:$4 sm:$0xff]  }
 0x355   : > { %3581 = vmatpush2.bf16.msra.mxu1 %v5187_v25  ;;  %3541 = vmatprep.subr.bf16.mxu0 %v5192_v40  ;;  %v5279_v25 = vld [vmem:[%s7165_s7 + $0x74c] ss:$16 sps:$4 sm:$0xff]   ;;  %v5274_v40 = vld [vmem:[%s7165_s7 + $0x548] ss:$16 sps:$4 sm:$0xff]  }
 0x356   : > { %3582 = vmatprep.subr.bf16.mxu1 %v5195_v45  ;;  %v5277_v45 = vld [vmem:[%s7165_s7 + $0x748] ss:$16 sps:$4 sm:$0xff]  }
 0x358   : > { %3542 = vmatpush2.bf16.msra.mxu0 %v5190_v41  ;;  %v5282_v41 = vld [vmem:[%s7165_s7 + $0x52c] ss:$16 sps:$4 sm:$0xff]  }
 0x359   : > { %3583 = vmatpush2.bf16.msra.mxu1 %v5193_v13  ;;  %3593 = vmatprep.subr.bf16.mxu0 %v5198_v49  ;;  %v5285_v13 = vld [vmem:[%s7165_s7 + $0x72c] ss:$16 sps:$4 sm:$0xff]   ;;  %v5280_v49 = vld [vmem:[%s7165_s7 + $0x528] ss:$16 sps:$4 sm:$0xff]  }
 0x35a   : > { %3634 = vmatprep.subr.bf16.mxu1 %v5201_v18  ;;  %v5283_v18 = vld [vmem:[%s7165_s7 + $0x728] ss:$16 sps:$4 sm:$0xff]  }
 0x35b   : > { %3544 = vmatmul.mubr.bf16.vlgmr.msra.gmra.mxu0 %v6245_v15  ;;  %v5210_v15 = vld [vmem:[%s7165_s7 + $0x4ac] ss:$16 sps:$4 sm:$0xff]  }
 0x35c   : > { %3585 = vmatmul.mubr.bf16.vlgmr.msra.gmra.mxu1 %v6247_v36  ;;  %3594 = vmatpush1.bf16.msra.mxu0 %v5196_v50  ;;  %v5213_v36 = vld [vmem:[%s7165_s7 + $0x6ac] ss:$16 sps:$4 sm:$0xff]  }
 0x35d   : > { %3625 = vmatprep.mubr.bf16.mxu0 %v6259_v16  ;;  %3635 = vmatpush1.bf16.msra.mxu1 %v5199_v46  ;;  %v5208_v16 = vld [vmem:[%s7165_s7 + $0x4a8] ss:$16 sps:$4 sm:$0xff]   ;;  %v5288_v50 = vld [vmem:[%s7165_s7 + $0x50c] ss:$16 sps:$4 sm:$0xff]  }
 0x35e   : > { %3666 = vmatprep.mubr.bf16.mxu1 %v6261_v37  ;;  %3595 = vmatprep.subr.bf16.mxu0 %v5204_v42  ;;  %v5216_v37 = vld [vmem:[%s7165_s7 + $0x48c] ss:$16 sps:$4 sm:$0xff]   ;;  %v5286_v42 = vld [vmem:[%s7165_s7 + $0x508] ss:$16 sps:$4 sm:$0xff]  }
 0x35f   : > { %3636 = vmatprep.subr.bf16.mxu1 %v5207_v53  ;;  %v5291_v46 = vld [vmem:[%s7165_s7 + $0x70c] ss:$16 sps:$4 sm:$0xff]   ;;  %v5289_v53 = vld [vmem:[%s7165_s7 + $0x708] ss:$16 sps:$4 sm:$0xff]  }
 0x360   : > { %3596 = vmatpush1.bf16.msra.mxu0 %v5202_v57  ;;  %v5294_v57 = vld [vmem:[%s7167_s9 + $0x74] ss:$8 sps:$4 sm:$0xff]  }
 0x361   : > { %3637 = vmatpush1.bf16.msra.mxu1 %v5205_v58  ;;  %3597 = vmatprep.subr.bf16.mxu0 %v5210_v15  ;;  %v5292_v58 = vld [vmem:[%s7167_s9 + $0x70] ss:$8 sps:$4 sm:$0xff]   ;;  %v5297_v15 = vld [vmem:[%s7167_s9 + $0x64] ss:$8 sps:$4 sm:$0xff]  }
 0x362   : > { %3638 = vmatprep.subr.bf16.mxu1 %v5213_v36 }
 0x364   : > { %3598 = vmatpush1.bf16.msra.mxu0 %v5208_v16 }
 0x365   : > { %3639 = vmatpush1.bf16.msra.mxu1 %v5211_v51  ;;  %3599 = vmatprep.subr.bf16.mxu0 %v5216_v37  ;;  %v5295_v51 = vld [vmem:[%s7167_s9 + $0x60] ss:$8 sps:$4 sm:$0xff]  }
 0x366   : > { %3640 = vmatprep.subr.bf16.mxu1 %v5219_v60 }
 0x368   : > { %3600 = vmatpush1.bf16.msra.mxu0 %v5214_v62 }
 0x369   : > { %3641 = vmatpush1.bf16.msra.mxu1 %v5217_v63  ;;  %3601 = vmatprep.subr.bf16.mxu0 %v5222_v59 }
 0x36a   : > { %3642 = vmatprep.subr.bf16.mxu1 %v5225_v52 }
 0x36c   : > { %3602 = vmatpush1.bf16.msra.mxu0 %v5220_v0  ;;  %v5303_v0 = vld [vmem:[%s7167_s9 + $0x44] ss:$8 sps:$4 sm:$0xff]  }
 0x36d   : > { %3643 = vmatpush1.bf16.msra.mxu1 %v5223_v1  ;;  %3603 = vmatprep.subr.bf16.mxu0 %v5228_v2  ;;  %v5340_v1 = vld [vmem:[%s7167_s9 + $0x170] ss:$8 sps:$4 sm:$0xff]   ;;  %v5342_v2 = vld [vmem:[%s7167_s9 + $0x174] ss:$8 sps:$4 sm:$0xff]  }
 0x36e   : > { %3644 = vmatprep.subr.bf16.mxu1 %v5231_v4  ;;  %v5345_v4 = vld [vmem:[%s7167_s9 + $0x164] ss:$8 sps:$4 sm:$0xff]  }
 0x370   : > { %3604 = vmatpush1.bf16.msra.mxu0 %v5226_v5  ;;  %v5301_v5 = vld [vmem:[%s7167_s9 + $0x40] ss:$8 sps:$4 sm:$0xff]  }
 0x371   : > { %3645 = vmatpush1.bf16.msra.mxu1 %v5229_v6  ;;  %3605 = vmatprep.subr.bf16.mxu0 %v5234_v7  ;;  %v5306_v6 = vld [vmem:[%s7167_s9 + $0x34] ss:$8 sps:$4 sm:$0xff]   ;;  %v5343_v7 = vld [vmem:[%s7167_s9 + $0x160] ss:$8 sps:$4 sm:$0xff]  }
 0x372   : > { %3646 = vmatprep.subr.bf16.mxu1 %v5237_v61  ;;  %v5348_v61 = vld [vmem:[%s7167_s9 + $0x154] ss:$8 sps:$4 sm:$0xff]  }
 0x374   : > { %3606 = vmatpush1.bf16.msra.mxu0 %v5232_v3  ;;  %v5304_v3 = vld [vmem:[%s7167_s9 + $0x30] ss:$8 sps:$4 sm:$0xff]  }
 0x375   : > { %3647 = vmatpush1.bf16.msra.mxu1 %v5235_v8  ;;  %3607 = vmatprep.subr.bf16.mxu0 %v5240_v54  ;;  %v5309_v8 = vld [vmem:[%s7167_s9 + $0x24] ss:$8 sps:$4 sm:$0xff]   ;;  %v5346_v54 = vld [vmem:[%s7167_s9 + $0x150] ss:$8 sps:$4 sm:$0xff]  }
 0x376   : > { %3648 = vmatprep.subr.bf16.mxu1 %v5243_v26  ;;  %v5351_v26 = vld [vmem:[%s7167_s9 + $0x144] ss:$8 sps:$4 sm:$0xff]  }
 0x378   : > { %3608 = vmatpush1.bf16.msra.mxu0 %v5238_v56  ;;  %v5307_v56 = vld [vmem:[%s7167_s9 + $0x20] ss:$8 sps:$4 sm:$0xff]  }
 0x379   : > { %3649 = vmatpush1.bf16.msra.mxu1 %v5241_v43  ;;  %3609 = vmatprep.subr.bf16.mxu0 %v5246_v10  ;;  %v5312_v43 = vld [vmem:[%s7167_s9 + $0x14] ss:$8 sps:$4 sm:$0xff]   ;;  %v5349_v10 = vld [vmem:[%s7167_s9 + $0x140] ss:$8 sps:$4 sm:$0xff]  }
 0x37a   : > { %3650 = vmatprep.subr.bf16.mxu1 %v5249_v12  ;;  %v5354_v12 = vld [vmem:[%s7167_s9 + $0x134] ss:$8 sps:$4 sm:$0xff]  }
 0x37c   : > { %3610 = vmatpush2.bf16.msra.mxu0 %v5244_v14  ;;  %v5310_v14 = vld [vmem:[%s7167_s9 + $0x10] ss:$8 sps:$4 sm:$0xff]  }
 0x37d   : > { %3651 = vmatpush2.bf16.msra.mxu1 %v5247_v19  ;;  %3611 = vmatprep.subr.bf16.mxu0 %v5252_v47  ;;  %v5315_v19 = vld [vmem:[%s7167_s9 + $0x4] ss:$8 sps:$4 sm:$0xff]   ;;  %v5352_v47 = vld [vmem:[%s7167_s9 + $0x130] ss:$8 sps:$4 sm:$0xff]  }
 0x37e   : > { %3652 = vmatprep.subr.bf16.mxu1 %v5255_v48  ;;  %v5357_v48 = vld [vmem:[%s7167_s9 + $0x124] ss:$8 sps:$4 sm:$0xff]  }
 0x380   : > { %3612 = vmatpush2.bf16.msra.mxu0 %v5250_v17  ;;  %v5313_v17 = vld [vmem:[%s7167_s9] ss:$8 sps:$4 sm:$0xff]  }
 0x381   : > { %3653 = vmatpush2.bf16.msra.mxu1 %v5253_v11  ;;  %3613 = vmatprep.subr.bf16.mxu0 %v5258_v20  ;;  %v5318_v11 = vld [vmem:[%s7167_s9 + $0xf4] ss:$8 sps:$4 sm:$0xff]   ;;  %v5355_v20 = vld [vmem:[%s7167_s9 + $0x120] ss:$8 sps:$4 sm:$0xff]  }
 0x382   : > { %3654 = vmatprep.subr.bf16.mxu1 %v5261_v55  ;;  %v5360_v55 = vld [vmem:[%s7167_s9 + $0x114] ss:$8 sps:$4 sm:$0xff]  }
 0x384   : > { %3614 = vmatpush2.bf16.msra.mxu0 %v5256_v21  ;;  %v5316_v21 = vld [vmem:[%s7167_s9 + $0xf0] ss:$8 sps:$4 sm:$0xff]  }
 0x385   : > { %3655 = vmatpush2.bf16.msra.mxu1 %v5259_v22  ;;  %3615 = vmatprep.subr.bf16.mxu0 %v5264_v27  ;;  %v5321_v22 = vld [vmem:[%s7167_s9 + $0xe4] ss:$8 sps:$4 sm:$0xff]   ;;  %v5358_v27 = vld [vmem:[%s7167_s9 + $0x110] ss:$8 sps:$4 sm:$0xff]  }
 0x386   : > { %3656 = vmatprep.subr.bf16.mxu1 %v5267_v23  ;;  %v5363_v23 = vld [vmem:[%s7167_s9 + $0x104] ss:$8 sps:$4 sm:$0xff]  }
 0x388   : > { %3616 = vmatpush2.bf16.msra.mxu0 %v5262_v28  ;;  %v5319_v28 = vld [vmem:[%s7167_s9 + $0xe0] ss:$8 sps:$4 sm:$0xff]  }
 0x389   : > { %3657 = vmatpush2.bf16.msra.mxu1 %v5265_v24  ;;  %3617 = vmatprep.subr.bf16.mxu0 %v5270_v29  ;;  %v5324_v24 = vld [vmem:[%s7167_s9 + $0xd4] ss:$8 sps:$4 sm:$0xff]   ;;  %v5361_v29 = vld [vmem:[%s7167_s9 + $0x100] ss:$8 sps:$4 sm:$0xff]  }
 0x38a   : > { %3658 = vmatprep.subr.bf16.mxu1 %v5273_v30  ;;  %v5366_v30 = vld [vmem:[%s7167_s9 + $0x1f4] ss:$8 sps:$4 sm:$0xff]  }
 0x38c   : > { %3618 = vmatpush2.bf16.msra.mxu0 %v5268_v32  ;;  %v5322_v32 = vld [vmem:[%s7167_s9 + $0xd0] ss:$8 sps:$4 sm:$0xff]  }
 0x38d   : > { %3659 = vmatpush2.bf16.msra.mxu1 %v5271_v31  ;;  %3619 = vmatprep.subr.bf16.mxu0 %v5276_v9  ;;  %v5327_v31 = vld [vmem:[%s7167_s9 + $0xc4] ss:$8 sps:$4 sm:$0xff]   ;;  %v5364_v9 = vld [vmem:[%s7167_s9 + $0x1f0] ss:$8 sps:$4 sm:$0xff]  }
 0x38e   : > { %3660 = vmatprep.subr.bf16.mxu1 %v5279_v25  ;;  %v5369_v25 = vld [vmem:[%s7167_s9 + $0x1e4] ss:$8 sps:$4 sm:$0xff]  }
 0x390   : > { %3620 = vmatpush2.bf16.msra.mxu0 %v5274_v40  ;;  %v5325_v40 = vld [vmem:[%s7167_s9 + $0xc0] ss:$8 sps:$4 sm:$0xff]  }
 0x391   : > { %3661 = vmatpush2.bf16.msra.mxu1 %v5277_v45  ;;  %3621 = vmatprep.subr.bf16.mxu0 %v5282_v41  ;;  %v5330_v45 = vld [vmem:[%s7167_s9 + $0xb4] ss:$8 sps:$4 sm:$0xff]   ;;  %v5367_v41 = vld [vmem:[%s7167_s9 + $0x1e0] ss:$8 sps:$4 sm:$0xff]  }
 0x392   : > { %3662 = vmatprep.subr.bf16.mxu1 %v5285_v13  ;;  %v5372_v13 = vld [vmem:[%s7167_s9 + $0x1d4] ss:$8 sps:$4 sm:$0xff]  }
 0x394   : > { %3622 = vmatpush2.bf16.msra.mxu0 %v5280_v49  ;;  %v5328_v49 = vld [vmem:[%s7167_s9 + $0xb0] ss:$8 sps:$4 sm:$0xff]  }
 0x395   : > { %3663 = vmatpush2.bf16.msra.mxu1 %v5283_v18  ;;  %3623 = vmatprep.subr.bf16.mxu0 %v5288_v50  ;;  %v5333_v18 = vld [vmem:[%s7167_s9 + $0xa4] ss:$8 sps:$4 sm:$0xff]   ;;  %v5370_v50 = vld [vmem:[%s7167_s9 + $0x1d0] ss:$8 sps:$4 sm:$0xff]  }
 0x396   : > { %3664 = vmatprep.subr.bf16.mxu1 %v5291_v46  ;;  %v5375_v46 = vld [vmem:[%s7167_s9 + $0x1c4] ss:$8 sps:$4 sm:$0xff]  }
 0x398   : > { %3624 = vmatpush2.bf16.msra.mxu0 %v5286_v42  ;;  %v5331_v42 = vld [vmem:[%s7167_s9 + $0xa0] ss:$8 sps:$4 sm:$0xff]  }
 0x399   : > { %3665 = vmatpush2.bf16.msra.mxu1 %v5289_v53  ;;  %4014 = vmatprep.subr.bf16.mxu0 %v5294_v57  ;;  %v5336_v53 = vld [vmem:[%s7167_s9 + $0x94] ss:$8 sps:$4 sm:$0xff]   ;;  %v5373_v57 = vld [vmem:[%s7167_s9 + $0x1c0] ss:$8 sps:$4 sm:$0xff]  }
 0x39a   : > { %4055 = vmatprep.subr.bf16.mxu1 %v5342_v2 }
 0x39b   : > { %3626 = vmatmul.mubr.bf16.vlgmr.msra.gmra.mxu0 %v6454_v33  ;;  %v6851_v36 = vpop.f32.mrf.mxu0  ;;  %v6853_v16 = vpop.f32.mrf.mxu1  ;;  %v5300_v33 = vld [vmem:[%s7167_s9 + $0x54] ss:$8 sps:$4 sm:$0xff]  }
 0x39c   : > { %3667 = vmatmul.mubr.bf16.vlgmr.msra.gmra.mxu1 %v6456_v44  ;;  %4015 = vmatpush1.bf16.msra.mxu0 %v5292_v58  ;;  %v5298_v44 = vld [vmem:[%s7167_s9 + $0x50] ss:$8 sps:$4 sm:$0xff]   ;;  %v5378_v58 = vld [vmem:[%s7167_s9 + $0x1b4] ss:$8 sps:$4 sm:$0xff]  }
 0x39d   : > { %v6859_v37 = vpop.f32.mrf.mxu0  ;;  %v6861_v60 = vpop.f32.mrf.mxu1  ;;  %4016 = vmatprep.subr.bf16.mxu0 %v5297_v15  ;;  %4056 = vmatpush1.bf16.msra.mxu1 %v5340_v1  ;;  %v7016_v15 = vld [vmem:[%s7166_s8] sm:$0xf] }
 0x39e   : > { %4057 = vmatprep.subr.bf16.mxu1 %v5345_v4 }
 0x39f   : > { %v3385_v62 = vpop.f32.mrf.mxu0  ;;  %v3426_v63 = vpop.f32.mrf.mxu1 }
 0x3a0   : > { %4017 = vmatpush1.bf16.msra.mxu0 %v5295_v51  ;;  %v5334_v51 = vld [vmem:[%s7167_s9 + $0x90] ss:$8 sps:$4 sm:$0xff]   ;;  %v3330_v63 = vrot.slane %v7016_v15, %v6088_v38 }
 0x3a1   : > { %v3386_v59 = vpop.f32.mrf.mxu0  ;;  %v3427_v52 = vpop.f32.mrf.mxu1  ;;  %4018 = vmatprep.subr.bf16.mxu0 %v5300_v33  ;;  %4058 = vmatpush1.bf16.msra.mxu1 %v5343_v7  ;;  %v5339_v33 = vld [vmem:[%s7167_s9 + $0x84] ss:$8 sps:$4 sm:$0xff]   ;;  %v5376_v62 = vld [vmem:[%s7167_s9 + $0x1b0] ss:$8 sps:$4 sm:$0xff]  }
 0x3a2   : > { %4059 = vmatprep.subr.bf16.mxu1 %v5348_v61  ;;  %v5337_v59 = vld [vmem:[%s7167_s9 + $0x80] ss:$8 sps:$4 sm:$0xff]   ;;  %v3382_v52 = vadd.f32 %v6851_v36, %v3330_v63 }
 0x3a3   : > { %v5379_v61 = vld [vmem:[%s7167_s9 + $0x1a0] ss:$8 sps:$4 sm:$0xff]  }
 0x3a4   : > { %4019 = vmatpush1.bf16.msra.mxu0 %v5298_v44  ;;  %v3334_v44 = vrot.slane %v7016_v15, %v6082_v34  ;;  %v3423_v1 = vadd.f32 %v6853_v16, %v3382_v52 }
 0x3a5   : > { %4020 = vmatprep.subr.bf16.mxu0 %v5303_v0  ;;  %4060 = vmatpush1.bf16.msra.mxu1 %v5346_v54 }
 0x3a6   : > { %4061 = vmatprep.subr.bf16.mxu1 %v5351_v26  ;;  %v3384_v0 = vadd.f32 %v6859_v37, %v3334_v44  ;;  %v5384_v26 = vld [vmem:[%s7167_s9 + $0x194] ss:$8 sps:$4 sm:$0xff]  }
 0x3a8   : > { %4021 = vmatpush1.bf16.msra.mxu0 %v5301_v5  ;;  %v5381_v5 = vld [vmem:[%s7167_s9 + $0x1a4] ss:$8 sps:$4 sm:$0xff]  }
 0x3a9   : > { %4022 = vmatprep.subr.bf16.mxu0 %v5306_v6  ;;  %4062 = vmatpush1.bf16.msra.mxu1 %v5349_v10  ;;  %v3425_v6 = vadd.f32 %v6861_v60, %v3384_v0  ;;  %v5382_v60 = vld [vmem:[%s7167_s9 + $0x190] ss:$8 sps:$4 sm:$0xff]  }
 0x3aa   : > { %4063 = vmatprep.subr.bf16.mxu1 %v5354_v12 }
 0x3ac   : > { %4023 = vmatpush1.bf16.msra.mxu0 %v5304_v3 }
 0x3ad   : > { %4024 = vmatprep.subr.bf16.mxu0 %v5309_v8  ;;  %4064 = vmatpush1.bf16.msra.mxu1 %v5352_v47 }
 0x3ae   : > { %4065 = vmatprep.subr.bf16.mxu1 %v5357_v48  ;;  %v5385_v48 = vld [vmem:[%s7167_s9 + $0x180] ss:$8 sps:$4 sm:$0xff]  }
 0x3b0   : > { %4025 = vmatpush1.bf16.msra.mxu0 %v5307_v56 }
 0x3b1   : > { %4026 = vmatprep.subr.bf16.mxu0 %v5312_v43  ;;  %4066 = vmatpush1.bf16.msra.mxu1 %v5355_v20 }
 0x3b2   : > { %4067 = vmatprep.subr.bf16.mxu1 %v5360_v55 }
 0x3b4   : > { %4027 = vmatpush1.bf16.msra.mxu0 %v5310_v14 }
 0x3b5   : > { %4028 = vmatprep.subr.bf16.mxu0 %v5315_v19  ;;  %4068 = vmatpush1.bf16.msra.mxu1 %v5358_v27  ;;  %v5387_v19 = vld [vmem:[%s7167_s9 + $0x184] ss:$8 sps:$4 sm:$0xff]  }
 0x3b6   : > { %4069 = vmatprep.subr.bf16.mxu1 %v5363_v23 }
 0x3b8   : > { %4029 = vmatpush1.bf16.msra.mxu0 %v5313_v17 }
 0x3b9   : > { %4030 = vmatprep.subr.bf16.mxu0 %v5318_v11  ;;  %4070 = vmatpush1.bf16.msra.mxu1 %v5361_v29  ;;  %v5389_v29 = vld [vmem:[%s7169_s11 + $0x38] sm:$0xff]  }
 0x3ba   : > { %4071 = vmatprep.subr.bf16.mxu1 %v5366_v30  ;;  %v5390_v30 = vld [vmem:[%s7169_s11 + $0x70] sm:$0xff]  }
 0x3bc   : > { %4031 = vmatpush2.bf16.msra.mxu0 %v5316_v21 }
 0x3bd   : > { %4032 = vmatprep.subr.bf16.mxu0 %v5321_v22  ;;  %4072 = vmatpush2.bf16.msra.mxu1 %v5364_v9  ;;  %v5393_v9 = vld [vmem:[%s7169_s11 + $0x28] sm:$0xff]  }
 0x3be   : > { %4073 = vmatprep.subr.bf16.mxu1 %v5369_v25  ;;  %v5394_v25 = vld [vmem:[%s7169_s11 + $0x60] sm:$0xff]  }
 0x3c0   : > { %4033 = vmatpush2.bf16.msra.mxu0 %v5319_v28 }
 0x3c1   : > { %4034 = vmatprep.subr.bf16.mxu0 %v5324_v24  ;;  %4074 = vmatpush2.bf16.msra.mxu1 %v5367_v41  ;;  %v5388_v24 = vld [vmem:[%s7169_s11 + $0x78] sm:$0xff]  }
 0x3c2   : > { %4075 = vmatprep.subr.bf16.mxu1 %v5372_v13  ;;  %v5397_v41 = vld [vmem:[%s7169_s11 + $0x18] sm:$0xff]   ;;  %v5398_v13 = vld [vmem:[%s7169_s11 + $0x50] sm:$0xff]  }
 0x3c4   : > { %4035 = vmatpush2.bf16.msra.mxu0 %v5322_v32  ;;  %v5391_v32 = vld [vmem:[%s7169_s11 + $0x30] sm:$0xff]  }
 0x3c5   : > { %4036 = vmatprep.subr.bf16.mxu0 %v5327_v31  ;;  %4076 = vmatpush2.bf16.msra.mxu1 %v5370_v50  ;;  %v5392_v31 = vld [vmem:[%s7169_s11 + $0x68] sm:$0xff]   ;;  %v3342_v50 = vrot.slane %v7016_v15, %v6085_v35 }
 0x3c6   : > { %4077 = vmatprep.subr.bf16.mxu1 %v5375_v46 }
 0x3c8   : > { %4037 = vmatpush2.bf16.msra.mxu0 %v5325_v40  ;;  %v5395_v40 = vld [vmem:[%s7169_s11 + $0x20] sm:$0xff]  }
 0x3c9   : > { %4038 = vmatprep.subr.bf16.mxu0 %v5330_v45  ;;  %4078 = vmatpush2.bf16.msra.mxu1 %v5373_v57  ;;  %v5396_v45 = vld [vmem:[%s7169_s11 + $0x58] sm:$0xff]  }
 0x3ca   : > { %4079 = vmatprep.subr.bf16.mxu1 %v5378_v58 }
 0x3cc   : > { %4039 = vmatpush2.bf16.msra.mxu0 %v5328_v49  ;;  %v5399_v49 = vld [vmem:[%s7169_s11 + $0x10] sm:$0xff]  }
 0x3cd   : > { %4040 = vmatprep.subr.bf16.mxu0 %v5333_v18  ;;  %4080 = vmatpush2.bf16.msra.mxu1 %v5376_v62  ;;  %v3338_v18 = vrot.slane %v7016_v15, %v6091_v39 }
 0x3ce   : > { %4081 = vmatprep.subr.bf16.mxu1 %v5381_v5 }
 0x3d0   : > { %4041 = vmatpush2.bf16.msra.mxu0 %v5331_v42 }
 0x3d1   : > { %4042 = vmatprep.subr.bf16.mxu0 %v5336_v53  ;;  %4082 = vmatpush2.bf16.msra.mxu1 %v5379_v61  ;;  %v5400_v61 = vld [vmem:[%s7169_s11 + $0x48] sm:$0xff]  }
 0x3d2   : > { %4083 = vmatprep.subr.bf16.mxu1 %v5384_v26 }
 0x3d4   : > { %4043 = vmatpush2.bf16.msra.mxu0 %v5334_v51 }
 0x3d5   : > { %4044 = vmatprep.subr.bf16.mxu0 %v5339_v33  ;;  %4084 = vmatpush2.bf16.msra.mxu1 %v5382_v60 }
 0x3d6   : > { %4085 = vmatprep.subr.bf16.mxu1 %v5387_v19 }
 0x3d8   : > { %4045 = vmatpush2.bf16.msra.mxu0 %v5337_v59 }
 0x3d9   : > { %4086 = vmatpush2.bf16.msra.mxu1 %v5385_v48  ;;  %4798 = vmatprep.subr.bf16.mxu0 %v5388_v24 }
 0x3db   : > { %v3463_v2 = vpop.f32.mrf.mxu0  ;;  %v3504_v4 = vpop.f32.mrf.mxu1 }
 0x3dc   : > { %v3464_v7 = vadd.f32 %v3463_v2, %v3423_v1 }
 0x3dd   : > { %v3465_v3 = vpop.f32.mrf.mxu0  ;;  %v3506_v36 = vpop.f32.mrf.mxu1 }
 0x3de   : > { %v3505_v37 = vadd.f32 %v3504_v4, %v3464_v7  ;;  %v3466_v8 = vadd.f32 %v3465_v3, %v3425_v6  ;;  %v5401_v3 = vld [vmem:[%s7169_s11 + $0x8] sm:$0xff]  }
 0x3df   : > { %v3467_v16 = vpop.f32.mrf.mxu0  ;;  %v3508_v54 = vpop.f32.mrf.mxu1 }
 0x3e0   : > { %v3507_v56 = vadd.f32 %v3506_v36, %v3466_v8  ;;  %v3675_v43 = vmax.f32 %v3505_v37, 0.0  ;;  %v5402_v8 = vld [vmem:[%s7169_s11 + $0x40] sm:$0xff]  }
 0x3e1   : > { %v3468_v10 = vpop.f32.mrf.mxu0  ;;  %v3509_v12 = vpop.f32.mrf.mxu1  ;;  %v5403_v16 = vld [vmem:[%s7169_s11] sm:$0xff]  }
 0x3e2   : > { %v3676_v14 = vmax.f32 %v3507_v56, 0.0  ;;  %v3679_v17 = vpack.c.bf16 %v3675_v43, %v3675_v43  ;;  %v1963_v54 = vld [vmem:[%s7168_s10] sm:$0x3] }
 0x3e3   : > { %v4007_v26 = vrot.slane %v1963_v54, %v6088_v38  ;;  %v4011_v56 = vrot.slane %v1963_v54, %v6082_v34  ;;  %v1996_v34 = vld [vmem:[%s7170_s12] sm:$0x1] }
 0x3e4   : > { %v3680_v47 = vpack.c.bf16 %v3676_v14, %v3676_v14 }
 0x3e6   : > { %4046 = vmatprep.mubr.bf16.mxu0 %v3680_v47 }
 0x3e7   : > { %4047 = vmatmul.mubr.bf16.vlgmr.msra.gmra.mxu0 %v3679_v17 }
 0x3e8   : > { %4799 = vmatpush3.bf16.msra.mxu0 %v5389_v29 }
 0x3e9   : > { %4800 = vmatprep.subr.bf16.mxu0 %v5390_v30 }
 0x3ec   : > { %4801 = vmatpush3.bf16.msra.mxu0 %v5391_v32 }
 0x3ed   : > { %4802 = vmatprep.subr.bf16.mxu0 %v5392_v31 }
 0x3f0   : > { %4803 = vmatpush3.bf16.msra.mxu0 %v5393_v9 }
 0x3f1   : > { %4804 = vmatprep.subr.bf16.mxu0 %v5394_v25 }
 0x3f4   : > { %4805 = vmatpush3.bf16.msra.mxu0 %v5395_v40 }
 0x3f5   : > { %4806 = vmatprep.subr.bf16.mxu0 %v5396_v45 }
 0x3f8   : > { %4807 = vmatpush3.bf16.msra.mxu0 %v5397_v41 }
 0x3f9   : > { %4808 = vmatprep.subr.bf16.mxu0 %v5398_v13 }
 0x3fc   : > { %4809 = vmatpush3.bf16.msra.mxu0 %v5399_v49 }
 0x3fd   : > { %4810 = vmatprep.subr.bf16.mxu0 %v5400_v61 }
 0x400   : > { %4811 = vmatpush3.bf16.msra.mxu0 %v5401_v3 }
 0x401   : > { %4812 = vmatprep.subr.bf16.mxu0 %v5402_v8 }
 0x404   : > { %4813 = vmatpush3.bf16.msra.mxu0 %v5403_v16 }
 0x41b   : > { %v3545_v11 = vpop.f32.mrf.mxu0 }
 0x41c   : > { %v3586_v20 = vpop.f32.mrf.mxu1  ;;  %v3546_v46 = vadd.f32 %v3545_v11, %v3338_v18 }
 0x41d   : > { %v3547_v55 = vpop.f32.mrf.mxu0 }
 0x41e   : > { %v3588_v21 = vpop.f32.mrf.mxu1  ;;  %v3548_v42 = vadd.f32 %v3547_v55, %v3342_v50  ;;  %v3587_v53 = vadd.f32 %v3586_v20, %v3546_v46 }
 0x41f   : > { %v3549_v22 = vpop.f32.mrf.mxu0 }
 0x420   : > { %v3590_v27 = vpop.f32.mrf.mxu1  ;;  %v3589_v58 = vadd.f32 %v3588_v21, %v3548_v42 }
 0x421   : > { %v3550_v23 = vpop.f32.mrf.mxu0 }
 0x422   : > { %v3591_v28 = vpop.f32.mrf.mxu1 }
 0x45b   : > { %v3627_v57 = vpop.f32.mrf.mxu0 }
 0x45c   : > { %v3628_v51 = vadd.f32 %v3627_v57, %v3587_v53  ;;  %v3668_v33 = vpop.f32.mrf.mxu1 }
 0x45d   : > { %v3629_v62 = vpop.f32.mrf.mxu0 }
 0x45e   : > { %v3669_v63 = vadd.f32 %v3668_v33, %v3628_v51  ;;  %v3630_v44 = vadd.f32 %v3629_v62, %v3589_v58  ;;  %v3670_v59 = vpop.f32.mrf.mxu1 }
 0x45f   : > { %v3631_v52 = vpop.f32.mrf.mxu0 }
 0x460   : > { %v3671_v0 = vadd.f32 %v3670_v59, %v3630_v44  ;;  %v3672_v1 = vpop.f32.mrf.mxu1  ;;  %v3677_v2 = vmax.f32 %v3669_v63, 0.0 }
 0x461   : > { %v3632_v4 = vpop.f32.mrf.mxu0 }
 0x462   : > { %v3678_v39 = vmax.f32 %v3671_v0, 0.0  ;;  %v3673_v5 = vpop.f32.mrf.mxu1  ;;  %v3681_v35 = vpack.c.bf16 %v3677_v2, %v3677_v2 }
 0x464   : > { %v3682_v6 = vpack.c.bf16 %v3678_v39, %v3678_v39 }
 0x466   : > { %4087 = vmatprep.mubr.bf16.mxu1 %v3682_v6 }
 0x467   : > { %4088 = vmatmul.mubr.bf16.vlgmr.msra.gmra.mxu1 %v3681_v35 }
 0x4a7   : > { %v4048_v15 = vpop.f32.mrf.mxu0 }
 0x4a8   : > { %v4049_v60 = vadd.f32 %v4048_v15, %v4007_v26 }
 0x4a9   : > { %v4050_v7 = vpop.f32.mrf.mxu0 }
 0x4aa   : > { %v4051_v10 = vadd.f32 %v4050_v7, %v4011_v56 }
 0x4ab   : > { %v4052_v36 = vpop.f32.mrf.mxu0 }
 0x4ad   : > { %v4053_v37 = vpop.f32.mrf.mxu0 }
 0x527   : > { %v4089_v43 = vpop.f32.mrf.mxu1 }
 0x528   : > { %v4090_v12 = vadd.f32 %v4089_v43, %v4049_v60 }
 0x529   : > { %v4091_v14 = vpop.f32.mrf.mxu1 }
 0x52a   : > { %v4092_v19 = vadd.f32 %v4091_v14, %v4051_v10  ;;  %v4096_v47 = vmax.f32 %v4090_v12, 0.0 }
 0x52b   : > { %v4093_v48 = vpop.f32.mrf.mxu1 }
 0x52c   : > { %v4097_v17 = vmax.f32 %v4092_v19, 0.0  ;;  %v4098_v55 = vpack.c.bf16 %v4096_v47, %v4096_v47 }
 0x52d   : > { %v4094_v11 = vpop.f32.mrf.mxu1 }
 0x52e   : > { %v4099_v20 = vpack.c.bf16 %v4097_v17, %v4097_v17 }
 0x530   : > { %4228 = vmatprep.mubr.bf16.mxu0 %v4099_v20 }
 0x531   : > { %4229 = vmatmul.mubr.bf16.vlgmr.msra.gmra.mxu0 %v4098_v55 }
 0x5f1   : > { %v4814_v21 = vpop.f32.mrf.mxu0 }
 0x5f3   : > { %v4815_v22 = vpop.f32.mrf.mxu0 }
 0x5f4   : > { %v4816_v38 = vadd.f32 %v4815_v22, %v4814_v21 }
 0x5f5   : > { %v4817_v27 = vpop.f32.mrf.mxu0 }
 0x5f6   : > { %v4231_v23 = vadd.f32 %v4816_v38, %v1996_v34 }
 0x5f7   : > { %v4818_v28 = vpop.f32.mrf.mxu0 }
 0x5f8   : > { %v4237_v24 = vsel %vm4236_vm4, %v4231_v23, -inf }
 0x5f9   : > { %4238 = vmax.xlane.f32.xlu0 %v4237_v24 }
 0x682   : > { %v4239_v29 = vpop.xlane.xlu0 %4238 }
 0x683   : > { %v4240_v30 = vsub.f32 %v4231_v23, %v4239_v29 }
 0x685   : > { %v4241_v32 = vmul.f32 1.442695, %v4240_v30 }
 0x687   : > { %5404 = vpow2.f32 %v4241_v32 }
 0x694   : > { %v5405_v31 = vpop.eup %5404 }
 0x695   : > { %v4243_v9 = vsel %vm4236_vm4, %v5405_v31, 0.0 }
 0x696   : > { %4244 = vadd.xlane.f32.xlu0 %v4243_v9 }
 0x71f   : > { %v4245_v25 = vpop.xlane.xlu0 %4244 }
 0x720   : > { %5406 = vlog2.f32 %v4245_v25 }
 0x72d   : > { %v5407_v40 = vpop.eup %5406 }
 0x72e   : > { %v4247_v45 = vmul.f32 0.6931472, %v5407_v40 }
 0x730   : > { %v4248_v41 = vsub.f32 %v4240_v30, %v4247_v45 }
 0x732   : > { %4249 = vst.msk [vmem:[%s483_s25] sm:$0x1] %vm4236_vm4, %v4248_v41 }
 0x733   : > { %5421 = shalt.err (!%p5418_p5)
}
 0x734   : > { %s5422_s21 = scalar_lea.hbm %s4261_s17, 16  ;;  %s5426_s24 = scalar_lea.hbm %s7171_s13, 32 }
 0x735   : > { %p5423_p6 = scmp.ne.s32.totalorder %s4261_s17, %s5422_s21  ;;  %p5427_p10 = scmp.lt.s32.totalorder %s4261_s17, %s7171_s13 }
 0x736   : > { %p5428_p11 = scmp.lt.s32.totalorder %s5426_s24, %s5422_s21 }
 0x737   : > { %p5424_p7 = pnand %p5423_p6, %p5600_p4 }
 0x738   : > { %p5429_p12 = por %p5428_p11, %p5427_p10 }
 0x739   : > { %p5425_p9 = pneg %p5424_p7 }
 0x73b   : > { %p5430_p13 = pnand %p5429_p12, %p5425_p9 }
 0x73d   : > { %5433 = shalt.err (!%p5430_p13)
}
 0x73e   : > { %4846 = dma.vmem_to_hbm [thread:$0]  (%p5600_p4), %s4264_s14, 16, %s4261_s17, %s4251_s27  }
 0x73f PF: > { %s7185_s19 = sld [smem:[#allocation6_spill]]  ;;  %p4852_p0 = scmp.ge.s32.totalorder %s5484_s30, 2 }
 0x741   : > { %p4849_p1 = pnand %p4852_p0, %p5607_p8 }
 0x743   : > { %p4850_p2 = pneg %p4849_p1 }
 0x745   : > { %s4275_s16 = sand.u32 1, %s7185_s19  }
 0x746   : > { %s4276_s20 = scalar_lea.sflag [#allocation4], %s4275_s16 }
 0x747   : > { %5459 = dma.done.wait (%p4850_p2), %s4276_s20, 16  }
 0x748   : > { %5461 = vsyncadd (%p4850_p2), %s4276_s20, 4294967280  ;;  %s26_s30 = sadd.s32 1, %s5484_s30   ;;  %s7187_s28 = sld [smem:[#allocation7_spill]] }
 0x749   : > { %p23_p3 = scmp.ge.s32.totalorder %s26_s30, 4   ;;  %s7188_s27 = sld [smem:[#allocation11_spill]] }
 0x74a   : > { %s7189_s18 = sld [smem:[#allocation8_spill]]  ;;  %s7191_s25 = smov %s5468_s26 }
 0x74b   : > { %s7190_s29 = sld [smem:[#allocation9_spill]] }
 0x74c   :  { %25 = sbr.rel (!%p23_p3) target bundleno = 4 (0x4), region = 121 }
 0x74e   : > { %s7192_s26 = smov %s7187_s28 }
 0x750   : > { %s7193_s28 = smov %s7189_s18 }
 0x751   :  { %4280 = vsyncpa [#allocation4], 1 }
 0x752   :  { %4282 = vsyncpa [#allocation4 + $0x1], 1 }

// kernel: pointnet_forward.4
= control target key start
LH: loop header
LB: loop body
LE: loop exit
PB: predicated region body
PF: predicated region fallthrough
CT: control target
= control target key end

     0   :  { %s12547_s0 = inlined_call_operand.vmem [shape: f32[2,64,3], index: 0, kind: input, shape index: {}]   ;;  %s12548_s1 = inlined_call_operand.vmem [shape: bf16[2,3,64], index: 1, kind: input, shape index: {}]   ;;  %s12549_s2 = inlined_call_operand.hbm [shape: f32[1,64], index: 2, kind: input, shape index: {}]   ;;  %s12550_s3 = inlined_call_operand.hbm [shape: bf16[64,64], index: 3, kind: input, shape index: {}]   ;;  %s12551_s4 = inlined_call_operand.hbm [shape: f32[1,64], index: 4, kind: input, shape index: {}]   ;;  %s12552_s5 = inlined_call_operand.hbm [shape: bf16[64,128], index: 5, kind: input, shape index: {}]   ;;  %s12553_s6 = inlined_call_operand.hbm [shape: f32[1,128], index: 6, kind: input, shape index: {}]   ;;  %s12554_s7 = inlined_call_operand.vmem [shape: bf16[128,1024], index: 7, kind: input, shape index: {}]   ;;  %s12555_s8 = inlined_call_operand.hbm [shape: f32[1,1024], index: 8, kind: input, shape index: {}]   ;;  %s12556_s9 = inlined_call_operand.vmem [shape: bf16[1024,512], index: 9, kind: input, shape index: {}]   ;;  %s12557_s10 = inlined_call_operand.hbm [shape: f32[1,512], index: 10, kind: input, shape index: {}]   ;;  %s12558_s11 = inlined_call_operand.vmem [shape: bf16[512,256], index: 11, kind: input, shape index: {}]   ;;  %s12559_s12 = inlined_call_operand.hbm [shape: f32[1,256], index: 12, kind: input, shape index: {}]   ;;  %s12560_s13 = inlined_call_operand.hbm [shape: bf16[256,4096], index: 13, kind: input, shape index: {}]   ;;  %s12561_s14 = inlined_call_operand.hbm [shape: f32[1,4096], index: 14, kind: input, shape index: {}]   ;;  %s12562_s15 = inlined_call_operand.vmem [shape: f32[2,1,4096], index: 15, kind: output, shape index: {}]  }
   0x1   :  { %12568 = sst [smem:[#allocation26_spill]] %s12558_s11 }
   0x2   :  { %12569 = sst [smem:[#allocation27_spill]] %s12562_s15 }
   0x3   :  { %20 = vsyncpa [#allocation4], 0 }
   0x4   :  { %21 = vsyncpa [#allocation6], 0 }
   0x5   :  { %22 = vsyncpa [#allocation9], 0 }
   0x6   :  { %23 = vsyncpa [#allocation12], 0 }
   0x7   :  { %24 = vsyncpa [#allocation15], 0 }
   0x8   :  { %25 = vsyncpa [#allocation18], 0  ;;  %s10775_s18 = smov 0   ;;  %s10777_s19 = smov 0  }
   0x9   :  { %s10779_s20 = smov 0  }
   0xa LB: > { %12570 = sst [smem:[#allocation25_spill]] %s10676_s20  ;;  %s10678_s21 = smov [#allocation5]   ;;  %s10676_s20 = sphi %s10779_s20, %s31_s20   ;;  %s10672_s19 = sphi %s10777_s19, %s12581_s19   ;;  %s10668_s18 = sphi %s10775_s18, %s12580_s18  }
   0xb   : > { %s424_s22 = sshll.u32 %s10678_s21, 4  ;;  %s8736_s23 = sadd.s32 4294967295, %s10676_s20   ;;  %s425_s22 = int_to_ptr.vmem [resolvable:$true] %s424_s22 }
   0xc   : > { %p8738_p0 = scmp.ge.s32.totalorder %s10676_s20, 1  ;;  %p401_p1 = scmp.lt.s32.totalorder %s10676_s20, 3 }
   0xd   : > { %p10793_p2 = scmp.eq.s32.totalorder %s8736_s23, 0  ;;  %s10679_s26 = smov [#allocation8]  }
   0xe   : > { %p10797_p3 = pnand %p8738_p0, %p401_p1  ;;  %s448_s27 = sshll.u32 %s10679_s26, 4  ;;  %s10803_s27 = int_to_ptr.vmem [resolvable:$true] %s448_s27 }
   0xf   : > { %s12571_s24 = scalar_select %p10793_p2, 1, 0 }
  0x10   : > { %s12572_s25 = scalar_select %p10797_p3, 1, 0 }
  0x11   : > { %p9790_p4 = pneg %p10797_p3  ;;  %s10680_s29 = smov [#allocation11]  }
  0x12   : > { %s476_s30 = sshll.u32 %s10680_s29, 4  ;;  %s10681_s16 = smov [#allocation14]   ;;  %s10811_s30 = int_to_ptr.vmem [resolvable:$true] %s476_s30 }
  0x13   : > { %p10807_p5 = pnand %p10793_p2, %p9790_p4  ;;  %s10813_s17 = sshll.u32 %s10681_s16, 4  ;;  %s505_s17 = int_to_ptr.vmem [resolvable:$true] %s10813_s17 }
  0x14   : > { %s10381_s23 = scalar_lea.vmem %s425_s22, 512  ;;  %p10389_p10 = scmp.lt.s32.totalorder %s425_s22, %s425_s22 }
  0x15   : > { %p10817_p6 = pneg %p10807_p5  ;;  %p10382_p7 = scmp.ne.s32.totalorder %s425_s22, %s10381_s23 }
  0x16   : > { %p10390_p11 = scmp.lt.s32.totalorder %s10381_s23, %s10381_s23 }
  0x17   : > { %p10384_p8 = pnand %p10382_p7, %p10817_p6 }
  0x18   : > { %p10391_p12 = por %p10390_p11, %p10389_p10 }
  0x19   : > { %p10385_p9 = pneg %p10384_p8 }
  0x1b   : > { %p10392_p13 = pnand %p10391_p12, %p10385_p9 }
  0x1d   : > { %10395 = shalt.err (!%p10392_p13)
}
  0x1e   : > { %s10682_s26 = smov 64   ;;  %s10683_s29 = smov 4  }
  0x1f   : > { %9796 = dma.hbm_to_vmem [thread:$0]  (!%p10807_p5), %s12550_s3, 512, %s425_s22, [#allocation6], %s10682_s26, %s10682_s26, %s10683_s29  }
  0x20   : > { %s10407_s15 = scalar_lea.vmem %s10803_s27, 512  ;;  %p10415_p7 = scmp.lt.s32.totalorder %s10803_s27, %s10803_s27 }
  0x21   : > { %p10408_p0 = scmp.ne.s32.totalorder %s10803_s27, %s10407_s15  ;;  %p10416_p8 = scmp.lt.s32.totalorder %s10407_s15, %s10407_s15 }
  0x23   : > { %p10410_p1 = pnand %p10408_p0, %p10817_p6  ;;  %p10417_p9 = por %p10416_p8, %p10415_p7 }
  0x25   : > { %p10411_p4 = pneg %p10410_p1 }
  0x27   : > { %p10418_p10 = pnand %p10417_p9, %p10411_p4 }
  0x29   : > { %10421 = shalt.err (!%p10418_p10)
}
  0x2a   : > { %9802 = dma.hbm_to_vmem [thread:$0]  (!%p10807_p5), %s12552_s5, 512, %s10803_s27, [#allocation9], %s10682_s26, %s10682_s26, %s10683_s29  }
  0x2b   : > { %s10433_s20 = scalar_lea.vmem %s10811_s30, 128  ;;  %p10441_p0 = scmp.lt.s32.totalorder %s10811_s30, %s10811_s30 }
  0x2c   : > { %p10434_p11 = scmp.ne.s32.totalorder %s10811_s30, %s10433_s20  ;;  %p10442_p1 = scmp.lt.s32.totalorder %s10433_s20, %s10433_s20 }
  0x2e   : > { %p10436_p12 = pnand %p10434_p11, %p10817_p6  ;;  %p10443_p4 = por %p10442_p1, %p10441_p0 }
  0x30   : > { %p10437_p13 = pneg %p10436_p12 }
  0x32   : > { %p10444_p7 = pnand %p10443_p4, %p10437_p13 }
  0x34   : > { %10447 = shalt.err (!%p10444_p7)
}
  0x35   : > { %9808 = dma.hbm_to_vmem [thread:$0]  (!%p10807_p5), %s12555_s8, 128, %s10811_s30, [#allocation12]  }
  0x36   : > { %s10459_s22 = scalar_lea.vmem %s505_s17, 32  ;;  %p10467_p11 = scmp.lt.s32.totalorder %s505_s17, %s505_s17 }
  0x37   : > { %p10460_p8 = scmp.ne.s32.totalorder %s505_s17, %s10459_s22  ;;  %p10468_p12 = scmp.lt.s32.totalorder %s10459_s22, %s10459_s22 }
  0x39   : > { %p10462_p9 = pnand %p10460_p8, %p10817_p6  ;;  %p10469_p0 = por %p10468_p12, %p10467_p11 }
  0x3b   : > { %p10463_p10 = pneg %p10462_p9 }
  0x3d   : > { %p10470_p13 = pnand %p10469_p0, %p10463_p10 }
  0x3f   : > { %10473 = shalt.err (!%p10470_p13)
}
  0x40   : > { %9814 = dma.hbm_to_vmem [thread:$0]  (!%p10807_p5), %s12559_s12, 32, %s505_s17, [#allocation15]  }
  0x41   : > { %s43_s30 = sadd.s32 1, %s10672_s19  ;;  %s10684_s29 = smov [#allocation3]  }
  0x42   : > { %s414_s16 = sshll.u32 %s10684_s29, 4  ;;  %p45_p1 = scmp.ge.s32.totalorder %s43_s30, 2  ;;  %s415_s16 = int_to_ptr.vmem [resolvable:$true] %s414_s16 }
  0x43   : > { %s10485_s23 = scalar_lea.vmem %s415_s16, 16  ;;  %s10492_s20 = scalar_lea.vmem %s415_s16, 32 }
  0x44   : > { %p10486_p4 = scmp.ne.s32.totalorder %s415_s16, %s10485_s23  ;;  %p10493_p9 = scmp.lt.s32.totalorder %s415_s16, %s415_s16 }
  0x45   : > { %p10494_p10 = scmp.lt.s32.totalorder %s10492_s20, %s10485_s23 }
  0x46   : > { %p10488_p7 = pnand %p10486_p4, %p10817_p6 }
  0x47   : > { %p10495_p11 = por %p10494_p10, %p10493_p9 }
  0x48   : > { %p10489_p8 = pneg %p10488_p7 }
  0x4a   : > { %p10496_p12 = pnand %p10495_p11, %p10489_p8 }
  0x4c   : > { %10499 = shalt.err (!%p10496_p12)
}
  0x4d   : > { %9793 = dma.hbm_to_vmem [thread:$0]  (!%p10807_p5), %s12549_s2, 16, %s415_s16, [#allocation4]  }
  0x4e   : > { %s12583_s30 = smov (%p45_p1, %s43_s30), 0  ;;  %s10685_s15 = smov [#allocation7]  }
  0x4f   : > { %s438_s22 = sshll.u32 %s10685_s15, 4  ;;  %s10686_s27 = smov [#allocation10]   ;;  %s439_s22 = int_to_ptr.vmem [resolvable:$true] %s438_s22 }
  0x50   : > { %s462_s26 = sshll.u32 %s10686_s27, 4  ;;  %s10511_s29 = scalar_lea.vmem %s439_s22, 16  ;;  %s463_s26 = int_to_ptr.vmem [resolvable:$true] %s462_s26 }
  0x51   : > { %p10512_p0 = scmp.ne.s32.totalorder %s439_s22, %s10511_s29  ;;  %s10518_s23 = scalar_lea.vmem %s439_s22, 32 }
  0x52   : > { %p10519_p7 = scmp.lt.s32.totalorder %s439_s22, %s439_s22  ;;  %p10520_p8 = scmp.lt.s32.totalorder %s10518_s23, %s10511_s29 }
  0x53   : > { %p10514_p13 = pnand %p10512_p0, %p10817_p6 }
  0x54   : > { %p10521_p9 = por %p10520_p8, %p10519_p7 }
  0x55   : > { %p10515_p4 = pneg %p10514_p13 }
  0x57   : > { %p10522_p10 = pnand %p10521_p9, %p10515_p4 }
  0x59   : > { %10525 = shalt.err (!%p10522_p10)
}
  0x5a   : > { %9799 = dma.hbm_to_vmem [thread:$0]  (!%p10807_p5), %s12551_s4, 16, %s439_s22, [#allocation6]  }
  0x5b   : > { %s10537_s11 = scalar_lea.vmem %s463_s26, 16  ;;  %s10544_s17 = scalar_lea.vmem %s463_s26, 32 }
  0x5c   : > { %p10538_p1 = scmp.ne.s32.totalorder %s463_s26, %s10537_s11  ;;  %p10545_p0 = scmp.lt.s32.totalorder %s463_s26, %s463_s26 }
  0x5d   : > { %p10546_p13 = scmp.lt.s32.totalorder %s10544_s17, %s10537_s11 }
  0x5e   : > { %p10540_p11 = pnand %p10538_p1, %p10817_p6 }
  0x5f   : > { %p10547_p2 = por %p10546_p13, %p10545_p0 }
  0x60   : > { %p10541_p12 = pneg %p10540_p11 }
  0x62   : > { %p10548_p3 = pnand %p10547_p2, %p10541_p12 }
  0x64   : > { %10551 = shalt.err (!%p10548_p3)
}
  0x65   : > { %9805 = dma.hbm_to_vmem [thread:$0]  (!%p10807_p5), %s12553_s6, 16, %s463_s26, [#allocation9]  }
  0x66   : > { %s10687_s29 = smov [#allocation13]   ;;  %s10688_s23 = smov [#allocation16]  }
  0x67   : > { %s490_s22 = sshll.u32 %s10687_s29, 4  ;;  %s514_s16 = sshll.u32 %s10688_s23, 4  ;;  %s491_s22 = int_to_ptr.vmem [resolvable:$true] %s490_s22  ;;  %s515_s16 = int_to_ptr.vmem [resolvable:$true] %s514_s16 }
  0x68   : > { %s10563_s20 = scalar_lea.vmem %s491_s22, 64  ;;  %p10571_p2 = scmp.lt.s32.totalorder %s491_s22, %s491_s22 }
  0x69   : > { %p10564_p4 = scmp.ne.s32.totalorder %s491_s22, %s10563_s20  ;;  %p10572_p3 = scmp.lt.s32.totalorder %s10563_s20, %s10563_s20 }
  0x6b   : > { %p10566_p7 = pnand %p10564_p4, %p10817_p6  ;;  %p10573_p9 = por %p10572_p3, %p10571_p2 }
  0x6d   : > { %p10567_p8 = pneg %p10566_p7 }
  0x6f   : > { %p10574_p10 = pnand %p10573_p9, %p10567_p8 }
  0x71   : > { %10577 = shalt.err (!%p10574_p10)
}
  0x72   : > { %9811 = dma.hbm_to_vmem [thread:$0]  (!%p10807_p5), %s12557_s10, 64, %s491_s22, [#allocation12]  }
  0x73   : > { %s10589_s17 = scalar_lea.vmem %s515_s16, 65536  ;;  %p10597_p0 = scmp.lt.s32.totalorder %s515_s16, %s515_s16 }
  0x74   : > { %p10590_p1 = scmp.ne.s32.totalorder %s515_s16, %s10589_s17  ;;  %p10598_p13 = scmp.lt.s32.totalorder %s10589_s17, %s10589_s17 }
  0x76   : > { %p10592_p11 = pnand %p10590_p1, %p10817_p6  ;;  %p10599_p4 = por %p10598_p13, %p10597_p0 }
  0x78   : > { %p10593_p12 = pneg %p10592_p11 }
  0x7a   : > { %p10600_p7 = pnand %p10599_p4, %p10593_p12 }
  0x7c   : > { %10603 = shalt.err (!%p10600_p7)
}
  0x7d   : > { %s10689_s15 = smov 2048   ;;  %s10690_s27 = smov 128  }
  0x7e   : > { %9817 = dma.hbm_to_vmem [thread:$0]  (!%p10807_p5), %s12560_s13, 65536, %s515_s16, [#allocation15], %s10689_s15, %s10689_s15, %s10690_s27  }
  0x7f   : > { %s10691_s22 = smov [#allocation17]  }
  0x80   : > { %s528_s20 = sshll.u32 %s10691_s22, 4  ;;  %s529_s20 = int_to_ptr.vmem [resolvable:$true] %s528_s20 }
  0x81   : > { %s10615_s11 = scalar_lea.vmem %s529_s20, 512  ;;  %p10623_p9 = scmp.lt.s32.totalorder %s529_s20, %s529_s20 }
  0x82   : > { %p10616_p8 = scmp.ne.s32.totalorder %s529_s20, %s10615_s11  ;;  %p10624_p10 = scmp.lt.s32.totalorder %s10615_s11, %s10615_s11 }
  0x84   : > { %p10618_p2 = pnand %p10616_p8, %p10817_p6  ;;  %p10625_p1 = por %p10624_p10, %p10623_p9 }
  0x86   : > { %p10619_p3 = pneg %p10618_p2 }
  0x88   : > { %p10626_p11 = pnand %p10625_p1, %p10619_p3 }
  0x8a   : > { %10629 = shalt.err (!%p10626_p11)
}
  0x8b   : > { %9820 = dma.hbm_to_vmem [thread:$0]  (!%p10807_p5), %s12561_s14, 512, %s529_s20, [#allocation18]  }
  0x8c   : > { %p12575_p12 = scmp.ne.s32.totalorder %s12572_s25, 0 }
  0x8d   : > { %p12576_p0 = scmp.ne.s32.totalorder (!%p12575_p12), %s12571_s24, 0 }
  0x8e   : > { %561 = sbr.rel (%p12575_p12) target bundleno = 2330 (0x91a), region = 80 }
  0x93   : > { %10643 = dma.done.wait (%p12576_p0), [#allocation4], 16  }
  0x94   : > { %10645 = vsyncadd (%p12576_p0), [#allocation4], 4294967280 }
  0x95   : > { %10647 = dma.done.wait (%p12576_p0), [#allocation6], 528  }
  0x96   : > { %10649 = vsyncadd (%p12576_p0), [#allocation6], 4294966768 }
  0x97   : > { %10651 = dma.done.wait (%p12576_p0), [#allocation9], 528  }
  0x98   : > { %10653 = vsyncadd (%p12576_p0), [#allocation9], 4294966768 }
  0x99   : > { %10655 = dma.done.wait (%p12576_p0), [#allocation12], 192  }
  0x9a   : > { %10657 = vsyncadd (%p12576_p0), [#allocation12], 4294967104 }
  0x9b   : > { %10659 = dma.done.wait (%p12576_p0), [#allocation15], 65568  }
  0x9c   : > { %10661 = vsyncadd (%p12576_p0), [#allocation15], 4294901728 }
  0x9d   : > { %10663 = dma.done.wait (%p12576_p0), [#allocation18], 512  }
  0x9e   : > { %10665 = vsyncadd (%p12576_p0), [#allocation18], 4294966784  ;;  %p653_p5 = scmp.lt.s32.totalorder %s10668_s18, 1  ;;  %vm704_vm0 = vcmask 1040384   ;;  %vm705_vm1 = vcmask 1041408   ;;  %v10692_v0 = vmov 65535  }
  0x9f   : > { %v706_v1 = vsel %vm704_vm0, 4294967295, %v10692_v0  ;;  %vm691_vm2 = vcmask 23552   ;;  %v9882_v13 = vld [vmem:[#allocation5 + $0x18] sm:$0xff]   ;;  %v9883_v18 = vld [vmem:[#allocation5 + $0x10] sm:$0xff]   ;;  %v9884_v19 = vld [vmem:[#allocation5 + $0x8] sm:$0xff]   ;;  %vm827_vm3 = vcmask 523264  }
  0xa0   : > { %s12585_s18 = smov (!%p653_p5, %s10668_s18), 1  ;;  %v707_v2 = vsel %vm705_vm1, %v706_v1, 0  ;;  %9718 = vmatprep.subr.bf16.mxu1 %v9882_v13  ;;  %v9885_v20 = vld [vmem:[#allocation5] sm:$0xff]   ;;  %v8765_v24 = vld [vmem:[#allocation3] ss:$0 sm:$0xff]  ;;  %v9887_v51 = vld [vmem:[#allocation8 + $0x10] sm:$0xff]  }
  0xa1   : > { %s9686_s25 = sshll.u32 %s12585_s18, 6  ;;  %s8763_s28 = sshll.u32 %s12585_s18, 1  ;;  %9719 = vmatpush3.bf16.msra.mxu1 %v9882_v13  ;;  %v9886_v21 = vld [vmem:[#allocation8 + $0x18] sm:$0xff]   ;;  %v9888_v52 = vld [vmem:[#allocation8 + $0x8] sm:$0xff]   ;;  %v9889_v53 = vld [vmem:[#allocation8] sm:$0xff]  }
  0xa2   : > { %s660_s15 = scalar_lea.vmem %s12547_s0, %s9686_s25  ;;  %s665_s29 = scalar_lea.vmem %s12548_s1, %s8763_s28  ;;  %9720 = vmatprep.subr.bf16.mxu1 %v9883_v18  ;;  %v1101_v54 = vld [vmem:[%s12554_s7 + $0x1c0] sm:$0xff]  ;;  %v10960_v56 = vld [vmem:[%s12554_s7 + $0x1c8] sm:$0xff] }
  0xa3   : > { %v683_v3 = vld [vmem:[%s665_s29] sm:$0x3]  ;;  %v672_v5 = vld [vmem:[%s660_s15 + $0x8] sm:$0xff]  ;;  %v673_v8 = vld [vmem:[%s660_s15 + $0x10] sm:$0xff]  ;;  %s12577_s24 = sld [smem:[#allocation26_spill]]  ;;  %s8764_s21 = sshll.u32 %s12585_s18, 5 }
  0xa4   : > { %v671_v4 = vld [vmem:[%s660_s15] sm:$0xff]  ;;  %v709_v6 = vand.u32 %v707_v2, %v683_v3  ;;  %v674_v9 = vld [vmem:[%s660_s15 + $0x18] sm:$0xff]  ;;  %v676_v11 = vld [vmem:[%s660_s15 + $0x28] sm:$0xff] }
  0xa5   : > { %v679_v7 = vpack.c.bf16 %v672_v5, %v671_v4  ;;  %v675_v10 = vld [vmem:[%s660_s15 + $0x20] sm:$0xff]  ;;  %v680_v12 = vpack.c.bf16 %v674_v9, %v673_v8  ;;  %v677_v15 = vld [vmem:[%s660_s15 + $0x30] sm:$0xff]  ;;  %v678_v16 = vld [vmem:[%s660_s15 + $0x38] sm:$0xff]  ;;  %9721 = vmatpush3.bf16.msra.mxu1 %v9883_v18  ;;  %s12578_s15 = sld [smem:[#allocation27_spill]] }
  0xa6   : > { %9708 = vmatprep.subr.bf16.mxu0 %v709_v6  ;;  %v681_v14 = vpack.c.bf16 %v676_v11, %v675_v10  ;;  %v682_v17 = vpack.c.bf16 %v678_v16, %v677_v15  ;;  %9722 = vmatprep.subr.bf16.mxu1 %v9884_v19  ;;  %v1105_v55 = vld [vmem:[%s12554_s7 + $0x1e0] sm:$0xff]  ;;  %v1106_v59 = vld [vmem:[%s12554_s7 + $0x1e8] sm:$0xff] }
  0xa7   : > { %9710 = vmatprep.mubr.msk.bf16.mxu0 %vm691_vm2, %v679_v7  ;;  %9709 = vmatpush3.bf16.msra.mxu0 %v709_v6  ;;  %v8844_v57 = vcombine.low %v1101_v54, %v1105_v55  ;;  %v8845_v58 = vcombine.high %v1101_v54, %v1105_v55  ;;  %v1093_v60 = vld [vmem:[%s12554_s7 + $0x180] sm:$0xff]  ;;  %v8846_v62 = vcombine.low %v10960_v56, %v1106_v59  ;;  %v1070_v54 = vld [vmem:[%s12554_s7 + $0xc8] sm:$0xff] }
  0xa8   : > { %9734 = vmatprep.subr.bf16.mxu0 %v9886_v21  ;;  %v1097_v61 = vld [vmem:[%s12554_s7 + $0x1a0] sm:$0xff]  ;;  %v8847_v63 = vcombine.high %v10960_v56, %v1106_v59  ;;  %v1074_v55 = vld [vmem:[%s12554_s7 + $0xe8] sm:$0xff] }
  0xa9   : > { %9723 = vmatpush3.bf16.msra.mxu1 %v9884_v19  ;;  %v8837_v0 = vcombine.high %v1093_v60, %v1097_v61  ;;  %v1085_v1 = vld [vmem:[%s12554_s7 + $0x140] sm:$0xff]  ;;  %v8836_v3 = vcombine.low %v1093_v60, %v1097_v61  ;;  %v1062_v61 = vld [vmem:[%s12554_s7 + $0x88] sm:$0xff] }
  0xaa   : > { %9711 = vmatmul.mubr.msk.bf16.vlgmr.msra.gmra.mxu0 %vm691_vm2, %v680_v12  ;;  %9724 = vmatprep.subr.bf16.mxu1 %v9885_v20  ;;  %v1089_v2 = vld [vmem:[%s12554_s7 + $0x160] sm:$0xff] }
  0xab   : > { %9714 = vmatprep.mubr.msk.bf16.mxu0 %vm691_vm2, %v681_v14  ;;  %9735 = vmatpush3.bf16.msra.mxu0 %v9886_v21  ;;  %v8829_v4 = vcombine.high %v1085_v1, %v1089_v2  ;;  %v1077_v5 = vld [vmem:[%s12554_s7 + $0x100] sm:$0xff]  ;;  %v8828_v7 = vcombine.low %v1085_v1, %v1089_v2  ;;  %s12461_s27 = scalar_lea.vmem %s12578_s15, %s8764_s21 }
  0xac   : > { %9736 = vmatprep.subr.bf16.mxu0 %v9887_v51  ;;  %v1081_v6 = vld [vmem:[%s12554_s7 + $0x120] sm:$0xff] }
  0xad   : > { %9725 = vmatpush3.bf16.msra.mxu1 %v9885_v20  ;;  %v8821_v8 = vcombine.high %v1077_v5, %v1081_v6  ;;  %v1069_v9 = vld [vmem:[%s12554_s7 + $0xc0] sm:$0xff]  ;;  %v8820_v11 = vcombine.low %v1077_v5, %v1081_v6  ;;  %v1054_v5 = vld [vmem:[%s12554_s7 + $0x48] sm:$0xff] }
  0xae   : > { %1471 = vmatprep.subr.bf16.mxu1 %v8845_v58  ;;  %v1073_v10 = vld [vmem:[%s12554_s7 + $0xe0] sm:$0xff]  ;;  %v8814_v58 = vcombine.low %v1070_v54, %v1074_v55 }
  0xaf   : > { %9737 = vmatpush3.bf16.msra.mxu0 %v9887_v51  ;;  %v8813_v12 = vcombine.high %v1069_v9, %v1073_v10  ;;  %v8812_v13 = vcombine.low %v1069_v9, %v1073_v10  ;;  %v8770_v16 = vld [vmem:[#allocation7] ss:$0 sm:$0xff] }
  0xb0   : > { %9738 = vmatprep.subr.bf16.mxu0 %v9888_v52  ;;  %v1061_v59 = vld [vmem:[%s12554_s7 + $0x80] sm:$0xff] }
  0xb1   : > { %v1065_v60 = vld [vmem:[%s12554_s7 + $0xa0] sm:$0xff] }
  0xb2   : > { %9715 = vmatmul.mubr.msk.bf16.gmra.mxu0 %vm691_vm2, %v682_v17 }
  0xb3   : > { %9739 = vmatpush3.bf16.msra.mxu0 %v9888_v52 }
  0xb4   : > { %9740 = vmatprep.subr.bf16.mxu0 %v9889_v53 }
  0xb7   : > { %9741 = vmatpush3.bf16.msra.mxu0 %v9889_v53 }
  0xb8   : > { %1544 = vmatprep.subr.bf16.mxu0 %v8847_v63  ;;  %v1066_v63 = vld [vmem:[%s12554_s7 + $0xa8] sm:$0xff] }
  0xb9   : > { %v8806_v1 = vcombine.low %v1062_v61, %v1066_v63  ;;  %v8807_v2 = vcombine.high %v1062_v61, %v1066_v63  ;;  %v1080_v61 = vld [vmem:[%s12554_s7 + $0x118] sm:$0xff] }
 0x16a   : > { %v9712_v22 = vpop.f32.mrf.mxu0 }
 0x16b   : > { %v754_v28 = vadd.f32 %v9712_v22, %v8765_v24 }
 0x16c   : > { %v745_v23 = vpop.f32.mrf.mxu0 }
 0x16d   : > { %v746_v26 = vadd.f32 %v8765_v24, %v745_v23  ;;  %v778_v35 = vmax.f32 %v754_v28, 0.0  ;;  %v1098_v28 = vld [vmem:[%s12554_s7 + $0x1a8] sm:$0xff] }
 0x16e   : > { %v9713_v25 = vpop.f32.mrf.mxu0 }
 0x16f   : > { %v757_v27 = vadd.f32 %v9713_v25, %v8765_v24  ;;  %v776_v33 = vmax.f32 %v746_v26, 0.0 }
 0x170   : > { %v748_v29 = vpop.f32.mrf.mxu0 }
 0x171   : > { %v749_v30 = vadd.f32 %v8765_v24, %v748_v29  ;;  %v779_v31 = vmax.f32 %v757_v27, 0.0  ;;  %v1094_v27 = vld [vmem:[%s12554_s7 + $0x188] sm:$0xff] }
 0x172   : > { %v9716_v32 = vpop.f32.mrf.mxu0 }
 0x173   : > { %v777_v34 = vmax.f32 %v749_v30, 0.0  ;;  %v770_v36 = vadd.f32 %v9716_v32, %v8765_v24  ;;  %v785_v40 = vpack.c.bf16 %v779_v31, %v778_v35 }
 0x174   : > { %v761_v37 = vpop.f32.mrf.mxu0 }
 0x175   : > { %v762_v38 = vadd.f32 %v8765_v24, %v761_v37  ;;  %v784_v39 = vpack.c.bf16 %v777_v34, %v776_v33  ;;  %v782_v43 = vmax.f32 %v770_v36, 0.0  ;;  %v8839_v34 = vcombine.high %v1094_v27, %v1098_v28  ;;  %v1086_v37 = vld [vmem:[%s12554_s7 + $0x148] sm:$0xff] }
 0x176   : > { %v9717_v41 = vpop.f32.mrf.mxu0 }
 0x177   : > { %v773_v42 = vadd.f32 %v9717_v41, %v8765_v24  ;;  %9726 = vmatprep.mubr.msk.bf16.mxu1 %vm827_vm3, %v784_v39  ;;  %v780_v45 = vmax.f32 %v762_v38, 0.0  ;;  %v1090_v38 = vld [vmem:[%s12554_s7 + $0x168] sm:$0xff] }
 0x178   : > { %v764_v44 = vpop.f32.mrf.mxu0  ;;  %9727 = vmatmul.mubr.msk.bf16.vlgmr.msra.gmra.mxu1 %vm827_vm3, %v785_v40  ;;  %v8830_v51 = vcombine.low %v1086_v37, %v1090_v38 }
 0x179   : > { %v783_v46 = vmax.f32 %v773_v42, 0.0  ;;  %v765_v47 = vadd.f32 %v8765_v24, %v764_v44  ;;  %1472 = vmatpush1.bf16.msra.mxu1 %v8844_v57  ;;  %v8838_v42 = vcombine.low %v1094_v27, %v1098_v28  ;;  %v8831_v44 = vcombine.high %v1086_v37, %v1090_v38  ;;  %v1099_v37 = vld [vmem:[%s12554_s7 + $0x1b0] sm:$0xff]  ;;  %v1096_v38 = vld [vmem:[%s12554_s7 + $0x198] sm:$0xff] }
 0x17a   : > { %1473 = vmatprep.subr.bf16.mxu1 %v8837_v0  ;;  %v8815_v57 = vcombine.high %v1070_v54, %v1074_v55  ;;  %v8804_v0 = vcombine.low %v1061_v59, %v1065_v60 }
 0x17b   : > { %v781_v48 = vmax.f32 %v765_v47, 0.0  ;;  %v787_v49 = vpack.c.bf16 %v783_v46, %v782_v43  ;;  %v1078_v47 = vld [vmem:[%s12554_s7 + $0x108] sm:$0xff] }
 0x17d   : > { %v786_v50 = vpack.c.bf16 %v781_v48, %v780_v45  ;;  %1474 = vmatpush1.bf16.msra.mxu1 %v8836_v3  ;;  %v1082_v48 = vld [vmem:[%s12554_s7 + $0x128] sm:$0xff]  ;;  %v1053_v3 = vld [vmem:[%s12554_s7 + $0x40] sm:$0xff] }
 0x17e   : > { %1475 = vmatprep.subr.bf16.mxu1 %v8829_v4  ;;  %v8823_v53 = vcombine.high %v1078_v47, %v1082_v48  ;;  %v8822_v56 = vcombine.low %v1078_v47, %v1082_v48  ;;  %v1057_v4 = vld [vmem:[%s12554_s7 + $0x60] sm:$0xff]  ;;  %v1087_v47 = vld [vmem:[%s12554_s7 + $0x150] sm:$0xff] }
 0x17f   : > { %9730 = vmatprep.mubr.msk.bf16.mxu1 %vm827_vm3, %v786_v50  ;;  %v8797_v6 = vcombine.high %v1053_v3, %v1057_v4 }
 0x180   : > { %9731 = vmatmul.mubr.msk.bf16.gmra.mxu1 %vm827_vm3, %v787_v49 }
 0x181   : > { %1476 = vmatpush1.bf16.msra.mxu1 %v8828_v7  ;;  %v1058_v7 = vld [vmem:[%s12554_s7 + $0x68] sm:$0xff] }
 0x182   : > { %1477 = vmatprep.subr.bf16.mxu1 %v8821_v8  ;;  %v8796_v8 = vcombine.low %v1053_v3, %v1057_v4  ;;  %v8798_v9 = vcombine.low %v1054_v5, %v1058_v7  ;;  %v8799_v10 = vcombine.high %v1054_v5, %v1058_v7  ;;  %v1075_v7 = vld [vmem:[%s12554_s7 + $0xf0] sm:$0xff] }
 0x185   : > { %1478 = vmatpush1.bf16.msra.mxu1 %v8820_v11  ;;  %v1045_v11 = vld [vmem:[%s12554_s7] sm:$0xff] }
 0x186   : > { %1479 = vmatprep.subr.bf16.mxu1 %v8813_v12  ;;  %v1049_v12 = vld [vmem:[%s12554_s7 + $0x20] sm:$0xff] }
 0x189   : > { %1480 = vmatpush1.bf16.msra.mxu1 %v8812_v13  ;;  %v1046_v13 = vld [vmem:[%s12554_s7 + $0x8] sm:$0xff] }
 0x238   : > { %v9728_v14 = vpop.f32.mrf.mxu1 }
 0x239   : > { %v883_v20 = vadd.f32 %v9728_v14, %v8770_v16  ;;  %v8789_v14 = vcombine.high %v1045_v11, %v1049_v12 }
 0x23a   : > { %v874_v15 = vpop.f32.mrf.mxu1 }
 0x23b   : > { %v875_v18 = vadd.f32 %v8770_v16, %v874_v15  ;;  %v907_v29 = vmax.f32 %v883_v20, 0.0  ;;  %v1050_v15 = vld [vmem:[%s12554_s7 + $0x28] sm:$0xff]  ;;  %v1107_v20 = vld [vmem:[%s12554_s7 + $0x1f0] sm:$0xff] }
 0x23c   : > { %v9729_v17 = vpop.f32.mrf.mxu1 }
 0x23d   : > { %v886_v19 = vadd.f32 %v9729_v17, %v8770_v16  ;;  %v905_v25 = vmax.f32 %v875_v18, 0.0  ;;  %v8790_v17 = vcombine.low %v1046_v13, %v1050_v15  ;;  %v8791_v18 = vcombine.high %v1046_v13, %v1050_v15 }
 0x23e   : > { %v877_v21 = vpop.f32.mrf.mxu1 }
 0x23f   : > { %v878_v22 = vadd.f32 %v8770_v16, %v877_v21  ;;  %v908_v23 = vmax.f32 %v886_v19, 0.0  ;;  %v1103_v19 = vld [vmem:[%s12554_s7 + $0x1d0] sm:$0xff]  ;;  %v1104_v21 = vld [vmem:[%s12554_s7 + $0x1d8] sm:$0xff] }
 0x240   : > { %v9732_v24 = vpop.f32.mrf.mxu1 }
 0x241   : > { %v906_v26 = vmax.f32 %v878_v22, 0.0  ;;  %v914_v32 = vpack.c.bf16 %v908_v23, %v907_v29  ;;  %v899_v39 = vadd.f32 %v9732_v24, %v8770_v16  ;;  %v8849_v22 = vcombine.high %v1103_v19, %v1107_v20  ;;  %v1108_v23 = vld [vmem:[%s12554_s7 + $0x1f8] sm:$0xff] }
 0x242   : > { %v890_v30 = vpop.f32.mrf.mxu1  ;;  %v10693_v24 = vmov 0   ;;  %v8851_v27 = vcombine.high %v1104_v21, %v1108_v23 }
 0x243   : > { %v913_v31 = vpack.c.bf16 %v906_v26, %v905_v25  ;;  %v891_v35 = vadd.f32 %v8770_v16, %v890_v30  ;;  %v911_v49 = vmax.f32 %v899_v39, 0.0  ;;  %1503 = vmatprep.mubr.bf16.mxu1 %v10693_v24  ;;  %v8848_v25 = vcombine.low %v1103_v19, %v1107_v20  ;;  %v11069_v30 = vld [vmem:[#allocation10] ss:$0 sm:$0xff]  ;;  %v1100_v39 = vld [vmem:[%s12554_s7 + $0x1b8] sm:$0xff] }
 0x244   : > { %v9733_v33 = vpop.f32.mrf.mxu1  ;;  %v8850_v26 = vcombine.low %v1104_v21, %v1108_v23  ;;  %v8842_v54 = vcombine.low %v1096_v38, %v1100_v39  ;;  %v1068_v19 = vld [vmem:[%s12554_s7 + $0xb8] sm:$0xff] }
 0x245   : > { %v902_v36 = vadd.f32 %v9733_v33, %v8770_v16  ;;  %9742 = vmatprep.mubr.msk.bf16.mxu0 %vm827_vm3, %v913_v31  ;;  %v909_v45 = vmax.f32 %v891_v35, 0.0  ;;  %v1095_v35 = vld [vmem:[%s12554_s7 + $0x190] sm:$0xff] }
 0x246   : > { %v893_v40 = vpop.f32.mrf.mxu1  ;;  %9743 = vmatmul.mubr.msk.bf16.vlgmr.msra.gmra.mxu0 %vm827_vm3, %v914_v32 }
 0x247   : > { %v894_v41 = vadd.f32 %v8770_v16, %v893_v40  ;;  %1545 = vmatpush1.bf16.msra.mxu0 %v8846_v62  ;;  %v912_v43 = vmax.f32 %v902_v36, 0.0  ;;  %v8805_v62 = vcombine.high %v1061_v59, %v1065_v60  ;;  %v8788_v16 = vcombine.low %v1045_v11, %v1049_v12  ;;  %v1083_v59 = vld [vmem:[%s12554_s7 + $0x130] sm:$0xff] }
 0x248   : > { %1546 = vmatprep.subr.bf16.mxu0 %v8839_v34 }
 0x249   : > { %v910_v46 = vmax.f32 %v894_v41, 0.0  ;;  %v916_v52 = vpack.c.bf16 %v912_v43, %v911_v49  ;;  %1481 = vmatprep.subr.bf16.mxu1 %v8805_v62  ;;  %v1091_v49 = vld [vmem:[%s12554_s7 + $0x170] sm:$0xff]  ;;  %v1084_v62 = vld [vmem:[%s12554_s7 + $0x138] sm:$0xff] }
 0x24a   : > { %1482 = vmatpush1.bf16.msra.mxu1 %v8804_v0  ;;  %v8832_v0 = vcombine.low %v1087_v47, %v1091_v49  ;;  %v8827_v5 = vcombine.high %v1080_v61, %v1084_v62  ;;  %v8826_v12 = vcombine.low %v1080_v61, %v1084_v62  ;;  %v9910_v61 = vld [vmem:[%s12556_s9 + $0x84] ss:$16 sps:$4 sm:$0xff]  }
 0x24b   : > { %v915_v50 = vpack.c.bf16 %v910_v46, %v909_v45  ;;  %1547 = vmatpush1.bf16.msra.mxu0 %v8838_v42  ;;  %1483 = vmatprep.subr.bf16.mxu1 %v8797_v6  ;;  %v8841_v45 = vcombine.high %v1095_v35, %v1099_v37  ;;  %v8843_v46 = vcombine.high %v1096_v38, %v1100_v39  ;;  %v1071_v6 = vld [vmem:[%s12554_s7 + $0xd0] sm:$0xff] }
 0x24c   : > { %1548 = vmatprep.subr.bf16.mxu0 %v8831_v44  ;;  %v8816_v21 = vcombine.low %v1071_v6, %v1075_v7  ;;  %v9913_v62 = vld [vmem:[%s12556_s9 + $0x284] ss:$16 sps:$4 sm:$0xff]  }
 0x24d   : > { %9746 = vmatprep.mubr.msk.bf16.mxu0 %vm827_vm3, %v915_v50  ;;  %v1088_v50 = vld [vmem:[%s12554_s7 + $0x158] sm:$0xff] }
 0x24e   : > { %9747 = vmatmul.mubr.msk.bf16.gmra.mxu0 %vm827_vm3, %v916_v52  ;;  %1484 = vmatpush1.bf16.msra.mxu1 %v8796_v8  ;;  %v1072_v8 = vld [vmem:[%s12554_s7 + $0xd8] sm:$0xff] }
 0x24f   : > { %1549 = vmatpush1.bf16.msra.mxu0 %v8830_v51  ;;  %1485 = vmatprep.subr.bf16.mxu1 %v8789_v14  ;;  %v1092_v51 = vld [vmem:[%s12554_s7 + $0x178] sm:$0xff]  ;;  %v8817_v14 = vcombine.high %v1071_v6, %v1075_v7  ;;  %v9925_v6 = vld [vmem:[%s12556_s9 + $0x244] ss:$16 sps:$4 sm:$0xff]   ;;  %v9920_v7 = vld [vmem:[%s12556_s9 + $0x40] ss:$16 sps:$4 sm:$0xff]  }
 0x250   : > { %1550 = vmatprep.subr.bf16.mxu0 %v8823_v53  ;;  %1576 = vmatprep.mubr.bf16.mxu0 %v10693_v24  ;;  %v8840_v53 = vcombine.low %v1095_v35, %v1099_v37 }
 0x252   : > { %1486 = vmatpush1.bf16.msra.mxu1 %v8788_v16  ;;  %v1063_v16 = vld [vmem:[%s12554_s7 + $0x90] sm:$0xff] }
 0x253   : > { %1551 = vmatpush1.bf16.msra.mxu0 %v8822_v56  ;;  %1617 = vmatprep.subr.bf16.mxu1 %v8849_v22  ;;  %v8833_v56 = vcombine.high %v1087_v47, %v1091_v49 }
 0x254   : > { %1552 = vmatprep.subr.bf16.mxu0 %v8815_v57  ;;  %v8835_v57 = vcombine.high %v1088_v50, %v1092_v51 }
 0x257   : > { %1553 = vmatpush1.bf16.msra.mxu0 %v8814_v58  ;;  %v1079_v58 = vld [vmem:[%s12554_s7 + $0x110] sm:$0xff] }
 0x258   : > { %1554 = vmatprep.subr.bf16.mxu0 %v8807_v2  ;;  %v8825_v2 = vcombine.high %v1079_v58, %v1083_v59  ;;  %v8824_v11 = vcombine.low %v1079_v58, %v1083_v59  ;;  %v9907_v58 = vld [vmem:[%s12556_s9 + $0x2a4] ss:$16 sps:$4 sm:$0xff]   ;;  %v9902_v59 = vld [vmem:[%s12556_s9 + $0xa0] ss:$16 sps:$4 sm:$0xff]  }
 0x25b   : > { %1555 = vmatpush1.bf16.msra.mxu0 %v8806_v1  ;;  %v8834_v1 = vcombine.low %v1088_v50, %v1092_v51  ;;  %v9895_v51 = vld [vmem:[%s12556_s9 + $0x2e4] ss:$16 sps:$4 sm:$0xff]  }
 0x25c   : > { %1556 = vmatprep.subr.bf16.mxu0 %v8799_v10 }
 0x25f   : > { %1557 = vmatpush1.bf16.msra.mxu0 %v8798_v9  ;;  %v1076_v9 = vld [vmem:[%s12554_s7 + $0xf8] sm:$0xff] }
 0x260   : > { %1558 = vmatprep.subr.bf16.mxu0 %v8791_v18  ;;  %v8819_v15 = vcombine.high %v1072_v8, %v1076_v9  ;;  %v1064_v18 = vld [vmem:[%s12554_s7 + $0x98] sm:$0xff]  ;;  %v8818_v22 = vcombine.low %v1072_v8, %v1076_v9  ;;  %v9923_v8 = vld [vmem:[%s12556_s9 + $0x240] ss:$16 sps:$4 sm:$0xff]   ;;  %v9928_v9 = vld [vmem:[%s12556_s9 + $0x24] ss:$16 sps:$4 sm:$0xff]  }
 0x261   : > { %v8810_v35 = vcombine.low %v1064_v18, %v1068_v19 }
 0x263   : > { %1559 = vmatpush1.bf16.msra.mxu0 %v8790_v17  ;;  %v1067_v17 = vld [vmem:[%s12554_s7 + $0xb0] sm:$0xff] }
 0x264   : > { %1690 = vmatprep.subr.bf16.mxu0 %v8851_v27  ;;  %v8809_v23 = vcombine.high %v1063_v16, %v1067_v17  ;;  %v8811_v27 = vcombine.high %v1064_v18, %v1068_v19  ;;  %v9943_v18 = vld [vmem:[%s12556_s9 + $0x3e4] ss:$16 sps:$4 sm:$0xff]   ;;  %v9938_v19 = vld [vmem:[%s12556_s9 + $0x1e0] ss:$16 sps:$4 sm:$0xff]  }
 0x306   : > { %v9744_v28 = vpop.f32.mrf.mxu0 }
 0x307   : > { %v1011_v52 = vadd.f32 %v9744_v28, %v11069_v30  ;;  %v1055_v28 = vld [vmem:[%s12554_s7 + $0x50] sm:$0xff] }
 0x308   : > { %v1002_v29 = vpop.f32.mrf.mxu0 }
 0x309   : > { %v1003_v32 = vadd.f32 %v11069_v30, %v1002_v29  ;;  %v1035_v63 = vmax.f32 %v1011_v52, 0.0  ;;  %v1059_v29 = vld [vmem:[%s12554_s7 + $0x70] sm:$0xff] }
 0x30a   : > { %v9745_v31 = vpop.f32.mrf.mxu0  ;;  %v8801_v38 = vcombine.high %v1055_v28, %v1059_v29  ;;  %v9890_v52 = vld [vmem:[%s12556_s9 + $0xe0] ss:$16 sps:$4 sm:$0xff]  }
 0x30b   : > { %v1033_v40 = vmax.f32 %v1003_v32, 0.0  ;;  %v1014_v43 = vadd.f32 %v9745_v31, %v11069_v30  ;;  %v1056_v31 = vld [vmem:[%s12554_s7 + $0x58] sm:$0xff] }
 0x30c   : > { %v1005_v33 = vpop.f32.mrf.mxu0  ;;  %v1060_v32 = vld [vmem:[%s12554_s7 + $0x78] sm:$0xff] }
 0x30d   : > { %v1006_v34 = vadd.f32 %v11069_v30, %v1005_v33  ;;  %v1036_v55 = vmax.f32 %v1014_v43, 0.0  ;;  %v8803_v39 = vcombine.high %v1056_v31, %v1060_v32  ;;  %v8800_v43 = vcombine.low %v1055_v28, %v1059_v29  ;;  %v9950_v28 = vld [vmem:[%s12556_s9 + $0x1a0] ss:$16 sps:$4 sm:$0xff]  }
 0x30e   : > { %v11076_v36 = vpop.f32.mrf.mxu0  ;;  %v9953_v29 = vld [vmem:[%s12556_s9 + $0x3a0] ss:$16 sps:$4 sm:$0xff]  }
 0x30f   : > { %v1034_v41 = vmax.f32 %v1006_v34, 0.0  ;;  %v11119_v3 = vpack.c.bf16 %v1036_v55, %v1035_v63  ;;  %v1027_v33 = vadd.f32 %v11076_v36, %v11069_v30  ;;  %v8808_v34 = vcombine.low %v1063_v16, %v1067_v17  ;;  %v1048_v36 = vld [vmem:[%s12554_s7 + $0x18] sm:$0xff]  ;;  %v9896_v55 = vld [vmem:[%s12556_s9 + $0xc0] ss:$16 sps:$4 sm:$0xff]   ;;  %v9940_v17 = vld [vmem:[%s12556_s9 + $0x1e4] ss:$16 sps:$4 sm:$0xff]  }
 0x310   : > { %v1018_v42 = vpop.f32.mrf.mxu0  ;;  %v9908_v63 = vld [vmem:[%s12556_s9 + $0x80] ss:$16 sps:$4 sm:$0xff]  }
 0x311   : > { %v11088_v44 = vpack.c.bf16 %v1034_v41, %v1033_v40  ;;  %v1019_v10 = vadd.f32 %v11069_v30, %v1018_v42  ;;  %v1047_v40 = vld [vmem:[%s12554_s7 + $0x10] sm:$0xff]  ;;  %v1052_v41 = vld [vmem:[%s12554_s7 + $0x38] sm:$0xff]  ;;  %v1039_v42 = vmax.f32 %v1027_v33, 0.0 }
 0x312   : > { %v9749_v48 = vpop.f32.mrf.mxu0  ;;  %v8794_v50 = vcombine.low %v1048_v36, %v1052_v41  ;;  %v9935_v16 = vld [vmem:[%s12556_s9 + $0x200] ss:$16 sps:$4 sm:$0xff]  }
 0x313   : > { %1504 = vmatmul.mubr.bf16.vlgmr.msra.gmra.mxu1 %v11088_v44  ;;  %1577 = vmatmul.mubr.bf16.vlgmr.msra.gmra.mxu0 %v11088_v44  ;;  %v1037_v20 = vmax.f32 %v1019_v10, 0.0  ;;  %v9931_v10 = vld [vmem:[%s12556_s9 + $0x224] ss:$16 sps:$4 sm:$0xff]   ;;  %v9956_v33 = vld [vmem:[%s12556_s9 + $0x180] ss:$16 sps:$4 sm:$0xff]  }
 0x314   : > { %1618 = vmatpush1.bf16.msra.mxu1 %v8848_v25  ;;  %1691 = vmatpush1.bf16.msra.mxu0 %v8850_v26  ;;  %v1021_v60 = vpop.f32.mrf.mxu0  ;;  %v1030_v25 = vadd.f32 %v9749_v48, %v11069_v30  ;;  %v8795_v48 = vcombine.high %v1048_v36, %v1052_v41  ;;  %v9968_v36 = vld [vmem:[%s12556_s9 + $0x140] ss:$16 sps:$4 sm:$0xff]  }
 0x315   : > { %1619 = vmatprep.subr.bf16.mxu1 %v8841_v45  ;;  %1692 = vmatprep.subr.bf16.mxu0 %v8843_v46  ;;  %v1022_v4 = vadd.f32 %v11069_v30, %v1021_v60  ;;  %v1051_v30 = vld [vmem:[%s12554_s7 + $0x30] sm:$0xff]  ;;  %v8802_v45 = vcombine.low %v1056_v31, %v1060_v32 }
 0x316   : > { %1513 = vmatprep.mubr.bf16.mxu1 %v10693_v24  ;;  %1586 = vmatprep.mubr.bf16.mxu0 %v10693_v24  ;;  %v1040_v37 = vmax.f32 %v1030_v25, 0.0  ;;  %v8793_v47 = vcombine.high %v1047_v40, %v1051_v30  ;;  %v8792_v49 = vcombine.low %v1047_v40, %v1051_v30  ;;  %v9905_v60 = vld [vmem:[%s12556_s9 + $0x2a0] ss:$16 sps:$4 sm:$0xff]   ;;  %v9958_v31 = vld [vmem:[%s12556_s9 + $0x184] ss:$16 sps:$4 sm:$0xff]  }
 0x317   : > { %v1038_v13 = vmax.f32 %v1022_v4, 0.0  ;;  %v9917_v4 = vld [vmem:[%s12556_s9 + $0x260] ss:$16 sps:$4 sm:$0xff]   ;;  %v9961_v32 = vld [vmem:[%s12556_s9 + $0x384] ss:$16 sps:$4 sm:$0xff]  }
 0x318   : > { %1620 = vmatpush1.bf16.msra.mxu1 %v8840_v53  ;;  %1693 = vmatpush1.bf16.msra.mxu0 %v8842_v54  ;;  %v1044_v46 = vpack.c.bf16 %v1040_v37, %v1039_v42  ;;  %v9893_v53 = vld [vmem:[%s12556_s9 + $0x2e0] ss:$16 sps:$4 sm:$0xff]   ;;  %v9901_v54 = vld [vmem:[%s12556_s9 + $0x2c4] ss:$16 sps:$4 sm:$0xff]  }
 0x319   : > { %1621 = vmatprep.subr.bf16.mxu1 %v8833_v56  ;;  %1694 = vmatprep.subr.bf16.mxu0 %v8835_v57  ;;  %v1043_v26 = vpack.c.bf16 %v1038_v13, %v1037_v20  ;;  %v9899_v56 = vld [vmem:[%s12556_s9 + $0x2c0] ss:$16 sps:$4 sm:$0xff]   ;;  %v9904_v57 = vld [vmem:[%s12556_s9 + $0xa4] ss:$16 sps:$4 sm:$0xff]  }
 0x31a   : > { %v9934_v13 = vld [vmem:[%s12556_s9 + $0x4] ss:$16 sps:$4 sm:$0xff]   ;;  %v9941_v20 = vld [vmem:[%s12556_s9 + $0x3e0] ss:$16 sps:$4 sm:$0xff]  }
 0x31b   : > { %1514 = vmatmul.mubr.bf16.gmra.mxu1 %v11119_v3  ;;  %1587 = vmatmul.mubr.bf16.gmra.mxu0 %v11119_v3  ;;  %v9947_v25 = vld [vmem:[%s12556_s9 + $0x3c0] ss:$16 sps:$4 sm:$0xff]   ;;  %v9967_v37 = vld [vmem:[%s12556_s9 + $0x364] ss:$16 sps:$4 sm:$0xff]  }
 0x31c   : > { %1622 = vmatpush1.bf16.msra.mxu1 %v8832_v0  ;;  %1695 = vmatpush1.bf16.msra.mxu0 %v8834_v1  ;;  %v9911_v0 = vld [vmem:[%s12556_s9 + $0x280] ss:$16 sps:$4 sm:$0xff]   ;;  %v9916_v1 = vld [vmem:[%s12556_s9 + $0x64] ss:$16 sps:$4 sm:$0xff]  }
 0x31d   : > { %1623 = vmatprep.subr.bf16.mxu1 %v8825_v2  ;;  %1696 = vmatprep.subr.bf16.mxu0 %v8827_v5  ;;  %v9919_v2 = vld [vmem:[%s12556_s9 + $0x264] ss:$16 sps:$4 sm:$0xff]   ;;  %v9971_v41 = vld [vmem:[%s12556_s9 + $0x340] ss:$16 sps:$4 sm:$0xff]  }
 0x31e   : > { %1523 = vmatprep.mubr.bf16.mxu1 %v10693_v24  ;;  %1596 = vmatprep.mubr.bf16.mxu0 %v10693_v24  ;;  %v9922_v5 = vld [vmem:[%s12556_s9 + $0x44] ss:$16 sps:$4 sm:$0xff]  }
 0x31f   : > { %v9970_v40 = vld [vmem:[%s12556_s9 + $0x144] ss:$16 sps:$4 sm:$0xff]  }
 0x320   : > { %1624 = vmatpush1.bf16.msra.mxu1 %v8824_v11  ;;  %1697 = vmatpush1.bf16.msra.mxu0 %v8826_v12  ;;  %v9926_v11 = vld [vmem:[%s12556_s9 + $0x20] ss:$16 sps:$4 sm:$0xff]   ;;  %v9973_v30 = vld [vmem:[%s12556_s9 + $0x344] ss:$16 sps:$4 sm:$0xff]  }
 0x321   : > { %1625 = vmatprep.subr.bf16.mxu1 %v8817_v14  ;;  %1698 = vmatprep.subr.bf16.mxu0 %v8819_v15  ;;  %v9929_v12 = vld [vmem:[%s12556_s9 + $0x220] ss:$16 sps:$4 sm:$0xff]   ;;  %v9937_v14 = vld [vmem:[%s12556_s9 + $0x204] ss:$16 sps:$4 sm:$0xff]  }
 0x322   : > { %v9932_v15 = vld [vmem:[%s12556_s9] ss:$16 sps:$4 sm:$0xff]   ;;  %v9976_v42 = vld [vmem:[%s12556_s9 + $0x124] ss:$16 sps:$4 sm:$0xff]  }
 0x323   : > { %1524 = vmatmul.mubr.bf16.gmra.mxu1 %v1043_v26  ;;  %1597 = vmatmul.mubr.bf16.gmra.mxu0 %v1043_v26 }
 0x324   : > { %1626 = vmatpush1.bf16.msra.mxu1 %v8816_v21  ;;  %1699 = vmatpush1.bf16.msra.mxu0 %v8818_v22  ;;  %v9946_v21 = vld [vmem:[%s12556_s9 + $0x1c4] ss:$16 sps:$4 sm:$0xff]  }
 0x325   : > { %1627 = vmatprep.subr.bf16.mxu1 %v8809_v23  ;;  %1700 = vmatprep.subr.bf16.mxu0 %v8811_v27  ;;  %v9949_v22 = vld [vmem:[%s12556_s9 + $0x3c4] ss:$16 sps:$4 sm:$0xff]   ;;  %v9944_v23 = vld [vmem:[%s12556_s9 + $0x1c0] ss:$16 sps:$4 sm:$0xff]  }
 0x326   : > { %1533 = vmatprep.mubr.bf16.mxu1 %v10693_v24  ;;  %1606 = vmatprep.mubr.bf16.mxu0 %v10693_v24  ;;  %v9955_v27 = vld [vmem:[%s12556_s9 + $0x3a4] ss:$16 sps:$4 sm:$0xff]  }
 0x328   : > { %1628 = vmatpush1.bf16.msra.mxu1 %v8808_v34  ;;  %1701 = vmatpush1.bf16.msra.mxu0 %v8810_v35  ;;  %v9959_v34 = vld [vmem:[%s12556_s9 + $0x380] ss:$16 sps:$4 sm:$0xff]   ;;  %v9964_v35 = vld [vmem:[%s12556_s9 + $0x164] ss:$16 sps:$4 sm:$0xff]  }
 0x329   : > { %1629 = vmatprep.subr.bf16.mxu1 %v8801_v38  ;;  %1702 = vmatprep.subr.bf16.mxu0 %v8803_v39  ;;  %v9962_v38 = vld [vmem:[%s12556_s9 + $0x160] ss:$16 sps:$4 sm:$0xff]  }
 0x32a   : > { %v9965_v39 = vld [vmem:[%s12556_s9 + $0x360] ss:$16 sps:$4 sm:$0xff]  }
 0x32b   : > { %1534 = vmatmul.mubr.bf16.gmra.mxu1 %v1044_v46  ;;  %1607 = vmatmul.mubr.bf16.gmra.mxu0 %v1044_v46 }
 0x32c   : > { %1630 = vmatpush1.bf16.msra.mxu1 %v8800_v43  ;;  %1703 = vmatpush1.bf16.msra.mxu0 %v8802_v45  ;;  %v9979_v43 = vld [vmem:[%s12556_s9 + $0x324] ss:$16 sps:$4 sm:$0xff]   ;;  %v9974_v45 = vld [vmem:[%s12556_s9 + $0x120] ss:$16 sps:$4 sm:$0xff]  }
 0x32d   : > { %1631 = vmatprep.subr.bf16.mxu1 %v8793_v47  ;;  %1704 = vmatprep.subr.bf16.mxu0 %v8795_v48  ;;  %v9982_v47 = vld [vmem:[%s12556_s9 + $0x104] ss:$16 sps:$4 sm:$0xff]  }
 0x32e   : > { %1649 = vmatprep.mubr.bf16.mxu1 %v10693_v24  ;;  %1722 = vmatprep.mubr.bf16.mxu0 %v10693_v24  ;;  %v9985_v48 = vld [vmem:[%s12556_s9 + $0x304] ss:$16 sps:$4 sm:$0xff]  }
 0x330   : > { %1632 = vmatpush1.bf16.msra.mxu1 %v8792_v49  ;;  %1705 = vmatpush1.bf16.msra.mxu0 %v8794_v50  ;;  %v9980_v49 = vld [vmem:[%s12556_s9 + $0x100] ss:$16 sps:$4 sm:$0xff]  }
 0x331   : > { %4230 = vmatprep.subr.bf16.mxu0 %v9895_v51  ;;  %v9983_v50 = vld [vmem:[%s12556_s9 + $0x300] ss:$16 sps:$4 sm:$0xff]   ;;  %v9991_v51 = vld [vmem:[%s12556_s9 + $0x6e4] ss:$16 sps:$4 sm:$0xff]  }
 0x333   : > { %1650 = vmatmul.mubr.bf16.vlgmr.msra.gmra.mxu1 %v11088_v44  ;;  %1723 = vmatmul.mubr.bf16.vlgmr.msra.gmra.mxu0 %v11088_v44  ;;  %v9892_v44 = vld [vmem:[%s12556_s9 + $0xe4] ss:$16 sps:$4 sm:$0xff]  }
 0x334   : > { %1659 = vmatprep.mubr.bf16.mxu1 %v10693_v24  ;;  %1732 = vmatprep.mubr.bf16.mxu0 %v10693_v24 }
 0x335   : > { %4189 = vmatprep.subr.bf16.mxu1 %v9892_v44  ;;  %4231 = vmatpush1.bf16.msra.mxu0 %v9893_v53  ;;  %v9988_v44 = vld [vmem:[%s12556_s9 + $0x4e4] ss:$16 sps:$4 sm:$0xff]  }
 0x336   : > { %4190 = vmatpush1.bf16.msra.mxu1 %v9890_v52  ;;  %4232 = vmatprep.subr.bf16.mxu0 %v9901_v54  ;;  %v1111_v52 = vlaneseq }
 0x338   : > { %v11390_v53 = vshrl.u32 %v1111_v52, 7 }
 0x339   : > { %4233 = vmatpush1.bf16.msra.mxu0 %v9899_v56 }
 0x33a   : > { %4234 = vmatprep.subr.bf16.mxu0 %v9907_v58  ;;  %v11396_v56 = vsub.s32 2, %v11390_v53 }
 0x33b   : > { %1660 = vmatmul.mubr.bf16.gmra.mxu1 %v11119_v3  ;;  %1733 = vmatmul.mubr.bf16.gmra.mxu0 %v11119_v3  ;;  %v9914_v3 = vld [vmem:[%s12556_s9 + $0x60] ss:$16 sps:$4 sm:$0xff]  }
 0x33c   : > { %1669 = vmatprep.mubr.bf16.mxu1 %v10693_v24  ;;  %1742 = vmatprep.mubr.bf16.mxu0 %v10693_v24 }
 0x33d   : > { %4235 = vmatpush1.bf16.msra.mxu0 %v9905_v60 }
 0x33e   : > { %4236 = vmatprep.subr.bf16.mxu0 %v9913_v62  ;;  %v11401_v62 = vsub.s32 1, %v11390_v53 }
 0x341   : > { %4237 = vmatpush1.bf16.msra.mxu0 %v9911_v0 }
 0x342   : > { %4238 = vmatprep.subr.bf16.mxu0 %v9919_v2 }
 0x343   : > { %1670 = vmatmul.mubr.bf16.gmra.mxu1 %v1043_v26  ;;  %1743 = vmatmul.mubr.bf16.gmra.mxu0 %v1043_v26  ;;  %v9952_v26 = vld [vmem:[%s12556_s9 + $0x1a4] ss:$16 sps:$4 sm:$0xff]  }
 0x344   : > { %1679 = vmatprep.mubr.bf16.mxu1 %v10693_v24  ;;  %1752 = vmatprep.mubr.bf16.mxu0 %v10693_v24  ;;  %v9898_v24 = vld [vmem:[%s12556_s9 + $0xc4] ss:$16 sps:$4 sm:$0xff]  }
 0x345   : > { %4191 = vmatprep.subr.bf16.mxu1 %v9898_v24  ;;  %4239 = vmatpush1.bf16.msra.mxu0 %v9917_v4 }
 0x346   : > { %4192 = vmatpush1.bf16.msra.mxu1 %v9896_v55  ;;  %4240 = vmatprep.subr.bf16.mxu0 %v9925_v6  ;;  %v11393_v55 = vsub.s32 0, %v11390_v53 }
 0x347   : > { %4193 = vmatprep.subr.bf16.mxu1 %v9904_v57 }
 0x349   : > { %4241 = vmatpush1.bf16.msra.mxu0 %v9923_v8 }
 0x34a   : > { %4194 = vmatpush1.bf16.msra.mxu1 %v9902_v59  ;;  %4242 = vmatprep.subr.bf16.mxu0 %v9931_v10  ;;  %v11398_v59 = vld [vmem:[#allocation11] sm:$0xff] }
 0x34b   : > { %1680 = vmatmul.mubr.bf16.gmra.mxu1 %v1044_v46  ;;  %1753 = vmatmul.mubr.bf16.gmra.mxu0 %v1044_v46  ;;  %v9977_v46 = vld [vmem:[%s12556_s9 + $0x320] ss:$16 sps:$4 sm:$0xff]   ;;  %v11408_v0 = vrot.slane %v11398_v59, %v11393_v55  ;;  %v11416_v6 = vrot.slane %v11398_v59, %v11401_v62 }
 0x34c   : > { %4195 = vmatprep.subr.bf16.mxu1 %v9910_v61 }
 0x34d   : > { %4243 = vmatpush1.bf16.msra.mxu0 %v9929_v12 }
 0x34e   : > { %4196 = vmatpush1.bf16.msra.mxu1 %v9908_v63  ;;  %4244 = vmatprep.subr.bf16.mxu0 %v9937_v14  ;;  %v11404_v63 = vsub.s32 3, %v11390_v53 }
 0x34f   : > { %4197 = vmatprep.subr.bf16.mxu1 %v9916_v1  ;;  %v11412_v1 = vrot.slane %v11398_v59, %v11396_v56 }
 0x351   : > { %4245 = vmatpush1.bf16.msra.mxu0 %v9935_v16 }
 0x352   : > { %4198 = vmatpush1.bf16.msra.mxu1 %v9914_v3  ;;  %4246 = vmatprep.subr.bf16.mxu0 %v9943_v18 }
 0x353   : > { %4199 = vmatprep.subr.bf16.mxu1 %v9922_v5 }
 0x355   : > { %4247 = vmatpush2.bf16.msra.mxu0 %v9941_v20 }
 0x356   : > { %4200 = vmatpush1.bf16.msra.mxu1 %v9920_v7  ;;  %4248 = vmatprep.subr.bf16.mxu0 %v9949_v22  ;;  %v11420_v7 = vrot.slane %v11398_v59, %v11404_v63  ;;  %v11433_v22 = vsub.s32 4, %v11390_v53 }
 0x357   : > { %4201 = vmatprep.subr.bf16.mxu1 %v9928_v9 }
 0x359   : > { %4249 = vmatpush2.bf16.msra.mxu0 %v9947_v25 }
 0x35a   : > { %4202 = vmatpush1.bf16.msra.mxu1 %v9926_v11  ;;  %4250 = vmatprep.subr.bf16.mxu0 %v9955_v27 }
 0x35b   : > { %4203 = vmatprep.subr.bf16.mxu1 %v9934_v13 }
 0x35d   : > { %4251 = vmatpush2.bf16.msra.mxu0 %v9953_v29 }
 0x35e   : > { %4204 = vmatpush1.bf16.msra.mxu1 %v9932_v15  ;;  %4252 = vmatprep.subr.bf16.mxu0 %v9961_v32 }
 0x35f   : > { %4205 = vmatprep.subr.bf16.mxu1 %v9940_v17 }
 0x361   : > { %4253 = vmatpush2.bf16.msra.mxu0 %v9959_v34 }
 0x362   : > { %4206 = vmatpush2.bf16.msra.mxu1 %v9938_v19  ;;  %4254 = vmatprep.subr.bf16.mxu0 %v9967_v37 }
 0x363   : > { %4207 = vmatprep.subr.bf16.mxu1 %v9946_v21 }
 0x365   : > { %4255 = vmatpush2.bf16.msra.mxu0 %v9965_v39 }
 0x366   : > { %4208 = vmatpush2.bf16.msra.mxu1 %v9944_v23  ;;  %4256 = vmatprep.subr.bf16.mxu0 %v9973_v30  ;;  %v11436_v23 = vsub.s32 6, %v11390_v53 }
 0x367   : > { %4209 = vmatprep.subr.bf16.mxu1 %v9952_v26 }
 0x369   : > { %4257 = vmatpush2.bf16.msra.mxu0 %v9971_v41 }
 0x36a   : > { %4210 = vmatpush2.bf16.msra.mxu1 %v9950_v28  ;;  %4258 = vmatprep.subr.bf16.mxu0 %v9979_v43 }
 0x36b   : > { %4211 = vmatprep.subr.bf16.mxu1 %v9958_v31 }
 0x36d   : > { %4259 = vmatpush2.bf16.msra.mxu0 %v9977_v46 }
 0x36e   : > { %4212 = vmatpush2.bf16.msra.mxu1 %v9956_v33  ;;  %4260 = vmatprep.subr.bf16.mxu0 %v9985_v48 }
 0x36f   : > { %4213 = vmatprep.subr.bf16.mxu1 %v9964_v35 }
 0x371   : > { %4261 = vmatpush2.bf16.msra.mxu0 %v9983_v50 }
 0x372   : > { %4214 = vmatpush2.bf16.msra.mxu1 %v9962_v38  ;;  %4312 = vmatprep.subr.bf16.mxu0 %v9991_v51 }
 0x373   : > { %4215 = vmatprep.subr.bf16.mxu1 %v9970_v40 }
 0x376   : > { %4216 = vmatpush2.bf16.msra.mxu1 %v9968_v36 }
 0x377   : > { %4217 = vmatprep.subr.bf16.mxu1 %v9976_v42 }
 0x37a   : > { %4218 = vmatpush2.bf16.msra.mxu1 %v9974_v45 }
 0x37b   : > { %4219 = vmatprep.subr.bf16.mxu1 %v9982_v47 }
 0x37e   : > { %4220 = vmatpush2.bf16.msra.mxu1 %v9980_v49 }
 0x37f   : > { %4271 = vmatprep.subr.bf16.mxu1 %v9988_v44 }
 0x3d3   : > { %v1505_v24 = vpop.f32.mrf.mxu1  ;;  %v1578_v54 = vpop.f32.mrf.mxu0 }
 0x3d4   : > { %v1506_v8 = vadd.f32 %v1505_v24, %v11408_v0  ;;  %v1579_v9 = vadd.f32 %v1578_v54, %v11412_v1 }
 0x3d5   : > { %v1507_v57 = vpop.f32.mrf.mxu1  ;;  %v1580_v58 = vpop.f32.mrf.mxu0 }
 0x3d6   : > { %v1508_v20 = vadd.f32 %v1507_v57, %v11416_v6  ;;  %v1581_v21 = vadd.f32 %v1580_v58, %v11420_v7  ;;  %v1763_v25 = vmax.f32 %v1506_v8, 0.0  ;;  %v1765_v26 = vmax.f32 %v1579_v9, 0.0 }
 0x3d7   : > { %v1509_v60 = vpop.f32.mrf.mxu1  ;;  %v1582_v61 = vpop.f32.mrf.mxu0 }
 0x3d8   : > { %v1510_v10 = vadd.f32 %v1509_v60, %v11408_v0  ;;  %v1583_v11 = vadd.f32 %v1582_v61, %v11412_v1  ;;  %v1764_v41 = vmax.f32 %v1508_v20, 0.0  ;;  %v1766_v42 = vmax.f32 %v1581_v21, 0.0 }
 0x3d9   : > { %v1511_v2 = vpop.f32.mrf.mxu1  ;;  %v1584_v3 = vpop.f32.mrf.mxu0 }
 0x3da   : > { %v1512_v14 = vadd.f32 %v1511_v2, %v11416_v6  ;;  %v1585_v15 = vadd.f32 %v1584_v3, %v11420_v7  ;;  %v1771_v27 = vmax.f32 %v1510_v10, 0.0  ;;  %v1773_v28 = vmax.f32 %v1583_v11, 0.0 }
 0x3db   : > { %v1515_v4 = vpop.f32.mrf.mxu1  ;;  %v1588_v5 = vpop.f32.mrf.mxu0 }
 0x3dc   : > { %v1516_v16 = vadd.f32 %v1515_v4, %v11408_v0  ;;  %v1589_v17 = vadd.f32 %v1588_v5, %v11412_v1  ;;  %v1772_v32 = vmax.f32 %v1512_v14, 0.0  ;;  %v1774_v33 = vmax.f32 %v1585_v15, 0.0 }
 0x3dd   : > { %v1517_v12 = vpop.f32.mrf.mxu1  ;;  %v1590_v13 = vpop.f32.mrf.mxu0  ;;  %v1827_v46 = vmax.f32 %v1763_v25, %v1771_v27  ;;  %v1853_v47 = vmax.f32 %v1765_v26, %v1773_v28 }
 0x3de   : > { %v1518_v34 = vadd.f32 %v1517_v12, %v11416_v6  ;;  %v1591_v35 = vadd.f32 %v1590_v13, %v11420_v7  ;;  %v1779_v37 = vmax.f32 %v1516_v16, 0.0  ;;  %v1781_v38 = vmax.f32 %v1589_v17, 0.0 }
 0x3df   : > { %v1519_v18 = vpop.f32.mrf.mxu1  ;;  %v1592_v19 = vpop.f32.mrf.mxu0  ;;  %v1840_v51 = vmax.f32 %v1764_v41, %v1772_v32  ;;  %v1866_v52 = vmax.f32 %v1766_v42, %v1774_v33 }
 0x3e0   : > { %v1520_v39 = vadd.f32 %v1519_v18, %v11408_v0  ;;  %v1593_v40 = vadd.f32 %v1592_v19, %v11412_v1  ;;  %v1780_v24 = vmax.f32 %v1518_v34, 0.0  ;;  %v1782_v54 = vmax.f32 %v1591_v35, 0.0 }
 0x3e1   : > { %v1521_v29 = vpop.f32.mrf.mxu1  ;;  %v1594_v31 = vpop.f32.mrf.mxu0  ;;  %v1828_v57 = vmax.f32 %v1827_v46, %v1779_v37  ;;  %v1854_v58 = vmax.f32 %v1853_v47, %v1781_v38 }
 0x3e2   : > { %v1522_v43 = vadd.f32 %v1521_v29, %v11416_v6  ;;  %v1595_v45 = vadd.f32 %v1594_v31, %v11420_v7  ;;  %v1787_v60 = vmax.f32 %v1520_v39, 0.0  ;;  %v1789_v61 = vmax.f32 %v1593_v40, 0.0 }
 0x3e3   : > { %v1525_v30 = vpop.f32.mrf.mxu1  ;;  %v1598_v36 = vpop.f32.mrf.mxu0  ;;  %v1841_v16 = vmax.f32 %v1840_v51, %v1780_v24  ;;  %v1867_v17 = vmax.f32 %v1866_v52, %v1782_v54 }
 0x3e4   : > { %v1526_v48 = vadd.f32 %v1525_v30, %v11408_v0  ;;  %v1599_v49 = vadd.f32 %v1598_v36, %v11412_v1  ;;  %v1788_v4 = vmax.f32 %v1522_v43, 0.0  ;;  %v1790_v5 = vmax.f32 %v1595_v45, 0.0 }
 0x3e5   : > { %v1527_v50 = vpop.f32.mrf.mxu1  ;;  %v1600_v44 = vpop.f32.mrf.mxu0  ;;  %v1829_v20 = vmax.f32 %v1828_v57, %v1787_v60  ;;  %v1855_v21 = vmax.f32 %v1854_v58, %v1789_v61 }
 0x3e6   : > { %v1528_v8 = vadd.f32 %v1527_v50, %v11416_v6  ;;  %v1601_v9 = vadd.f32 %v1600_v44, %v11420_v7  ;;  %v1795_v10 = vmax.f32 %v1526_v48, 0.0  ;;  %v1797_v11 = vmax.f32 %v1599_v49, 0.0 }
 0x3e7   : > { %v1529_v2 = vpop.f32.mrf.mxu1  ;;  %v1602_v3 = vpop.f32.mrf.mxu0  ;;  %v1842_v34 = vmax.f32 %v1841_v16, %v1788_v4  ;;  %v1868_v35 = vmax.f32 %v1867_v17, %v1790_v5  ;;  %v11464_v17 = vsub.s32 7, %v11390_v53 }
 0x3e8   : > { %v1530_v12 = vadd.f32 %v1529_v2, %v11408_v0  ;;  %v1603_v13 = vadd.f32 %v1602_v3, %v11412_v1  ;;  %v1796_v29 = vmax.f32 %v1528_v8, 0.0  ;;  %v1798_v31 = vmax.f32 %v1601_v9, 0.0 }
 0x3e9   : > { %v1531_v14 = vpop.f32.mrf.mxu1  ;;  %v1604_v15 = vpop.f32.mrf.mxu0  ;;  %v1830_v37 = vmax.f32 %v1829_v20, %v1795_v10  ;;  %v1856_v38 = vmax.f32 %v1855_v21, %v1797_v11 }
 0x3ea   : > { %v1532_v18 = vadd.f32 %v1531_v14, %v11416_v6  ;;  %v1605_v19 = vadd.f32 %v1604_v15, %v11420_v7  ;;  %v1803_v25 = vmax.f32 %v1530_v12, 0.0  ;;  %v1805_v26 = vmax.f32 %v1603_v13, 0.0 }
 0x3eb   : > { %v1535_v27 = vpop.f32.mrf.mxu1  ;;  %v1608_v28 = vpop.f32.mrf.mxu0  ;;  %v1843_v50 = vmax.f32 %v1842_v34, %v1796_v29  ;;  %v1869_v44 = vmax.f32 %v1868_v35, %v1798_v31  ;;  %v11480_v31 = vrot.slane %v11398_v59, %v11464_v17 }
 0x3ec   : > { %v1536_v32 = vadd.f32 %v1535_v27, %v11408_v0  ;;  %v1609_v33 = vadd.f32 %v1608_v28, %v11412_v1  ;;  %v1804_v30 = vmax.f32 %v1532_v18, 0.0  ;;  %v1806_v36 = vmax.f32 %v1605_v19, 0.0 }
 0x3ed   : > { %v1537_v39 = vpop.f32.mrf.mxu1  ;;  %v1610_v40 = vpop.f32.mrf.mxu0  ;;  %v1831_v43 = vmax.f32 %v1830_v37, %v1803_v25  ;;  %v1857_v45 = vmax.f32 %v1856_v38, %v1805_v26  ;;  %v11472_v19 = vrot.slane %v11398_v59, %v11436_v23 }
 0x3ee   : > { %v1811_v41 = vmax.f32 %v1536_v32, 0.0  ;;  %v1813_v42 = vmax.f32 %v1609_v33, 0.0  ;;  %v1538_v46 = vadd.f32 %v1537_v39, %v11416_v6  ;;  %v1611_v47 = vadd.f32 %v1610_v40, %v11420_v7 }
 0x3ef   : > { %v1539_v48 = vpop.f32.mrf.mxu1  ;;  %v1612_v49 = vpop.f32.mrf.mxu0  ;;  %v1844_v8 = vmax.f32 %v1843_v50, %v1804_v30  ;;  %v1870_v9 = vmax.f32 %v1869_v44, %v1806_v36 }
 0x3f0   : > { %v1540_v51 = vadd.f32 %v1539_v48, %v11408_v0  ;;  %v1613_v52 = vadd.f32 %v1612_v49, %v11412_v1  ;;  %v1832_v24 = vmax.f32 %v1831_v43, %v1811_v41  ;;  %v1858_v54 = vmax.f32 %v1857_v45, %v1813_v42 }
 0x3f1   : > { %v1812_v57 = vmax.f32 %v1538_v46, 0.0  ;;  %v1814_v58 = vmax.f32 %v1611_v47, 0.0  ;;  %v1541_v60 = vpop.f32.mrf.mxu1  ;;  %v1614_v61 = vpop.f32.mrf.mxu0  ;;  %v11461_v0 = vsub.s32 5, %v11390_v53  ;;  %v10694_v48 = vmov 1966171168  }
 0x3f2   : > { %v1819_v2 = vmax.f32 %v1540_v51, 0.0  ;;  %v1821_v3 = vmax.f32 %v1613_v52, 0.0  ;;  %v1542_v4 = vadd.f32 %v1541_v60, %v11416_v6  ;;  %v1615_v5 = vadd.f32 %v1614_v61, %v11420_v7 }
 0x3f3   : > { %v1651_v10 = vpop.f32.mrf.mxu1  ;;  %v1724_v11 = vpop.f32.mrf.mxu0  ;;  %v1845_v15 = vmax.f32 %v1844_v8, %v1812_v57  ;;  %v1871_v6 = vmax.f32 %v1870_v9, %v1814_v58  ;;  %v11468_v7 = vrot.slane %v11398_v59, %v11433_v22  ;;  %v11476_v29 = vrot.slane %v11398_v59, %v11461_v0 }
 0x3f4   : > { %v1833_v1 = vmax.f32 %v1832_v24, %v1819_v2  ;;  %v1859_v12 = vmax.f32 %v1858_v54, %v1821_v3  ;;  %v1820_v13 = vmax.f32 %v1542_v4, 0.0  ;;  %v1822_v14 = vmax.f32 %v1615_v5, 0.0 }
 0x3f5   : > { %v1653_v16 = vpop.f32.mrf.mxu1  ;;  %v1726_v18 = vpop.f32.mrf.mxu0  ;;  %v1652_v34 = vadd.f32 %v1651_v10, %v11468_v7  ;;  %v1725_v35 = vadd.f32 %v1724_v11, %v11472_v19  ;;  %v11489_v49 = vunpack.c.l.s4 %v10694_v48 }
 0x3f6   : > { %v1834_v20 = vrot.slane %v1833_v1, 4  ;;  %v1860_v21 = vrot.slane %v1859_v12, 4  ;;  %v1846_v25 = vmax.f32 %v1845_v15, %v1820_v13  ;;  %v1872_v28 = vmax.f32 %v1871_v6, %v1822_v14 }
 0x3f7   : > { %v1655_v26 = vpop.f32.mrf.mxu1  ;;  %v1728_v27 = vpop.f32.mrf.mxu0  ;;  %v1654_v41 = vadd.f32 %v1653_v16, %v11476_v29  ;;  %v1727_v43 = vadd.f32 %v1726_v18, %v11480_v31  ;;  %v1767_v50 = vmax.f32 %v1652_v34, 0.0  ;;  %v1769_v44 = vmax.f32 %v1725_v35, 0.0 }
 0x3f8   : > { %v1835_v37 = vmax.f32 %v1833_v1, %v1834_v20  ;;  %v1861_v38 = vmax.f32 %v1859_v12, %v1860_v21  ;;  %v1847_v39 = vrot.slane %v1846_v25, 4  ;;  %v1873_v36 = vrot.slane %v1872_v28, 4 }
 0x3f9   : > { %v1657_v32 = vpop.f32.mrf.mxu1  ;;  %v1730_v33 = vpop.f32.mrf.mxu0  ;;  %v1656_v42 = vadd.f32 %v1655_v26, %v11468_v7  ;;  %v1729_v59 = vadd.f32 %v1728_v27, %v11472_v19  ;;  %v1768_v2 = vmax.f32 %v1654_v41, 0.0  ;;  %v1770_v5 = vmax.f32 %v1727_v43, 0.0 }
 0x3fa   : > { %v1658_v45 = vadd.f32 %v1657_v32, %v11476_v29  ;;  %v1731_v51 = vadd.f32 %v1730_v33, %v11480_v31  ;;  %v1836_v52 = vrot.slane %v1835_v37, 2  ;;  %v1862_v24 = vrot.slane %v1861_v38, 2 }
 0x3fb   : > { %v1661_v40 = vpop.f32.mrf.mxu1  ;;  %v1734_v30 = vpop.f32.mrf.mxu0  ;;  %v1848_v54 = vmax.f32 %v1846_v25, %v1847_v39  ;;  %v1874_v61 = vmax.f32 %v1872_v28, %v1873_v36  ;;  %v1775_v3 = vmax.f32 %v1656_v42, 0.0  ;;  %v1777_v8 = vmax.f32 %v1729_v59, 0.0 }
 0x3fc   : > { %v1662_v57 = vadd.f32 %v1661_v40, %v11468_v7  ;;  %v1735_v4 = vadd.f32 %v1734_v30, %v11472_v19  ;;  %v1776_v9 = vmax.f32 %v1658_v45, 0.0  ;;  %v1778_v12 = vmax.f32 %v1731_v51, 0.0 }
 0x3fd   : > { %v1663_v46 = vpop.f32.mrf.mxu1  ;;  %v1736_v47 = vpop.f32.mrf.mxu0  ;;  %v11498_v16 = vmax.f32 %v1835_v37, %v1836_v52  ;;  %v11500_v18 = vmax.f32 %v1861_v38, %v1862_v24  ;;  %v1849_v6 = vrot.slane %v1848_v54, 2  ;;  %v1875_v26 = vrot.slane %v1874_v61, 2 }
 0x3fe   : > { %v1664_v10 = vadd.f32 %v1663_v46, %v11476_v29  ;;  %v1737_v13 = vadd.f32 %v1736_v47, %v11480_v31  ;;  %v1783_v20 = vmax.f32 %v1662_v57, 0.0  ;;  %v1879_v27 = vmax.f32 %v1767_v50, %v1775_v3 }
 0x3ff   : > { %v1665_v58 = vpop.f32.mrf.mxu1  ;;  %v1738_v60 = vpop.f32.mrf.mxu0  ;;  %v1785_v28 = vmax.f32 %v1735_v4, 0.0  ;;  %v1905_v33 = vmax.f32 %v1769_v44, %v1777_v8  ;;  %v1892_v34 = vmax.f32 %v1768_v2, %v1776_v9  ;;  %v1918_v37 = vmax.f32 %v1770_v5, %v1778_v12 }
 0x400   : > { %v1666_v14 = vadd.f32 %v1665_v58, %v11468_v7  ;;  %v1739_v15 = vadd.f32 %v1738_v60, %v11472_v19  ;;  %v1784_v32 = vmax.f32 %v1664_v10, 0.0  ;;  %v1786_v36 = vmax.f32 %v1737_v13, 0.0 }
 0x401   : > { %v1667_v11 = vpop.f32.mrf.mxu1  ;;  %v1740_v1 = vpop.f32.mrf.mxu0  ;;  %v1880_v42 = vmax.f32 %v1879_v27, %v1783_v20  ;;  %v1906_v48 = vmax.f32 %v1905_v33, %v1785_v28  ;;  %v11508_v52 = vmax.f32 %v1848_v54, %v1849_v6  ;;  %v11510_v24 = vmax.f32 %v1874_v61, %v1875_v26 }
 0x402   : > { %v1668_v35 = vadd.f32 %v1667_v11, %v11476_v29  ;;  %v1741_v39 = vadd.f32 %v1740_v1, %v11480_v31  ;;  %v1791_v38 = vmax.f32 %v1666_v14, 0.0  ;;  %v1793_v41 = vmax.f32 %v1739_v15, 0.0 }
 0x403   : > { %v1671_v21 = vpop.f32.mrf.mxu1  ;;  %v1744_v25 = vpop.f32.mrf.mxu0  ;;  %v1893_v50 = vmax.f32 %v1892_v34, %v1784_v32  ;;  %v1919_v3 = vmax.f32 %v1918_v37, %v1786_v36 }
 0x404   : > { %v1792_v43 = vmax.f32 %v1668_v35, 0.0  ;;  %v1672_v59 = vadd.f32 %v1671_v21, %v11468_v7  ;;  %v1745_v45 = vadd.f32 %v1744_v25, %v11472_v19  ;;  %v1794_v57 = vmax.f32 %v1741_v39, 0.0 }
 0x405   : > { %v1673_v40 = vpop.f32.mrf.mxu1  ;;  %v1746_v30 = vpop.f32.mrf.mxu0  ;;  %v1881_v4 = vmax.f32 %v1880_v42, %v1791_v38  ;;  %v1907_v5 = vmax.f32 %v1906_v48, %v1793_v41 }
 0x406   : > { %v1674_v44 = vadd.f32 %v1673_v40, %v11476_v29  ;;  %v1747_v51 = vadd.f32 %v1746_v30, %v11480_v31  ;;  %v1894_v8 = vmax.f32 %v1893_v50, %v1792_v43  ;;  %v1799_v9 = vmax.f32 %v1672_v59, 0.0 }
 0x407   : > { %v1675_v46 = vpop.f32.mrf.mxu1  ;;  %v1748_v47 = vpop.f32.mrf.mxu0  ;;  %v1801_v10 = vmax.f32 %v1745_v45, 0.0  ;;  %v1920_v6 = vmax.f32 %v1919_v3, %v1794_v57 }
 0x408   : > { %v1676_v58 = vadd.f32 %v1675_v46, %v11468_v7  ;;  %v1749_v11 = vadd.f32 %v1748_v47, %v11472_v19  ;;  %v1800_v13 = vmax.f32 %v1674_v44, 0.0  ;;  %v1802_v61 = vmax.f32 %v1747_v51, 0.0 }
 0x409   : > { %v1677_v60 = vpop.f32.mrf.mxu1  ;;  %v1750_v2 = vpop.f32.mrf.mxu0  ;;  %v1882_v35 = vmax.f32 %v1881_v4, %v1799_v9  ;;  %v1908_v39 = vmax.f32 %v1907_v5, %v1801_v10 }
 0x40a   : > { %v1678_v1 = vadd.f32 %v1677_v60, %v11476_v29  ;;  %v1751_v14 = vadd.f32 %v1750_v2, %v11480_v31  ;;  %v1807_v20 = vmax.f32 %v1676_v58, 0.0  ;;  %v1809_v21 = vmax.f32 %v1749_v11, 0.0 }
 0x40b   : > { %v1681_v12 = vpop.f32.mrf.mxu1  ;;  %v1754_v54 = vpop.f32.mrf.mxu0  ;;  %v1895_v38 = vmax.f32 %v1894_v8, %v1800_v13  ;;  %v1921_v41 = vmax.f32 %v1920_v6, %v1802_v61 }
 0x40c   : > { %v1682_v15 = vadd.f32 %v1681_v12, %v11468_v7  ;;  %v1755_v25 = vadd.f32 %v1754_v54, %v11472_v19  ;;  %v1808_v28 = vmax.f32 %v1678_v1, 0.0  ;;  %v1810_v32 = vmax.f32 %v1751_v14, 0.0 }
 0x40d   : > { %v1683_v26 = vpop.f32.mrf.mxu1  ;;  %v1756_v27 = vpop.f32.mrf.mxu0  ;;  %v1883_v59 = vmax.f32 %v1882_v35, %v1807_v20  ;;  %v1909_v45 = vmax.f32 %v1908_v39, %v1809_v21  ;;  %v1951_v14 = vunpack.c.0.s8 %v11489_v49 }
 0x40e   : > { %v1684_v33 = vadd.f32 %v1683_v26, %v11476_v29  ;;  %v1757_v34 = vadd.f32 %v1756_v27, %v11480_v31  ;;  %v1815_v40 = vmax.f32 %v1682_v15, 0.0  ;;  %v1817_v30 = vmax.f32 %v1755_v25, 0.0 }
 0x40f   : > { %v1685_v37 = vpop.f32.mrf.mxu1  ;;  %v1758_v36 = vpop.f32.mrf.mxu0  ;;  %v1896_v44 = vmax.f32 %v1895_v38, %v1808_v28  ;;  %v1922_v51 = vmax.f32 %v1921_v41, %v1810_v32  ;;  %v11534_v39 = vsub.s32 %v1951_v14, %v11390_v53 }
 0x410   : > { %v1816_v42 = vmax.f32 %v1684_v33, 0.0  ;;  %v1818_v43 = vmax.f32 %v1757_v34, 0.0  ;;  %v1686_v46 = vadd.f32 %v1685_v37, %v11468_v7  ;;  %v1759_v47 = vadd.f32 %v1758_v36, %v11472_v19 }
 0x411   : > { %v1687_v48 = vpop.f32.mrf.mxu1  ;;  %v1760_v50 = vpop.f32.mrf.mxu0  ;;  %v1884_v60 = vmax.f32 %v1883_v59, %v1815_v40  ;;  %v1910_v2 = vmax.f32 %v1909_v45, %v1817_v30  ;;  %v1851_v7 = vrot.slane %v11508_v52, 1  ;;  %v1877_v19 = vrot.slane %v11510_v24, 1 }
 0x412   : > { %v1688_v57 = vadd.f32 %v1687_v48, %v11476_v29  ;;  %v1761_v58 = vadd.f32 %v1760_v50, %v11480_v31  ;;  %v1823_v3 = vmax.f32 %v1686_v46, 0.0  ;;  %v1825_v4 = vmax.f32 %v1759_v47, 0.0 }
 0x413   : > { %v1897_v5 = vmax.f32 %v1896_v44, %v1816_v42  ;;  %v1923_v8 = vmax.f32 %v1922_v51, %v1818_v43  ;;  %v1838_v29 = vrot.slane %v11498_v16, 1  ;;  %v1864_v31 = vrot.slane %v11500_v18, 1 }
 0x414   : > { %v1824_v9 = vmax.f32 %v1688_v57, 0.0  ;;  %v1826_v10 = vmax.f32 %v1761_v58, 0.0  ;;  %v1885_v11 = vmax.f32 %v1884_v60, %v1823_v3  ;;  %v1911_v1 = vmax.f32 %v1910_v2, %v1825_v4 }
 0x415   : > { %v1852_v20 = vmax.f32 %v11508_v52, %v1851_v7  ;;  %v1878_v21 = vmax.f32 %v11510_v24, %v1877_v19  ;;  %v1839_v32 = vmax.f32 %v11498_v16, %v1838_v29  ;;  %v1865_v33 = vmax.f32 %v11500_v18, %v1864_v31  ;;  %v9994_v31 = vld [vmem:[%s12556_s9 + $0x4c4] ss:$16 sps:$4 sm:$0xff]  }
 0x416   : > { %v1898_v12 = vmax.f32 %v1897_v5, %v1824_v9  ;;  %v1924_v54 = vmax.f32 %v1923_v8, %v1826_v10  ;;  %v1886_v13 = vrot.slane %v1885_v11, 4  ;;  %v1912_v61 = vrot.slane %v1911_v1, 4 }
 0x417   : > { %v1945_v30 = vcombine.low %v1839_v32, %v1852_v20  ;;  %v1946_v37 = vcombine.low %v1865_v33, %v1878_v21  ;;  %v10000_v20 = vld [vmem:[%s12556_s9 + $0x4a4] ss:$16 sps:$4 sm:$0xff]   ;;  %v10004_v32 = vld [vmem:[%s12556_s9 + $0x480] ss:$16 sps:$4 sm:$0xff]  }
 0x418   : > { %v1899_v15 = vrot.slane %v1898_v12, 4  ;;  %v1925_v6 = vrot.slane %v1924_v54, 4  ;;  %v1887_v25 = vmax.f32 %v1885_v11, %v1886_v13  ;;  %v1913_v26 = vmax.f32 %v1911_v1, %v1912_v61  ;;  %v9986_v1 = vld [vmem:[%s12556_s9 + $0x4e0] ss:$16 sps:$4 sm:$0xff]   ;;  %v9997_v13 = vld [vmem:[%s12556_s9 + $0x6c4] ss:$16 sps:$4 sm:$0xff]  }
 0x419   : > { %v1955_v16 = vrot.slane %v1945_v30, %v11534_v39  ;;  %v1962_v18 = vrot.slane %v1946_v37, %v11534_v39  ;;  %v10003_v21 = vld [vmem:[%s12556_s9 + $0x6a4] ss:$16 sps:$4 sm:$0xff]   ;;  %v10007_v33 = vld [vmem:[%s12556_s9 + $0x680] ss:$16 sps:$4 sm:$0xff]  }
 0x41a   : > { %v1900_v27 = vmax.f32 %v1898_v12, %v1899_v15  ;;  %v1926_v28 = vmax.f32 %v1924_v54, %v1925_v6  ;;  %v1888_v34 = vrot.slane %v1887_v25, 2  ;;  %v1914_v35 = vrot.slane %v1913_v26, 2  ;;  %v9989_v12 = vld [vmem:[%s12556_s9 + $0x6e0] ss:$16 sps:$4 sm:$0xff]   ;;  %v10018_v30 = vld [vmem:[%s12556_s9 + $0x444] ss:$16 sps:$4 sm:$0xff]  }
 0x41b   : > { %v1977_v44 = vcombine.low %v1955_v16, %v1962_v18  ;;  %v9992_v15 = vld [vmem:[%s12556_s9 + $0x4c0] ss:$16 sps:$4 sm:$0xff]   ;;  %v10021_v37 = vld [vmem:[%s12556_s9 + $0x644] ss:$16 sps:$4 sm:$0xff]  }
 0x41c   : > { %v1901_v49 = vrot.slane %v1900_v27, 2  ;;  %v1927_v40 = vrot.slane %v1926_v28, 2  ;;  %v1889_v52 = vmax.f32 %v1887_v25, %v1888_v34  ;;  %v1915_v36 = vmax.f32 %v1913_v26, %v1914_v35  ;;  %v9995_v6 = vld [vmem:[%s12556_s9 + $0x6c0] ss:$16 sps:$4 sm:$0xff]   ;;  %v10012_v34 = vld [vmem:[%s12556_s9 + $0x464] ss:$16 sps:$4 sm:$0xff]  }
 0x41d   : > { %v1985_v60 = vrot.slane %v1977_v44, %v11534_v39  ;;  %v9998_v25 = vld [vmem:[%s12556_s9 + $0x4a0] ss:$16 sps:$4 sm:$0xff]   ;;  %v10015_v35 = vld [vmem:[%s12556_s9 + $0x664] ss:$16 sps:$4 sm:$0xff]  }
 0x41e   : > { %v1902_v24 = vmax.f32 %v1900_v27, %v1901_v49  ;;  %v1928_v38 = vmax.f32 %v1926_v28, %v1927_v40  ;;  %v1890_v41 = vrot.slane %v1889_v52, 1  ;;  %v1916_v42 = vrot.slane %v1915_v36, 1  ;;  %v10001_v26 = vld [vmem:[%s12556_s9 + $0x6a0] ss:$16 sps:$4 sm:$0xff]   ;;  %v10006_v27 = vld [vmem:[%s12556_s9 + $0x484] ss:$16 sps:$4 sm:$0xff]  }
 0x41f   : > { %v10009_v28 = vld [vmem:[%s12556_s9 + $0x684] ss:$16 sps:$4 sm:$0xff]   ;;  %v10010_v49 = vld [vmem:[%s12556_s9 + $0x460] ss:$16 sps:$4 sm:$0xff]  }
 0x420   : > { %v1903_v43 = vrot.slane %v1902_v24, 1  ;;  %v1929_v59 = vrot.slane %v1928_v38, 1  ;;  %v1891_v45 = vmax.f32 %v1889_v52, %v1890_v41  ;;  %v1917_v46 = vmax.f32 %v1915_v36, %v1916_v42  ;;  %v10013_v40 = vld [vmem:[%s12556_s9 + $0x660] ss:$16 sps:$4 sm:$0xff]  }
 0x421   : > { %v10016_v52 = vld [vmem:[%s12556_s9 + $0x440] ss:$16 sps:$4 sm:$0xff]  }
 0x422   : > { %v1904_v53 = vmax.f32 %v1902_v24, %v1903_v43  ;;  %v1930_v47 = vmax.f32 %v1928_v38, %v1929_v59  ;;  %v10019_v36 = vld [vmem:[%s12556_s9 + $0x640] ss:$16 sps:$4 sm:$0xff]   ;;  %v10024_v24 = vld [vmem:[%s12556_s9 + $0x424] ss:$16 sps:$4 sm:$0xff]  }
 0x423   : > { %v10027_v38 = vld [vmem:[%s12556_s9 + $0x624] ss:$16 sps:$4 sm:$0xff]   ;;  %v10022_v41 = vld [vmem:[%s12556_s9 + $0x420] ss:$16 sps:$4 sm:$0xff]  }
 0x424   : > { %v1947_v48 = vcombine.low %v1891_v45, %v1904_v53  ;;  %v1948_v50 = vcombine.low %v1917_v46, %v1930_v47  ;;  %v10025_v42 = vld [vmem:[%s12556_s9 + $0x620] ss:$16 sps:$4 sm:$0xff]   ;;  %v10030_v43 = vld [vmem:[%s12556_s9 + $0x404] ss:$16 sps:$4 sm:$0xff]  }
 0x425   : > { %v10033_v59 = vld [vmem:[%s12556_s9 + $0x604] ss:$16 sps:$4 sm:$0xff]   ;;  %v10028_v16 = vld [vmem:[%s12556_s9 + $0x400] ss:$16 sps:$4 sm:$0xff]  }
 0x426   : > { %v1969_v51 = vrot.slane %v1947_v48, %v11534_v39  ;;  %v1976_v57 = vrot.slane %v1948_v50, %v11534_v39  ;;  %v10031_v18 = vld [vmem:[%s12556_s9 + $0x600] ss:$16 sps:$4 sm:$0xff]   ;;  %v10036_v45 = vld [vmem:[%s12556_s9 + $0x5e4] ss:$16 sps:$4 sm:$0xff]  }
 0x427   : > { %v10039_v46 = vld [vmem:[%s12556_s9 + $0x7e4] ss:$16 sps:$4 sm:$0xff]   ;;  %v10034_v53 = vld [vmem:[%s12556_s9 + $0x5e0] ss:$16 sps:$4 sm:$0xff]  }
 0x428   : > { %v1978_v58 = vcombine.low %v1969_v51, %v1976_v57  ;;  %v10037_v47 = vld [vmem:[%s12556_s9 + $0x7e0] ss:$16 sps:$4 sm:$0xff]   ;;  %v10042_v48 = vld [vmem:[%s12556_s9 + $0x5c4] ss:$16 sps:$4 sm:$0xff]  }
 0x429   : > { %v10045_v50 = vld [vmem:[%s12556_s9 + $0x7c4] ss:$16 sps:$4 sm:$0xff]   ;;  %v10040_v44 = vld [vmem:[%s12556_s9 + $0x5c0] ss:$16 sps:$4 sm:$0xff]  }
 0x42a   : > { %v1992_v2 = vrot.slane %v1978_v58, %v11534_v39  ;;  %v10043_v51 = vld [vmem:[%s12556_s9 + $0x7c0] ss:$16 sps:$4 sm:$0xff]   ;;  %v10048_v57 = vld [vmem:[%s12556_s9 + $0x5a4] ss:$16 sps:$4 sm:$0xff]  }
 0x42b   : > { %v10051_v58 = vld [vmem:[%s12556_s9 + $0x7a4] ss:$16 sps:$4 sm:$0xff]  }
 0x42c   : > { %v11542_v3 = vcombine.low %v1985_v60, %v1992_v2  ;;  %v10046_v60 = vld [vmem:[%s12556_s9 + $0x5a0] ss:$16 sps:$4 sm:$0xff]  }
 0x42d   : > { %v10049_v2 = vld [vmem:[%s12556_s9 + $0x7a0] ss:$16 sps:$4 sm:$0xff]  }
 0x42e   : > { %v2847_v4 = vrot.slane %v11542_v3, %v11401_v62  ;;  %v2855_v5 = vrot.slane %v11542_v3, %v11404_v63  ;;  %v2843_v8 = vrot.slane %v11542_v3, %v11393_v55  ;;  %v2851_v9 = vrot.slane %v11542_v3, %v11396_v56 }
 0x42f   : > { %v2863_v10 = vrot.slane %v11542_v3, %v11461_v0  ;;  %v2871_v7 = vrot.slane %v11542_v3, %v11464_v17 }
 0x430   : > { %v11556_v19 = vpack.c.bf16 %v2847_v4, %v2847_v4  ;;  %v11558_v11 = vpack.c.bf16 %v2855_v5, %v2855_v5  ;;  %v11566_v54 = vpack.c.bf16 %v2843_v8, %v2843_v8  ;;  %v11568_v29 = vpack.c.bf16 %v2851_v9, %v2851_v9  ;;  %v10054_v4 = vld [vmem:[%s12556_s9 + $0x584] ss:$16 sps:$4 sm:$0xff]   ;;  %v10052_v8 = vld [vmem:[%s12556_s9 + $0x580] ss:$16 sps:$4 sm:$0xff]  }
 0x431   : > { %v11580_v61 = vpack.c.bf16 %v2863_v10, %v2863_v10  ;;  %v11582_v14 = vpack.c.bf16 %v2871_v7, %v2871_v7  ;;  %v10057_v5 = vld [vmem:[%s12556_s9 + $0x784] ss:$16 sps:$4 sm:$0xff]   ;;  %v10055_v9 = vld [vmem:[%s12556_s9 + $0x780] ss:$16 sps:$4 sm:$0xff]  }
 0x432   : > { %4221 = vmatprep.mubr.bf16.mxu1 %v11556_v19  ;;  %4262 = vmatprep.mubr.bf16.mxu0 %v11558_v11  ;;  %v10060_v10 = vld [vmem:[%s12556_s9 + $0x564] ss:$16 sps:$4 sm:$0xff]  }
 0x433   : > { %4222 = vmatmul.mubr.bf16.vlgmr.msra.gmra.mxu1 %v11566_v54  ;;  %4263 = vmatmul.mubr.bf16.vlgmr.msra.gmra.mxu0 %v11568_v29  ;;  %v10063_v7 = vld [vmem:[%s12556_s9 + $0x764] ss:$16 sps:$4 sm:$0xff]  }
 0x434   : > { %4272 = vmatpush1.bf16.msra.mxu1 %v9986_v1  ;;  %4313 = vmatpush1.bf16.msra.mxu0 %v9989_v12  ;;  %v10058_v1 = vld [vmem:[%s12556_s9 + $0x560] ss:$16 sps:$4 sm:$0xff]  }
 0x435   : > { %4303 = vmatprep.mubr.bf16.mxu1 %v11580_v61  ;;  %4344 = vmatprep.mubr.bf16.mxu0 %v11582_v14  ;;  %v10061_v12 = vld [vmem:[%s12556_s9 + $0x760] ss:$16 sps:$4 sm:$0xff]  }
 0x436   : > { %4273 = vmatprep.subr.bf16.mxu1 %v9994_v31  ;;  %4314 = vmatprep.subr.bf16.mxu0 %v9997_v13  ;;  %v10066_v31 = vld [vmem:[%s12556_s9 + $0x544] ss:$16 sps:$4 sm:$0xff]  }
 0x437   : > { %v10069_v13 = vld [vmem:[%s12556_s9 + $0x744] ss:$16 sps:$4 sm:$0xff]  }
 0x438   : > { %4274 = vmatpush1.bf16.msra.mxu1 %v9992_v15  ;;  %4315 = vmatpush1.bf16.msra.mxu0 %v9995_v6  ;;  %v10064_v15 = vld [vmem:[%s12556_s9 + $0x540] ss:$16 sps:$4 sm:$0xff]  }
 0x439   : > { %4275 = vmatprep.subr.bf16.mxu1 %v10000_v20  ;;  %4316 = vmatprep.subr.bf16.mxu0 %v10003_v21  ;;  %v10067_v6 = vld [vmem:[%s12556_s9 + $0x740] ss:$16 sps:$4 sm:$0xff]   ;;  %v10072_v20 = vld [vmem:[%s12556_s9 + $0x524] ss:$16 sps:$4 sm:$0xff]  }
 0x43a   : > { %v10075_v21 = vld [vmem:[%s12556_s9 + $0x724] ss:$16 sps:$4 sm:$0xff]  }
 0x43c   : > { %4276 = vmatpush1.bf16.msra.mxu1 %v9998_v25  ;;  %4317 = vmatpush1.bf16.msra.mxu0 %v10001_v26  ;;  %v10070_v25 = vld [vmem:[%s12556_s9 + $0x520] ss:$16 sps:$4 sm:$0xff]  }
 0x43d   : > { %4277 = vmatprep.subr.bf16.mxu1 %v10006_v27  ;;  %4318 = vmatprep.subr.bf16.mxu0 %v10009_v28  ;;  %v10073_v26 = vld [vmem:[%s12556_s9 + $0x720] ss:$16 sps:$4 sm:$0xff]   ;;  %v10078_v27 = vld [vmem:[%s12556_s9 + $0x504] ss:$16 sps:$4 sm:$0xff]  }
 0x43e   : > { %v10081_v28 = vld [vmem:[%s12556_s9 + $0x704] ss:$16 sps:$4 sm:$0xff]  }
 0x440   : > { %4278 = vmatpush1.bf16.msra.mxu1 %v10004_v32  ;;  %4319 = vmatpush1.bf16.msra.mxu0 %v10007_v33  ;;  %v10076_v32 = vld [vmem:[%s12556_s9 + $0x500] ss:$16 sps:$4 sm:$0xff]  }
 0x441   : > { %4279 = vmatprep.subr.bf16.mxu1 %v10012_v34  ;;  %4320 = vmatprep.subr.bf16.mxu0 %v10015_v35  ;;  %v10079_v33 = vld [vmem:[%s12556_s9 + $0x700] ss:$16 sps:$4 sm:$0xff]   ;;  %v2859_v34 = vrot.slane %v11542_v3, %v11433_v22  ;;  %v2867_v35 = vrot.slane %v11542_v3, %v11436_v23  ;;  %v10085_v3 = vld [vmem:[%s12556_s9 + $0x2e8] ss:$16 sps:$4 sm:$0xff]  }
 0x444   : > { %4280 = vmatpush1.bf16.msra.mxu1 %v10010_v49  ;;  %4321 = vmatpush1.bf16.msra.mxu0 %v10013_v40  ;;  %v10084_v49 = vld [vmem:[%s12556_s9 + $0xec] ss:$16 sps:$4 sm:$0xff]  }
 0x445   : > { %4281 = vmatprep.subr.bf16.mxu1 %v10018_v30  ;;  %4322 = vmatprep.subr.bf16.mxu0 %v10021_v37  ;;  %v10087_v40 = vld [vmem:[%s12556_s9 + $0x2ec] ss:$16 sps:$4 sm:$0xff]   ;;  %v10082_v30 = vld [vmem:[%s12556_s9 + $0xe8] ss:$16 sps:$4 sm:$0xff]   ;;  %v11773_v37 = vpack.c.bf16 %v2859_v34, %v2859_v34 }
 0x446   : > { %v10151_v34 = vld [vmem:[%s12556_s9 + $0x388] ss:$16 sps:$4 sm:$0xff]  }
 0x448   : > { %4282 = vmatpush1.bf16.msra.mxu1 %v10016_v52  ;;  %4323 = vmatpush1.bf16.msra.mxu0 %v10019_v36  ;;  %v11775_v52 = vpack.c.bf16 %v2867_v35, %v2867_v35  ;;  %v10090_v36 = vld [vmem:[%s12556_s9 + $0xcc] ss:$16 sps:$4 sm:$0xff]  }
 0x449   : > { %4283 = vmatprep.subr.bf16.mxu1 %v10024_v24  ;;  %4324 = vmatprep.subr.bf16.mxu0 %v10027_v38  ;;  %v10093_v24 = vld [vmem:[%s12556_s9 + $0x2cc] ss:$16 sps:$4 sm:$0xff]   ;;  %v10088_v38 = vld [vmem:[%s12556_s9 + $0xc8] ss:$16 sps:$4 sm:$0xff]  }
 0x44a   : > { %v10156_v35 = vld [vmem:[%s12556_s9 + $0x16c] ss:$16 sps:$4 sm:$0xff]  }
 0x44c   : > { %4284 = vmatpush1.bf16.msra.mxu1 %v10022_v41  ;;  %4325 = vmatpush1.bf16.msra.mxu0 %v10025_v42  ;;  %v10091_v41 = vld [vmem:[%s12556_s9 + $0x2c8] ss:$16 sps:$4 sm:$0xff]   ;;  %v10096_v42 = vld [vmem:[%s12556_s9 + $0xac] ss:$16 sps:$4 sm:$0xff]  }
 0x44d   : > { %4285 = vmatprep.subr.bf16.mxu1 %v10030_v43  ;;  %4326 = vmatprep.subr.bf16.mxu0 %v10033_v59  ;;  %v10094_v43 = vld [vmem:[%s12556_s9 + $0xa8] ss:$16 sps:$4 sm:$0xff]   ;;  %v10102_v59 = vld [vmem:[%s12556_s9 + $0x8c] ss:$16 sps:$4 sm:$0xff]  }
 0x450   : > { %4286 = vmatpush1.bf16.msra.mxu1 %v10028_v16  ;;  %4327 = vmatpush1.bf16.msra.mxu0 %v10031_v18  ;;  %v10105_v16 = vld [vmem:[%s12556_s9 + $0x28c] ss:$16 sps:$4 sm:$0xff]   ;;  %v10100_v18 = vld [vmem:[%s12556_s9 + $0x88] ss:$16 sps:$4 sm:$0xff]  }
 0x451   : > { %4287 = vmatprep.subr.bf16.mxu1 %v10036_v45  ;;  %4328 = vmatprep.subr.bf16.mxu0 %v10039_v46  ;;  %v10103_v45 = vld [vmem:[%s12556_s9 + $0x288] ss:$16 sps:$4 sm:$0xff]   ;;  %v10108_v46 = vld [vmem:[%s12556_s9 + $0x6c] ss:$16 sps:$4 sm:$0xff]  }
 0x454   : > { %4288 = vmatpush2.bf16.msra.mxu1 %v10034_v53  ;;  %4329 = vmatpush2.bf16.msra.mxu0 %v10037_v47  ;;  %v10111_v53 = vld [vmem:[%s12556_s9 + $0x26c] ss:$16 sps:$4 sm:$0xff]   ;;  %v10106_v47 = vld [vmem:[%s12556_s9 + $0x68] ss:$16 sps:$4 sm:$0xff]  }
 0x455   : > { %4289 = vmatprep.subr.bf16.mxu1 %v10042_v48  ;;  %4330 = vmatprep.subr.bf16.mxu0 %v10045_v50  ;;  %v10109_v48 = vld [vmem:[%s12556_s9 + $0x268] ss:$16 sps:$4 sm:$0xff]   ;;  %v10114_v50 = vld [vmem:[%s12556_s9 + $0x4c] ss:$16 sps:$4 sm:$0xff]  }
 0x458   : > { %4290 = vmatpush2.bf16.msra.mxu1 %v10040_v44  ;;  %4331 = vmatpush2.bf16.msra.mxu0 %v10043_v51  ;;  %v10117_v44 = vld [vmem:[%s12556_s9 + $0x24c] ss:$16 sps:$4 sm:$0xff]   ;;  %v10112_v51 = vld [vmem:[%s12556_s9 + $0x48] ss:$16 sps:$4 sm:$0xff]  }
 0x459   : > { %4291 = vmatprep.subr.bf16.mxu1 %v10048_v57  ;;  %4332 = vmatprep.subr.bf16.mxu0 %v10051_v58  ;;  %v10115_v57 = vld [vmem:[%s12556_s9 + $0x248] ss:$16 sps:$4 sm:$0xff]   ;;  %v10120_v58 = vld [vmem:[%s12556_s9 + $0x2c] ss:$16 sps:$4 sm:$0xff]  }
 0x45c   : > { %4292 = vmatpush2.bf16.msra.mxu1 %v10046_v60  ;;  %4333 = vmatpush2.bf16.msra.mxu0 %v10049_v2  ;;  %v10123_v60 = vld [vmem:[%s12556_s9 + $0x22c] ss:$16 sps:$4 sm:$0xff]   ;;  %v10118_v2 = vld [vmem:[%s12556_s9 + $0x28] ss:$16 sps:$4 sm:$0xff]  }
 0x45d   : > { %4293 = vmatprep.subr.bf16.mxu1 %v10054_v4  ;;  %4334 = vmatprep.subr.bf16.mxu0 %v10057_v5  ;;  %v10121_v4 = vld [vmem:[%s12556_s9 + $0x228] ss:$16 sps:$4 sm:$0xff]   ;;  %v10126_v5 = vld [vmem:[%s12556_s9 + $0xc] ss:$16 sps:$4 sm:$0xff]  }
 0x460   : > { %4294 = vmatpush2.bf16.msra.mxu1 %v10052_v8  ;;  %4335 = vmatpush2.bf16.msra.mxu0 %v10055_v9  ;;  %v10129_v8 = vld [vmem:[%s12556_s9 + $0x20c] ss:$16 sps:$4 sm:$0xff]   ;;  %v10124_v9 = vld [vmem:[%s12556_s9 + $0x8] ss:$16 sps:$4 sm:$0xff]  }
 0x461   : > { %4295 = vmatprep.subr.bf16.mxu1 %v10060_v10  ;;  %4336 = vmatprep.subr.bf16.mxu0 %v10063_v7  ;;  %v10127_v10 = vld [vmem:[%s12556_s9 + $0x208] ss:$16 sps:$4 sm:$0xff]   ;;  %v10132_v7 = vld [vmem:[%s12556_s9 + $0x1ec] ss:$16 sps:$4 sm:$0xff]  }
 0x464   : > { %4296 = vmatpush2.bf16.msra.mxu1 %v10058_v1  ;;  %4337 = vmatpush2.bf16.msra.mxu0 %v10061_v12  ;;  %v10135_v1 = vld [vmem:[%s12556_s9 + $0x3ec] ss:$16 sps:$4 sm:$0xff]   ;;  %v10130_v12 = vld [vmem:[%s12556_s9 + $0x1e8] ss:$16 sps:$4 sm:$0xff]  }
 0x465   : > { %4297 = vmatprep.subr.bf16.mxu1 %v10066_v31  ;;  %4338 = vmatprep.subr.bf16.mxu0 %v10069_v13  ;;  %v10133_v31 = vld [vmem:[%s12556_s9 + $0x3e8] ss:$16 sps:$4 sm:$0xff]   ;;  %v10138_v13 = vld [vmem:[%s12556_s9 + $0x1cc] ss:$16 sps:$4 sm:$0xff]  }
 0x468   : > { %4298 = vmatpush2.bf16.msra.mxu1 %v10064_v15  ;;  %4339 = vmatpush2.bf16.msra.mxu0 %v10067_v6  ;;  %v10141_v15 = vld [vmem:[%s12556_s9 + $0x3cc] ss:$16 sps:$4 sm:$0xff]   ;;  %v10136_v6 = vld [vmem:[%s12556_s9 + $0x1c8] ss:$16 sps:$4 sm:$0xff]  }
 0x469   : > { %4299 = vmatprep.subr.bf16.mxu1 %v10072_v20  ;;  %4340 = vmatprep.subr.bf16.mxu0 %v10075_v21  ;;  %v10139_v20 = vld [vmem:[%s12556_s9 + $0x3c8] ss:$16 sps:$4 sm:$0xff]   ;;  %v10144_v21 = vld [vmem:[%s12556_s9 + $0x1ac] ss:$16 sps:$4 sm:$0xff]  }
 0x46c   : > { %4300 = vmatpush2.bf16.msra.mxu1 %v10070_v25  ;;  %4341 = vmatpush2.bf16.msra.mxu0 %v10073_v26  ;;  %v10147_v25 = vld [vmem:[%s12556_s9 + $0x3ac] ss:$16 sps:$4 sm:$0xff]   ;;  %v10142_v26 = vld [vmem:[%s12556_s9 + $0x1a8] ss:$16 sps:$4 sm:$0xff]  }
 0x46d   : > { %4301 = vmatprep.subr.bf16.mxu1 %v10078_v27  ;;  %4342 = vmatprep.subr.bf16.mxu0 %v10081_v28  ;;  %v10145_v27 = vld [vmem:[%s12556_s9 + $0x3a8] ss:$16 sps:$4 sm:$0xff]   ;;  %v10150_v28 = vld [vmem:[%s12556_s9 + $0x18c] ss:$16 sps:$4 sm:$0xff]  }
 0x470   : > { %4302 = vmatpush2.bf16.msra.mxu1 %v10076_v32  ;;  %4343 = vmatpush2.bf16.msra.mxu0 %v10079_v33  ;;  %v10153_v32 = vld [vmem:[%s12556_s9 + $0x38c] ss:$16 sps:$4 sm:$0xff]   ;;  %v10148_v33 = vld [vmem:[%s12556_s9 + $0x188] ss:$16 sps:$4 sm:$0xff]  }
 0x471   : > { %4353 = vmatprep.subr.bf16.mxu1 %v10084_v49  ;;  %4394 = vmatprep.subr.bf16.mxu0 %v10087_v40  ;;  %v10159_v49 = vld [vmem:[%s12556_s9 + $0x36c] ss:$16 sps:$4 sm:$0xff]   ;;  %v10154_v40 = vld [vmem:[%s12556_s9 + $0x168] ss:$16 sps:$4 sm:$0xff]  }
 0x473   : > { %4304 = vmatmul.mubr.bf16.vlgmr.msra.gmra.mxu1 %v11773_v37  ;;  %4345 = vmatmul.mubr.bf16.vlgmr.msra.gmra.mxu0 %v11775_v52 }
 0x474   : > { %4354 = vmatpush1.bf16.msra.mxu1 %v10082_v30  ;;  %4385 = vmatprep.mubr.bf16.mxu1 %v11556_v19  ;;  %v10099_v19 = vld [vmem:[%s12556_s9 + $0x2ac] ss:$16 sps:$4 sm:$0xff]   ;;  %v10157_v30 = vld [vmem:[%s12556_s9 + $0x368] ss:$16 sps:$4 sm:$0xff]  }
 0x475   : > { %4395 = vmatpush1.bf16.msra.mxu0 %v10085_v3  ;;  %4426 = vmatprep.mubr.bf16.mxu0 %v11558_v11  ;;  %v10097_v11 = vld [vmem:[%s12556_s9 + $0x2a8] ss:$16 sps:$4 sm:$0xff]   ;;  %v10162_v3 = vld [vmem:[%s12556_s9 + $0x14c] ss:$16 sps:$4 sm:$0xff]  }
 0x476   : > { %4355 = vmatprep.subr.bf16.mxu1 %v10090_v36  ;;  %4396 = vmatprep.subr.bf16.mxu0 %v10093_v24  ;;  %v10165_v36 = vld [vmem:[%s12556_s9 + $0x34c] ss:$16 sps:$4 sm:$0xff]   ;;  %v10160_v24 = vld [vmem:[%s12556_s9 + $0x148] ss:$16 sps:$4 sm:$0xff]  }
 0x478   : > { %4356 = vmatpush1.bf16.msra.mxu1 %v10088_v38  ;;  %v10163_v38 = vld [vmem:[%s12556_s9 + $0x348] ss:$16 sps:$4 sm:$0xff]  }
 0x479   : > { %4397 = vmatpush1.bf16.msra.mxu0 %v10091_v41  ;;  %4357 = vmatprep.subr.bf16.mxu1 %v10096_v42  ;;  %v10168_v41 = vld [vmem:[%s12556_s9 + $0x12c] ss:$16 sps:$4 sm:$0xff]  }
 0x47a   : > { %4398 = vmatprep.subr.bf16.mxu0 %v10099_v19  ;;  %v10171_v42 = vld [vmem:[%s12556_s9 + $0x32c] ss:$16 sps:$4 sm:$0xff]   ;;  %v10166_v19 = vld [vmem:[%s12556_s9 + $0x128] ss:$16 sps:$4 sm:$0xff]  }
 0x47c   : > { %4358 = vmatpush1.bf16.msra.mxu1 %v10094_v43  ;;  %v10169_v43 = vld [vmem:[%s12556_s9 + $0x328] ss:$16 sps:$4 sm:$0xff]  }
 0x47d   : > { %4399 = vmatpush1.bf16.msra.mxu0 %v10097_v11  ;;  %4359 = vmatprep.subr.bf16.mxu1 %v10102_v59  ;;  %v10174_v11 = vld [vmem:[%s12556_s9 + $0x10c] ss:$16 sps:$4 sm:$0xff]  }
 0x47e   : > { %4400 = vmatprep.subr.bf16.mxu0 %v10105_v16  ;;  %v10177_v59 = vld [vmem:[%s12556_s9 + $0x30c] ss:$16 sps:$4 sm:$0xff]   ;;  %v10172_v16 = vld [vmem:[%s12556_s9 + $0x108] ss:$16 sps:$4 sm:$0xff]  }
 0x480   : > { %4360 = vmatpush1.bf16.msra.mxu1 %v10100_v18  ;;  %v10175_v18 = vld [vmem:[%s12556_s9 + $0x308] ss:$16 sps:$4 sm:$0xff]  }
 0x481   : > { %4401 = vmatpush1.bf16.msra.mxu0 %v10103_v45  ;;  %4361 = vmatprep.subr.bf16.mxu1 %v10108_v46  ;;  %v10180_v45 = vld [vmem:[%s12556_s9 + $0x4ec] ss:$16 sps:$4 sm:$0xff]  }
 0x482   : > { %4402 = vmatprep.subr.bf16.mxu0 %v10111_v53  ;;  %v10183_v46 = vld [vmem:[%s12556_s9 + $0x6ec] ss:$16 sps:$4 sm:$0xff]   ;;  %v10178_v53 = vld [vmem:[%s12556_s9 + $0x4e8] ss:$16 sps:$4 sm:$0xff]  }
 0x484   : > { %4362 = vmatpush1.bf16.msra.mxu1 %v10106_v47  ;;  %v10181_v47 = vld [vmem:[%s12556_s9 + $0x6e8] ss:$16 sps:$4 sm:$0xff]  }
 0x485   : > { %4403 = vmatpush1.bf16.msra.mxu0 %v10109_v48  ;;  %4363 = vmatprep.subr.bf16.mxu1 %v10114_v50  ;;  %v10186_v48 = vld [vmem:[%s12556_s9 + $0x4cc] ss:$16 sps:$4 sm:$0xff]  }
 0x486   : > { %4404 = vmatprep.subr.bf16.mxu0 %v10117_v44  ;;  %v10189_v50 = vld [vmem:[%s12556_s9 + $0x6cc] ss:$16 sps:$4 sm:$0xff]   ;;  %v10184_v44 = vld [vmem:[%s12556_s9 + $0x4c8] ss:$16 sps:$4 sm:$0xff]  }
 0x488   : > { %4364 = vmatpush1.bf16.msra.mxu1 %v10112_v51  ;;  %v10187_v51 = vld [vmem:[%s12556_s9 + $0x6c8] ss:$16 sps:$4 sm:$0xff]  }
 0x489   : > { %4405 = vmatpush1.bf16.msra.mxu0 %v10115_v57  ;;  %4365 = vmatprep.subr.bf16.mxu1 %v10120_v58  ;;  %v10193_v57 = vld [vmem:[%s12556_s9 + $0x6a8] ss:$16 sps:$4 sm:$0xff]   ;;  %v10201_v58 = vld [vmem:[%s12556_s9 + $0x68c] ss:$16 sps:$4 sm:$0xff]  }
 0x48a   : > { %4406 = vmatprep.subr.bf16.mxu0 %v10123_v60  ;;  %v10196_v60 = vld [vmem:[%s12556_s9 + $0x488] ss:$16 sps:$4 sm:$0xff]  }
 0x48c   : > { %4366 = vmatpush1.bf16.msra.mxu1 %v10118_v2  ;;  %v10199_v2 = vld [vmem:[%s12556_s9 + $0x688] ss:$16 sps:$4 sm:$0xff]  }
 0x48d   : > { %4407 = vmatpush1.bf16.msra.mxu0 %v10121_v4  ;;  %4367 = vmatprep.subr.bf16.mxu1 %v10126_v5  ;;  %v10204_v4 = vld [vmem:[%s12556_s9 + $0x46c] ss:$16 sps:$4 sm:$0xff]  }
 0x48e   : > { %4408 = vmatprep.subr.bf16.mxu0 %v10129_v8  ;;  %v10207_v5 = vld [vmem:[%s12556_s9 + $0x66c] ss:$16 sps:$4 sm:$0xff]   ;;  %v10202_v8 = vld [vmem:[%s12556_s9 + $0x468] ss:$16 sps:$4 sm:$0xff]  }
 0x490   : > { %4368 = vmatpush1.bf16.msra.mxu1 %v10124_v9  ;;  %v10205_v9 = vld [vmem:[%s12556_s9 + $0x668] ss:$16 sps:$4 sm:$0xff]  }
 0x491   : > { %4409 = vmatpush1.bf16.msra.mxu0 %v10127_v10  ;;  %4369 = vmatprep.subr.bf16.mxu1 %v10132_v7  ;;  %v10210_v10 = vld [vmem:[%s12556_s9 + $0x44c] ss:$16 sps:$4 sm:$0xff]  }
 0x492   : > { %4410 = vmatprep.subr.bf16.mxu0 %v10135_v1  ;;  %v10213_v7 = vld [vmem:[%s12556_s9 + $0x64c] ss:$16 sps:$4 sm:$0xff]   ;;  %v10208_v1 = vld [vmem:[%s12556_s9 + $0x448] ss:$16 sps:$4 sm:$0xff]  }
 0x494   : > { %4370 = vmatpush2.bf16.msra.mxu1 %v10130_v12  ;;  %v10211_v12 = vld [vmem:[%s12556_s9 + $0x648] ss:$16 sps:$4 sm:$0xff]  }
 0x495   : > { %4411 = vmatpush2.bf16.msra.mxu0 %v10133_v31  ;;  %4371 = vmatprep.subr.bf16.mxu1 %v10138_v13  ;;  %v10216_v31 = vld [vmem:[%s12556_s9 + $0x42c] ss:$16 sps:$4 sm:$0xff]  }
 0x496   : > { %4412 = vmatprep.subr.bf16.mxu0 %v10141_v15  ;;  %v10219_v13 = vld [vmem:[%s12556_s9 + $0x62c] ss:$16 sps:$4 sm:$0xff]   ;;  %v10214_v15 = vld [vmem:[%s12556_s9 + $0x428] ss:$16 sps:$4 sm:$0xff]  }
 0x498   : > { %4372 = vmatpush2.bf16.msra.mxu1 %v10136_v6  ;;  %v10217_v6 = vld [vmem:[%s12556_s9 + $0x628] ss:$16 sps:$4 sm:$0xff]  }
 0x499   : > { %4413 = vmatpush2.bf16.msra.mxu0 %v10139_v20  ;;  %4373 = vmatprep.subr.bf16.mxu1 %v10144_v21  ;;  %v10222_v20 = vld [vmem:[%s12556_s9 + $0x40c] ss:$16 sps:$4 sm:$0xff]  }
 0x49a   : > { %4414 = vmatprep.subr.bf16.mxu0 %v10147_v25  ;;  %v10225_v21 = vld [vmem:[%s12556_s9 + $0x60c] ss:$16 sps:$4 sm:$0xff]   ;;  %v10220_v25 = vld [vmem:[%s12556_s9 + $0x408] ss:$16 sps:$4 sm:$0xff]  }
 0x49c   : > { %4374 = vmatpush2.bf16.msra.mxu1 %v10142_v26  ;;  %v10223_v26 = vld [vmem:[%s12556_s9 + $0x608] ss:$16 sps:$4 sm:$0xff]  }
 0x49d   : > { %4415 = vmatpush2.bf16.msra.mxu0 %v10145_v27  ;;  %4375 = vmatprep.subr.bf16.mxu1 %v10150_v28  ;;  %v10228_v27 = vld [vmem:[%s12556_s9 + $0x5ec] ss:$16 sps:$4 sm:$0xff]  }
 0x49e   : > { %4416 = vmatprep.subr.bf16.mxu0 %v10153_v32  ;;  %v10231_v28 = vld [vmem:[%s12556_s9 + $0x7ec] ss:$16 sps:$4 sm:$0xff]   ;;  %v10226_v32 = vld [vmem:[%s12556_s9 + $0x5e8] ss:$16 sps:$4 sm:$0xff]  }
 0x4a0   : > { %4376 = vmatpush2.bf16.msra.mxu1 %v10148_v33  ;;  %v10229_v33 = vld [vmem:[%s12556_s9 + $0x7e8] ss:$16 sps:$4 sm:$0xff]  }
 0x4a1   : > { %4417 = vmatpush2.bf16.msra.mxu0 %v10151_v34  ;;  %4377 = vmatprep.subr.bf16.mxu1 %v10156_v35  ;;  %v10234_v34 = vld [vmem:[%s12556_s9 + $0x5cc] ss:$16 sps:$4 sm:$0xff]  }
 0x4a2   : > { %4418 = vmatprep.subr.bf16.mxu0 %v10159_v49  ;;  %v10237_v35 = vld [vmem:[%s12556_s9 + $0x7cc] ss:$16 sps:$4 sm:$0xff]   ;;  %v10232_v49 = vld [vmem:[%s12556_s9 + $0x5c8] ss:$16 sps:$4 sm:$0xff]  }
 0x4a4   : > { %4378 = vmatpush2.bf16.msra.mxu1 %v10154_v40  ;;  %v10235_v40 = vld [vmem:[%s12556_s9 + $0x7c8] ss:$16 sps:$4 sm:$0xff]  }
 0x4a5   : > { %4419 = vmatpush2.bf16.msra.mxu0 %v10157_v30  ;;  %4379 = vmatprep.subr.bf16.mxu1 %v10162_v3  ;;  %v10240_v30 = vld [vmem:[%s12556_s9 + $0x5ac] ss:$16 sps:$4 sm:$0xff]  }
 0x4a6   : > { %4420 = vmatprep.subr.bf16.mxu0 %v10165_v36  ;;  %v10243_v3 = vld [vmem:[%s12556_s9 + $0x7ac] ss:$16 sps:$4 sm:$0xff]   ;;  %v10238_v36 = vld [vmem:[%s12556_s9 + $0x5a8] ss:$16 sps:$4 sm:$0xff]  }
 0x4a8   : > { %4380 = vmatpush2.bf16.msra.mxu1 %v10160_v24  ;;  %v10241_v24 = vld [vmem:[%s12556_s9 + $0x7a8] ss:$16 sps:$4 sm:$0xff]  }
 0x4a9   : > { %4421 = vmatpush2.bf16.msra.mxu0 %v10163_v38  ;;  %4381 = vmatprep.subr.bf16.mxu1 %v10168_v41  ;;  %v10246_v38 = vld [vmem:[%s12556_s9 + $0x58c] ss:$16 sps:$4 sm:$0xff]  }
 0x4aa   : > { %4422 = vmatprep.subr.bf16.mxu0 %v10171_v42  ;;  %v10249_v41 = vld [vmem:[%s12556_s9 + $0x78c] ss:$16 sps:$4 sm:$0xff]   ;;  %v10244_v42 = vld [vmem:[%s12556_s9 + $0x588] ss:$16 sps:$4 sm:$0xff]  }
 0x4ac   : > { %4382 = vmatpush2.bf16.msra.mxu1 %v10166_v19  ;;  %v10247_v19 = vld [vmem:[%s12556_s9 + $0x788] ss:$16 sps:$4 sm:$0xff]  }
 0x4ad   : > { %4423 = vmatpush2.bf16.msra.mxu0 %v10169_v43  ;;  %4383 = vmatprep.subr.bf16.mxu1 %v10174_v11  ;;  %v10252_v43 = vld [vmem:[%s12556_s9 + $0x56c] ss:$16 sps:$4 sm:$0xff]  }
 0x4ae   : > { %4424 = vmatprep.subr.bf16.mxu0 %v10177_v59  ;;  %v10255_v11 = vld [vmem:[%s12556_s9 + $0x76c] ss:$16 sps:$4 sm:$0xff]   ;;  %v10250_v59 = vld [vmem:[%s12556_s9 + $0x568] ss:$16 sps:$4 sm:$0xff]  }
 0x4b0   : > { %4384 = vmatpush2.bf16.msra.mxu1 %v10172_v16  ;;  %v10253_v16 = vld [vmem:[%s12556_s9 + $0x768] ss:$16 sps:$4 sm:$0xff]  }
 0x4b1   : > { %4425 = vmatpush2.bf16.msra.mxu0 %v10175_v18  ;;  %4435 = vmatprep.subr.bf16.mxu1 %v10180_v45  ;;  %v10258_v18 = vld [vmem:[%s12556_s9 + $0x54c] ss:$16 sps:$4 sm:$0xff]  }
 0x4b2   : > { %4476 = vmatprep.subr.bf16.mxu0 %v10183_v46  ;;  %v10261_v45 = vld [vmem:[%s12556_s9 + $0x74c] ss:$16 sps:$4 sm:$0xff]   ;;  %v10256_v46 = vld [vmem:[%s12556_s9 + $0x548] ss:$16 sps:$4 sm:$0xff]  }
 0x4b3   : > { %4386 = vmatmul.mubr.bf16.vlgmr.msra.gmra.mxu1 %v11566_v54  ;;  %v10192_v54 = vld [vmem:[%s12556_s9 + $0x4ac] ss:$16 sps:$4 sm:$0xff]  }
 0x4b4   : > { %4427 = vmatmul.mubr.bf16.vlgmr.msra.gmra.mxu0 %v11568_v29  ;;  %4436 = vmatpush1.bf16.msra.mxu1 %v10178_v53  ;;  %v10195_v29 = vld [vmem:[%s12556_s9 + $0x6ac] ss:$16 sps:$4 sm:$0xff]   ;;  %v10259_v53 = vld [vmem:[%s12556_s9 + $0x748] ss:$16 sps:$4 sm:$0xff]  }
 0x4b5   : > { %4467 = vmatprep.mubr.bf16.mxu1 %v11580_v61  ;;  %4477 = vmatpush1.bf16.msra.mxu0 %v10181_v47  ;;  %v10190_v61 = vld [vmem:[%s12556_s9 + $0x4a8] ss:$16 sps:$4 sm:$0xff]   ;;  %v10264_v47 = vld [vmem:[%s12556_s9 + $0x52c] ss:$16 sps:$4 sm:$0xff]  }
 0x4b6   : > { %4508 = vmatprep.mubr.bf16.mxu0 %v11582_v14  ;;  %4437 = vmatprep.subr.bf16.mxu1 %v10186_v48  ;;  %v10198_v14 = vld [vmem:[%s12556_s9 + $0x48c] ss:$16 sps:$4 sm:$0xff]  }
 0x4b7   : > { %4478 = vmatprep.subr.bf16.mxu0 %v10189_v50  ;;  %v10267_v48 = vld [vmem:[%s12556_s9 + $0x72c] ss:$16 sps:$4 sm:$0xff]   ;;  %v10262_v50 = vld [vmem:[%s12556_s9 + $0x528] ss:$16 sps:$4 sm:$0xff]  }
 0x4b8   : > { %4438 = vmatpush1.bf16.msra.mxu1 %v10184_v44  ;;  %v10265_v44 = vld [vmem:[%s12556_s9 + $0x728] ss:$16 sps:$4 sm:$0xff]  }
 0x4b9   : > { %4479 = vmatpush1.bf16.msra.mxu0 %v10187_v51  ;;  %4439 = vmatprep.subr.bf16.mxu1 %v10192_v54  ;;  %v10270_v51 = vld [vmem:[%s12556_s9 + $0x50c] ss:$16 sps:$4 sm:$0xff]  }
 0x4ba   : > { %4480 = vmatprep.subr.bf16.mxu0 %v10195_v29  ;;  %v10273_v54 = vld [vmem:[%s12556_s9 + $0x70c] ss:$16 sps:$4 sm:$0xff]   ;;  %v10268_v29 = vld [vmem:[%s12556_s9 + $0x508] ss:$16 sps:$4 sm:$0xff]  }
 0x4bc   : > { %4440 = vmatpush1.bf16.msra.mxu1 %v10190_v61  ;;  %v10271_v61 = vld [vmem:[%s12556_s9 + $0x708] ss:$16 sps:$4 sm:$0xff]  }
 0x4bd   : > { %4481 = vmatpush1.bf16.msra.mxu0 %v10193_v57  ;;  %4441 = vmatprep.subr.bf16.mxu1 %v10198_v14  ;;  %v10276_v57 = vld [vmem:[%s12577_s24 + $0x74] ss:$8 sps:$4 sm:$0xff]   ;;  %v10274_v14 = vld [vmem:[%s12577_s24 + $0x70] ss:$8 sps:$4 sm:$0xff]  }
 0x4be   : > { %4482 = vmatprep.subr.bf16.mxu0 %v10201_v58  ;;  %v10279_v58 = vld [vmem:[%s12577_s24 + $0x64] ss:$8 sps:$4 sm:$0xff]  }
 0x4c0   : > { %4442 = vmatpush1.bf16.msra.mxu1 %v10196_v60 }
 0x4c1   : > { %4483 = vmatpush1.bf16.msra.mxu0 %v10199_v2  ;;  %4443 = vmatprep.subr.bf16.mxu1 %v10204_v4  ;;  %v10277_v4 = vld [vmem:[%s12577_s24 + $0x60] ss:$8 sps:$4 sm:$0xff]  }
 0x4c2   : > { %4484 = vmatprep.subr.bf16.mxu0 %v10207_v5 }
 0x4c4   : > { %4444 = vmatpush1.bf16.msra.mxu1 %v10202_v8 }
 0x4c5   : > { %4485 = vmatpush1.bf16.msra.mxu0 %v10205_v9  ;;  %4445 = vmatprep.subr.bf16.mxu1 %v10210_v10 }
 0x4c6   : > { %4486 = vmatprep.subr.bf16.mxu0 %v10213_v7 }
 0x4c8   : > { %4446 = vmatpush1.bf16.msra.mxu1 %v10208_v1 }
 0x4c9   : > { %4487 = vmatpush1.bf16.msra.mxu0 %v10211_v12  ;;  %4447 = vmatprep.subr.bf16.mxu1 %v10216_v31  ;;  %v10285_v12 = vld [vmem:[%s12577_s24 + $0x44] ss:$8 sps:$4 sm:$0xff]   ;;  %v10322_v31 = vld [vmem:[%s12577_s24 + $0x170] ss:$8 sps:$4 sm:$0xff]  }
 0x4ca   : > { %4488 = vmatprep.subr.bf16.mxu0 %v10219_v13  ;;  %v10324_v13 = vld [vmem:[%s12577_s24 + $0x174] ss:$8 sps:$4 sm:$0xff]  }
 0x4cc   : > { %4448 = vmatpush1.bf16.msra.mxu1 %v10214_v15  ;;  %v10327_v15 = vld [vmem:[%s12577_s24 + $0x164] ss:$8 sps:$4 sm:$0xff]  }
 0x4cd   : > { %4489 = vmatpush1.bf16.msra.mxu0 %v10217_v6  ;;  %4449 = vmatprep.subr.bf16.mxu1 %v10222_v20  ;;  %v10283_v6 = vld [vmem:[%s12577_s24 + $0x40] ss:$8 sps:$4 sm:$0xff]   ;;  %v10288_v20 = vld [vmem:[%s12577_s24 + $0x34] ss:$8 sps:$4 sm:$0xff]  }
 0x4ce   : > { %4490 = vmatprep.subr.bf16.mxu0 %v10225_v21  ;;  %v10325_v21 = vld [vmem:[%s12577_s24 + $0x160] ss:$8 sps:$4 sm:$0xff]  }
 0x4d0   : > { %4450 = vmatpush1.bf16.msra.mxu1 %v10220_v25  ;;  %v10330_v25 = vld [vmem:[%s12577_s24 + $0x154] ss:$8 sps:$4 sm:$0xff]  }
 0x4d1   : > { %4491 = vmatpush1.bf16.msra.mxu0 %v10223_v26  ;;  %4451 = vmatprep.subr.bf16.mxu1 %v10228_v27  ;;  %v10286_v26 = vld [vmem:[%s12577_s24 + $0x30] ss:$8 sps:$4 sm:$0xff]   ;;  %v10291_v27 = vld [vmem:[%s12577_s24 + $0x24] ss:$8 sps:$4 sm:$0xff]  }
 0x4d2   : > { %4492 = vmatprep.subr.bf16.mxu0 %v10231_v28  ;;  %v10328_v28 = vld [vmem:[%s12577_s24 + $0x150] ss:$8 sps:$4 sm:$0xff]  }
 0x4d4   : > { %4452 = vmatpush2.bf16.msra.mxu1 %v10226_v32  ;;  %v10333_v32 = vld [vmem:[%s12577_s24 + $0x144] ss:$8 sps:$4 sm:$0xff]  }
 0x4d5   : > { %4493 = vmatpush2.bf16.msra.mxu0 %v10229_v33  ;;  %4453 = vmatprep.subr.bf16.mxu1 %v10234_v34  ;;  %v10289_v33 = vld [vmem:[%s12577_s24 + $0x20] ss:$8 sps:$4 sm:$0xff]   ;;  %v10294_v34 = vld [vmem:[%s12577_s24 + $0x14] ss:$8 sps:$4 sm:$0xff]  }
 0x4d6   : > { %4494 = vmatprep.subr.bf16.mxu0 %v10237_v35  ;;  %v10331_v35 = vld [vmem:[%s12577_s24 + $0x140] ss:$8 sps:$4 sm:$0xff]  }
 0x4d8   : > { %4454 = vmatpush2.bf16.msra.mxu1 %v10232_v49  ;;  %v10336_v49 = vld [vmem:[%s12577_s24 + $0x134] ss:$8 sps:$4 sm:$0xff]  }
 0x4d9   : > { %4495 = vmatpush2.bf16.msra.mxu0 %v10235_v40  ;;  %4455 = vmatprep.subr.bf16.mxu1 %v10240_v30  ;;  %v10292_v40 = vld [vmem:[%s12577_s24 + $0x10] ss:$8 sps:$4 sm:$0xff]   ;;  %v10297_v30 = vld [vmem:[%s12577_s24 + $0x4] ss:$8 sps:$4 sm:$0xff]  }
 0x4da   : > { %4496 = vmatprep.subr.bf16.mxu0 %v10243_v3  ;;  %v10334_v3 = vld [vmem:[%s12577_s24 + $0x130] ss:$8 sps:$4 sm:$0xff]  }
 0x4dc   : > { %4456 = vmatpush2.bf16.msra.mxu1 %v10238_v36  ;;  %v10339_v36 = vld [vmem:[%s12577_s24 + $0x124] ss:$8 sps:$4 sm:$0xff]  }
 0x4dd   : > { %4497 = vmatpush2.bf16.msra.mxu0 %v10241_v24  ;;  %4457 = vmatprep.subr.bf16.mxu1 %v10246_v38  ;;  %v10295_v24 = vld [vmem:[%s12577_s24] ss:$8 sps:$4 sm:$0xff]   ;;  %v10300_v38 = vld [vmem:[%s12577_s24 + $0xf4] ss:$8 sps:$4 sm:$0xff]  }
 0x4de   : > { %4498 = vmatprep.subr.bf16.mxu0 %v10249_v41  ;;  %v10337_v41 = vld [vmem:[%s12577_s24 + $0x120] ss:$8 sps:$4 sm:$0xff]  }
 0x4e0   : > { %4458 = vmatpush2.bf16.msra.mxu1 %v10244_v42  ;;  %v10342_v42 = vld [vmem:[%s12577_s24 + $0x114] ss:$8 sps:$4 sm:$0xff]  }
 0x4e1   : > { %4499 = vmatpush2.bf16.msra.mxu0 %v10247_v19  ;;  %4459 = vmatprep.subr.bf16.mxu1 %v10252_v43  ;;  %v10298_v19 = vld [vmem:[%s12577_s24 + $0xf0] ss:$8 sps:$4 sm:$0xff]   ;;  %v10303_v43 = vld [vmem:[%s12577_s24 + $0xe4] ss:$8 sps:$4 sm:$0xff]  }
 0x4e2   : > { %4500 = vmatprep.subr.bf16.mxu0 %v10255_v11  ;;  %v10340_v11 = vld [vmem:[%s12577_s24 + $0x110] ss:$8 sps:$4 sm:$0xff]  }
 0x4e4   : > { %4460 = vmatpush2.bf16.msra.mxu1 %v10250_v59  ;;  %v10345_v59 = vld [vmem:[%s12577_s24 + $0x104] ss:$8 sps:$4 sm:$0xff]  }
 0x4e5   : > { %4501 = vmatpush2.bf16.msra.mxu0 %v10253_v16  ;;  %4461 = vmatprep.subr.bf16.mxu1 %v10258_v18  ;;  %v10301_v16 = vld [vmem:[%s12577_s24 + $0xe0] ss:$8 sps:$4 sm:$0xff]   ;;  %v10306_v18 = vld [vmem:[%s12577_s24 + $0xd4] ss:$8 sps:$4 sm:$0xff]  }
 0x4e6   : > { %4502 = vmatprep.subr.bf16.mxu0 %v10261_v45  ;;  %v10343_v45 = vld [vmem:[%s12577_s24 + $0x100] ss:$8 sps:$4 sm:$0xff]  }
 0x4e8   : > { %4462 = vmatpush2.bf16.msra.mxu1 %v10256_v46  ;;  %v10348_v46 = vld [vmem:[%s12577_s24 + $0x1f4] ss:$8 sps:$4 sm:$0xff]  }
 0x4e9   : > { %4503 = vmatpush2.bf16.msra.mxu0 %v10259_v53  ;;  %4463 = vmatprep.subr.bf16.mxu1 %v10264_v47  ;;  %v10304_v53 = vld [vmem:[%s12577_s24 + $0xd0] ss:$8 sps:$4 sm:$0xff]   ;;  %v10309_v47 = vld [vmem:[%s12577_s24 + $0xc4] ss:$8 sps:$4 sm:$0xff]  }
 0x4ea   : > { %4504 = vmatprep.subr.bf16.mxu0 %v10267_v48  ;;  %v10346_v48 = vld [vmem:[%s12577_s24 + $0x1f0] ss:$8 sps:$4 sm:$0xff]  }
 0x4ec   : > { %4464 = vmatpush2.bf16.msra.mxu1 %v10262_v50  ;;  %v10351_v50 = vld [vmem:[%s12577_s24 + $0x1e4] ss:$8 sps:$4 sm:$0xff]  }
 0x4ed   : > { %4505 = vmatpush2.bf16.msra.mxu0 %v10265_v44  ;;  %4465 = vmatprep.subr.bf16.mxu1 %v10270_v51  ;;  %v10307_v44 = vld [vmem:[%s12577_s24 + $0xc0] ss:$8 sps:$4 sm:$0xff]   ;;  %v10312_v51 = vld [vmem:[%s12577_s24 + $0xb4] ss:$8 sps:$4 sm:$0xff]  }
 0x4ee   : > { %4506 = vmatprep.subr.bf16.mxu0 %v10273_v54  ;;  %v10349_v54 = vld [vmem:[%s12577_s24 + $0x1e0] ss:$8 sps:$4 sm:$0xff]  }
 0x4f0   : > { %4466 = vmatpush2.bf16.msra.mxu1 %v10268_v29  ;;  %v10354_v29 = vld [vmem:[%s12577_s24 + $0x1d4] ss:$8 sps:$4 sm:$0xff]  }
 0x4f1   : > { %4507 = vmatpush2.bf16.msra.mxu0 %v10271_v61  ;;  %4856 = vmatprep.subr.bf16.mxu1 %v10276_v57  ;;  %v10310_v61 = vld [vmem:[%s12577_s24 + $0xb0] ss:$8 sps:$4 sm:$0xff]   ;;  %v10315_v57 = vld [vmem:[%s12577_s24 + $0xa4] ss:$8 sps:$4 sm:$0xff]  }
 0x4f2   : > { %4897 = vmatprep.subr.bf16.mxu0 %v10324_v13 }
 0x4f3   : > { %4468 = vmatmul.mubr.bf16.vlgmr.msra.gmra.mxu1 %v11773_v37  ;;  %v12170_v60 = vpop.f32.mrf.mxu1  ;;  %v12172_v2 = vpop.f32.mrf.mxu0  ;;  %v10282_v37 = vld [vmem:[%s12577_s24 + $0x54] ss:$8 sps:$4 sm:$0xff]  }
 0x4f4   : > { %4509 = vmatmul.mubr.bf16.vlgmr.msra.gmra.mxu0 %v11775_v52  ;;  %4857 = vmatpush1.bf16.msra.mxu1 %v10274_v14  ;;  %v10280_v52 = vld [vmem:[%s12577_s24 + $0x50] ss:$8 sps:$4 sm:$0xff]  }
 0x4f5   : > { %v12178_v5 = vpop.f32.mrf.mxu1  ;;  %v12180_v8 = vpop.f32.mrf.mxu0  ;;  %4858 = vmatprep.subr.bf16.mxu1 %v10279_v58  ;;  %4898 = vmatpush1.bf16.msra.mxu0 %v10322_v31  ;;  %v10352_v14 = vld [vmem:[%s12577_s24 + $0x1d0] ss:$8 sps:$4 sm:$0xff]   ;;  %v10357_v58 = vld [vmem:[%s12577_s24 + $0x1c4] ss:$8 sps:$4 sm:$0xff]  }
 0x4f6   : > { %4899 = vmatprep.subr.bf16.mxu0 %v10327_v15  ;;  %v10319_v15 = vld [vmem:[%s12577_s24 + $0x80] ss:$8 sps:$4 sm:$0xff]  }
 0x4f7   : > { %v4227_v9 = vpop.f32.mrf.mxu1  ;;  %v4268_v10 = vpop.f32.mrf.mxu0 }
 0x4f8   : > { %4859 = vmatpush1.bf16.msra.mxu1 %v10277_v4  ;;  %v10313_v4 = vld [vmem:[%s12577_s24 + $0xa0] ss:$8 sps:$4 sm:$0xff]   ;;  %v10360_v10 = vld [vmem:[%s12577_s24 + $0x1b4] ss:$8 sps:$4 sm:$0xff]  }
 0x4f9   : > { %v4228_v7 = vpop.f32.mrf.mxu1  ;;  %v4269_v1 = vpop.f32.mrf.mxu0  ;;  %4860 = vmatprep.subr.bf16.mxu1 %v10282_v37  ;;  %4900 = vmatpush1.bf16.msra.mxu0 %v10325_v21  ;;  %v10318_v37 = vld [vmem:[%s12577_s24 + $0x94] ss:$8 sps:$4 sm:$0xff]   ;;  %v10355_v9 = vld [vmem:[%s12577_s24 + $0x1c0] ss:$8 sps:$4 sm:$0xff]  }
 0x4fa   : > { %4901 = vmatprep.subr.bf16.mxu0 %v10330_v25  ;;  %v10316_v7 = vld [vmem:[%s12577_s24 + $0x90] ss:$8 sps:$4 sm:$0xff]   ;;  %v10321_v1 = vld [vmem:[%s12577_s24 + $0x84] ss:$8 sps:$4 sm:$0xff]  }
 0x4fc   : > { %4861 = vmatpush1.bf16.msra.mxu1 %v10280_v52  ;;  %v12332_v52 = vld [vmem:[#allocation13] sm:$0xf] }
 0x4fd   : > { %4862 = vmatprep.subr.bf16.mxu1 %v10285_v12  ;;  %4902 = vmatpush1.bf16.msra.mxu0 %v10328_v28  ;;  %v10358_v12 = vld [vmem:[%s12577_s24 + $0x1b0] ss:$8 sps:$4 sm:$0xff]   ;;  %v4172_v31 = vrot.slane %v12332_v52, %v11393_v55  ;;  %v4176_v13 = vrot.slane %v12332_v52, %v11401_v62 }
 0x4fe   : > { %4903 = vmatprep.subr.bf16.mxu0 %v10333_v32 }
 0x500   : > { %4863 = vmatpush1.bf16.msra.mxu1 %v10283_v6  ;;  %v4224_v6 = vadd.f32 %v12170_v60, %v4172_v31 }
 0x501   : > { %4864 = vmatprep.subr.bf16.mxu1 %v10288_v20  ;;  %4904 = vmatpush1.bf16.msra.mxu0 %v10331_v35  ;;  %v4226_v20 = vadd.f32 %v12178_v5, %v4176_v13  ;;  %v2419_v13 = vld [vmem:[#allocation16 + $0x300] sm:$0xff] }
 0x502   : > { %4905 = vmatprep.subr.bf16.mxu0 %v10336_v49  ;;  %v4265_v21 = vadd.f32 %v12172_v2, %v4224_v6 }
 0x503   : > { %v4267_v28 = vadd.f32 %v12180_v8, %v4226_v20  ;;  %v10364_v8 = vld [vmem:[%s12577_s24 + $0x190] ss:$8 sps:$4 sm:$0xff]  }
 0x504   : > { %4865 = vmatpush1.bf16.msra.mxu1 %v10286_v26 }
 0x505   : > { %4866 = vmatprep.subr.bf16.mxu1 %v10291_v27  ;;  %4906 = vmatpush1.bf16.msra.mxu0 %v10334_v3  ;;  %v10363_v27 = vld [vmem:[%s12577_s24 + $0x1a4] ss:$8 sps:$4 sm:$0xff]  }
 0x506   : > { %4907 = vmatprep.subr.bf16.mxu0 %v10339_v36 }
 0x508   : > { %4867 = vmatpush1.bf16.msra.mxu1 %v10289_v33  ;;  %v10361_v33 = vld [vmem:[%s12577_s24 + $0x1a0] ss:$8 sps:$4 sm:$0xff]  }
 0x509   : > { %4868 = vmatprep.subr.bf16.mxu1 %v10294_v34  ;;  %4908 = vmatpush1.bf16.msra.mxu0 %v10337_v41  ;;  %v10369_v41 = vld [vmem:[%s12577_s24 + $0x184] ss:$8 sps:$4 sm:$0xff]  }
 0x50a   : > { %4909 = vmatprep.subr.bf16.mxu0 %v10342_v42 }
 0x50c   : > { %4869 = vmatpush1.bf16.msra.mxu1 %v10292_v40  ;;  %v10366_v40 = vld [vmem:[%s12577_s24 + $0x194] ss:$8 sps:$4 sm:$0xff]  }
 0x50d   : > { %4870 = vmatprep.subr.bf16.mxu1 %v10297_v30  ;;  %4910 = vmatpush1.bf16.msra.mxu0 %v10340_v11 }
 0x50e   : > { %4911 = vmatprep.subr.bf16.mxu0 %v10345_v59 }
 0x510   : > { %4871 = vmatpush1.bf16.msra.mxu1 %v10295_v24 }
 0x511   : > { %4872 = vmatprep.subr.bf16.mxu1 %v10300_v38  ;;  %4912 = vmatpush1.bf16.msra.mxu0 %v10343_v45 }
 0x512   : > { %4913 = vmatprep.subr.bf16.mxu0 %v10348_v46 }
 0x514   : > { %4873 = vmatpush2.bf16.msra.mxu1 %v10298_v19  ;;  %v10367_v19 = vld [vmem:[%s12577_s24 + $0x180] ss:$8 sps:$4 sm:$0xff]  }
 0x515   : > { %4874 = vmatprep.subr.bf16.mxu1 %v10303_v43  ;;  %4914 = vmatpush2.bf16.msra.mxu0 %v10346_v48  ;;  %v2547_v48 = vld [vmem:[#allocation16 + $0x700] sm:$0xff] }
 0x516   : > { %4915 = vmatprep.subr.bf16.mxu0 %v10351_v50  ;;  %v2563_v50 = vld [vmem:[#allocation16 + $0x780] sm:$0xff] }
 0x518   : > { %4875 = vmatpush2.bf16.msra.mxu1 %v10301_v16 }
 0x519   : > { %4876 = vmatprep.subr.bf16.mxu1 %v10306_v18  ;;  %4916 = vmatpush2.bf16.msra.mxu0 %v10349_v54  ;;  %v9397_v54 = vcombine.high %v2547_v48, %v2563_v50 }
 0x51a   : > { %4917 = vmatprep.subr.bf16.mxu0 %v10354_v29  ;;  %v12382_v29 = vld [vmem:[#allocation16 + $0x788] sm:$0xff] }
 0x51c   : > { %4877 = vmatpush2.bf16.msra.mxu1 %v10304_v53 }
 0x51d   : > { %4878 = vmatprep.subr.bf16.mxu1 %v10309_v47  ;;  %4918 = vmatpush2.bf16.msra.mxu0 %v10352_v14 }
 0x51e   : > { %4919 = vmatprep.subr.bf16.mxu0 %v10357_v58 }
 0x520   : > { %4879 = vmatpush2.bf16.msra.mxu1 %v10307_v44  ;;  %v12380_v44 = vld [vmem:[#allocation16 + $0x708] sm:$0xff] }
 0x521   : > { %4880 = vmatprep.subr.bf16.mxu1 %v10312_v51  ;;  %4920 = vmatpush2.bf16.msra.mxu0 %v10355_v9  ;;  %v9396_v51 = vcombine.low %v2547_v48, %v2563_v50  ;;  %v9399_v14 = vcombine.high %v12380_v44, %v12382_v29 }
 0x522   : > { %4921 = vmatprep.subr.bf16.mxu0 %v10360_v10 }
 0x524   : > { %4881 = vmatpush2.bf16.msra.mxu1 %v10310_v61  ;;  %v2515_v61 = vld [vmem:[#allocation16 + $0x600] sm:$0xff] }
 0x525   : > { %4882 = vmatprep.subr.bf16.mxu1 %v10315_v57  ;;  %4922 = vmatpush2.bf16.msra.mxu0 %v10358_v12  ;;  %v2531_v57 = vld [vmem:[#allocation16 + $0x680] sm:$0xff] }
 0x526   : > { %4923 = vmatprep.subr.bf16.mxu0 %v10363_v27  ;;  %v9365_v58 = vcombine.high %v2515_v61, %v2531_v57  ;;  %v9364_v9 = vcombine.low %v2515_v61, %v2531_v57  ;;  %v2691_v61 = vld [vmem:[#allocation16 + $0xb80] sm:$0xff] }
 0x528   : > { %4883 = vmatpush2.bf16.msra.mxu1 %v10313_v4  ;;  %v2483_v4 = vld [vmem:[#allocation16 + $0x500] sm:$0xff] }
 0x529   : > { %4884 = vmatprep.subr.bf16.mxu1 %v10318_v37  ;;  %4924 = vmatpush2.bf16.msra.mxu0 %v10361_v33  ;;  %v2499_v37 = vld [vmem:[#allocation16 + $0x580] sm:$0xff] }
 0x52a   : > { %4925 = vmatprep.subr.bf16.mxu0 %v10366_v40  ;;  %v9333_v10 = vcombine.high %v2483_v4, %v2499_v37  ;;  %v9332_v12 = vcombine.low %v2483_v4, %v2499_v37  ;;  %v2819_v40 = vld [vmem:[#allocation16 + $0xf80] sm:$0xff] }
 0x52c   : > { %4885 = vmatpush2.bf16.msra.mxu1 %v10316_v7  ;;  %v2451_v7 = vld [vmem:[#allocation16 + $0x400] sm:$0xff] }
 0x52d   : > { %4886 = vmatprep.subr.bf16.mxu1 %v10321_v1  ;;  %4926 = vmatpush2.bf16.msra.mxu0 %v10364_v8  ;;  %v2467_v1 = vld [vmem:[#allocation16 + $0x480] sm:$0xff] }
 0x52e   : > { %4927 = vmatprep.subr.bf16.mxu0 %v10369_v41  ;;  %v9301_v31 = vcombine.high %v2451_v7, %v2467_v1  ;;  %v9300_v6 = vcombine.low %v2451_v7, %v2467_v1  ;;  %v2739_v41 = vld [vmem:[#allocation16 + $0xd00] sm:$0xff] }
 0x530   : > { %4887 = vmatpush2.bf16.msra.mxu1 %v10319_v15  ;;  %v2435_v15 = vld [vmem:[#allocation16 + $0x380] sm:$0xff] }
 0x531   : > { %4928 = vmatpush2.bf16.msra.mxu0 %v10367_v19  ;;  %7666 = vmatprep.subr.bf16.mxu1 %v9397_v54  ;;  %v9269_v20 = vcombine.high %v2419_v13, %v2435_v15  ;;  %v2675_v54 = vld [vmem:[#allocation16 + $0xb00] sm:$0xff] }
 0x532   : > { %7707 = vmatprep.subr.bf16.mxu0 %v9399_v14  ;;  %v9525_v4 = vcombine.high %v2675_v54, %v2691_v61 }
 0x533   : > { %v4305_v25 = vpop.f32.mrf.mxu1  ;;  %v4346_v26 = vpop.f32.mrf.mxu0 }
 0x534   : > { %v4306_v32 = vadd.f32 %v4305_v25, %v4265_v21  ;;  %v2387_v21 = vld [vmem:[#allocation16 + $0x200] sm:$0xff] }
 0x535   : > { %v4307_v34 = vpop.f32.mrf.mxu1  ;;  %v4348_v60 = vpop.f32.mrf.mxu0  ;;  %v2403_v25 = vld [vmem:[#allocation16 + $0x280] sm:$0xff] }
 0x536   : > { %v4347_v5 = vadd.f32 %v4346_v26, %v4306_v32  ;;  %v4308_v35 = vadd.f32 %v4307_v34, %v4267_v28  ;;  %v9268_v26 = vcombine.low %v2419_v13, %v2435_v15  ;;  %v9237_v27 = vcombine.high %v2387_v21, %v2403_v25  ;;  %v2355_v28 = vld [vmem:[#allocation16 + $0x100] sm:$0xff] }
 0x537   : > { %v4309_v2 = vpop.f32.mrf.mxu1  ;;  %v4350_v49 = vpop.f32.mrf.mxu0  ;;  %v2371_v32 = vld [vmem:[#allocation16 + $0x180] sm:$0xff]  ;;  %v9236_v33 = vcombine.low %v2387_v21, %v2403_v25 }
 0x538   : > { %v4349_v30 = vadd.f32 %v4348_v60, %v4308_v35  ;;  %v4517_v3 = vmax.f32 %v4347_v5, 0.0  ;;  %v9205_v34 = vcombine.high %v2355_v28, %v2371_v32  ;;  %v2323_v60 = vld [vmem:[#allocation16] sm:$0xff]  ;;  %v9204_v35 = vcombine.low %v2355_v28, %v2371_v32  ;;  %v2532_v32 = vld [vmem:[#allocation16 + $0x688] sm:$0xff] }
 0x539   : > { %v4310_v36 = vpop.f32.mrf.mxu1  ;;  %v4351_v24 = vpop.f32.mrf.mxu0  ;;  %v2339_v5 = vld [vmem:[#allocation16 + $0x80] sm:$0xff] }
 0x53a   : > { %v4518_v38 = vmax.f32 %v4349_v30, 0.0  ;;  %v4521_v43 = vpack.c.bf16 %v4517_v3, %v4517_v3  ;;  %v9173_v2 = vcombine.high %v2323_v60, %v2339_v5  ;;  %v2803_v49 = vld [vmem:[#allocation16 + $0xf00] sm:$0xff]  ;;  %v9172_v30 = vcombine.low %v2323_v60, %v2339_v5 }
 0x53b   : > { %v9653_v8 = vcombine.high %v2803_v49, %v2819_v40  ;;  %v2771_v3 = vld [vmem:[#allocation16 + $0xe00] sm:$0xff]  ;;  %v9652_v24 = vcombine.low %v2803_v49, %v2819_v40 }
 0x53c   : > { %v4522_v42 = vpack.c.bf16 %v4518_v38, %v4518_v38  ;;  %v2787_v36 = vld [vmem:[#allocation16 + $0xe80] sm:$0xff] }
 0x53d   : > { %v9621_v38 = vcombine.high %v2771_v3, %v2787_v36  ;;  %v9620_v19 = vcombine.low %v2771_v3, %v2787_v36 }
 0x53e   : > { %4888 = vmatprep.mubr.bf16.mxu1 %v4522_v42  ;;  %v2755_v42 = vld [vmem:[#allocation16 + $0xd80] sm:$0xff] }
 0x53f   : > { %4889 = vmatmul.mubr.bf16.vlgmr.msra.gmra.mxu1 %v4521_v43  ;;  %v4180_v43 = vrot.slane %v12332_v52, %v11396_v56  ;;  %v9588_v48 = vcombine.low %v2739_v41, %v2755_v42 }
 0x540   : > { %7667 = vmatpush1.bf16.msra.mxu1 %v9396_v51 }
 0x541   : > { %7668 = vmatprep.subr.bf16.mxu1 %v9365_v58 }
 0x544   : > { %7669 = vmatpush1.bf16.msra.mxu1 %v9364_v9  ;;  %v2643_v9 = vld [vmem:[#allocation16 + $0xa00] sm:$0xff] }
 0x545   : > { %7670 = vmatprep.subr.bf16.mxu1 %v9333_v10  ;;  %v2659_v10 = vld [vmem:[#allocation16 + $0xa80] sm:$0xff] }
 0x548   : > { %7671 = vmatpush1.bf16.msra.mxu1 %v9332_v12  ;;  %v9524_v12 = vcombine.low %v2675_v54, %v2691_v61  ;;  %v2804_v61 = vld [vmem:[#allocation16 + $0xf08] sm:$0xff] }
 0x549   : > { %7672 = vmatprep.subr.bf16.mxu1 %v9301_v31 }
 0x54c   : > { %7673 = vmatpush1.bf16.msra.mxu1 %v9300_v6 }
 0x54d   : > { %7674 = vmatprep.subr.bf16.mxu1 %v9269_v20 }
 0x550   : > { %7675 = vmatpush1.bf16.msra.mxu1 %v9268_v26  ;;  %v9492_v26 = vcombine.low %v2643_v9, %v2659_v10 }
 0x551   : > { %7676 = vmatprep.subr.bf16.mxu1 %v9237_v27 }
 0x554   : > { %7677 = vmatpush1.bf16.msra.mxu1 %v9236_v33 }
 0x555   : > { %7678 = vmatprep.subr.bf16.mxu1 %v9205_v34  ;;  %v9398_v34 = vcombine.low %v12380_v44, %v12382_v29 }
 0x558   : > { %7679 = vmatpush1.bf16.msra.mxu1 %v9204_v35  ;;  %v2484_v35 = vld [vmem:[#allocation16 + $0x508] sm:$0xff] }
 0x559   : > { %7680 = vmatprep.subr.bf16.mxu1 %v9173_v2  ;;  %v2500_v2 = vld [vmem:[#allocation16 + $0x588] sm:$0xff] }
 0x55a   : > { %v9335_v40 = vcombine.high %v2484_v35, %v2500_v2  ;;  %v9334_v3 = vcombine.low %v2484_v35, %v2500_v2 }
 0x55c   : > { %7681 = vmatpush1.bf16.msra.mxu1 %v9172_v30  ;;  %v2452_v30 = vld [vmem:[#allocation16 + $0x408] sm:$0xff] }
 0x55d   : > { %7682 = vmatprep.subr.bf16.mxu1 %v9653_v8  ;;  %v2468_v8 = vld [vmem:[#allocation16 + $0x488] sm:$0xff] }
 0x55e   : > { %v9303_v36 = vcombine.high %v2452_v30, %v2468_v8  ;;  %v9302_v44 = vcombine.low %v2452_v30, %v2468_v8  ;;  %v2579_v8 = vld [vmem:[#allocation16 + $0x800] sm:$0xff] }
 0x560   : > { %7683 = vmatpush2.bf16.msra.mxu1 %v9652_v24  ;;  %v2420_v24 = vld [vmem:[#allocation16 + $0x308] sm:$0xff] }
 0x561   : > { %7684 = vmatprep.subr.bf16.mxu1 %v9621_v38  ;;  %v2436_v38 = vld [vmem:[#allocation16 + $0x388] sm:$0xff] }
 0x562   : > { %v9271_v29 = vcombine.high %v2420_v24, %v2436_v38 }
 0x564   : > { %7685 = vmatpush2.bf16.msra.mxu1 %v9620_v19  ;;  %v9270_v19 = vcombine.low %v2420_v24, %v2436_v38  ;;  %v2596_v38 = vld [vmem:[#allocation16 + $0x888] sm:$0xff] }
 0x573   : > { %v12372_v11 = vpop.f32.mrf.mxu1 }
 0x574   : > { %v12374_v59 = vpop.f32.mrf.mxu0  ;;  %v4388_v50 = vadd.f32 %v12372_v11, %v4180_v43 }
 0x575   : > { %v12376_v16 = vpop.f32.mrf.mxu1 }
 0x576   : > { %v12378_v18 = vpop.f32.mrf.mxu0  ;;  %v4429_v58 = vadd.f32 %v12374_v59, %v4388_v50  ;;  %v2340_v50 = vld [vmem:[#allocation16 + $0x88] sm:$0xff] }
 0x577   : > { %v4391_v45 = vpop.f32.mrf.mxu1 }
 0x578   : > { %v4432_v46 = vpop.f32.mrf.mxu0  ;;  %v9589_v45 = vcombine.high %v2739_v41, %v2755_v42  ;;  %v2388_v41 = vld [vmem:[#allocation16 + $0x208] sm:$0xff] }
 0x579   : > { %v4392_v53 = vpop.f32.mrf.mxu1  ;;  %v2707_v46 = vld [vmem:[#allocation16 + $0xc00] sm:$0xff]  ;;  %v2404_v42 = vld [vmem:[#allocation16 + $0x288] sm:$0xff] }
 0x57a   : > { %v4433_v47 = vpop.f32.mrf.mxu0  ;;  %v2723_v53 = vld [vmem:[#allocation16 + $0xc80] sm:$0xff]  ;;  %7686 = vmatprep.subr.bf16.mxu1 %v9589_v45  ;;  %v9239_v43 = vcombine.high %v2388_v41, %v2404_v42  ;;  %v2356_v45 = vld [vmem:[#allocation16 + $0x108] sm:$0xff] }
 0x57b   : > { %v4184_v47 = vrot.slane %v12332_v52, %v11404_v63  ;;  %v9557_v51 = vcombine.high %v2707_v46, %v2723_v53  ;;  %7687 = vmatpush2.bf16.msra.mxu1 %v9588_v48  ;;  %v9556_v14 = vcombine.low %v2707_v46, %v2723_v53  ;;  %v2372_v46 = vld [vmem:[#allocation16 + $0x188] sm:$0xff]  ;;  %v9238_v53 = vcombine.low %v2388_v41, %v2404_v42 }
 0x57c   : > { %v2324_v48 = vld [vmem:[#allocation16 + $0x8] sm:$0xff] }
 0x57d   : > { %v4390_v57 = vadd.f32 %v12376_v16, %v4184_v47  ;;  %7688 = vmatprep.subr.bf16.mxu1 %v9557_v51  ;;  %v9493_v16 = vcombine.high %v2643_v9, %v2659_v10  ;;  %v9207_v47 = vcombine.high %v2356_v45, %v2372_v46  ;;  %v9206_v51 = vcombine.low %v2356_v45, %v2372_v46  ;;  %v2550_v45 = vld [vmem:[#allocation16 + $0x718] sm:$0xff] }
 0x57e   : > { %v9175_v54 = vcombine.high %v2324_v48, %v2340_v50 }
 0x57f   : > { %v4431_v52 = vadd.f32 %v12378_v18, %v4390_v57  ;;  %7689 = vmatpush2.bf16.msra.mxu1 %v9556_v14  ;;  %v2516_v18 = vld [vmem:[#allocation16 + $0x608] sm:$0xff]  ;;  %v9174_v14 = vcombine.low %v2324_v48, %v2340_v50 }
 0x580   : > { %7690 = vmatprep.subr.bf16.mxu1 %v9525_v4  ;;  %v9367_v5 = vcombine.high %v2516_v18, %v2532_v32  ;;  %v9366_v49 = vcombine.low %v2516_v18, %v2532_v32  ;;  %v2820_v57 = vld [vmem:[#allocation16 + $0xf88] sm:$0xff]  ;;  %v2611_v32 = vld [vmem:[#allocation16 + $0x900] sm:$0xff] }
 0x581   : > { %v2772_v4 = vld [vmem:[#allocation16 + $0xe08] sm:$0xff]  ;;  %v9654_v9 = vcombine.low %v2804_v61, %v2820_v57 }
 0x583   : > { %7691 = vmatpush2.bf16.msra.mxu1 %v9524_v12  ;;  %v2708_v12 = vld [vmem:[#allocation16 + $0xc08] sm:$0xff] }
 0x584   : > { %7692 = vmatprep.subr.bf16.mxu1 %v9493_v16  ;;  %v2676_v16 = vld [vmem:[#allocation16 + $0xb08] sm:$0xff] }
 0x587   : > { %7693 = vmatpush2.bf16.msra.mxu1 %v9492_v26 }
 0x5b3   : > { %v4469_v37 = vpop.f32.mrf.mxu1 }
 0x5b4   : > { %v4470_v7 = vadd.f32 %v4469_v37, %v4429_v58  ;;  %v4510_v1 = vpop.f32.mrf.mxu0  ;;  %v9655_v58 = vcombine.high %v2804_v61, %v2820_v57  ;;  %v2788_v37 = vld [vmem:[#allocation16 + $0xe88] sm:$0xff] }
 0x5b5   : > { %v4471_v11 = vpop.f32.mrf.mxu1  ;;  %v9623_v10 = vcombine.high %v2772_v4, %v2788_v37 }
 0x5b6   : > { %v4511_v31 = vadd.f32 %v4510_v1, %v4470_v7  ;;  %v4472_v13 = vadd.f32 %v4471_v11, %v4431_v52  ;;  %v4512_v15 = vpop.f32.mrf.mxu0  ;;  %v2740_v52 = vld [vmem:[#allocation16 + $0xd08] sm:$0xff]  ;;  %v9622_v1 = vcombine.low %v2772_v4, %v2788_v37 }
 0x5b7   : > { %v4473_v6 = vpop.f32.mrf.mxu1  ;;  %v2756_v7 = vld [vmem:[#allocation16 + $0xd88] sm:$0xff] }
 0x5b8   : > { %v4513_v20 = vadd.f32 %v4512_v15, %v4472_v13  ;;  %v4514_v59 = vpop.f32.mrf.mxu0  ;;  %v4519_v21 = vmax.f32 %v4511_v31, 0.0  ;;  %v9591_v11 = vcombine.high %v2740_v52, %v2756_v7  ;;  %v2724_v31 = vld [vmem:[#allocation16 + $0xc88] sm:$0xff]  ;;  %v9590_v13 = vcombine.low %v2740_v52, %v2756_v7 }
 0x5b9   : > { %v4474_v25 = vpop.f32.mrf.mxu1  ;;  %v9559_v15 = vcombine.high %v2708_v12, %v2724_v31  ;;  %v2692_v6 = vld [vmem:[#allocation16 + $0xb88] sm:$0xff] }
 0x5ba   : > { %v4520_v27 = vmax.f32 %v4513_v20, 0.0  ;;  %v4515_v28 = vpop.f32.mrf.mxu0  ;;  %v4523_v60 = vpack.c.bf16 %v4519_v21, %v4519_v21  ;;  %v9558_v20 = vcombine.low %v2708_v12, %v2724_v31  ;;  %v9527_v59 = vcombine.high %v2676_v16, %v2692_v6  ;;  %v2644_v21 = vld [vmem:[#allocation16 + $0xa08] sm:$0xff]  ;;  %v2533_v12 = vld [vmem:[#allocation16 + $0x690] sm:$0xff]  ;;  %v2518_v31 = vld [vmem:[#allocation16 + $0x618] sm:$0xff] }
 0x5bb   : > { %v2660_v25 = vld [vmem:[#allocation16 + $0xa88] sm:$0xff]  ;;  %v9526_v26 = vcombine.low %v2676_v16, %v2692_v6  ;;  %v2485_v6 = vld [vmem:[#allocation16 + $0x510] sm:$0xff] }
 0x5bc   : > { %v4524_v33 = vpack.c.bf16 %v4520_v27, %v4520_v27  ;;  %v9495_v27 = vcombine.high %v2644_v21, %v2660_v25  ;;  %v9494_v28 = vcombine.low %v2644_v21, %v2660_v25  ;;  %v2501_v21 = vld [vmem:[#allocation16 + $0x590] sm:$0xff]  ;;  %v2486_v25 = vld [vmem:[#allocation16 + $0x518] sm:$0xff] }
 0x5be   : > { %4929 = vmatprep.mubr.bf16.mxu0 %v4524_v33  ;;  %v2627_v33 = vld [vmem:[#allocation16 + $0x980] sm:$0xff] }
 0x5bf   : > { %4930 = vmatmul.mubr.bf16.vlgmr.msra.gmra.mxu0 %v4523_v60  ;;  %v9461_v60 = vcombine.high %v2611_v32, %v2627_v33  ;;  %v9460_v2 = vcombine.low %v2611_v32, %v2627_v33  ;;  %v2453_v33 = vld [vmem:[#allocation16 + $0x410] sm:$0xff] }
 0x5c0   : > { %7708 = vmatpush1.bf16.msra.mxu0 %v9398_v34  ;;  %v2612_v34 = vld [vmem:[#allocation16 + $0x908] sm:$0xff] }
 0x5c1   : > { %7709 = vmatprep.subr.bf16.mxu0 %v9367_v5  ;;  %v2628_v5 = vld [vmem:[#allocation16 + $0x988] sm:$0xff]  ;;  %7694 = vmatprep.subr.bf16.mxu1 %v9461_v60  ;;  %v2454_v60 = vld [vmem:[#allocation16 + $0x418] sm:$0xff] }
 0x5c2   : > { %7695 = vmatpush2.bf16.msra.mxu1 %v9460_v2 }
 0x5c4   : > { %7710 = vmatpush1.bf16.msra.mxu0 %v9366_v49  ;;  %v9462_v49 = vcombine.low %v2612_v34, %v2628_v5 }
 0x5c5   : > { %7711 = vmatprep.subr.bf16.mxu0 %v9335_v40  ;;  %v9463_v40 = vcombine.high %v2612_v34, %v2628_v5  ;;  %v2469_v34 = vld [vmem:[#allocation16 + $0x490] sm:$0xff]  ;;  %v2470_v5 = vld [vmem:[#allocation16 + $0x498] sm:$0xff] }
 0x5c8   : > { %7712 = vmatpush1.bf16.msra.mxu0 %v9334_v3  ;;  %v2595_v3 = vld [vmem:[#allocation16 + $0x880] sm:$0xff] }
 0x5c9   : > { %7713 = vmatprep.subr.bf16.mxu0 %v9303_v36  ;;  %v2580_v36 = vld [vmem:[#allocation16 + $0x808] sm:$0xff]  ;;  %v9429_v24 = vcombine.high %v2579_v8, %v2595_v3 }
 0x5ca   : > { %v9430_v41 = vcombine.low %v2580_v36, %v2596_v38  ;;  %v9431_v42 = vcombine.high %v2580_v36, %v2596_v38  ;;  %v2438_v36 = vld [vmem:[#allocation16 + $0x398] sm:$0xff]  ;;  %v9306_v38 = vcombine.low %v2454_v60, %v2470_v5 }
 0x5cb   : > { %7696 = vmatprep.subr.bf16.mxu1 %v9429_v24  ;;  %v9304_v24 = vcombine.low %v2453_v33, %v2469_v34 }
 0x5cc   : > { %7714 = vmatpush1.bf16.msra.mxu0 %v9302_v44 }
 0x5cd   : > { %7715 = vmatprep.subr.bf16.mxu0 %v9271_v29  ;;  %v9428_v29 = vcombine.low %v2579_v8, %v2595_v3  ;;  %v2437_v8 = vld [vmem:[#allocation16 + $0x390] sm:$0xff]  ;;  %v2422_v3 = vld [vmem:[#allocation16 + $0x318] sm:$0xff] }
 0x5cf   : > { %7697 = vmatpush2.bf16.msra.mxu1 %v9428_v29  ;;  %v9275_v29 = vcombine.high %v2422_v3, %v2438_v36 }
 0x5d0   : > { %7716 = vmatpush1.bf16.msra.mxu0 %v9270_v19  ;;  %v2549_v19 = vld [vmem:[#allocation16 + $0x710] sm:$0xff] }
 0x5d1   : > { %7717 = vmatprep.subr.bf16.mxu0 %v9239_v43  ;;  %v2565_v43 = vld [vmem:[#allocation16 + $0x790] sm:$0xff] }
 0x5d2   : > { %v9400_v46 = vcombine.low %v2549_v19, %v2565_v43 }
 0x5d4   : > { %7718 = vmatpush1.bf16.msra.mxu0 %v9238_v53  ;;  %v9401_v53 = vcombine.high %v2549_v19, %v2565_v43  ;;  %v2390_v19 = vld [vmem:[#allocation16 + $0x218] sm:$0xff] }
 0x5d5   : > { %7719 = vmatprep.subr.bf16.mxu0 %v9207_v47  ;;  %v2566_v47 = vld [vmem:[#allocation16 + $0x798] sm:$0xff] }
 0x5d6   : > { %v9402_v48 = vcombine.low %v2550_v45, %v2566_v47  ;;  %v9403_v50 = vcombine.high %v2550_v45, %v2566_v47  ;;  %7748 = vmatprep.subr.bf16.mxu1 %v9401_v53  ;;  %v2406_v43 = vld [vmem:[#allocation16 + $0x298] sm:$0xff] }
 0x5d7   : > { %v9243_v47 = vcombine.high %v2390_v19, %v2406_v43 }
 0x5d8   : > { %7720 = vmatpush1.bf16.msra.mxu0 %v9206_v51  ;;  %v2322_v51 = vld [vmem:[#allocation14] sm:$0x3] }
 0x5d9   : > { %7721 = vmatprep.subr.bf16.mxu0 %v9175_v54  ;;  %v4849_v54 = vrot.slane %v2322_v51, %v11393_v55  ;;  %v4853_v61 = vrot.slane %v2322_v51, %v11401_v62  ;;  %v2358_v51 = vld [vmem:[#allocation16 + $0x118] sm:$0xff] }
 0x5dc   : > { %7722 = vmatpush1.bf16.msra.mxu0 %v9174_v14 }
 0x5dd   : > { %7723 = vmatprep.subr.bf16.mxu0 %v9655_v58 }
 0x5e0   : > { %7724 = vmatpush2.bf16.msra.mxu0 %v9654_v9 }
 0x5e1   : > { %7725 = vmatprep.subr.bf16.mxu0 %v9623_v10 }
 0x5e4   : > { %7726 = vmatpush2.bf16.msra.mxu0 %v9622_v1  ;;  %v2517_v1 = vld [vmem:[#allocation16 + $0x610] sm:$0xff] }
 0x5e5   : > { %7727 = vmatprep.subr.bf16.mxu0 %v9591_v11 }
 0x5e8   : > { %7728 = vmatpush2.bf16.msra.mxu0 %v9590_v13  ;;  %v2534_v13 = vld [vmem:[#allocation16 + $0x698] sm:$0xff] }
 0x5e9   : > { %7729 = vmatprep.subr.bf16.mxu0 %v9559_v15 }
 0x5ec   : > { %7730 = vmatpush2.bf16.msra.mxu0 %v9558_v20  ;;  %v9369_v20 = vcombine.high %v2517_v1, %v2533_v12 }
 0x5ed   : > { %7731 = vmatprep.subr.bf16.mxu0 %v9527_v59  ;;  %v9371_v59 = vcombine.high %v2518_v31, %v2534_v13 }
 0x5f0   : > { %7732 = vmatpush2.bf16.msra.mxu0 %v9526_v26  ;;  %v2502_v26 = vld [vmem:[#allocation16 + $0x598] sm:$0xff] }
 0x5f1   : > { %7733 = vmatprep.subr.bf16.mxu0 %v9495_v27  ;;  %v9368_v27 = vcombine.low %v2517_v1, %v2533_v12  ;;  %v9339_v32 = vcombine.high %v2486_v25, %v2502_v26  ;;  %v9338_v2 = vcombine.low %v2486_v25, %v2502_v26  ;;  %v2805_v12 = vld [vmem:[#allocation16 + $0xf10] sm:$0xff] }
 0x5f2   : > { %v2773_v26 = vld [vmem:[#allocation16 + $0xe10] sm:$0xff] }
 0x5f4   : > { %7734 = vmatpush2.bf16.msra.mxu0 %v9494_v28  ;;  %v9370_v28 = vcombine.low %v2518_v31, %v2534_v13  ;;  %v2821_v31 = vld [vmem:[#allocation16 + $0xf90] sm:$0xff]  ;;  %v2806_v13 = vld [vmem:[#allocation16 + $0xf18] sm:$0xff] }
 0x5f5   : > { %7735 = vmatprep.subr.bf16.mxu0 %v9463_v40  ;;  %v9307_v40 = vcombine.high %v2454_v60, %v2470_v5  ;;  %v2741_v5 = vld [vmem:[#allocation16 + $0xd10] sm:$0xff] }
 0x5f8   : > { %7736 = vmatpush2.bf16.msra.mxu0 %v9462_v49  ;;  %v9305_v49 = vcombine.high %v2453_v33, %v2469_v34 }
 0x5f9   : > { %7737 = vmatprep.subr.bf16.mxu0 %v9431_v42  ;;  %v2405_v42 = vld [vmem:[#allocation16 + $0x290] sm:$0xff] }
 0x5fc   : > { %7738 = vmatpush2.bf16.msra.mxu0 %v9430_v41  ;;  %v2389_v41 = vld [vmem:[#allocation16 + $0x210] sm:$0xff] }
 0x5fd   : > { %7789 = vmatprep.subr.bf16.mxu0 %v9403_v50  ;;  %v9241_v53 = vcombine.high %v2389_v41, %v2405_v42  ;;  %v2373_v50 = vld [vmem:[#allocation16 + $0x190] sm:$0xff] }
 0x5ff   : > { %v4890_v18 = vpop.f32.mrf.mxu1 }
 0x600   : > { %v4891_v57 = vadd.f32 %v4890_v18, %v4849_v54  ;;  %v9337_v18 = vcombine.high %v2485_v6, %v2501_v21  ;;  %v2374_v54 = vld [vmem:[#allocation16 + $0x198] sm:$0xff] }
 0x601   : > { %v4892_v35 = vpop.f32.mrf.mxu1 }
 0x602   : > { %v4893_v58 = vadd.f32 %v4892_v35, %v4853_v61  ;;  %v9336_v35 = vcombine.low %v2485_v6, %v2501_v21  ;;  %v9240_v61 = vcombine.low %v2389_v41, %v2405_v42  ;;  %v2822_v6 = vld [vmem:[#allocation16 + $0xf98] sm:$0xff]  ;;  %v9657_v21 = vcombine.high %v2805_v12, %v2821_v31 }
 0x603   : > { %v4894_v30 = vpop.f32.mrf.mxu1  ;;  %v9659_v25 = vcombine.high %v2806_v13, %v2822_v6  ;;  %v9658_v33 = vcombine.low %v2806_v13, %v2822_v6  ;;  %v2581_v6 = vld [vmem:[#allocation16 + $0x810] sm:$0xff] }
 0x604   : > { %v2421_v30 = vld [vmem:[#allocation16 + $0x310] sm:$0xff] }
 0x605   : > { %v4895_v44 = vpop.f32.mrf.mxu1  ;;  %v9272_v45 = vcombine.low %v2421_v30, %v2437_v8 }
 0x606   : > { %v9273_v44 = vcombine.high %v2421_v30, %v2437_v8 }
 0x67f   : > { %v4931_v14 = vpop.f32.mrf.mxu0 }
 0x680   : > { %v4932_v4 = vadd.f32 %v4931_v14, %v4891_v57  ;;  %v9242_v57 = vcombine.low %v2390_v19, %v2406_v43  ;;  %v2677_v43 = vld [vmem:[#allocation16 + $0xb10] sm:$0xff] }
 0x681   : > { %v4933_v37 = vpop.f32.mrf.mxu0 }
 0x682   : > { %v4934_v9 = vadd.f32 %v4933_v37, %v4893_v58  ;;  %v4938_v10 = vmax.f32 %v4932_v4, 0.0  ;;  %v9211_v58 = vcombine.high %v2358_v51, %v2374_v54  ;;  %v2325_v4 = vld [vmem:[#allocation16 + $0x10] sm:$0xff] }
 0x683   : > { %v4935_v52 = vpop.f32.mrf.mxu0  ;;  %v2341_v37 = vld [vmem:[#allocation16 + $0x90] sm:$0xff] }
 0x684   : > { %v4939_v7 = vmax.f32 %v4934_v9, 0.0  ;;  %v12400_v16 = vpack.c.bf16 %v4938_v10, %v4938_v10  ;;  %v2326_v9 = vld [vmem:[#allocation16 + $0x18] sm:$0xff]  ;;  %v9177_v1 = vcombine.high %v2325_v4, %v2341_v37 }
 0x685   : > { %v4936_v11 = vpop.f32.mrf.mxu0  ;;  %v2342_v10 = vld [vmem:[#allocation16 + $0x98] sm:$0xff] }
 0x686   : > { %v12398_v15 = vpack.c.bf16 %v4939_v7, %v4939_v7  ;;  %v9210_v7 = vcombine.low %v2358_v51, %v2374_v54  ;;  %v9179_v11 = vcombine.high %v2326_v9, %v2342_v10  ;;  %v2645_v54 = vld [vmem:[#allocation16 + $0xa10] sm:$0xff] }
 0x688   : > { %7698 = vmatprep.mubr.bf16.mxu1 %v12398_v15  ;;  %7739 = vmatprep.mubr.bf16.mxu0 %v12398_v15 }
 0x689   : > { %7699 = vmatmul.mubr.bf16.vlgmr.msra.gmra.mxu1 %v12400_v16  ;;  %7740 = vmatmul.mubr.bf16.vlgmr.msra.gmra.mxu0 %v12400_v16 }
 0x68a   : > { %7749 = vmatpush1.bf16.msra.mxu1 %v9400_v46  ;;  %7790 = vmatpush1.bf16.msra.mxu0 %v9402_v48  ;;  %v9274_v46 = vcombine.low %v2422_v3, %v2438_v36  ;;  %v2357_v48 = vld [vmem:[#allocation16 + $0x110] sm:$0xff] }
 0x68b   : > { %7780 = vmatprep.mubr.bf16.mxu1 %v12398_v15  ;;  %7821 = vmatprep.mubr.bf16.mxu0 %v12398_v15  ;;  %v9209_v14 = vcombine.high %v2357_v48, %v2373_v50  ;;  %v9208_v52 = vcombine.low %v2357_v48, %v2373_v50  ;;  %v2709_v36 = vld [vmem:[#allocation16 + $0xc10] sm:$0xff] }
 0x68c   : > { %7750 = vmatprep.subr.bf16.mxu1 %v9369_v20  ;;  %7791 = vmatprep.subr.bf16.mxu0 %v9371_v59  ;;  %v9176_v20 = vcombine.low %v2325_v4, %v2341_v37  ;;  %v9178_v59 = vcombine.low %v2326_v9, %v2342_v10  ;;  %v2613_v10 = vld [vmem:[#allocation16 + $0x910] sm:$0xff] }
 0x68e   : > { %7751 = vmatpush1.bf16.msra.mxu1 %v9368_v27  ;;  %7792 = vmatpush1.bf16.msra.mxu0 %v9370_v28  ;;  %v2789_v27 = vld [vmem:[#allocation16 + $0xe90] sm:$0xff]  ;;  %v2774_v28 = vld [vmem:[#allocation16 + $0xe18] sm:$0xff] }
 0x68f   : > { %7752 = vmatprep.subr.bf16.mxu1 %v9337_v18  ;;  %7793 = vmatprep.subr.bf16.mxu0 %v9339_v32  ;;  %v2790_v18 = vld [vmem:[#allocation16 + $0xe98] sm:$0xff]  ;;  %v9656_v32 = vcombine.low %v2805_v12, %v2821_v31  ;;  %v9625_v34 = vcombine.high %v2773_v26, %v2789_v27 }
 0x690   : > { %v9627_v60 = vcombine.high %v2774_v28, %v2790_v18  ;;  %v9626_v30 = vcombine.low %v2774_v28, %v2790_v18  ;;  %v2551_v18 = vld [vmem:[#allocation16 + $0x720] sm:$0xff] }
 0x692   : > { %7753 = vmatpush1.bf16.msra.mxu1 %v9336_v35  ;;  %7794 = vmatpush1.bf16.msra.mxu0 %v9338_v2  ;;  %v2757_v35 = vld [vmem:[#allocation16 + $0xd90] sm:$0xff]  ;;  %v2742_v2 = vld [vmem:[#allocation16 + $0xd18] sm:$0xff] }
 0x693   : > { %7754 = vmatprep.subr.bf16.mxu1 %v9305_v49  ;;  %7795 = vmatprep.subr.bf16.mxu0 %v9307_v40  ;;  %v2758_v49 = vld [vmem:[#allocation16 + $0xd98] sm:$0xff]  ;;  %v9624_v40 = vcombine.low %v2773_v26, %v2789_v27  ;;  %v9593_v8 = vcombine.high %v2741_v5, %v2757_v35 }
 0x694   : > { %v9595_v3 = vcombine.high %v2742_v2, %v2758_v49  ;;  %v9594_v41 = vcombine.low %v2742_v2, %v2758_v49  ;;  %v2519_v49 = vld [vmem:[#allocation16 + $0x620] sm:$0xff] }
 0x696   : > { %7755 = vmatpush1.bf16.msra.mxu1 %v9304_v24  ;;  %7796 = vmatpush1.bf16.msra.mxu0 %v9306_v38  ;;  %v2725_v24 = vld [vmem:[#allocation16 + $0xc90] sm:$0xff]  ;;  %v2710_v38 = vld [vmem:[#allocation16 + $0xc18] sm:$0xff] }
 0x697   : > { %7756 = vmatprep.subr.bf16.mxu1 %v9273_v44  ;;  %7797 = vmatprep.subr.bf16.mxu0 %v9275_v29  ;;  %v2726_v44 = vld [vmem:[#allocation16 + $0xc98] sm:$0xff]  ;;  %v9592_v29 = vcombine.low %v2741_v5, %v2757_v35  ;;  %v9561_v42 = vcombine.high %v2709_v36, %v2725_v24 }
 0x698   : > { %v9563_v19 = vcombine.high %v2710_v38, %v2726_v44  ;;  %v9562_v48 = vcombine.low %v2710_v38, %v2726_v44  ;;  %v2487_v44 = vld [vmem:[#allocation16 + $0x520] sm:$0xff] }
 0x69a   : > { %7757 = vmatpush1.bf16.msra.mxu1 %v9272_v45  ;;  %7798 = vmatpush1.bf16.msra.mxu0 %v9274_v46  ;;  %v2693_v45 = vld [vmem:[#allocation16 + $0xb90] sm:$0xff]  ;;  %v2678_v46 = vld [vmem:[#allocation16 + $0xb18] sm:$0xff] }
 0x69b   : > { %7758 = vmatprep.subr.bf16.mxu1 %v9241_v53  ;;  %7799 = vmatprep.subr.bf16.mxu0 %v9243_v47  ;;  %v2694_v53 = vld [vmem:[#allocation16 + $0xb98] sm:$0xff]  ;;  %v9560_v47 = vcombine.low %v2709_v36, %v2725_v24  ;;  %v9529_v50 = vcombine.high %v2677_v43, %v2693_v45 }
 0x69c   : > { %v9531_v51 = vcombine.high %v2678_v46, %v2694_v53  ;;  %v9530_v4 = vcombine.low %v2678_v46, %v2694_v53  ;;  %v2455_v53 = vld [vmem:[#allocation16 + $0x420] sm:$0xff] }
 0x69e   : > { %7759 = vmatpush1.bf16.msra.mxu1 %v9240_v61  ;;  %7800 = vmatpush1.bf16.msra.mxu0 %v9242_v57  ;;  %v2661_v61 = vld [vmem:[#allocation16 + $0xa90] sm:$0xff]  ;;  %v2646_v57 = vld [vmem:[#allocation16 + $0xa18] sm:$0xff] }
 0x69f   : > { %7760 = vmatprep.subr.bf16.mxu1 %v9209_v14  ;;  %7801 = vmatprep.subr.bf16.mxu0 %v9211_v58  ;;  %v2662_v14 = vld [vmem:[#allocation16 + $0xa98] sm:$0xff]  ;;  %v9528_v58 = vcombine.low %v2677_v43, %v2693_v45  ;;  %v9497_v37 = vcombine.high %v2645_v54, %v2661_v61 }
 0x6a0   : > { %v9499_v9 = vcombine.high %v2646_v57, %v2662_v14  ;;  %v9498_v12 = vcombine.low %v2646_v57, %v2662_v14  ;;  %v2423_v14 = vld [vmem:[#allocation16 + $0x320] sm:$0xff] }
 0x6a2   : > { %7761 = vmatpush1.bf16.msra.mxu1 %v9208_v52  ;;  %7802 = vmatpush1.bf16.msra.mxu0 %v9210_v7  ;;  %v2629_v52 = vld [vmem:[#allocation16 + $0x990] sm:$0xff]  ;;  %v2614_v7 = vld [vmem:[#allocation16 + $0x918] sm:$0xff] }
 0x6a3   : > { %7762 = vmatprep.subr.bf16.mxu1 %v9177_v1  ;;  %7803 = vmatprep.subr.bf16.mxu0 %v9179_v11  ;;  %v2630_v1 = vld [vmem:[#allocation16 + $0x998] sm:$0xff]  ;;  %v9496_v11 = vcombine.low %v2645_v54, %v2661_v61  ;;  %v9465_v31 = vcombine.high %v2613_v10, %v2629_v52 }
 0x6a4   : > { %v9467_v13 = vcombine.high %v2614_v7, %v2630_v1  ;;  %v9466_v26 = vcombine.low %v2614_v7, %v2630_v1  ;;  %v2391_v1 = vld [vmem:[#allocation16 + $0x220] sm:$0xff] }
 0x6a6   : > { %7763 = vmatpush1.bf16.msra.mxu1 %v9176_v20  ;;  %7804 = vmatpush1.bf16.msra.mxu0 %v9178_v59  ;;  %v2597_v20 = vld [vmem:[#allocation16 + $0x890] sm:$0xff]  ;;  %v2582_v59 = vld [vmem:[#allocation16 + $0x818] sm:$0xff] }
 0x6a7   : > { %7764 = vmatprep.subr.bf16.mxu1 %v9657_v21  ;;  %7805 = vmatprep.subr.bf16.mxu0 %v9659_v25  ;;  %v2598_v21 = vld [vmem:[#allocation16 + $0x898] sm:$0xff]  ;;  %v9464_v25 = vcombine.low %v2613_v10, %v2629_v52  ;;  %v9433_v27 = vcombine.high %v2581_v6, %v2597_v20 }
 0x6a8   : > { %v9435_v28 = vcombine.high %v2582_v59, %v2598_v21  ;;  %v9434_v5 = vcombine.low %v2582_v59, %v2598_v21  ;;  %v2359_v21 = vld [vmem:[#allocation16 + $0x120] sm:$0xff] }
 0x6aa   : > { %7765 = vmatpush2.bf16.msra.mxu1 %v9656_v32  ;;  %7806 = vmatpush2.bf16.msra.mxu0 %v9658_v33  ;;  %v2567_v32 = vld [vmem:[#allocation16 + $0x7a0] sm:$0xff]  ;;  %v2552_v33 = vld [vmem:[#allocation16 + $0x728] sm:$0xff] }
 0x6ab   : > { %7766 = vmatprep.subr.bf16.mxu1 %v9625_v34  ;;  %7807 = vmatprep.subr.bf16.mxu0 %v9627_v60  ;;  %v2568_v34 = vld [vmem:[#allocation16 + $0x7a8] sm:$0xff]  ;;  %v9432_v60 = vcombine.low %v2581_v6, %v2597_v20  ;;  %v9405_v35 = vcombine.high %v2551_v18, %v2567_v32 }
 0x6ac   : > { %v9407_v2 = vcombine.high %v2552_v33, %v2568_v34  ;;  %v9406_v36 = vcombine.low %v2552_v33, %v2568_v34  ;;  %v2327_v34 = vld [vmem:[#allocation16 + $0x20] sm:$0xff] }
 0x6ae   : > { %7767 = vmatpush2.bf16.msra.mxu1 %v9624_v40  ;;  %7808 = vmatpush2.bf16.msra.mxu0 %v9626_v30  ;;  %v2535_v40 = vld [vmem:[#allocation16 + $0x6a0] sm:$0xff]  ;;  %v2520_v30 = vld [vmem:[#allocation16 + $0x628] sm:$0xff] }
 0x6af   : > { %7768 = vmatprep.subr.bf16.mxu1 %v9593_v8  ;;  %7809 = vmatprep.subr.bf16.mxu0 %v9595_v3  ;;  %v2536_v8 = vld [vmem:[#allocation16 + $0x6a8] sm:$0xff]  ;;  %v9404_v3 = vcombine.low %v2551_v18, %v2567_v32  ;;  %v9373_v24 = vcombine.high %v2519_v49, %v2535_v40 }
 0x6b0   : > { %v9375_v38 = vcombine.high %v2520_v30, %v2536_v8  ;;  %v9374_v43 = vcombine.low %v2520_v30, %v2536_v8  ;;  %v2807_v8 = vld [vmem:[#allocation16 + $0xf20] sm:$0xff] }
 0x6b2   : > { %7769 = vmatpush2.bf16.msra.mxu1 %v9592_v29  ;;  %7810 = vmatpush2.bf16.msra.mxu0 %v9594_v41  ;;  %v2503_v29 = vld [vmem:[#allocation16 + $0x5a0] sm:$0xff]  ;;  %v2488_v41 = vld [vmem:[#allocation16 + $0x528] sm:$0xff] }
 0x6b3   : > { %7770 = vmatprep.subr.bf16.mxu1 %v9561_v42  ;;  %7811 = vmatprep.subr.bf16.mxu0 %v9563_v19  ;;  %v2504_v42 = vld [vmem:[#allocation16 + $0x5a8] sm:$0xff]  ;;  %v9372_v19 = vcombine.low %v2519_v49, %v2535_v40  ;;  %v9341_v45 = vcombine.high %v2487_v44, %v2503_v29 }
 0x6b4   : > { %v9343_v46 = vcombine.high %v2488_v41, %v2504_v42  ;;  %v9342_v54 = vcombine.low %v2488_v41, %v2504_v42  ;;  %v2775_v42 = vld [vmem:[#allocation16 + $0xe20] sm:$0xff] }
 0x6b6   : > { %7771 = vmatpush2.bf16.msra.mxu1 %v9560_v47  ;;  %7812 = vmatpush2.bf16.msra.mxu0 %v9562_v48  ;;  %v2471_v47 = vld [vmem:[#allocation16 + $0x4a0] sm:$0xff]  ;;  %v2456_v48 = vld [vmem:[#allocation16 + $0x428] sm:$0xff] }
 0x6b7   : > { %7772 = vmatprep.subr.bf16.mxu1 %v9529_v50  ;;  %7813 = vmatprep.subr.bf16.mxu0 %v9531_v51  ;;  %v2472_v50 = vld [vmem:[#allocation16 + $0x4a8] sm:$0xff]  ;;  %v9340_v51 = vcombine.low %v2487_v44, %v2503_v29  ;;  %v9309_v61 = vcombine.high %v2455_v53, %v2471_v47 }
 0x6b8   : > { %v9311_v57 = vcombine.high %v2456_v48, %v2472_v50  ;;  %v9310_v10 = vcombine.low %v2456_v48, %v2472_v50  ;;  %v2743_v50 = vld [vmem:[#allocation16 + $0xd20] sm:$0xff] }
 0x6ba   : > { %7773 = vmatpush2.bf16.msra.mxu1 %v9528_v58  ;;  %7814 = vmatpush2.bf16.msra.mxu0 %v9530_v4  ;;  %v2439_v58 = vld [vmem:[#allocation16 + $0x3a0] sm:$0xff]  ;;  %v2424_v4 = vld [vmem:[#allocation16 + $0x328] sm:$0xff] }
 0x6bb   : > { %7774 = vmatprep.subr.bf16.mxu1 %v9497_v37  ;;  %7815 = vmatprep.subr.bf16.mxu0 %v9499_v9  ;;  %v2440_v37 = vld [vmem:[#allocation16 + $0x3a8] sm:$0xff]  ;;  %v9308_v9 = vcombine.low %v2455_v53, %v2471_v47  ;;  %v9277_v52 = vcombine.high %v2423_v14, %v2439_v58 }
 0x6bc   : > { %v9279_v7 = vcombine.high %v2424_v4, %v2440_v37  ;;  %v9278_v6 = vcombine.low %v2424_v4, %v2440_v37  ;;  %v2711_v37 = vld [vmem:[#allocation16 + $0xc20] sm:$0xff] }
 0x6be   : > { %7775 = vmatpush2.bf16.msra.mxu1 %v9496_v11  ;;  %7816 = vmatpush2.bf16.msra.mxu0 %v9498_v12  ;;  %v2407_v11 = vld [vmem:[#allocation16 + $0x2a0] sm:$0xff]  ;;  %v2392_v12 = vld [vmem:[#allocation16 + $0x228] sm:$0xff] }
 0x6bf   : > { %7776 = vmatprep.subr.bf16.mxu1 %v9465_v31  ;;  %7817 = vmatprep.subr.bf16.mxu0 %v9467_v13  ;;  %v2408_v31 = vld [vmem:[#allocation16 + $0x2a8] sm:$0xff]  ;;  %v9276_v13 = vcombine.low %v2423_v14, %v2439_v58  ;;  %v9245_v20 = vcombine.high %v2391_v1, %v2407_v11 }
 0x6c0   : > { %v9247_v59 = vcombine.high %v2392_v12, %v2408_v31  ;;  %v9246_v18 = vcombine.low %v2392_v12, %v2408_v31  ;;  %v2679_v31 = vld [vmem:[#allocation16 + $0xb20] sm:$0xff] }
 0x6c2   : > { %7777 = vmatpush2.bf16.msra.mxu1 %v9464_v25  ;;  %7818 = vmatpush2.bf16.msra.mxu0 %v9466_v26  ;;  %v2375_v25 = vld [vmem:[#allocation16 + $0x1a0] sm:$0xff]  ;;  %v2360_v26 = vld [vmem:[#allocation16 + $0x128] sm:$0xff] }
 0x6c3   : > { %7778 = vmatprep.subr.bf16.mxu1 %v9433_v27  ;;  %7819 = vmatprep.subr.bf16.mxu0 %v9435_v28  ;;  %v2376_v27 = vld [vmem:[#allocation16 + $0x1a8] sm:$0xff]  ;;  %v9244_v28 = vcombine.low %v2391_v1, %v2407_v11  ;;  %v9213_v32 = vcombine.high %v2359_v21, %v2375_v25 }
 0x6c4   : > { %v9215_v33 = vcombine.high %v2360_v26, %v2376_v27  ;;  %v9214_v49 = vcombine.low %v2360_v26, %v2376_v27  ;;  %v2647_v27 = vld [vmem:[#allocation16 + $0xa20] sm:$0xff] }
 0x6c6   : > { %7779 = vmatpush2.bf16.msra.mxu1 %v9432_v60  ;;  %7820 = vmatpush2.bf16.msra.mxu0 %v9434_v5  ;;  %v2343_v60 = vld [vmem:[#allocation16 + $0xa0] sm:$0xff]  ;;  %v2328_v5 = vld [vmem:[#allocation16 + $0x28] sm:$0xff] }
 0x6c7   : > { %7830 = vmatprep.subr.bf16.mxu1 %v9405_v35  ;;  %7871 = vmatprep.subr.bf16.mxu0 %v9407_v2  ;;  %v2344_v35 = vld [vmem:[#allocation16 + $0xa8] sm:$0xff]  ;;  %v9212_v2 = vcombine.low %v2359_v21, %v2375_v25  ;;  %v9181_v40 = vcombine.high %v2327_v34, %v2343_v60 }
 0x6c8   : > { %v9183_v30 = vcombine.high %v2328_v5, %v2344_v35  ;;  %v9182_v44 = vcombine.low %v2328_v5, %v2344_v35  ;;  %v2615_v35 = vld [vmem:[#allocation16 + $0x920] sm:$0xff] }
 0x6c9   : > { %7781 = vmatmul.mubr.bf16.vlgmr.msra.gmra.mxu1 %v12400_v16  ;;  %7822 = vmatmul.mubr.bf16.vlgmr.msra.gmra.mxu0 %v12400_v16 }
 0x6ca   : > { %7831 = vmatpush1.bf16.msra.mxu1 %v9404_v3  ;;  %7862 = vmatprep.mubr.bf16.mxu1 %v12398_v15  ;;  %v2823_v3 = vld [vmem:[#allocation16 + $0xfa0] sm:$0xff] }
 0x6cb   : > { %7872 = vmatpush1.bf16.msra.mxu0 %v9406_v36  ;;  %7903 = vmatprep.mubr.bf16.mxu0 %v12398_v15  ;;  %v2808_v36 = vld [vmem:[#allocation16 + $0xf28] sm:$0xff]  ;;  %v9661_v29 = vcombine.high %v2807_v8, %v2823_v3 }
 0x6cc   : > { %7832 = vmatprep.subr.bf16.mxu1 %v9373_v24  ;;  %7873 = vmatprep.subr.bf16.mxu0 %v9375_v38  ;;  %v2824_v24 = vld [vmem:[#allocation16 + $0xfa8] sm:$0xff]  ;;  %v9180_v38 = vcombine.low %v2327_v34, %v2343_v60 }
 0x6cd   : > { %v9663_v41 = vcombine.high %v2808_v36, %v2824_v24  ;;  %v9662_v53 = vcombine.low %v2808_v36, %v2824_v24  ;;  %v2583_v24 = vld [vmem:[#allocation16 + $0x820] sm:$0xff] }
 0x6ce   : > { %7833 = vmatpush1.bf16.msra.mxu1 %v9372_v19  ;;  %v2791_v19 = vld [vmem:[#allocation16 + $0xea0] sm:$0xff] }
 0x6cf   : > { %7874 = vmatpush1.bf16.msra.mxu0 %v9374_v43  ;;  %7834 = vmatprep.subr.bf16.mxu1 %v9341_v45  ;;  %v2776_v43 = vld [vmem:[#allocation16 + $0xe28] sm:$0xff]  ;;  %v9629_v47 = vcombine.high %v2775_v42, %v2791_v19 }
 0x6d0   : > { %7875 = vmatprep.subr.bf16.mxu0 %v9343_v46  ;;  %v2792_v45 = vld [vmem:[#allocation16 + $0xea8] sm:$0xff]  ;;  %v9660_v46 = vcombine.low %v2807_v8, %v2823_v3 }
 0x6d1   : > { %v9631_v48 = vcombine.high %v2776_v43, %v2792_v45  ;;  %v9630_v14 = vcombine.low %v2776_v43, %v2792_v45  ;;  %v2553_v45 = vld [vmem:[#allocation16 + $0x730] sm:$0xff] }
 0x6d2   : > { %7835 = vmatpush1.bf16.msra.mxu1 %v9340_v51  ;;  %v2759_v51 = vld [vmem:[#allocation16 + $0xda0] sm:$0xff] }
 0x6d3   : > { %7876 = vmatpush1.bf16.msra.mxu0 %v9342_v54  ;;  %7836 = vmatprep.subr.bf16.mxu1 %v9309_v61  ;;  %v2744_v54 = vld [vmem:[#allocation16 + $0xd28] sm:$0xff]  ;;  %v9597_v58 = vcombine.high %v2743_v50, %v2759_v51 }
 0x6d4   : > { %7877 = vmatprep.subr.bf16.mxu0 %v9311_v57  ;;  %v2760_v61 = vld [vmem:[#allocation16 + $0xda8] sm:$0xff]  ;;  %v9628_v57 = vcombine.low %v2775_v42, %v2791_v19 }
 0x6d5   : > { %v9599_v4 = vcombine.high %v2744_v54, %v2760_v61  ;;  %v9598_v1 = vcombine.low %v2744_v54, %v2760_v61  ;;  %v2521_v61 = vld [vmem:[#allocation16 + $0x630] sm:$0xff] }
 0x6d6   : > { %7837 = vmatpush1.bf16.msra.mxu1 %v9308_v9  ;;  %v2727_v9 = vld [vmem:[#allocation16 + $0xca0] sm:$0xff] }
 0x6d7   : > { %7878 = vmatpush1.bf16.msra.mxu0 %v9310_v10  ;;  %7838 = vmatprep.subr.bf16.mxu1 %v9277_v52  ;;  %v2712_v10 = vld [vmem:[#allocation16 + $0xc28] sm:$0xff]  ;;  %v9565_v11 = vcombine.high %v2711_v37, %v2727_v9 }
 0x6d8   : > { %7879 = vmatprep.subr.bf16.mxu0 %v9279_v7  ;;  %v2728_v52 = vld [vmem:[#allocation16 + $0xca8] sm:$0xff]  ;;  %v9596_v7 = vcombine.low %v2743_v50, %v2759_v51 }
 0x6d9   : > { %v9567_v12 = vcombine.high %v2712_v10, %v2728_v52  ;;  %v9566_v21 = vcombine.low %v2712_v10, %v2728_v52  ;;  %v2489_v10 = vld [vmem:[#allocation16 + $0x530] sm:$0xff] }
 0x6da   : > { %7839 = vmatpush1.bf16.msra.mxu1 %v9276_v13  ;;  %v2695_v13 = vld [vmem:[#allocation16 + $0xba0] sm:$0xff]  ;;  %v2505_v52 = vld [vmem:[#allocation16 + $0x5b0] sm:$0xff] }
 0x6db   : > { %7880 = vmatpush1.bf16.msra.mxu0 %v9278_v6  ;;  %7840 = vmatprep.subr.bf16.mxu1 %v9245_v20  ;;  %v2680_v6 = vld [vmem:[#allocation16 + $0xb28] sm:$0xff]  ;;  %v9533_v25 = vcombine.high %v2679_v31, %v2695_v13 }
 0x6dc   : > { %7881 = vmatprep.subr.bf16.mxu0 %v9247_v59  ;;  %v2696_v20 = vld [vmem:[#allocation16 + $0xba8] sm:$0xff]  ;;  %v9564_v59 = vcombine.low %v2711_v37, %v2727_v9 }
 0x6dd   : > { %v9535_v26 = vcombine.high %v2680_v6, %v2696_v20  ;;  %v9534_v34 = vcombine.low %v2680_v6, %v2696_v20  ;;  %v2457_v20 = vld [vmem:[#allocation16 + $0x430] sm:$0xff] }
 0x6de   : > { %7841 = vmatpush1.bf16.msra.mxu1 %v9244_v28  ;;  %v2663_v28 = vld [vmem:[#allocation16 + $0xaa0] sm:$0xff] }
 0x6df   : > { %7882 = vmatpush1.bf16.msra.mxu0 %v9246_v18  ;;  %7842 = vmatprep.subr.bf16.mxu1 %v9213_v32  ;;  %v2648_v18 = vld [vmem:[#allocation16 + $0xa28] sm:$0xff]  ;;  %v9501_v60 = vcombine.high %v2647_v27, %v2663_v28 }
 0x6e0   : > { %7883 = vmatprep.subr.bf16.mxu0 %v9215_v33  ;;  %v2664_v32 = vld [vmem:[#allocation16 + $0xaa8] sm:$0xff]  ;;  %v9532_v33 = vcombine.low %v2679_v31, %v2695_v13  ;;  %v9345_v13 = vcombine.high %v2489_v10, %v2505_v52 }
 0x6e1   : > { %v9503_v5 = vcombine.high %v2648_v18, %v2664_v32  ;;  %v9502_v8 = vcombine.low %v2648_v18, %v2664_v32  ;;  %v2425_v32 = vld [vmem:[#allocation16 + $0x330] sm:$0xff] }
 0x6e2   : > { %7843 = vmatpush1.bf16.msra.mxu1 %v9212_v2  ;;  %v2631_v2 = vld [vmem:[#allocation16 + $0x9a0] sm:$0xff] }
 0x6e3   : > { %7884 = vmatpush1.bf16.msra.mxu0 %v9214_v49  ;;  %7844 = vmatprep.subr.bf16.mxu1 %v9181_v40  ;;  %v2616_v49 = vld [vmem:[#allocation16 + $0x928] sm:$0xff]  ;;  %v9469_v3 = vcombine.high %v2615_v35, %v2631_v2 }
 0x6e4   : > { %7885 = vmatprep.subr.bf16.mxu0 %v9183_v30  ;;  %v2632_v40 = vld [vmem:[#allocation16 + $0x9a8] sm:$0xff]  ;;  %v9500_v30 = vcombine.low %v2647_v27, %v2663_v28 }
 0x6e5   : > { %v9471_v36 = vcombine.high %v2616_v49, %v2632_v40  ;;  %v9470_v42 = vcombine.low %v2616_v49, %v2632_v40  ;;  %v2393_v40 = vld [vmem:[#allocation16 + $0x230] sm:$0xff] }
 0x6e6   : > { %7845 = vmatpush1.bf16.msra.mxu1 %v9180_v38  ;;  %v2599_v38 = vld [vmem:[#allocation16 + $0x8a0] sm:$0xff] }
 0x6e7   : > { %7886 = vmatpush1.bf16.msra.mxu0 %v9182_v44  ;;  %7846 = vmatprep.subr.bf16.mxu1 %v9661_v29  ;;  %v2584_v44 = vld [vmem:[#allocation16 + $0x828] sm:$0xff]  ;;  %v9437_v19 = vcombine.high %v2583_v24, %v2599_v38 }
 0x6e8   : > { %7887 = vmatprep.subr.bf16.mxu0 %v9663_v41  ;;  %v2600_v29 = vld [vmem:[#allocation16 + $0x8a8] sm:$0xff]  ;;  %v9468_v41 = vcombine.low %v2615_v35, %v2631_v2 }
 0x6e9   : > { %v9439_v43 = vcombine.high %v2584_v44, %v2600_v29  ;;  %v9438_v50 = vcombine.low %v2584_v44, %v2600_v29  ;;  %v2361_v29 = vld [vmem:[#allocation16 + $0x130] sm:$0xff] }
 0x6ea   : > { %7847 = vmatpush2.bf16.msra.mxu1 %v9660_v46  ;;  %v2569_v46 = vld [vmem:[#allocation16 + $0x7b0] sm:$0xff] }
 0x6eb   : > { %7888 = vmatpush2.bf16.msra.mxu0 %v9662_v53  ;;  %7848 = vmatprep.subr.bf16.mxu1 %v9629_v47  ;;  %v2554_v53 = vld [vmem:[#allocation16 + $0x738] sm:$0xff]  ;;  %v9409_v51 = vcombine.high %v2553_v45, %v2569_v46 }
 0x6ec   : > { %7889 = vmatprep.subr.bf16.mxu0 %v9631_v48  ;;  %v2570_v47 = vld [vmem:[#allocation16 + $0x7b8] sm:$0xff]  ;;  %v9436_v48 = vcombine.low %v2583_v24, %v2599_v38 }
 0x6ed   : > { %v9411_v54 = vcombine.high %v2554_v53, %v2570_v47  ;;  %v9410_v37 = vcombine.low %v2554_v53, %v2570_v47  ;;  %v2329_v47 = vld [vmem:[#allocation16 + $0x30] sm:$0xff] }
 0x6ee   : > { %7849 = vmatpush2.bf16.msra.mxu1 %v9628_v57  ;;  %v2537_v57 = vld [vmem:[#allocation16 + $0x6b0] sm:$0xff] }
 0x6ef   : > { %7890 = vmatpush2.bf16.msra.mxu0 %v9630_v14  ;;  %7850 = vmatprep.subr.bf16.mxu1 %v9597_v58  ;;  %v9408_v14 = vcombine.low %v2553_v45, %v2569_v46  ;;  %v2522_v58 = vld [vmem:[#allocation16 + $0x638] sm:$0xff]  ;;  %v9377_v9 = vcombine.high %v2521_v61, %v2537_v57 }
 0x6f0   : > { %7891 = vmatprep.subr.bf16.mxu0 %v9599_v4  ;;  %v2538_v4 = vld [vmem:[#allocation16 + $0x6b8] sm:$0xff] }
 0x6f1   : > { %v9378_v31 = vcombine.low %v2522_v58, %v2538_v4 }
 0x6f2   : > { %7851 = vmatpush2.bf16.msra.mxu1 %v9596_v7  ;;  %v9379_v7 = vcombine.high %v2522_v58, %v2538_v4  ;;  %v2809_v58 = vld [vmem:[#allocation16 + $0xf30] sm:$0xff] }
 0x6f3   : > { %7892 = vmatpush2.bf16.msra.mxu0 %v9598_v1  ;;  %7852 = vmatprep.subr.bf16.mxu1 %v9565_v11  ;;  %v2490_v1 = vld [vmem:[#allocation16 + $0x538] sm:$0xff]  ;;  %v2825_v4 = vld [vmem:[#allocation16 + $0xfb0] sm:$0xff] }
 0x6f4   : > { %7893 = vmatprep.subr.bf16.mxu0 %v9567_v12  ;;  %v2506_v11 = vld [vmem:[#allocation16 + $0x5b8] sm:$0xff]  ;;  %v9376_v12 = vcombine.low %v2521_v61, %v2537_v57 }
 0x6f5   : > { %v9347_v6 = vcombine.high %v2490_v1, %v2506_v11  ;;  %v9346_v27 = vcombine.low %v2490_v1, %v2506_v11  ;;  %v2777_v11 = vld [vmem:[#allocation16 + $0xe30] sm:$0xff] }
 0x6f6   : > { %7853 = vmatpush2.bf16.msra.mxu1 %v9564_v59  ;;  %v2473_v59 = vld [vmem:[#allocation16 + $0x4b0] sm:$0xff] }
 0x6f7   : > { %7894 = vmatpush2.bf16.msra.mxu0 %v9566_v21  ;;  %7854 = vmatprep.subr.bf16.mxu1 %v9533_v25  ;;  %v2458_v21 = vld [vmem:[#allocation16 + $0x438] sm:$0xff]  ;;  %v9313_v28 = vcombine.high %v2457_v20, %v2473_v59 }
 0x6f8   : > { %7895 = vmatprep.subr.bf16.mxu0 %v9535_v26  ;;  %v2474_v25 = vld [vmem:[#allocation16 + $0x4b8] sm:$0xff]  ;;  %v9344_v26 = vcombine.low %v2489_v10, %v2505_v52 }
 0x6f9   : > { %v9315_v18 = vcombine.high %v2458_v21, %v2474_v25  ;;  %v9314_v35 = vcombine.low %v2458_v21, %v2474_v25  ;;  %v2745_v25 = vld [vmem:[#allocation16 + $0xd30] sm:$0xff] }
 0x6fa   : > { %7855 = vmatpush2.bf16.msra.mxu1 %v9532_v33  ;;  %v2441_v33 = vld [vmem:[#allocation16 + $0x3b0] sm:$0xff] }
 0x6fb   : > { %7896 = vmatpush2.bf16.msra.mxu0 %v9534_v34  ;;  %7856 = vmatprep.subr.bf16.mxu1 %v9501_v60  ;;  %v2426_v34 = vld [vmem:[#allocation16 + $0x338] sm:$0xff]  ;;  %v9281_v2 = vcombine.high %v2425_v32, %v2441_v33 }
 0x6fc   : > { %7897 = vmatprep.subr.bf16.mxu0 %v9503_v5  ;;  %v2442_v60 = vld [vmem:[#allocation16 + $0x3b8] sm:$0xff]  ;;  %v9312_v5 = vcombine.low %v2457_v20, %v2473_v59 }
 0x6fd   : > { %v9283_v49 = vcombine.high %v2426_v34, %v2442_v60  ;;  %v9282_v24 = vcombine.low %v2426_v34, %v2442_v60  ;;  %v2713_v60 = vld [vmem:[#allocation16 + $0xc30] sm:$0xff] }
 0x6fe   : > { %7857 = vmatpush2.bf16.msra.mxu1 %v9500_v30  ;;  %v2409_v30 = vld [vmem:[#allocation16 + $0x2b0] sm:$0xff] }
 0x6ff   : > { %7898 = vmatpush2.bf16.msra.mxu0 %v9502_v8  ;;  %7858 = vmatprep.subr.bf16.mxu1 %v9469_v3  ;;  %v2394_v8 = vld [vmem:[#allocation16 + $0x238] sm:$0xff]  ;;  %v9249_v38 = vcombine.high %v2393_v40, %v2409_v30 }
 0x700   : > { %7899 = vmatprep.subr.bf16.mxu0 %v9471_v36  ;;  %v2410_v3 = vld [vmem:[#allocation16 + $0x2b8] sm:$0xff]  ;;  %v9280_v36 = vcombine.low %v2425_v32, %v2441_v33 }
 0x701   : > { %v9251_v44 = vcombine.high %v2394_v8, %v2410_v3  ;;  %v9250_v45 = vcombine.low %v2394_v8, %v2410_v3  ;;  %v2681_v3 = vld [vmem:[#allocation16 + $0xb30] sm:$0xff] }
 0x702   : > { %7859 = vmatpush2.bf16.msra.mxu1 %v9468_v41  ;;  %v2377_v41 = vld [vmem:[#allocation16 + $0x1b0] sm:$0xff] }
 0x703   : > { %7900 = vmatpush2.bf16.msra.mxu0 %v9470_v42  ;;  %7860 = vmatprep.subr.bf16.mxu1 %v9437_v19  ;;  %v2362_v42 = vld [vmem:[#allocation16 + $0x138] sm:$0xff]  ;;  %v9217_v46 = vcombine.high %v2361_v29, %v2377_v41 }
 0x704   : > { %7901 = vmatprep.subr.bf16.mxu0 %v9439_v43  ;;  %v2378_v19 = vld [vmem:[#allocation16 + $0x1b8] sm:$0xff]  ;;  %v9248_v43 = vcombine.low %v2393_v40, %v2409_v30 }
 0x705   : > { %v9219_v53 = vcombine.high %v2362_v42, %v2378_v19  ;;  %v9218_v61 = vcombine.low %v2362_v42, %v2378_v19  ;;  %v2649_v19 = vld [vmem:[#allocation16 + $0xa30] sm:$0xff] }
 0x706   : > { %7861 = vmatpush2.bf16.msra.mxu1 %v9436_v48  ;;  %v2345_v48 = vld [vmem:[#allocation16 + $0xb0] sm:$0xff] }
 0x707   : > { %7902 = vmatpush2.bf16.msra.mxu0 %v9438_v50  ;;  %7912 = vmatprep.subr.bf16.mxu1 %v9409_v51  ;;  %v2330_v50 = vld [vmem:[#allocation16 + $0x38] sm:$0xff]  ;;  %v9185_v57 = vcombine.high %v2329_v47, %v2345_v48  ;;  %v9184_v10 = vcombine.low %v2329_v47, %v2345_v48 }
 0x708   : > { %7953 = vmatprep.subr.bf16.mxu0 %v9411_v54  ;;  %v2346_v51 = vld [vmem:[#allocation16 + $0xb8] sm:$0xff]  ;;  %v9216_v54 = vcombine.low %v2361_v29, %v2377_v41 }
 0x709   : > { %7863 = vmatmul.mubr.bf16.vlgmr.msra.gmra.mxu1 %v12400_v16  ;;  %v9186_v52 = vcombine.low %v2330_v50, %v2346_v51 }
 0x70a   : > { %7904 = vmatmul.mubr.bf16.vlgmr.msra.gmra.mxu0 %v12400_v16  ;;  %7913 = vmatpush1.bf16.msra.mxu1 %v9408_v14  ;;  %v9187_v14 = vcombine.high %v2330_v50, %v2346_v51  ;;  %v2617_v51 = vld [vmem:[#allocation16 + $0x930] sm:$0xff] }
 0x70b   : > { %7944 = vmatprep.mubr.bf16.mxu1 %v12398_v15  ;;  %7954 = vmatpush1.bf16.msra.mxu0 %v9410_v37  ;;  %v2810_v37 = vld [vmem:[#allocation16 + $0xf38] sm:$0xff] }
 0x70c   : > { %7985 = vmatprep.mubr.bf16.mxu0 %v12398_v15  ;;  %7914 = vmatprep.subr.bf16.mxu1 %v9377_v9  ;;  %v2826_v9 = vld [vmem:[#allocation16 + $0xfb8] sm:$0xff] }
 0x70d   : > { %7955 = vmatprep.subr.bf16.mxu0 %v9379_v7  ;;  %v9665_v7 = vcombine.high %v2809_v58, %v2825_v4  ;;  %v9667_v1 = vcombine.high %v2810_v37, %v2826_v9  ;;  %v9666_v20 = vcombine.low %v2810_v37, %v2826_v9  ;;  %v2585_v9 = vld [vmem:[#allocation16 + $0x830] sm:$0xff] }
 0x70e   : > { %7915 = vmatpush1.bf16.msra.mxu1 %v9376_v12  ;;  %v2793_v12 = vld [vmem:[#allocation16 + $0xeb0] sm:$0xff] }
 0x70f   : > { %7956 = vmatpush1.bf16.msra.mxu0 %v9378_v31  ;;  %7916 = vmatprep.subr.bf16.mxu1 %v9345_v13  ;;  %v2778_v31 = vld [vmem:[#allocation16 + $0xe38] sm:$0xff]  ;;  %v9633_v59 = vcombine.high %v2777_v11, %v2793_v12 }
 0x710   : > { %7957 = vmatprep.subr.bf16.mxu0 %v9347_v6  ;;  %v2794_v13 = vld [vmem:[#allocation16 + $0xeb8] sm:$0xff]  ;;  %v9664_v6 = vcombine.low %v2809_v58, %v2825_v4 }
 0x711   : > { %v9635_v21 = vcombine.high %v2778_v31, %v2794_v13  ;;  %v9634_v32 = vcombine.low %v2778_v31, %v2794_v13  ;;  %v2555_v13 = vld [vmem:[#allocation16 + $0x740] sm:$0xff] }
 0x712   : > { %7917 = vmatpush1.bf16.msra.mxu1 %v9344_v26  ;;  %v2761_v26 = vld [vmem:[#allocation16 + $0xdb0] sm:$0xff] }
 0x713   : > { %7958 = vmatpush1.bf16.msra.mxu0 %v9346_v27  ;;  %7918 = vmatprep.subr.bf16.mxu1 %v9313_v28  ;;  %v2746_v27 = vld [vmem:[#allocation16 + $0xd38] sm:$0xff]  ;;  %v9601_v33 = vcombine.high %v2745_v25, %v2761_v26 }
 0x714   : > { %7959 = vmatprep.subr.bf16.mxu0 %v9315_v18  ;;  %v2762_v28 = vld [vmem:[#allocation16 + $0xdb8] sm:$0xff]  ;;  %v9632_v18 = vcombine.low %v2777_v11, %v2793_v12 }
 0x715   : > { %v9603_v34 = vcombine.high %v2746_v27, %v2762_v28  ;;  %v9602_v40 = vcombine.low %v2746_v27, %v2762_v28  ;;  %v12416_v28 = vld [vmem:[#allocation17] sm:$0xff] }
 0x716   : > { %7919 = vmatpush1.bf16.msra.mxu1 %v9312_v5  ;;  %v2729_v5 = vld [vmem:[#allocation16 + $0xcb0] sm:$0xff] }
 0x717   : > { %7960 = vmatpush1.bf16.msra.mxu0 %v9314_v35  ;;  %7920 = vmatprep.subr.bf16.mxu1 %v9281_v2  ;;  %v2714_v35 = vld [vmem:[#allocation16 + $0xc38] sm:$0xff]  ;;  %v9569_v30 = vcombine.high %v2713_v60, %v2729_v5 }
 0x718   : > { %7961 = vmatprep.subr.bf16.mxu0 %v9283_v49  ;;  %v2730_v2 = vld [vmem:[#allocation16 + $0xcb8] sm:$0xff]  ;;  %v9600_v49 = vcombine.low %v2745_v25, %v2761_v26 }
 0x719   : > { %v9571_v8 = vcombine.high %v2714_v35, %v2730_v2  ;;  %v9570_v29 = vcombine.low %v2714_v35, %v2730_v2  ;;  %v7509_v35 = vrot.slane %v12416_v28, %v11393_v55  ;;  %v2491_v2 = vld [vmem:[#allocation16 + $0x540] sm:$0xff] }
 0x71a   : > { %7921 = vmatpush1.bf16.msra.mxu1 %v9280_v36  ;;  %v2697_v36 = vld [vmem:[#allocation16 + $0xbb0] sm:$0xff] }
 0x71b   : > { %7962 = vmatpush1.bf16.msra.mxu0 %v9282_v24  ;;  %7922 = vmatprep.subr.bf16.mxu1 %v9249_v38  ;;  %v2682_v24 = vld [vmem:[#allocation16 + $0xb38] sm:$0xff]  ;;  %v9537_v41 = vcombine.high %v2681_v3, %v2697_v36 }
 0x71c   : > { %7963 = vmatprep.subr.bf16.mxu0 %v9251_v44  ;;  %v2698_v38 = vld [vmem:[#allocation16 + $0xbb8] sm:$0xff]  ;;  %v9568_v44 = vcombine.low %v2713_v60, %v2729_v5  ;;  %v2540_v60 = vld [vmem:[#allocation16 + $0x6c8] sm:$0xff] }
 0x71d   : > { %v9539_v42 = vcombine.high %v2682_v24, %v2698_v38  ;;  %v9538_v47 = vcombine.low %v2682_v24, %v2698_v38  ;;  %v2508_v24 = vld [vmem:[#allocation16 + $0x5c8] sm:$0xff] }
 0x71e   : > { %7923 = vmatpush1.bf16.msra.mxu1 %v9248_v43  ;;  %v2665_v43 = vld [vmem:[#allocation16 + $0xab0] sm:$0xff] }
 0x71f   : > { %7964 = vmatpush1.bf16.msra.mxu0 %v9250_v45  ;;  %7924 = vmatprep.subr.bf16.mxu1 %v9217_v46  ;;  %v2650_v45 = vld [vmem:[#allocation16 + $0xa38] sm:$0xff]  ;;  %v9505_v48 = vcombine.high %v2649_v19, %v2665_v43 }
 0x720   : > { %7965 = vmatprep.subr.bf16.mxu0 %v9219_v53  ;;  %v2666_v46 = vld [vmem:[#allocation16 + $0xab8] sm:$0xff]  ;;  %v9536_v53 = vcombine.low %v2681_v3, %v2697_v36  ;;  %v2507_v3 = vld [vmem:[#allocation16 + $0x5c0] sm:$0xff]  ;;  %v2492_v36 = vld [vmem:[#allocation16 + $0x548] sm:$0xff] }
 0x721   : > { %v9507_v50 = vcombine.high %v2650_v45, %v2666_v46  ;;  %v9506_v58 = vcombine.low %v2650_v45, %v2666_v46  ;;  %v9349_v46 = vcombine.high %v2491_v2, %v2507_v3 }
 0x722   : > { %7925 = vmatpush1.bf16.msra.mxu1 %v9216_v54  ;;  %v2633_v54 = vld [vmem:[#allocation16 + $0x9b0] sm:$0xff] }
 0x723   : > { %7966 = vmatpush1.bf16.msra.mxu0 %v9218_v61  ;;  %7926 = vmatprep.subr.bf16.mxu1 %v9185_v57  ;;  %v2618_v61 = vld [vmem:[#allocation16 + $0x938] sm:$0xff]  ;;  %v9473_v4 = vcombine.high %v2617_v51, %v2633_v54 }
 0x724   : > { %7967 = vmatprep.subr.bf16.mxu0 %v9187_v14  ;;  %v2634_v57 = vld [vmem:[#allocation16 + $0x9b8] sm:$0xff]  ;;  %v9504_v14 = vcombine.low %v2649_v19, %v2665_v43 }
 0x725   : > { %v9475_v37 = vcombine.high %v2618_v61, %v2634_v57  ;;  %v9474_v11 = vcombine.low %v2618_v61, %v2634_v57 }
 0x726   : > { %7927 = vmatpush1.bf16.msra.mxu1 %v9184_v10  ;;  %v2601_v10 = vld [vmem:[#allocation16 + $0x8b0] sm:$0xff] }
 0x727   : > { %7968 = vmatpush1.bf16.msra.mxu0 %v9186_v52  ;;  %7928 = vmatprep.subr.bf16.mxu1 %v9665_v7  ;;  %v2586_v52 = vld [vmem:[#allocation16 + $0x838] sm:$0xff]  ;;  %v9441_v12 = vcombine.high %v2585_v9, %v2601_v10 }
 0x728   : > { %7969 = vmatprep.subr.bf16.mxu0 %v9667_v1  ;;  %v2602_v7 = vld [vmem:[#allocation16 + $0x8b8] sm:$0xff]  ;;  %v9472_v1 = vcombine.low %v2617_v51, %v2633_v54  ;;  %v2459_v51 = vld [vmem:[#allocation16 + $0x440] sm:$0xff] }
 0x729   : > { %v9443_v31 = vcombine.high %v2586_v52, %v2602_v7  ;;  %v9442_v25 = vcombine.low %v2586_v52, %v2602_v7  ;;  %v2475_v54 = vld [vmem:[#allocation16 + $0x4c0] sm:$0xff]  ;;  %v9350_v7 = vcombine.low %v2492_v36, %v2508_v24 }
 0x72a   : > { %7929 = vmatpush2.bf16.msra.mxu1 %v9664_v6  ;;  %v2571_v6 = vld [vmem:[#allocation16 + $0x7c0] sm:$0xff] }
 0x72b   : > { %7970 = vmatpush2.bf16.msra.mxu0 %v9666_v20  ;;  %7930 = vmatprep.subr.bf16.mxu1 %v9633_v59  ;;  %v2556_v20 = vld [vmem:[#allocation16 + $0x748] sm:$0xff]  ;;  %v9413_v26 = vcombine.high %v2555_v13, %v2571_v6 }
 0x72c   : > { %7971 = vmatprep.subr.bf16.mxu0 %v9635_v21  ;;  %v2572_v59 = vld [vmem:[#allocation16 + $0x7c8] sm:$0xff]  ;;  %v9440_v21 = vcombine.low %v2585_v9, %v2601_v10  ;;  %v9348_v9 = vcombine.low %v2491_v2, %v2507_v3 }
 0x72d   : > { %v9415_v27 = vcombine.high %v2556_v20, %v2572_v59  ;;  %v9414_v5 = vcombine.low %v2556_v20, %v2572_v59  ;;  %v2428_v20 = vld [vmem:[#allocation16 + $0x348] sm:$0xff] }
 0x72e   : > { %7931 = vmatpush2.bf16.msra.mxu1 %v9632_v18  ;;  %v2523_v18 = vld [vmem:[#allocation16 + $0x640] sm:$0xff]  ;;  %v2444_v59 = vld [vmem:[#allocation16 + $0x3c8] sm:$0xff] }
 0x72f   : > { %7972 = vmatpush2.bf16.msra.mxu0 %v9634_v32  ;;  %7932 = vmatprep.subr.bf16.mxu1 %v9601_v33  ;;  %v2539_v32 = vld [vmem:[#allocation16 + $0x6c0] sm:$0xff]  ;;  %v9412_v33 = vcombine.low %v2555_v13, %v2571_v6  ;;  %v2380_v3 = vld [vmem:[#allocation16 + $0x1c8] sm:$0xff] }
 0x730   : > { %7973 = vmatprep.subr.bf16.mxu0 %v9603_v34  ;;  %v2524_v34 = vld [vmem:[#allocation16 + $0x648] sm:$0xff]  ;;  %v2427_v13 = vld [vmem:[#allocation16 + $0x340] sm:$0xff] }
 0x731   : > { %v2443_v6 = vld [vmem:[#allocation16 + $0x3c0] sm:$0xff] }
 0x732   : > { %7933 = vmatpush2.bf16.msra.mxu1 %v9600_v49  ;;  %v7517_v49 = vrot.slane %v12416_v28, %v11396_v56 }
 0x733   : > { %7974 = vmatpush2.bf16.msra.mxu0 %v9602_v40  ;;  %7934 = vmatprep.subr.bf16.mxu1 %v9569_v30  ;;  %v7513_v40 = vrot.slane %v12416_v28, %v11401_v62  ;;  %v7521_v30 = vrot.slane %v12416_v28, %v11404_v63 }
 0x734   : > { %7975 = vmatprep.subr.bf16.mxu0 %v9571_v8  ;;  %v9381_v8 = vcombine.high %v2523_v18, %v2539_v32 }
 0x736   : > { %7935 = vmatpush2.bf16.msra.mxu1 %v9568_v44 }
 0x737   : > { %7976 = vmatpush2.bf16.msra.mxu0 %v9570_v29  ;;  %7936 = vmatprep.subr.bf16.mxu1 %v9537_v41  ;;  %v9383_v29 = vcombine.high %v2524_v34, %v2540_v60  ;;  %v9380_v41 = vcombine.low %v2523_v18, %v2539_v32  ;;  %v9287_v18 = vcombine.high %v2428_v20, %v2444_v59  ;;  %v2395_v32 = vld [vmem:[#allocation16 + $0x240] sm:$0xff] }
 0x738   : > { %7977 = vmatprep.subr.bf16.mxu0 %v9539_v42  ;;  %v9382_v42 = vcombine.low %v2524_v34, %v2540_v60  ;;  %v2396_v34 = vld [vmem:[#allocation16 + $0x248] sm:$0xff] }
 0x739   : > { %v2412_v60 = vld [vmem:[#allocation16 + $0x2c8] sm:$0xff] }
 0x73a   : > { %7937 = vmatpush2.bf16.msra.mxu1 %v9536_v53  ;;  %v9351_v53 = vcombine.high %v2492_v36, %v2508_v24  ;;  %v9254_v24 = vcombine.low %v2396_v34, %v2412_v60 }
 0x73b   : > { %7978 = vmatpush2.bf16.msra.mxu0 %v9538_v47  ;;  %7938 = vmatprep.subr.bf16.mxu1 %v9505_v48 }
 0x73c   : > { %7979 = vmatprep.subr.bf16.mxu0 %v9507_v50 }
 0x73e   : > { %7939 = vmatpush2.bf16.msra.mxu1 %v9504_v14  ;;  %v2460_v14 = vld [vmem:[#allocation16 + $0x448] sm:$0xff] }
 0x73f   : > { %7980 = vmatpush2.bf16.msra.mxu0 %v9506_v58  ;;  %7940 = vmatprep.subr.bf16.mxu1 %v9473_v4  ;;  %v2476_v58 = vld [vmem:[#allocation16 + $0x4c8] sm:$0xff] }
 0x740   : > { %7981 = vmatprep.subr.bf16.mxu0 %v9475_v37 }
 0x742   : > { %7941 = vmatpush2.bf16.msra.mxu1 %v9472_v1  ;;  %v9317_v1 = vcombine.high %v2459_v51, %v2475_v54 }
 0x743   : > { %7982 = vmatpush2.bf16.msra.mxu0 %v9474_v11  ;;  %7942 = vmatprep.subr.bf16.mxu1 %v9441_v12 }
 0x744   : > { %7983 = vmatprep.subr.bf16.mxu0 %v9443_v31  ;;  %v9319_v31 = vcombine.high %v2460_v14, %v2476_v58 }
 0x746   : > { %7943 = vmatpush2.bf16.msra.mxu1 %v9440_v21 }
 0x747   : > { %7984 = vmatpush2.bf16.msra.mxu0 %v9442_v25  ;;  %7994 = vmatprep.subr.bf16.mxu1 %v9413_v26  ;;  %v9316_v25 = vcombine.low %v2459_v51, %v2475_v54  ;;  %v9318_v26 = vcombine.low %v2460_v14, %v2476_v58  ;;  %v2828_v51 = vld [vmem:[#allocation16 + $0xfc8] sm:$0xff]  ;;  %v2779_v58 = vld [vmem:[#allocation16 + $0xe40] sm:$0xff] }
 0x748   : > { %8035 = vmatprep.subr.bf16.mxu0 %v9415_v27  ;;  %v9285_v27 = vcombine.high %v2427_v13, %v2443_v6 }
 0x749   : > { %7945 = vmatmul.mubr.bf16.vlgmr.msra.gmra.mxu1 %v12400_v16  ;;  %v7700_v38 = vpop.f32.mrf.mxu1  ;;  %v7741_v44 = vpop.f32.mrf.mxu0 }
 0x74a   : > { %7986 = vmatmul.mubr.bf16.vlgmr.msra.gmra.mxu0 %v12400_v16  ;;  %7995 = vmatpush1.bf16.msra.mxu1 %v9412_v33  ;;  %v7701_v19 = vadd.f32 %v7700_v38, %v7509_v35  ;;  %v7742_v47 = vadd.f32 %v7741_v44, %v7517_v49  ;;  %v2411_v33 = vld [vmem:[#allocation16 + $0x2c0] sm:$0xff]  ;;  %v9286_v35 = vcombine.low %v2428_v20, %v2444_v59  ;;  %v2764_v20 = vld [vmem:[#allocation16 + $0xdc8] sm:$0xff] }
 0x74b   : > { %8026 = vmatprep.mubr.bf16.mxu1 %v12398_v15  ;;  %8036 = vmatpush1.bf16.msra.mxu0 %v9414_v5  ;;  %v7702_v43 = vpop.f32.mrf.mxu1  ;;  %v7743_v45 = vpop.f32.mrf.mxu0  ;;  %v9284_v5 = vcombine.low %v2427_v13, %v2443_v6  ;;  %v9253_v2 = vcombine.high %v2395_v32, %v2411_v33  ;;  %v9255_v49 = vcombine.high %v2396_v34, %v2412_v60  ;;  %v2763_v13 = vld [vmem:[#allocation16 + $0xdc0] sm:$0xff]  ;;  %v2748_v6 = vld [vmem:[#allocation16 + $0xd48] sm:$0xff] }
 0x74c   : > { %8067 = vmatprep.mubr.bf16.mxu0 %v12398_v15  ;;  %v7703_v48 = vadd.f32 %v7702_v43, %v7513_v40  ;;  %v7744_v50 = vadd.f32 %v7743_v45, %v7521_v30  ;;  %7996 = vmatprep.subr.bf16.mxu1 %v9381_v8  ;;  %v2363_v40 = vld [vmem:[#allocation16 + $0x140] sm:$0xff]  ;;  %v2364_v8 = vld [vmem:[#allocation16 + $0x148] sm:$0xff]  ;;  %v9252_v36 = vcombine.low %v2395_v32, %v2411_v33 }
 0x74d   : > { %8037 = vmatprep.subr.bf16.mxu0 %v9383_v29  ;;  %v7704_v61 = vpop.f32.mrf.mxu1  ;;  %v7745_v57 = vpop.f32.mrf.mxu0  ;;  %v2379_v30 = vld [vmem:[#allocation16 + $0x1c0] sm:$0xff]  ;;  %v9223_v44 = vcombine.high %v2364_v8, %v2380_v3  ;;  %v9222_v45 = vcombine.low %v2364_v8, %v2380_v3  ;;  %v2716_v33 = vld [vmem:[#allocation16 + $0xc48] sm:$0xff] }
 0x74e   : > { %v8354_v4 = vcombine.low %v7701_v19, %v7703_v48  ;;  %v8355_v37 = vcombine.low %v7742_v47, %v7744_v50  ;;  %7997 = vmatpush1.bf16.msra.mxu1 %v9380_v41  ;;  %v9221_v38 = vcombine.high %v2363_v40, %v2379_v30  ;;  %v2331_v29 = vld [vmem:[#allocation16 + $0x40] sm:$0xff]  ;;  %v2348_v19 = vld [vmem:[#allocation16 + $0xc8] sm:$0xff]  ;;  %v9220_v43 = vcombine.low %v2363_v40, %v2379_v30 }
 0x74f   : > { %8038 = vmatpush1.bf16.msra.mxu0 %v9382_v42  ;;  %v7705_v10 = vpop.f32.mrf.mxu1  ;;  %v7746_v52 = vpop.f32.mrf.mxu0  ;;  %7998 = vmatprep.subr.bf16.mxu1 %v9349_v46  ;;  %v2347_v41 = vld [vmem:[#allocation16 + $0xc0] sm:$0xff]  ;;  %v2332_v42 = vld [vmem:[#allocation16 + $0x48] sm:$0xff] }
 0x750   : > { %v12431_v11 = vrot.slane %v8354_v4, %v11534_v39  ;;  %v12434_v12 = vrot.slane %v8355_v37, %v11534_v39  ;;  %8039 = vmatprep.subr.bf16.mxu0 %v9351_v53  ;;  %v9189_v46 = vcombine.high %v2331_v29, %v2347_v41  ;;  %v9191_v53 = vcombine.high %v2332_v42, %v2348_v19  ;;  %v2811_v47 = vld [vmem:[#allocation16 + $0xf40] sm:$0xff]  ;;  %v2812_v50 = vld [vmem:[#allocation16 + $0xf48] sm:$0xff] }
 0x751   : > { %v2827_v48 = vld [vmem:[#allocation16 + $0xfc0] sm:$0xff]  ;;  %v9188_v54 = vcombine.low %v2331_v29, %v2347_v41  ;;  %v9190_v61 = vcombine.low %v2332_v42, %v2348_v19  ;;  %v9671_v14 = vcombine.high %v2812_v50, %v2828_v51  ;;  %v2780_v37 = vld [vmem:[#allocation16 + $0xe48] sm:$0xff]  ;;  %v9670_v52 = vcombine.low %v2812_v50, %v2828_v51 }
 0x752   : > { %v8386_v21 = vcombine.low %v12431_v11, %v12434_v12  ;;  %7999 = vmatpush1.bf16.msra.mxu1 %v9348_v9  ;;  %v9669_v57 = vcombine.high %v2811_v47, %v2827_v48  ;;  %v2795_v4 = vld [vmem:[#allocation16 + $0xec0] sm:$0xff]  ;;  %v2796_v9 = vld [vmem:[#allocation16 + $0xec8] sm:$0xff]  ;;  %v9668_v10 = vcombine.low %v2811_v47, %v2827_v48 }
 0x753   : > { %8040 = vmatpush1.bf16.msra.mxu0 %v9350_v7  ;;  %8000 = vmatprep.subr.bf16.mxu1 %v9317_v1  ;;  %v9637_v7 = vcombine.high %v2779_v58, %v2795_v4  ;;  %v9639_v1 = vcombine.high %v2780_v37, %v2796_v9  ;;  %v9636_v59 = vcombine.low %v2779_v58, %v2795_v4  ;;  %v2731_v32 = vld [vmem:[#allocation16 + $0xcc0] sm:$0xff]  ;;  %v2732_v34 = vld [vmem:[#allocation16 + $0xcc8] sm:$0xff] }
 0x754   : > { %8041 = vmatprep.subr.bf16.mxu0 %v9319_v31  ;;  %v2747_v31 = vld [vmem:[#allocation16 + $0xd40] sm:$0xff]  ;;  %v2684_v30 = vld [vmem:[#allocation16 + $0xb48] sm:$0xff] }
 0x755   : > { %v9604_v60 = vcombine.low %v2747_v31, %v2763_v13  ;;  %v2699_v40 = vld [vmem:[#allocation16 + $0xbc0] sm:$0xff]  ;;  %v2700_v8 = vld [vmem:[#allocation16 + $0xbc8] sm:$0xff] }
 0x756   : > { %8001 = vmatpush1.bf16.msra.mxu1 %v9316_v25  ;;  %v9638_v25 = vcombine.low %v2780_v37, %v2796_v9  ;;  %v2667_v29 = vld [vmem:[#allocation16 + $0xac0] sm:$0xff]  ;;  %v2652_v41 = vld [vmem:[#allocation16 + $0xa48] sm:$0xff] }
 0x757   : > { %8042 = vmatpush1.bf16.msra.mxu0 %v9318_v26  ;;  %8002 = vmatprep.subr.bf16.mxu1 %v9285_v27  ;;  %v9605_v26 = vcombine.high %v2747_v31, %v2763_v13  ;;  %v9607_v27 = vcombine.high %v2748_v6, %v2764_v20  ;;  %v2668_v42 = vld [vmem:[#allocation16 + $0xac8] sm:$0xff]  ;;  %v2635_v47 = vld [vmem:[#allocation16 + $0x9c0] sm:$0xff]  ;;  %v2573_v31 = vld [vmem:[#allocation16 + $0x7d0] sm:$0xff] }
 0x758   : > { %8043 = vmatprep.subr.bf16.mxu0 %v9287_v18  ;;  %v2715_v18 = vld [vmem:[#allocation16 + $0xc40] sm:$0xff]  ;;  %v2620_v48 = vld [vmem:[#allocation16 + $0x948] sm:$0xff]  ;;  %v2558_v13 = vld [vmem:[#allocation16 + $0x758] sm:$0xff] }
 0x759   : > { %v9572_v3 = vcombine.low %v2715_v18, %v2731_v32  ;;  %v2636_v50 = vld [vmem:[#allocation16 + $0x9c8] sm:$0xff]  ;;  %v2603_v58 = vld [vmem:[#allocation16 + $0x8c0] sm:$0xff] }
 0x75a   : > { %8003 = vmatpush1.bf16.msra.mxu1 %v9284_v5  ;;  %v9606_v5 = vcombine.low %v2748_v6, %v2764_v20  ;;  %v2588_v4 = vld [vmem:[#allocation16 + $0x848] sm:$0xff]  ;;  %v2574_v6 = vld [vmem:[#allocation16 + $0x7d8] sm:$0xff] }
 0x75b   : > { %8044 = vmatpush1.bf16.msra.mxu0 %v9286_v35  ;;  %8004 = vmatprep.subr.bf16.mxu1 %v9253_v2  ;;  %v9573_v35 = vcombine.high %v2715_v18, %v2731_v32  ;;  %v9575_v2 = vcombine.high %v2716_v33, %v2732_v34  ;;  %v2604_v37 = vld [vmem:[#allocation16 + $0x8c8] sm:$0xff]  ;;  %v2541_v18 = vld [vmem:[#allocation16 + $0x6d0] sm:$0xff] }
 0x75c   : > { %8045 = vmatprep.subr.bf16.mxu0 %v9255_v49  ;;  %v2683_v49 = vld [vmem:[#allocation16 + $0xb40] sm:$0xff] }
 0x75d   : > { %v9540_v19 = vcombine.low %v2683_v49, %v2699_v40 }
 0x75e   : > { %8005 = vmatpush1.bf16.msra.mxu1 %v9252_v36  ;;  %v9574_v36 = vcombine.low %v2716_v33, %v2732_v34  ;;  %v2526_v33 = vld [vmem:[#allocation16 + $0x658] sm:$0xff] }
 0x75f   : > { %8046 = vmatpush1.bf16.msra.mxu0 %v9254_v24  ;;  %8006 = vmatprep.subr.bf16.mxu1 %v9221_v38  ;;  %v9541_v24 = vcombine.high %v2683_v49, %v2699_v40  ;;  %v9543_v38 = vcombine.high %v2684_v30, %v2700_v8  ;;  %v2542_v34 = vld [vmem:[#allocation16 + $0x6d8] sm:$0xff]  ;;  %v7529_v49 = vrot.slane %v12416_v28, %v11461_v0 }
 0x760   : > { %8047 = vmatprep.subr.bf16.mxu0 %v9223_v44  ;;  %v2651_v44 = vld [vmem:[#allocation16 + $0xa40] sm:$0xff]  ;;  %v7537_v40 = vrot.slane %v12416_v28, %v11464_v17 }
 0x761   : > { %v9508_v51 = vcombine.low %v2651_v44, %v2667_v29 }
 0x762   : > { %8007 = vmatpush1.bf16.msra.mxu1 %v9220_v43  ;;  %v9542_v43 = vcombine.low %v2684_v30, %v2700_v8  ;;  %v2509_v8 = vld [vmem:[#allocation16 + $0x5d0] sm:$0xff] }
 0x763   : > { %8048 = vmatpush1.bf16.msra.mxu0 %v9222_v45  ;;  %8008 = vmatprep.subr.bf16.mxu1 %v9189_v46  ;;  %v9509_v45 = vcombine.high %v2651_v44, %v2667_v29  ;;  %v9511_v46 = vcombine.high %v2652_v41, %v2668_v42  ;;  %v9387_v44 = vcombine.high %v2526_v33, %v2542_v34 }
 0x764   : > { %8049 = vmatprep.subr.bf16.mxu0 %v9191_v53  ;;  %v2619_v53 = vld [vmem:[#allocation16 + $0x940] sm:$0xff] }
 0x765   : > { %v9476_v9 = vcombine.low %v2619_v53, %v2635_v47 }
 0x766   : > { %8009 = vmatpush1.bf16.msra.mxu1 %v9188_v54  ;;  %v9510_v54 = vcombine.low %v2652_v41, %v2668_v42  ;;  %v9386_v41 = vcombine.low %v2526_v33, %v2542_v34 }
 0x767   : > { %8050 = vmatpush1.bf16.msra.mxu0 %v9190_v61  ;;  %8010 = vmatprep.subr.bf16.mxu1 %v9669_v57  ;;  %v9477_v61 = vcombine.high %v2619_v53, %v2635_v47  ;;  %v9479_v57 = vcombine.high %v2620_v48, %v2636_v50 }
 0x768   : > { %8051 = vmatprep.subr.bf16.mxu0 %v9671_v14  ;;  %v2587_v14 = vld [vmem:[#allocation16 + $0x840] sm:$0xff] }
 0x769   : > { %v9444_v20 = vcombine.low %v2587_v14, %v2603_v58 }
 0x76a   : > { %8011 = vmatpush2.bf16.msra.mxu1 %v9668_v10  ;;  %v9478_v10 = vcombine.low %v2620_v48, %v2636_v50  ;;  %v2461_v48 = vld [vmem:[#allocation16 + $0x450] sm:$0xff] }
 0x76b   : > { %8052 = vmatpush2.bf16.msra.mxu0 %v9670_v52  ;;  %8012 = vmatprep.subr.bf16.mxu1 %v9637_v7  ;;  %v9445_v52 = vcombine.high %v2587_v14, %v2603_v58  ;;  %v9447_v7 = vcombine.high %v2588_v4, %v2604_v37  ;;  %v2477_v50 = vld [vmem:[#allocation16 + $0x4d0] sm:$0xff] }
 0x76c   : > { %8053 = vmatprep.subr.bf16.mxu0 %v9639_v1  ;;  %v2557_v1 = vld [vmem:[#allocation16 + $0x750] sm:$0xff] }
 0x76d   : > { %v9416_v32 = vcombine.low %v2557_v1, %v2573_v31 }
 0x76e   : > { %8013 = vmatpush2.bf16.msra.mxu1 %v9636_v59  ;;  %v9446_v59 = vcombine.low %v2588_v4, %v2604_v37 }
 0x76f   : > { %8054 = vmatpush2.bf16.msra.mxu0 %v9638_v25  ;;  %8014 = vmatprep.subr.bf16.mxu1 %v9605_v26  ;;  %v9417_v25 = vcombine.high %v2557_v1, %v2573_v31  ;;  %v9419_v26 = vcombine.high %v2558_v13, %v2574_v6 }
 0x770   : > { %8055 = vmatprep.subr.bf16.mxu0 %v9607_v27  ;;  %v2525_v27 = vld [vmem:[#allocation16 + $0x650] sm:$0xff] }
 0x771   : > { %v9385_v30 = vcombine.high %v2525_v27, %v2541_v18  ;;  %v9384_v29 = vcombine.low %v2525_v27, %v2541_v18 }
 0x772   : > { %8015 = vmatpush2.bf16.msra.mxu1 %v9604_v60  ;;  %v7525_v60 = vrot.slane %v12416_v28, %v11433_v22 }
 0x773   : > { %8056 = vmatpush2.bf16.msra.mxu0 %v9606_v5  ;;  %8016 = vmatprep.subr.bf16.mxu1 %v9573_v35  ;;  %v9418_v5 = vcombine.low %v2558_v13, %v2574_v6  ;;  %v2493_v35 = vld [vmem:[#allocation16 + $0x550] sm:$0xff] }
 0x774   : > { %8057 = vmatprep.subr.bf16.mxu0 %v9575_v2  ;;  %v7533_v2 = vrot.slane %v12416_v28, %v11436_v23  ;;  %v9352_v4 = vcombine.low %v2493_v35, %v2509_v8  ;;  %v2429_v13 = vld [vmem:[#allocation16 + $0x350] sm:$0xff] }
 0x775   : > { %v2445_v6 = vld [vmem:[#allocation16 + $0x3d0] sm:$0xff] }
 0x776   : > { %8017 = vmatpush2.bf16.msra.mxu1 %v9572_v3  ;;  %v2494_v3 = vld [vmem:[#allocation16 + $0x558] sm:$0xff]  ;;  %v9289_v18 = vcombine.high %v2429_v13, %v2445_v6 }
 0x777   : > { %8058 = vmatpush2.bf16.msra.mxu0 %v9574_v36  ;;  %8018 = vmatprep.subr.bf16.mxu1 %v9541_v24  ;;  %v2510_v36 = vld [vmem:[#allocation16 + $0x5d8] sm:$0xff] }
 0x778   : > { %8059 = vmatprep.subr.bf16.mxu0 %v9543_v38 }
 0x77a   : > { %8019 = vmatpush2.bf16.msra.mxu1 %v9540_v19 }
 0x77b   : > { %8060 = vmatpush2.bf16.msra.mxu0 %v9542_v43  ;;  %8020 = vmatprep.subr.bf16.mxu1 %v9509_v45  ;;  %v9353_v43 = vcombine.high %v2493_v35, %v2509_v8  ;;  %v9355_v45 = vcombine.high %v2494_v3, %v2510_v36  ;;  %v2398_v35 = vld [vmem:[#allocation16 + $0x258] sm:$0xff]  ;;  %v2381_v8 = vld [vmem:[#allocation16 + $0x1d0] sm:$0xff] }
 0x77c   : > { %8061 = vmatprep.subr.bf16.mxu0 %v9511_v46 }
 0x77e   : > { %8021 = vmatpush2.bf16.msra.mxu1 %v9508_v51 }
 0x77f   : > { %8062 = vmatpush2.bf16.msra.mxu0 %v9510_v54  ;;  %8022 = vmatprep.subr.bf16.mxu1 %v9477_v61  ;;  %v2462_v61 = vld [vmem:[#allocation16 + $0x458] sm:$0xff] }
 0x780   : > { %8063 = vmatprep.subr.bf16.mxu0 %v9479_v57  ;;  %v2478_v57 = vld [vmem:[#allocation16 + $0x4d8] sm:$0xff] }
 0x781   : > { %v9323_v31 = vcombine.high %v2462_v61, %v2478_v57  ;;  %v9322_v27 = vcombine.low %v2462_v61, %v2478_v57 }
 0x782   : > { %8023 = vmatpush2.bf16.msra.mxu1 %v9476_v9 }
 0x783   : > { %8064 = vmatpush2.bf16.msra.mxu0 %v9478_v10  ;;  %8024 = vmatprep.subr.bf16.mxu1 %v9445_v52  ;;  %v9354_v10 = vcombine.low %v2494_v3, %v2510_v36  ;;  %v9321_v52 = vcombine.high %v2461_v48, %v2477_v50  ;;  %v2366_v3 = vld [vmem:[#allocation16 + $0x158] sm:$0xff] }
 0x784   : > { %8065 = vmatprep.subr.bf16.mxu0 %v9447_v7  ;;  %v2382_v36 = vld [vmem:[#allocation16 + $0x1d8] sm:$0xff] }
 0x786   : > { %8025 = vmatpush2.bf16.msra.mxu1 %v9444_v20  ;;  %v2430_v20 = vld [vmem:[#allocation16 + $0x358] sm:$0xff] }
 0x787   : > { %8066 = vmatpush2.bf16.msra.mxu0 %v9446_v59  ;;  %8076 = vmatprep.subr.bf16.mxu1 %v9417_v25  ;;  %v2446_v59 = vld [vmem:[#allocation16 + $0x3d8] sm:$0xff] }
 0x788   : > { %8117 = vmatprep.subr.bf16.mxu0 %v9419_v26  ;;  %v9320_v26 = vcombine.low %v2461_v48, %v2477_v50  ;;  %v9291_v34 = vcombine.high %v2430_v20, %v2446_v59  ;;  %v9290_v11 = vcombine.low %v2430_v20, %v2446_v59  ;;  %v2829_v48 = vld [vmem:[#allocation16 + $0xfd0] sm:$0xff]  ;;  %v2814_v50 = vld [vmem:[#allocation16 + $0xf58] sm:$0xff] }
 0x789   : > { %v7782_v24 = vpop.f32.mrf.mxu1  ;;  %v7823_v38 = vpop.f32.mrf.mxu0  ;;  %8027 = vmatmul.mubr.bf16.vlgmr.msra.gmra.mxu1 %v12400_v16  ;;  %v2766_v20 = vld [vmem:[#allocation16 + $0xdd8] sm:$0xff] }
 0x78a   : > { %8068 = vmatmul.mubr.bf16.vlgmr.msra.gmra.mxu0 %v12400_v16  ;;  %8077 = vmatpush1.bf16.msra.mxu1 %v9416_v32  ;;  %v7783_v42 = vadd.f32 %v7782_v24, %v7525_v60  ;;  %v7824_v46 = vadd.f32 %v7823_v38, %v7533_v2  ;;  %v8394_v32 = vrot.slane %v8386_v21, %v11534_v39  ;;  %v2397_v60 = vld [vmem:[#allocation16 + $0x250] sm:$0xff]  ;;  %v2414_v2 = vld [vmem:[#allocation16 + $0x2d8] sm:$0xff] }
 0x78b   : > { %8108 = vmatprep.mubr.bf16.mxu1 %v12398_v15  ;;  %8118 = vmatpush1.bf16.msra.mxu0 %v9418_v5  ;;  %v7784_v19 = vpop.f32.mrf.mxu1  ;;  %v7825_v28 = vpop.f32.mrf.mxu0  ;;  %v2413_v5 = vld [vmem:[#allocation16 + $0x2d0] sm:$0xff]  ;;  %v9259_v21 = vcombine.high %v2398_v35, %v2414_v2  ;;  %v9258_v38 = vcombine.low %v2398_v35, %v2414_v2 }
 0x78c   : > { %8149 = vmatprep.mubr.bf16.mxu0 %v12398_v15  ;;  %v7785_v53 = vadd.f32 %v7784_v19, %v7529_v49  ;;  %v7826_v47 = vadd.f32 %v7825_v28, %v7537_v40  ;;  %8078 = vmatprep.subr.bf16.mxu1 %v9385_v30  ;;  %v9288_v40 = vcombine.low %v2429_v13, %v2445_v6  ;;  %v2365_v30 = vld [vmem:[#allocation16 + $0x150] sm:$0xff]  ;;  %v2334_v19 = vld [vmem:[#allocation16 + $0x58] sm:$0xff] }
 0x78d   : > { %v7786_v51 = vpop.f32.mrf.mxu1  ;;  %v7827_v54 = vpop.f32.mrf.mxu0  ;;  %8119 = vmatprep.subr.bf16.mxu0 %v9387_v44  ;;  %v9257_v12 = vcombine.high %v2397_v60, %v2413_v5  ;;  %v9256_v24 = vcombine.low %v2397_v60, %v2413_v5  ;;  %v9225_v44 = vcombine.high %v2365_v30, %v2381_v8  ;;  %v2350_v28 = vld [vmem:[#allocation16 + $0xd8] sm:$0xff]  ;;  %v2765_v13 = vld [vmem:[#allocation16 + $0xdd0] sm:$0xff] }
 0x78e   : > { %v8356_v14 = vcombine.low %v7783_v42, %v7785_v53  ;;  %v8357_v58 = vcombine.low %v7824_v46, %v7826_v47  ;;  %8079 = vmatpush1.bf16.msra.mxu1 %v9384_v29  ;;  %v9227_v29 = vcombine.high %v2366_v3, %v2382_v36  ;;  %v2349_v42 = vld [vmem:[#allocation16 + $0xd0] sm:$0xff]  ;;  %v9195_v53 = vcombine.high %v2334_v19, %v2350_v28  ;;  %v2830_v51 = vld [vmem:[#allocation16 + $0xfd8] sm:$0xff] }
 0x78f   : > { %8120 = vmatpush1.bf16.msra.mxu0 %v9386_v41  ;;  %v7787_v37 = vpop.f32.mrf.mxu1  ;;  %v7828_v9 = vpop.f32.mrf.mxu0  ;;  %8080 = vmatprep.subr.bf16.mxu1 %v9353_v43  ;;  %v2333_v41 = vld [vmem:[#allocation16 + $0x50] sm:$0xff]  ;;  %v9224_v43 = vcombine.low %v2365_v30, %v2381_v8  ;;  %v9194_v61 = vcombine.low %v2334_v19, %v2350_v28  ;;  %v2750_v6 = vld [vmem:[#allocation16 + $0xd58] sm:$0xff] }
 0x790   : > { %v8378_v7 = vrot.slane %v8356_v14, %v11534_v39  ;;  %v8385_v1 = vrot.slane %v8357_v58, %v11534_v39  ;;  %8121 = vmatprep.subr.bf16.mxu0 %v9355_v45  ;;  %v9226_v45 = vcombine.low %v2366_v3, %v2382_v36  ;;  %v9193_v46 = vcombine.high %v2333_v41, %v2349_v42  ;;  %v2813_v47 = vld [vmem:[#allocation16 + $0xf50] sm:$0xff]  ;;  %v2782_v37 = vld [vmem:[#allocation16 + $0xe58] sm:$0xff] }
 0x791   : > { %v9192_v54 = vcombine.low %v2333_v41, %v2349_v42  ;;  %v9673_v57 = vcombine.high %v2813_v47, %v2829_v48  ;;  %v9675_v14 = vcombine.high %v2814_v50, %v2830_v51  ;;  %v2781_v58 = vld [vmem:[#allocation16 + $0xe50] sm:$0xff]  ;;  %v2798_v9 = vld [vmem:[#allocation16 + $0xed8] sm:$0xff]  ;;  %v9610_v5 = vcombine.low %v2750_v6, %v2766_v20 }
 0x792   : > { %v8387_v25 = vcombine.low %v8378_v7, %v8385_v1  ;;  %8081 = vmatpush1.bf16.msra.mxu1 %v9352_v4  ;;  %v2797_v4 = vld [vmem:[#allocation16 + $0xed0] sm:$0xff]  ;;  %v9643_v1 = vcombine.high %v2782_v37, %v2798_v9 }
 0x793   : > { %8122 = vmatpush1.bf16.msra.mxu0 %v9354_v10  ;;  %8082 = vmatprep.subr.bf16.mxu1 %v9321_v52  ;;  %v9672_v10 = vcombine.low %v2813_v47, %v2829_v48  ;;  %v9674_v52 = vcombine.low %v2814_v50, %v2830_v51  ;;  %v9641_v7 = vcombine.high %v2781_v58, %v2797_v4  ;;  %v2653_v36 = vld [vmem:[#allocation16 + $0xa50] sm:$0xff] }
 0x794   : > { %v8401_v33 = vrot.slane %v8387_v25, %v11534_v39  ;;  %8123 = vmatprep.subr.bf16.mxu0 %v9323_v31  ;;  %v2749_v31 = vld [vmem:[#allocation16 + $0xd50] sm:$0xff]  ;;  %v9640_v59 = vcombine.low %v2781_v58, %v2797_v4  ;;  %v9642_v25 = vcombine.low %v2782_v37, %v2798_v9  ;;  %v2559_v9 = vld [vmem:[#allocation16 + $0x760] sm:$0xff] }
 0x795   : > { %v9608_v60 = vcombine.low %v2749_v31, %v2765_v13  ;;  %v2621_v28 = vld [vmem:[#allocation16 + $0x950] sm:$0xff] }
 0x796   : > { %v8402_v49 = vcombine.low %v8394_v32, %v8401_v33  ;;  %8083 = vmatpush1.bf16.msra.mxu1 %v9320_v26  ;;  %v9609_v26 = vcombine.high %v2749_v31, %v2765_v13  ;;  %v2733_v32 = vld [vmem:[#allocation16 + $0xcd0] sm:$0xff]  ;;  %v2718_v33 = vld [vmem:[#allocation16 + $0xc58] sm:$0xff] }
 0x797   : > { %8124 = vmatpush1.bf16.msra.mxu0 %v9322_v27  ;;  %8084 = vmatprep.subr.bf16.mxu1 %v9289_v18  ;;  %v9611_v27 = vcombine.high %v2750_v6, %v2766_v20  ;;  %v2717_v18 = vld [vmem:[#allocation16 + $0xc50] sm:$0xff]  ;;  %v12464_v20 = vld [vmem:[#allocation17 + $0x8] sm:$0xff] }
 0x798   : > { %8554 = vst [vmem:[%s12461_s27] sm:$0xff] %v8402_v49  ;;  %8125 = vmatprep.subr.bf16.mxu0 %v9291_v34  ;;  %v2734_v34 = vld [vmem:[#allocation16 + $0xcd8] sm:$0xff]  ;;  %v9577_v35 = vcombine.high %v2717_v18, %v2733_v32  ;;  %v2685_v49 = vld [vmem:[#allocation16 + $0xb50] sm:$0xff] }
 0x799   : > { %v9579_v2 = vcombine.high %v2718_v33, %v2734_v34  ;;  %v9578_v30 = vcombine.low %v2718_v33, %v2734_v34  ;;  %v2589_v51 = vld [vmem:[#allocation16 + $0x850] sm:$0xff]  ;;  %v7541_v33 = vrot.slane %v12464_v20, %v11393_v55  ;;  %v7545_v34 = vrot.slane %v12464_v20, %v11401_v62 }
 0x79a   : > { %8085 = vmatpush1.bf16.msra.mxu1 %v9288_v40  ;;  %v2701_v40 = vld [vmem:[#allocation16 + $0xbd0] sm:$0xff] }
 0x79b   : > { %8126 = vmatpush1.bf16.msra.mxu0 %v9290_v11  ;;  %8086 = vmatprep.subr.bf16.mxu1 %v9257_v12  ;;  %v2686_v11 = vld [vmem:[#allocation16 + $0xb58] sm:$0xff]  ;;  %v9545_v8 = vcombine.high %v2685_v49, %v2701_v40 }
 0x79c   : > { %8127 = vmatprep.subr.bf16.mxu0 %v9259_v21  ;;  %v2702_v12 = vld [vmem:[#allocation16 + $0xbd8] sm:$0xff]  ;;  %v9576_v21 = vcombine.low %v2717_v18, %v2733_v32  ;;  %v2544_v18 = vld [vmem:[#allocation16 + $0x6e8] sm:$0xff] }
 0x79d   : > { %v9547_v3 = vcombine.high %v2686_v11, %v2702_v12  ;;  %v9546_v41 = vcombine.low %v2686_v11, %v2702_v12  ;;  %v2496_v12 = vld [vmem:[#allocation16 + $0x568] sm:$0xff] }
 0x79e   : > { %8087 = vmatpush1.bf16.msra.mxu1 %v9256_v24  ;;  %v2669_v24 = vld [vmem:[#allocation16 + $0xad0] sm:$0xff] }
 0x79f   : > { %8128 = vmatpush1.bf16.msra.mxu0 %v9258_v38  ;;  %8088 = vmatprep.subr.bf16.mxu1 %v9225_v44  ;;  %v2654_v38 = vld [vmem:[#allocation16 + $0xa58] sm:$0xff]  ;;  %v9513_v42 = vcombine.high %v2653_v36, %v2669_v24 }
 0x7a0   : > { %8129 = vmatprep.subr.bf16.mxu0 %v9227_v29  ;;  %v2670_v44 = vld [vmem:[#allocation16 + $0xad8] sm:$0xff]  ;;  %v9544_v29 = vcombine.low %v2685_v49, %v2701_v40  ;;  %v7549_v49 = vrot.slane %v12464_v20, %v11396_v56  ;;  %v7553_v40 = vrot.slane %v12464_v20, %v11404_v63 }
 0x7a1   : > { %v9515_v19 = vcombine.high %v2654_v38, %v2670_v44  ;;  %v9514_v47 = vcombine.low %v2654_v38, %v2670_v44 }
 0x7a2   : > { %8089 = vmatpush1.bf16.msra.mxu1 %v9224_v43  ;;  %v2637_v43 = vld [vmem:[#allocation16 + $0x9d0] sm:$0xff] }
 0x7a3   : > { %8130 = vmatpush1.bf16.msra.mxu0 %v9226_v45  ;;  %8090 = vmatprep.subr.bf16.mxu1 %v9193_v46  ;;  %v2622_v45 = vld [vmem:[#allocation16 + $0x958] sm:$0xff]  ;;  %v9481_v48 = vcombine.high %v2621_v28, %v2637_v43 }
 0x7a4   : > { %8131 = vmatprep.subr.bf16.mxu0 %v9195_v53  ;;  %v2638_v46 = vld [vmem:[#allocation16 + $0x9d8] sm:$0xff]  ;;  %v9512_v53 = vcombine.low %v2653_v36, %v2669_v24 }
 0x7a5   : > { %v9483_v50 = vcombine.high %v2622_v45, %v2638_v46  ;;  %v9482_v58 = vcombine.low %v2622_v45, %v2638_v46  ;;  %v2464_v46 = vld [vmem:[#allocation16 + $0x468] sm:$0xff] }
 0x7a6   : > { %8091 = vmatpush1.bf16.msra.mxu1 %v9192_v54  ;;  %v2605_v54 = vld [vmem:[#allocation16 + $0x8d0] sm:$0xff] }
 0x7a7   : > { %8132 = vmatpush1.bf16.msra.mxu0 %v9194_v61  ;;  %8092 = vmatprep.subr.bf16.mxu1 %v9673_v57  ;;  %v2590_v61 = vld [vmem:[#allocation16 + $0x858] sm:$0xff]  ;;  %v9449_v4 = vcombine.high %v2589_v51, %v2605_v54 }
 0x7a8   : > { %8133 = vmatprep.subr.bf16.mxu0 %v9675_v14  ;;  %v2606_v57 = vld [vmem:[#allocation16 + $0x8d8] sm:$0xff]  ;;  %v9480_v14 = vcombine.low %v2621_v28, %v2637_v43 }
 0x7a9   : > { %v9451_v37 = vcombine.high %v2590_v61, %v2606_v57  ;;  %v9450_v31 = vcombine.low %v2590_v61, %v2606_v57 }
 0x7aa   : > { %8093 = vmatpush2.bf16.msra.mxu1 %v9672_v10  ;;  %v2575_v10 = vld [vmem:[#allocation16 + $0x7e0] sm:$0xff] }
 0x7ab   : > { %8134 = vmatpush2.bf16.msra.mxu0 %v9674_v52  ;;  %8094 = vmatprep.subr.bf16.mxu1 %v9641_v7  ;;  %v2560_v52 = vld [vmem:[#allocation16 + $0x768] sm:$0xff]  ;;  %v9421_v13 = vcombine.high %v2559_v9, %v2575_v10 }
 0x7ac   : > { %8135 = vmatprep.subr.bf16.mxu0 %v9643_v1  ;;  %v2576_v7 = vld [vmem:[#allocation16 + $0x7e8] sm:$0xff]  ;;  %v9448_v1 = vcombine.low %v2589_v51, %v2605_v54 }
 0x7ad   : > { %v9423_v6 = vcombine.high %v2560_v52, %v2576_v7  ;;  %v9422_v32 = vcombine.low %v2560_v52, %v2576_v7  ;;  %v2432_v52 = vld [vmem:[#allocation16 + $0x368] sm:$0xff] }
 0x7ae   : > { %8095 = vmatpush2.bf16.msra.mxu1 %v9640_v59  ;;  %v2527_v59 = vld [vmem:[#allocation16 + $0x660] sm:$0xff]  ;;  %v2448_v7 = vld [vmem:[#allocation16 + $0x3e8] sm:$0xff] }
 0x7af   : > { %8136 = vmatpush2.bf16.msra.mxu0 %v9642_v25  ;;  %8096 = vmatprep.subr.bf16.mxu1 %v9609_v26  ;;  %v2543_v25 = vld [vmem:[#allocation16 + $0x6e0] sm:$0xff]  ;;  %v9420_v26 = vcombine.low %v2559_v9, %v2575_v10 }
 0x7b0   : > { %8137 = vmatprep.subr.bf16.mxu0 %v9611_v27  ;;  %v2528_v27 = vld [vmem:[#allocation16 + $0x668] sm:$0xff]  ;;  %v2447_v9 = vld [vmem:[#allocation16 + $0x3e0] sm:$0xff] }
 0x7b1   : > { %v9391_v11 = vcombine.high %v2528_v27, %v2544_v18  ;;  %v9390_v36 = vcombine.low %v2528_v27, %v2544_v18  ;;  %v2400_v27 = vld [vmem:[#allocation16 + $0x268] sm:$0xff] }
 0x7b2   : > { %8097 = vmatpush2.bf16.msra.mxu1 %v9608_v60  ;;  %v9389_v60 = vcombine.high %v2527_v59, %v2543_v25  ;;  %v2416_v18 = vld [vmem:[#allocation16 + $0x2e8] sm:$0xff] }
 0x7b3   : > { %8138 = vmatpush2.bf16.msra.mxu0 %v9610_v5  ;;  %8098 = vmatprep.subr.bf16.mxu1 %v9577_v35  ;;  %v2495_v5 = vld [vmem:[#allocation16 + $0x560] sm:$0xff] }
 0x7b4   : > { %8139 = vmatprep.subr.bf16.mxu0 %v9579_v2  ;;  %v2511_v35 = vld [vmem:[#allocation16 + $0x5e0] sm:$0xff] }
 0x7b5   : > { %v9357_v24 = vcombine.high %v2495_v5, %v2511_v35 }
 0x7b6   : > { %8099 = vmatpush2.bf16.msra.mxu1 %v9576_v21  ;;  %v2512_v21 = vld [vmem:[#allocation16 + $0x5e8] sm:$0xff] }
 0x7b7   : > { %8140 = vmatpush2.bf16.msra.mxu0 %v9578_v30  ;;  %8100 = vmatprep.subr.bf16.mxu1 %v9545_v8  ;;  %v9388_v8 = vcombine.low %v2527_v59, %v2543_v25  ;;  %v9358_v61 = vcombine.low %v2496_v12, %v2512_v21  ;;  %v9295_v59 = vcombine.high %v2432_v52, %v2448_v7  ;;  %v2399_v25 = vld [vmem:[#allocation16 + $0x260] sm:$0xff] }
 0x7b8   : > { %8141 = vmatprep.subr.bf16.mxu0 %v9547_v3 }
 0x7ba   : > { %8101 = vmatpush2.bf16.msra.mxu1 %v9544_v29 }
 0x7bb   : > { %8142 = vmatpush2.bf16.msra.mxu0 %v9546_v41  ;;  %8102 = vmatprep.subr.bf16.mxu1 %v9513_v42  ;;  %v9359_v41 = vcombine.high %v2496_v12, %v2512_v21  ;;  %v2463_v42 = vld [vmem:[#allocation16 + $0x460] sm:$0xff] }
 0x7bc   : > { %8143 = vmatprep.subr.bf16.mxu0 %v9515_v19  ;;  %v2479_v19 = vld [vmem:[#allocation16 + $0x4e0] sm:$0xff] }
 0x7bd   : > { %v9325_v57 = vcombine.high %v2463_v42, %v2479_v19 }
 0x7be   : > { %8103 = vmatpush2.bf16.msra.mxu1 %v9512_v53  ;;  %v2480_v53 = vld [vmem:[#allocation16 + $0x4e8] sm:$0xff] }
 0x7bf   : > { %8144 = vmatpush2.bf16.msra.mxu0 %v9514_v47  ;;  %8104 = vmatprep.subr.bf16.mxu1 %v9481_v48 }
 0x7c0   : > { %8145 = vmatprep.subr.bf16.mxu0 %v9483_v50  ;;  %v9356_v50 = vcombine.low %v2495_v5, %v2511_v35  ;;  %v2367_v5 = vld [vmem:[#allocation16 + $0x160] sm:$0xff] }
 0x7c1   : > { %v2383_v35 = vld [vmem:[#allocation16 + $0x1e0] sm:$0xff] }
 0x7c2   : > { %8105 = vmatpush2.bf16.msra.mxu1 %v9480_v14  ;;  %v9229_v12 = vcombine.high %v2367_v5, %v2383_v35 }
 0x7c3   : > { %8146 = vmatpush2.bf16.msra.mxu0 %v9482_v58  ;;  %8106 = vmatprep.subr.bf16.mxu1 %v9449_v4  ;;  %v9327_v4 = vcombine.high %v2464_v46, %v2480_v53 }
 0x7c4   : > { %8147 = vmatprep.subr.bf16.mxu0 %v9451_v37  ;;  %v2431_v37 = vld [vmem:[#allocation16 + $0x360] sm:$0xff] }
 0x7c6   : > { %8107 = vmatpush2.bf16.msra.mxu1 %v9448_v1  ;;  %v9324_v1 = vcombine.low %v2463_v42, %v2479_v19  ;;  %v2831_v42 = vld [vmem:[#allocation16 + $0xfe0] sm:$0xff]  ;;  %v2816_v19 = vld [vmem:[#allocation16 + $0xf68] sm:$0xff] }
 0x7c7   : > { %8148 = vmatpush2.bf16.msra.mxu0 %v9450_v31  ;;  %8158 = vmatprep.subr.bf16.mxu1 %v9421_v13  ;;  %v9326_v13 = vcombine.low %v2464_v46, %v2480_v53 }
 0x7c8   : > { %8199 = vmatprep.subr.bf16.mxu0 %v9423_v6  ;;  %v9293_v6 = vcombine.high %v2431_v37, %v2447_v9 }
 0x7c9   : > { %v7864_v2 = vpop.f32.mrf.mxu1  ;;  %8109 = vmatmul.mubr.bf16.vlgmr.msra.gmra.mxu1 %v12400_v16 }
 0x7ca   : > { %v7905_v30 = vpop.f32.mrf.mxu0  ;;  %8150 = vmatmul.mubr.bf16.vlgmr.msra.gmra.mxu0 %v12400_v16  ;;  %8159 = vmatpush1.bf16.msra.mxu1 %v9420_v26  ;;  %v7865_v38 = vadd.f32 %v7864_v2, %v7541_v33  ;;  %v2415_v26 = vld [vmem:[#allocation16 + $0x2e0] sm:$0xff]  ;;  %v9294_v33 = vcombine.low %v2432_v52, %v2448_v7  ;;  %v2368_v2 = vld [vmem:[#allocation16 + $0x168] sm:$0xff] }
 0x7cb   : > { %8190 = vmatprep.mubr.bf16.mxu1 %v12398_v15  ;;  %8200 = vmatpush1.bf16.msra.mxu0 %v9422_v32  ;;  %v7866_v3 = vpop.f32.mrf.mxu1  ;;  %v7906_v28 = vadd.f32 %v7905_v30, %v7549_v49  ;;  %v9292_v32 = vcombine.low %v2431_v37, %v2447_v9  ;;  %v2384_v49 = vld [vmem:[#allocation16 + $0x1e8] sm:$0xff]  ;;  %v2335_v30 = vld [vmem:[#allocation16 + $0x60] sm:$0xff] }
 0x7cc   : > { %8231 = vmatprep.mubr.bf16.mxu0 %v12398_v15  ;;  %v7867_v44 = vadd.f32 %v7866_v3, %v7545_v34  ;;  %v7907_v29 = vpop.f32.mrf.mxu0  ;;  %8160 = vmatprep.subr.bf16.mxu1 %v9389_v60  ;;  %v9261_v34 = vcombine.high %v2399_v25, %v2415_v26  ;;  %v9263_v60 = vcombine.high %v2400_v27, %v2416_v18  ;;  %v2336_v3 = vld [vmem:[#allocation16 + $0x68] sm:$0xff]  ;;  %v2767_v37 = vld [vmem:[#allocation16 + $0xde0] sm:$0xff] }
 0x7cd   : > { %v7908_v43 = vadd.f32 %v7907_v29, %v7553_v40  ;;  %v7868_v45 = vpop.f32.mrf.mxu1  ;;  %8201 = vmatprep.subr.bf16.mxu0 %v9391_v11  ;;  %v9260_v40 = vcombine.low %v2399_v25, %v2415_v26  ;;  %v9262_v11 = vcombine.low %v2400_v27, %v2416_v18  ;;  %v9231_v21 = vcombine.high %v2368_v2, %v2384_v49  ;;  %v2752_v9 = vld [vmem:[#allocation16 + $0xd68] sm:$0xff]  ;;  %v2735_v25 = vld [vmem:[#allocation16 + $0xce0] sm:$0xff] }
 0x7ce   : > { %v8403_v47 = vcombine.low %v7865_v38, %v7867_v44  ;;  %v7909_v48 = vpop.f32.mrf.mxu0  ;;  %8161 = vmatpush1.bf16.msra.mxu1 %v9388_v8  ;;  %v2351_v8 = vld [vmem:[#allocation16 + $0xe0] sm:$0xff]  ;;  %v9230_v38 = vcombine.low %v2368_v2, %v2384_v49  ;;  %v2768_v52 = vld [vmem:[#allocation16 + $0xde8] sm:$0xff] }
 0x7cf   : > { %v8404_v51 = vcombine.low %v7906_v28, %v7908_v43  ;;  %8202 = vmatpush1.bf16.msra.mxu0 %v9390_v36  ;;  %v7869_v54 = vpop.f32.mrf.mxu1  ;;  %8162 = vmatprep.subr.bf16.mxu1 %v9357_v24  ;;  %v2352_v36 = vld [vmem:[#allocation16 + $0xe8] sm:$0xff]  ;;  %v9228_v24 = vcombine.low %v2367_v5, %v2383_v35  ;;  %v9197_v44 = vcombine.high %v2335_v30, %v2351_v8  ;;  %v2799_v48 = vld [vmem:[#allocation16 + $0xee0] sm:$0xff] }
 0x7d0   : > { %v12479_v14 = vrot.slane %v8403_v47, %v11534_v39  ;;  %v7910_v58 = vpop.f32.mrf.mxu0  ;;  %8203 = vmatprep.subr.bf16.mxu0 %v9359_v41  ;;  %v9199_v29 = vcombine.high %v2336_v3, %v2352_v36  ;;  %v2815_v41 = vld [vmem:[#allocation16 + $0xf60] sm:$0xff]  ;;  %v2832_v28 = vld [vmem:[#allocation16 + $0xfe8] sm:$0xff]  ;;  %v9196_v43 = vcombine.low %v2335_v30, %v2351_v8  ;;  %v9198_v45 = vcombine.low %v2336_v3, %v2352_v36 }
 0x7d1   : > { %v12482_v10 = vrot.slane %v8404_v51, %v11534_v39  ;;  %v9677_v46 = vcombine.high %v2815_v41, %v2831_v42  ;;  %v9679_v53 = vcombine.high %v2816_v19, %v2832_v28  ;;  %v2783_v47 = vld [vmem:[#allocation16 + $0xe60] sm:$0xff]  ;;  %v2800_v51 = vld [vmem:[#allocation16 + $0xee8] sm:$0xff]  ;;  %v9676_v54 = vcombine.low %v2815_v41, %v2831_v42 }
 0x7d2   : > { %8163 = vmatpush1.bf16.msra.mxu1 %v9356_v50  ;;  %v2784_v50 = vld [vmem:[#allocation16 + $0xe68] sm:$0xff]  ;;  %v9644_v7 = vcombine.low %v2783_v47, %v2799_v48  ;;  %v2703_v5 = vld [vmem:[#allocation16 + $0xbe0] sm:$0xff] }
 0x7d3   : > { %v8435_v31 = vcombine.low %v12479_v14, %v12482_v10  ;;  %8204 = vmatpush1.bf16.msra.mxu0 %v9358_v61  ;;  %8164 = vmatprep.subr.bf16.mxu1 %v9325_v57  ;;  %v9678_v61 = vcombine.low %v2816_v19, %v2832_v28  ;;  %v9645_v57 = vcombine.high %v2783_v47, %v2799_v48  ;;  %v2720_v26 = vld [vmem:[#allocation16 + $0xc68] sm:$0xff]  ;;  %v2671_v30 = vld [vmem:[#allocation16 + $0xae0] sm:$0xff]  ;;  %v2386_v14 = vld [vmem:[#allocation16 + $0x1f8] sm:$0xff] }
 0x7d4   : > { %8205 = vmatprep.subr.bf16.mxu0 %v9327_v4  ;;  %v9647_v58 = vcombine.high %v2784_v50, %v2800_v51  ;;  %v2751_v4 = vld [vmem:[#allocation16 + $0xd60] sm:$0xff]  ;;  %v2736_v27 = vld [vmem:[#allocation16 + $0xce8] sm:$0xff] }
 0x7d5   : > { %v9612_v18 = vcombine.low %v2751_v4, %v2767_v37  ;;  %v2688_v35 = vld [vmem:[#allocation16 + $0xb68] sm:$0xff]  ;;  %v2639_v41 = vld [vmem:[#allocation16 + $0x9e0] sm:$0xff] }
 0x7d6   : > { %8165 = vmatpush1.bf16.msra.mxu1 %v9324_v1  ;;  %v9646_v1 = vcombine.low %v2784_v50, %v2800_v51  ;;  %v2704_v2 = vld [vmem:[#allocation16 + $0xbe8] sm:$0xff]  ;;  %v2607_v47 = vld [vmem:[#allocation16 + $0x8e0] sm:$0xff] }
 0x7d7   : > { %8206 = vmatpush1.bf16.msra.mxu0 %v9326_v13  ;;  %8166 = vmatprep.subr.bf16.mxu1 %v9293_v6  ;;  %v9613_v13 = vcombine.high %v2751_v4, %v2767_v37  ;;  %v9615_v6 = vcombine.high %v2752_v9, %v2768_v52  ;;  %v2656_v8 = vld [vmem:[#allocation16 + $0xa68] sm:$0xff]  ;;  %v2577_v4 = vld [vmem:[#allocation16 + $0x7f0] sm:$0xff]  ;;  %v2562_v37 = vld [vmem:[#allocation16 + $0x778] sm:$0xff] }
 0x7d8   : > { %8207 = vmatprep.subr.bf16.mxu0 %v9295_v59  ;;  %v2719_v59 = vld [vmem:[#allocation16 + $0xc60] sm:$0xff]  ;;  %v2672_v3 = vld [vmem:[#allocation16 + $0xae8] sm:$0xff] }
 0x7d9   : > { %v9580_v49 = vcombine.low %v2719_v59, %v2735_v25  ;;  %v2624_v42 = vld [vmem:[#allocation16 + $0x968] sm:$0xff] }
 0x7da   : > { %8167 = vmatpush1.bf16.msra.mxu1 %v9292_v32  ;;  %v9614_v32 = vcombine.low %v2752_v9, %v2768_v52  ;;  %v2640_v19 = vld [vmem:[#allocation16 + $0x9e8] sm:$0xff]  ;;  %v2578_v9 = vld [vmem:[#allocation16 + $0x7f8] sm:$0xff] }
 0x7db   : > { %8208 = vmatpush1.bf16.msra.mxu0 %v9294_v33  ;;  %8168 = vmatprep.subr.bf16.mxu1 %v9261_v34  ;;  %v9581_v33 = vcombine.high %v2719_v59, %v2735_v25  ;;  %v9583_v34 = vcombine.high %v2720_v26, %v2736_v27  ;;  %v2592_v48 = vld [vmem:[#allocation16 + $0x868] sm:$0xff]  ;;  %v2545_v59 = vld [vmem:[#allocation16 + $0x6f0] sm:$0xff] }
 0x7dc   : > { %8209 = vmatprep.subr.bf16.mxu0 %v9263_v60  ;;  %v2687_v60 = vld [vmem:[#allocation16 + $0xb60] sm:$0xff]  ;;  %v2608_v50 = vld [vmem:[#allocation16 + $0x8e8] sm:$0xff] }
 0x7dd   : > { %v9548_v36 = vcombine.low %v2687_v60, %v2703_v5 }
 0x7de   : > { %8169 = vmatpush1.bf16.msra.mxu1 %v9260_v40  ;;  %v9582_v40 = vcombine.low %v2720_v26, %v2736_v27  ;;  %v2530_v26 = vld [vmem:[#allocation16 + $0x678] sm:$0xff] }
 0x7df   : > { %8210 = vmatpush1.bf16.msra.mxu0 %v9262_v11  ;;  %8170 = vmatprep.subr.bf16.mxu1 %v9229_v12  ;;  %v9549_v11 = vcombine.high %v2687_v60, %v2703_v5  ;;  %v9551_v12 = vcombine.high %v2688_v35, %v2704_v2  ;;  %v2546_v27 = vld [vmem:[#allocation16 + $0x6f8] sm:$0xff]  ;;  %v2497_v60 = vld [vmem:[#allocation16 + $0x570] sm:$0xff] }
 0x7e0   : > { %8211 = vmatprep.subr.bf16.mxu0 %v9231_v21  ;;  %v2655_v21 = vld [vmem:[#allocation16 + $0xa60] sm:$0xff]  ;;  %v2513_v5 = vld [vmem:[#allocation16 + $0x5f0] sm:$0xff] }
 0x7e1   : > { %v9516_v28 = vcombine.low %v2655_v21, %v2671_v30 }
 0x7e2   : > { %8171 = vmatpush1.bf16.msra.mxu1 %v9228_v24  ;;  %v9550_v24 = vcombine.low %v2688_v35, %v2704_v2  ;;  %v7565_v2 = vrot.slane %v12464_v20, %v11436_v23 }
 0x7e3   : > { %8212 = vmatpush1.bf16.msra.mxu0 %v9230_v38  ;;  %8172 = vmatprep.subr.bf16.mxu1 %v9197_v44  ;;  %v9517_v38 = vcombine.high %v2655_v21, %v2671_v30  ;;  %v9519_v44 = vcombine.high %v2656_v8, %v2672_v3 }
 0x7e4   : > { %8213 = vmatprep.subr.bf16.mxu0 %v9199_v29  ;;  %v2623_v29 = vld [vmem:[#allocation16 + $0x960] sm:$0xff] }
 0x7e5   : > { %v9484_v51 = vcombine.low %v2623_v29, %v2639_v41 }
 0x7e6   : > { %8173 = vmatpush1.bf16.msra.mxu1 %v9196_v43  ;;  %v9518_v43 = vcombine.low %v2656_v8, %v2672_v3  ;;  %v9394_v3 = vcombine.low %v2530_v26, %v2546_v27 }
 0x7e7   : > { %8214 = vmatpush1.bf16.msra.mxu0 %v9198_v45  ;;  %8174 = vmatprep.subr.bf16.mxu1 %v9677_v46  ;;  %v9485_v45 = vcombine.high %v2623_v29, %v2639_v41  ;;  %v9487_v46 = vcombine.high %v2624_v42, %v2640_v19  ;;  %v2465_v29 = vld [vmem:[#allocation16 + $0x470] sm:$0xff] }
 0x7e8   : > { %8215 = vmatprep.subr.bf16.mxu0 %v9679_v53  ;;  %v2591_v53 = vld [vmem:[#allocation16 + $0x860] sm:$0xff]  ;;  %v2481_v41 = vld [vmem:[#allocation16 + $0x4f0] sm:$0xff] }
 0x7e9   : > { %v9452_v52 = vcombine.low %v2591_v53, %v2607_v47 }
 0x7ea   : > { %8175 = vmatpush2.bf16.msra.mxu1 %v9676_v54  ;;  %v9486_v54 = vcombine.low %v2624_v42, %v2640_v19 }
 0x7eb   : > { %8216 = vmatpush2.bf16.msra.mxu0 %v9678_v61  ;;  %8176 = vmatprep.subr.bf16.mxu1 %v9645_v57  ;;  %v9453_v61 = vcombine.high %v2591_v53, %v2607_v47  ;;  %v9455_v57 = vcombine.high %v2592_v48, %v2608_v50  ;;  %v9360_v47 = vcombine.low %v2497_v60, %v2513_v5 }
 0x7ec   : > { %8217 = vmatprep.subr.bf16.mxu0 %v9647_v58  ;;  %v2561_v58 = vld [vmem:[#allocation16 + $0x770] sm:$0xff] }
 0x7ed   : > { %v9424_v25 = vcombine.low %v2561_v58, %v2577_v4 }
 0x7ee   : > { %8177 = vmatpush2.bf16.msra.mxu1 %v9644_v7  ;;  %v9454_v7 = vcombine.low %v2592_v48, %v2608_v50 }
 0x7ef   : > { %8218 = vmatpush2.bf16.msra.mxu0 %v9646_v1  ;;  %8178 = vmatprep.subr.bf16.mxu1 %v9613_v13  ;;  %v9425_v1 = vcombine.high %v2561_v58, %v2577_v4  ;;  %v9427_v13 = vcombine.high %v2562_v37, %v2578_v9  ;;  %v2433_v58 = vld [vmem:[#allocation16 + $0x370] sm:$0xff] }
 0x7f0   : > { %8219 = vmatprep.subr.bf16.mxu0 %v9615_v6  ;;  %v2529_v6 = vld [vmem:[#allocation16 + $0x670] sm:$0xff] }
 0x7f1   : > { %v9392_v30 = vcombine.low %v2529_v6, %v2545_v59  ;;  %v2449_v4 = vld [vmem:[#allocation16 + $0x3f0] sm:$0xff] }
 0x7f2   : > { %8179 = vmatpush2.bf16.msra.mxu1 %v9612_v18  ;;  %v9426_v18 = vcombine.low %v2562_v37, %v2578_v9  ;;  %v2434_v9 = vld [vmem:[#allocation16 + $0x378] sm:$0xff] }
 0x7f3   : > { %8220 = vmatpush2.bf16.msra.mxu0 %v9614_v32  ;;  %8180 = vmatprep.subr.bf16.mxu1 %v9581_v33  ;;  %v7557_v32 = vrot.slane %v12464_v20, %v11433_v22  ;;  %v7561_v33 = vrot.slane %v12464_v20, %v11461_v0 }
 0x7f4   : > { %8221 = vmatprep.subr.bf16.mxu0 %v9583_v34  ;;  %v9393_v34 = vcombine.high %v2529_v6, %v2545_v59  ;;  %v9297_v6 = vcombine.high %v2433_v58, %v2449_v4 }
 0x7f6   : > { %8181 = vmatpush2.bf16.msra.mxu1 %v9580_v49  ;;  %v7569_v49 = vrot.slane %v12464_v20, %v11464_v17 }
 0x7f7   : > { %8222 = vmatpush2.bf16.msra.mxu0 %v9582_v40  ;;  %8182 = vmatprep.subr.bf16.mxu1 %v9549_v11  ;;  %v9395_v40 = vcombine.high %v2530_v26, %v2546_v27  ;;  %v2498_v11 = vld [vmem:[#allocation16 + $0x578] sm:$0xff]  ;;  %v2417_v26 = vld [vmem:[#allocation16 + $0x2f0] sm:$0xff]  ;;  %v8443_v27 = vrot.slane %v8435_v31, %v11534_v39 }
 0x7f8   : > { %8223 = vmatprep.subr.bf16.mxu0 %v9551_v12  ;;  %v2514_v12 = vld [vmem:[#allocation16 + $0x5f8] sm:$0xff] }
 0x7f9   : > { %v9363_v20 = vcombine.high %v2498_v11, %v2514_v12 }
 0x7fa   : > { %8183 = vmatpush2.bf16.msra.mxu1 %v9548_v36  ;;  %v9361_v36 = vcombine.high %v2497_v60, %v2513_v5 }
 0x7fb   : > { %8224 = vmatpush2.bf16.msra.mxu0 %v9550_v24  ;;  %8184 = vmatprep.subr.bf16.mxu1 %v9517_v38 }
 0x7fc   : > { %8225 = vmatprep.subr.bf16.mxu0 %v9519_v44 }
 0x7fe   : > { %8185 = vmatpush2.bf16.msra.mxu1 %v9516_v28 }
 0x7ff   : > { %8226 = vmatpush2.bf16.msra.mxu0 %v9518_v43  ;;  %8186 = vmatprep.subr.bf16.mxu1 %v9485_v45  ;;  %v2466_v43 = vld [vmem:[#allocation16 + $0x478] sm:$0xff] }
 0x800   : > { %8227 = vmatprep.subr.bf16.mxu0 %v9487_v46  ;;  %v2482_v45 = vld [vmem:[#allocation16 + $0x4f8] sm:$0xff] }
 0x802   : > { %8187 = vmatpush2.bf16.msra.mxu1 %v9484_v51  ;;  %v9329_v51 = vcombine.high %v2465_v29, %v2481_v41 }
 0x803   : > { %8228 = vmatpush2.bf16.msra.mxu0 %v9486_v54  ;;  %8188 = vmatprep.subr.bf16.mxu1 %v9453_v61 }
 0x804   : > { %8229 = vmatprep.subr.bf16.mxu0 %v9455_v57  ;;  %v9331_v57 = vcombine.high %v2466_v43, %v2482_v45 }
 0x806   : > { %8189 = vmatpush2.bf16.msra.mxu1 %v9452_v52  ;;  %v2450_v52 = vld [vmem:[#allocation16 + $0x3f8] sm:$0xff] }
 0x807   : > { %8230 = vmatpush2.bf16.msra.mxu0 %v9454_v7  ;;  %8240 = vmatprep.subr.bf16.mxu1 %v9425_v1  ;;  %v9328_v7 = vcombine.low %v2465_v29, %v2481_v41  ;;  %v9299_v59 = vcombine.high %v2434_v9, %v2450_v52  ;;  %v9298_v5 = vcombine.low %v2434_v9, %v2450_v52  ;;  %v2817_v29 = vld [vmem:[#allocation16 + $0xf70] sm:$0xff] }
 0x808   : > { %8281 = vmatprep.subr.bf16.mxu0 %v9427_v13  ;;  %v9330_v13 = vcombine.low %v2466_v43, %v2482_v45  ;;  %v2833_v41 = vld [vmem:[#allocation16 + $0xff0] sm:$0xff] }
 0x809   : > { %v7946_v35 = vpop.f32.mrf.mxu1  ;;  %8191 = vmatmul.mubr.bf16.vlgmr.msra.gmra.mxu1 %v12400_v16  ;;  %v9681_v45 = vcombine.high %v2817_v29, %v2833_v41 }
 0x80a   : > { %v7987_v21 = vpop.f32.mrf.mxu0  ;;  %8232 = vmatmul.mubr.bf16.vlgmr.msra.gmra.mxu0 %v12400_v16  ;;  %8241 = vmatpush1.bf16.msra.mxu1 %v9424_v25  ;;  %v7947_v24 = vadd.f32 %v7946_v35, %v7557_v32  ;;  %v2401_v25 = vld [vmem:[#allocation16 + $0x270] sm:$0xff]  ;;  %v2402_v32 = vld [vmem:[#allocation16 + $0x278] sm:$0xff] }
 0x80b   : > { %8272 = vmatprep.mubr.bf16.mxu1 %v12398_v15  ;;  %8282 = vmatpush1.bf16.msra.mxu0 %v9426_v18  ;;  %v7948_v8 = vpop.f32.mrf.mxu1  ;;  %v7988_v42 = vadd.f32 %v7987_v21, %v7565_v2  ;;  %v9265_v35 = vcombine.high %v2401_v25, %v2417_v26  ;;  %v9264_v10 = vcombine.low %v2401_v25, %v2417_v26  ;;  %v2738_v25 = vld [vmem:[#allocation16 + $0xcf8] sm:$0xff] }
 0x80c   : > { %8313 = vmatprep.mubr.bf16.mxu0 %v12398_v15  ;;  %v7949_v38 = vadd.f32 %v7948_v8, %v7561_v33  ;;  %v7989_v44 = vpop.f32.mrf.mxu0  ;;  %8242 = vmatprep.subr.bf16.mxu1 %v9393_v34  ;;  %v9362_v15 = vcombine.low %v2498_v11, %v2514_v12  ;;  %v2418_v33 = vld [vmem:[#allocation16 + $0x2f8] sm:$0xff]  ;;  %v9296_v34 = vcombine.low %v2433_v58, %v2449_v4  ;;  %v2353_v8 = vld [vmem:[#allocation16 + $0xf0] sm:$0xff] }
 0x80d   : > { %v7990_v19 = vadd.f32 %v7989_v44, %v7569_v49  ;;  %v7950_v28 = vpop.f32.mrf.mxu1  ;;  %8283 = vmatprep.subr.bf16.mxu0 %v9395_v40  ;;  %v9267_v2 = vcombine.high %v2402_v32, %v2418_v33  ;;  %v2369_v49 = vld [vmem:[#allocation16 + $0x170] sm:$0xff]  ;;  %v2370_v11 = vld [vmem:[#allocation16 + $0x178] sm:$0xff]  ;;  %v9266_v31 = vcombine.low %v2402_v32, %v2418_v33 }
 0x80e   : > { %v8405_v46 = vcombine.low %v7947_v24, %v7949_v38  ;;  %v7991_v53 = vpop.f32.mrf.mxu0  ;;  %8243 = vmatpush1.bf16.msra.mxu1 %v9392_v30  ;;  %v2385_v40 = vld [vmem:[#allocation16 + $0x1f0] sm:$0xff]  ;;  %v9235_v21 = vcombine.high %v2370_v11, %v2386_v14  ;;  %v9234_v38 = vcombine.low %v2370_v11, %v2386_v14  ;;  %v2754_v4 = vld [vmem:[#allocation16 + $0xd78] sm:$0xff] }
 0x80f   : > { %v8406_v48 = vcombine.low %v7988_v42, %v7990_v19  ;;  %8284 = vmatpush1.bf16.msra.mxu0 %v9394_v3  ;;  %v7951_v50 = vpop.f32.mrf.mxu1  ;;  %8244 = vmatprep.subr.bf16.mxu1 %v9361_v36  ;;  %v9233_v12 = vcombine.high %v2369_v49, %v2385_v40  ;;  %v2337_v30 = vld [vmem:[#allocation16 + $0x70] sm:$0xff]  ;;  %v2338_v3 = vld [vmem:[#allocation16 + $0x78] sm:$0xff]  ;;  %v9232_v24 = vcombine.low %v2369_v49, %v2385_v40 }
 0x810   : > { %v8427_v54 = vrot.slane %v8405_v46, %v11534_v39  ;;  %v7992_v61 = vpop.f32.mrf.mxu0  ;;  %8285 = vmatprep.subr.bf16.mxu0 %v9363_v20  ;;  %v2354_v36 = vld [vmem:[#allocation16 + $0xf8] sm:$0xff]  ;;  %v9201_v44 = vcombine.high %v2337_v30, %v2353_v8  ;;  %v9200_v28 = vcombine.low %v2337_v30, %v2353_v8  ;;  %v2785_v53 = vld [vmem:[#allocation16 + $0xe70] sm:$0xff] }
 0x811   : > { %v8434_v37 = vrot.slane %v8406_v48, %v11534_v39  ;;  %v9203_v20 = vcombine.high %v2338_v3, %v2354_v36  ;;  %v2818_v42 = vld [vmem:[#allocation16 + $0xf78] sm:$0xff]  ;;  %v9202_v43 = vcombine.low %v2338_v3, %v2354_v36  ;;  %v2769_v58 = vld [vmem:[#allocation16 + $0xdf0] sm:$0xff] }
 0x812   : > { %8245 = vmatpush1.bf16.msra.mxu1 %v9360_v47  ;;  %v2834_v19 = vld [vmem:[#allocation16 + $0xff8] sm:$0xff]  ;;  %v2801_v47 = vld [vmem:[#allocation16 + $0xef0] sm:$0xff] }
 0x813   : > { %v8436_v1 = vcombine.low %v8427_v54, %v8434_v37  ;;  %8286 = vmatpush1.bf16.msra.mxu0 %v9362_v15  ;;  %8246 = vmatprep.subr.bf16.mxu1 %v9329_v51  ;;  %v9683_v46 = vcombine.high %v2818_v42, %v2834_v19  ;;  %v2786_v48 = vld [vmem:[#allocation16 + $0xe78] sm:$0xff]  ;;  %v9680_v15 = vcombine.low %v2817_v29, %v2833_v41  ;;  %v2689_v33 = vld [vmem:[#allocation16 + $0xb70] sm:$0xff] }
 0x814   : > { %8287 = vmatprep.subr.bf16.mxu0 %v9331_v57  ;;  %v2802_v50 = vld [vmem:[#allocation16 + $0xef8] sm:$0xff]  ;;  %v9682_v51 = vcombine.low %v2818_v42, %v2834_v19  ;;  %v9649_v54 = vcombine.high %v2785_v53, %v2801_v47  ;;  %v2753_v57 = vld [vmem:[#allocation16 + $0xd70] sm:$0xff]  ;;  %v9648_v9 = vcombine.low %v2785_v53, %v2801_v47 }
 0x815   : > { %v8450_v18 = vrot.slane %v8436_v1, %v11534_v39  ;;  %v9651_v61 = vcombine.high %v2786_v48, %v2802_v50  ;;  %v2770_v37 = vld [vmem:[#allocation16 + $0xdf8] sm:$0xff]  ;;  %v9650_v52 = vcombine.low %v2786_v48, %v2802_v50  ;;  %v9616_v26 = vcombine.low %v2753_v57, %v2769_v58  ;;  %v2657_v11 = vld [vmem:[#allocation16 + $0xa70] sm:$0xff] }
 0x816   : > { %8247 = vmatpush1.bf16.msra.mxu1 %v9328_v7  ;;  %v9617_v7 = vcombine.high %v2753_v57, %v2769_v58  ;;  %v9619_v1 = vcombine.high %v2754_v4, %v2770_v37  ;;  %v2673_v14 = vld [vmem:[#allocation16 + $0xaf0] sm:$0xff] }
 0x817   : > { %v8451_v60 = vcombine.low %v8443_v27, %v8450_v18  ;;  %8288 = vmatpush1.bf16.msra.mxu0 %v9330_v13  ;;  %8248 = vmatprep.subr.bf16.mxu1 %v9297_v6  ;;  %v2721_v13 = vld [vmem:[#allocation16 + $0xc70] sm:$0xff]  ;;  %v9618_v27 = vcombine.low %v2754_v4, %v2770_v37  ;;  %v9521_v30 = vcombine.high %v2657_v11, %v2673_v14 }
 0x818   : > { %8289 = vmatprep.subr.bf16.mxu0 %v9299_v59  ;;  %v2737_v6 = vld [vmem:[#allocation16 + $0xcf0] sm:$0xff]  ;;  %v2722_v59 = vld [vmem:[#allocation16 + $0xc78] sm:$0xff] }
 0x819   : > { %8555 = vst [vmem:[%s12461_s27 + $0x8] sm:$0xff] %v8451_v60  ;;  %v9585_v18 = vcombine.high %v2721_v13, %v2737_v6  ;;  %v9587_v32 = vcombine.high %v2722_v59, %v2738_v25  ;;  %v2690_v60 = vld [vmem:[#allocation16 + $0xb78] sm:$0xff]  ;;  %v2625_v3 = vld [vmem:[#allocation16 + $0x970] sm:$0xff] }
 0x81a   : > { %8249 = vmatpush1.bf16.msra.mxu1 %v9296_v34  ;;  %v2705_v34 = vld [vmem:[#allocation16 + $0xbf0] sm:$0xff] }
 0x81b   : > { %8290 = vmatpush1.bf16.msra.mxu0 %v9298_v5  ;;  %8250 = vmatprep.subr.bf16.mxu1 %v9265_v35  ;;  %v2706_v5 = vld [vmem:[#allocation16 + $0xbf8] sm:$0xff]  ;;  %v9584_v35 = vcombine.low %v2721_v13, %v2737_v6  ;;  %v9553_v49 = vcombine.high %v2689_v33, %v2705_v34  ;;  %v2641_v36 = vld [vmem:[#allocation16 + $0x9f0] sm:$0xff] }
 0x81c   : > { %8291 = vmatprep.subr.bf16.mxu0 %v9267_v2  ;;  %v9586_v2 = vcombine.low %v2722_v59, %v2738_v25  ;;  %v9555_v40 = vcombine.high %v2690_v60, %v2706_v5  ;;  %v9489_v29 = vcombine.high %v2625_v3, %v2641_v36  ;;  %v2593_v42 = vld [vmem:[#allocation16 + $0x870] sm:$0xff] }
 0x81d   : > { %v2609_v19 = vld [vmem:[#allocation16 + $0x8f0] sm:$0xff] }
 0x81e   : > { %8251 = vmatpush1.bf16.msra.mxu1 %v9264_v10  ;;  %v2658_v10 = vld [vmem:[#allocation16 + $0xa78] sm:$0xff]  ;;  %v9457_v53 = vcombine.high %v2593_v42, %v2609_v19  ;;  %v9456_v48 = vcombine.low %v2593_v42, %v2609_v19 }
 0x81f   : > { %8292 = vmatpush1.bf16.msra.mxu0 %v9266_v31  ;;  %8252 = vmatprep.subr.bf16.mxu1 %v9233_v12  ;;  %v2674_v31 = vld [vmem:[#allocation16 + $0xaf8] sm:$0xff]  ;;  %v9552_v12 = vcombine.low %v2689_v33, %v2705_v34 }
 0x820   : > { %8293 = vmatprep.subr.bf16.mxu0 %v9235_v21  ;;  %v9554_v21 = vcombine.low %v2690_v60, %v2706_v5  ;;  %v9523_v8 = vcombine.high %v2658_v10, %v2674_v31  ;;  %v2838_v19 = vld [vmem:[#allocation17 + $0x18] sm:$0xff] }
 0x822   : > { %8253 = vmatpush1.bf16.msra.mxu1 %v9232_v24  ;;  %v2626_v24 = vld [vmem:[#allocation16 + $0x978] sm:$0xff] }
 0x823   : > { %8294 = vmatpush1.bf16.msra.mxu0 %v9234_v38  ;;  %8254 = vmatprep.subr.bf16.mxu1 %v9201_v44  ;;  %v2642_v38 = vld [vmem:[#allocation16 + $0x9f8] sm:$0xff]  ;;  %v9520_v44 = vcombine.low %v2657_v11, %v2673_v14 }
 0x824   : > { %8295 = vmatprep.subr.bf16.mxu0 %v9203_v20  ;;  %v9522_v20 = vcombine.low %v2658_v10, %v2674_v31  ;;  %v9491_v41 = vcombine.high %v2626_v24, %v2642_v38 }
 0x826   : > { %8255 = vmatpush1.bf16.msra.mxu1 %v9200_v28  ;;  %v2594_v28 = vld [vmem:[#allocation16 + $0x878] sm:$0xff] }
 0x827   : > { %8296 = vmatpush1.bf16.msra.mxu0 %v9202_v43  ;;  %8256 = vmatprep.subr.bf16.mxu1 %v9681_v45  ;;  %v2610_v43 = vld [vmem:[#allocation16 + $0x8f8] sm:$0xff]  ;;  %v9488_v45 = vcombine.low %v2625_v3, %v2641_v36 }
 0x828   : > { %8297 = vmatprep.subr.bf16.mxu0 %v9683_v46  ;;  %v9490_v46 = vcombine.low %v2626_v24, %v2642_v38  ;;  %v9459_v47 = vcombine.high %v2594_v28, %v2610_v43  ;;  %v9458_v50 = vcombine.low %v2594_v28, %v2610_v43  ;;  %v7605_v28 = vrot.slane %v2838_v19, %v11393_v55 }
 0x829   : > { %v7609_v43 = vrot.slane %v2838_v19, %v11401_v62 }
 0x82a   : > { %8257 = vmatpush2.bf16.msra.mxu1 %v9680_v15  ;;  %v2837_v15 = vld [vmem:[#allocation17 + $0x10] sm:$0xff] }
 0x82b   : > { %8298 = vmatpush2.bf16.msra.mxu0 %v9682_v51  ;;  %8258 = vmatprep.subr.bf16.mxu1 %v9649_v54  ;;  %v7573_v51 = vrot.slane %v2837_v15, %v11393_v55  ;;  %v7577_v54 = vrot.slane %v2837_v15, %v11401_v62  ;;  %v7581_v57 = vrot.slane %v2837_v15, %v11396_v56 }
 0x82c   : > { %8299 = vmatprep.subr.bf16.mxu0 %v9651_v61  ;;  %v7585_v58 = vrot.slane %v2837_v15, %v11404_v63  ;;  %v7589_v60 = vrot.slane %v2837_v15, %v11433_v22 }
 0x82e   : > { %8259 = vmatpush2.bf16.msra.mxu1 %v9648_v9 }
 0x82f   : > { %8300 = vmatpush2.bf16.msra.mxu0 %v9650_v52  ;;  %8260 = vmatprep.subr.bf16.mxu1 %v9617_v7 }
 0x830   : > { %8301 = vmatprep.subr.bf16.mxu0 %v9619_v1 }
 0x832   : > { %8261 = vmatpush2.bf16.msra.mxu1 %v9616_v26 }
 0x833   : > { %8302 = vmatpush2.bf16.msra.mxu0 %v9618_v27  ;;  %8262 = vmatprep.subr.bf16.mxu1 %v9585_v18 }
 0x834   : > { %8303 = vmatprep.subr.bf16.mxu0 %v9587_v32 }
 0x836   : > { %8263 = vmatpush2.bf16.msra.mxu1 %v9584_v35  ;;  %v7597_v35 = vrot.slane %v2837_v15, %v11436_v23 }
 0x837   : > { %8304 = vmatpush2.bf16.msra.mxu0 %v9586_v2  ;;  %8264 = vmatprep.subr.bf16.mxu1 %v9553_v49  ;;  %v7601_v2 = vrot.slane %v2837_v15, %v11464_v17 }
 0x838   : > { %8305 = vmatprep.subr.bf16.mxu0 %v9555_v40 }
 0x83a   : > { %8265 = vmatpush2.bf16.msra.mxu1 %v9552_v12 }
 0x83b   : > { %8306 = vmatpush2.bf16.msra.mxu0 %v9554_v21  ;;  %8266 = vmatprep.subr.bf16.mxu1 %v9521_v30 }
 0x83c   : > { %8307 = vmatprep.subr.bf16.mxu0 %v9523_v8 }
 0x83e   : > { %8267 = vmatpush2.bf16.msra.mxu1 %v9520_v44 }
 0x83f   : > { %8308 = vmatpush2.bf16.msra.mxu0 %v9522_v20  ;;  %8268 = vmatprep.subr.bf16.mxu1 %v9489_v29 }
 0x840   : > { %8309 = vmatprep.subr.bf16.mxu0 %v9491_v41 }
 0x842   : > { %8269 = vmatpush2.bf16.msra.mxu1 %v9488_v45 }
 0x843   : > { %8310 = vmatpush2.bf16.msra.mxu0 %v9490_v46  ;;  %8270 = vmatprep.subr.bf16.mxu1 %v9457_v53  ;;  %v7613_v46 = vrot.slane %v2838_v19, %v11396_v56  ;;  %v7617_v53 = vrot.slane %v2838_v19, %v11404_v63  ;;  %v7621_v63 = vrot.slane %v2838_v19, %v11433_v22 }
 0x844   : > { %8311 = vmatprep.subr.bf16.mxu0 %v9459_v47 }
 0x846   : > { %8271 = vmatpush2.bf16.msra.mxu1 %v9456_v48 }
 0x847   : > { %8312 = vmatpush2.bf16.msra.mxu0 %v9458_v50 }
 0x849   : > { %v8028_v61 = vpop.f32.mrf.mxu1  ;;  %8273 = vmatmul.mubr.bf16.vlgmr.msra.gmra.mxu1 %v12400_v16 }
 0x84a   : > { %v8069_v4 = vpop.f32.mrf.mxu0  ;;  %8314 = vmatmul.mubr.bf16.vlgmr.msra.gmra.mxu0 %v12400_v16  ;;  %v8029_v9 = vadd.f32 %v8028_v61, %v7573_v51  ;;  %v7593_v16 = vrot.slane %v2837_v15, %v11461_v0 }
 0x84b   : > { %v8030_v37 = vpop.f32.mrf.mxu1  ;;  %v8070_v1 = vadd.f32 %v8069_v4, %v7581_v57 }
 0x84c   : > { %v8031_v52 = vadd.f32 %v8030_v37, %v7577_v54  ;;  %v8071_v7 = vpop.f32.mrf.mxu0 }
 0x84d   : > { %v8072_v13 = vadd.f32 %v8071_v7, %v7585_v58  ;;  %v8032_v6 = vpop.f32.mrf.mxu1  ;;  %v7625_v7 = vrot.slane %v2838_v19, %v11461_v0 }
 0x84e   : > { %v8452_v59 = vcombine.low %v8029_v9, %v8031_v52  ;;  %v8073_v25 = vpop.f32.mrf.mxu0  ;;  %v7633_v6 = vrot.slane %v2838_v19, %v11464_v17 }
 0x84f   : > { %v8453_v26 = vcombine.low %v8070_v1, %v8072_v13  ;;  %v8033_v27 = vpop.f32.mrf.mxu1  ;;  %v7629_v13 = vrot.slane %v2838_v19, %v11436_v23 }
 0x850   : > { %v8462_v18 = vrot.slane %v8452_v59, %v11534_v39  ;;  %v8074_v32 = vpop.f32.mrf.mxu0 }
 0x851   : > { %v8469_v33 = vrot.slane %v8453_v26, %v11534_v39 }
 0x853   : > { %v8484_v34 = vcombine.low %v8462_v18, %v8469_v33 }
 0x855   : > { %v8492_v29 = vrot.slane %v8484_v34, %v11534_v39 }
 0x889   : > { %v8110_v5 = vpop.f32.mrf.mxu1 }
 0x88a   : > { %v8151_v49 = vpop.f32.mrf.mxu0  ;;  %v8111_v11 = vadd.f32 %v8110_v5, %v7589_v60 }
 0x88b   : > { %v8112_v40 = vpop.f32.mrf.mxu1  ;;  %v8152_v31 = vadd.f32 %v8151_v49, %v7597_v35 }
 0x88c   : > { %v8113_v14 = vadd.f32 %v8112_v40, %v7593_v16  ;;  %v8153_v10 = vpop.f32.mrf.mxu0 }
 0x88d   : > { %v8154_v12 = vadd.f32 %v8153_v10, %v7601_v2  ;;  %v8114_v21 = vpop.f32.mrf.mxu1 }
 0x88e   : > { %v8454_v30 = vcombine.low %v8111_v11, %v8113_v14  ;;  %v8155_v8 = vpop.f32.mrf.mxu0 }
 0x88f   : > { %v8455_v3 = vcombine.low %v8152_v31, %v8154_v12  ;;  %v8115_v36 = vpop.f32.mrf.mxu1 }
 0x890   : > { %v8476_v24 = vrot.slane %v8454_v30, %v11534_v39  ;;  %v8156_v38 = vpop.f32.mrf.mxu0 }
 0x891   : > { %v8483_v44 = vrot.slane %v8455_v3, %v11534_v39 }
 0x893   : > { %v8485_v20 = vcombine.low %v8476_v24, %v8483_v44 }
 0x895   : > { %v8499_v41 = vrot.slane %v8485_v20, %v11534_v39 }
 0x897   : > { %v8500_v42 = vcombine.low %v8492_v29, %v8499_v41 }
 0x899   : > { %8556 = vst [vmem:[%s12461_s27 + $0x10] sm:$0xff] %v8500_v42 }
 0x8c9   : > { %v8192_v45 = vpop.f32.mrf.mxu1 }
 0x8ca   : > { %v8233_v47 = vpop.f32.mrf.mxu0  ;;  %v8193_v50 = vadd.f32 %v8192_v45, %v7605_v28 }
 0x8cb   : > { %v8194_v48 = vpop.f32.mrf.mxu1  ;;  %v8234_v54 = vadd.f32 %v8233_v47, %v7613_v46 }
 0x8cc   : > { %v8195_v15 = vadd.f32 %v8194_v48, %v7609_v43  ;;  %v8235_v51 = vpop.f32.mrf.mxu0 }
 0x8cd   : > { %v8236_v61 = vadd.f32 %v8235_v51, %v7617_v53  ;;  %v8196_v57 = vpop.f32.mrf.mxu1 }
 0x8ce   : > { %v8501_v58 = vcombine.low %v8193_v50, %v8195_v15  ;;  %v8237_v4 = vpop.f32.mrf.mxu0 }
 0x8cf   : > { %v8502_v37 = vcombine.low %v8234_v54, %v8236_v61  ;;  %v8197_v9 = vpop.f32.mrf.mxu1 }
 0x8d0   : > { %v8511_v55 = vrot.slane %v8501_v58, %v11534_v39  ;;  %v8238_v62 = vpop.f32.mrf.mxu0 }
 0x8d1   : > { %v8518_v52 = vrot.slane %v8502_v37, %v11534_v39 }
 0x8d3   : > { %v8533_v56 = vcombine.low %v8511_v55, %v8518_v52 }
 0x8d5   : > { %v8541_v17 = vrot.slane %v8533_v56, %v11534_v39 }
 0x909   : > { %v8274_v1 = vpop.f32.mrf.mxu1 }
 0x90a   : > { %v8315_v59 = vpop.f32.mrf.mxu0  ;;  %v8275_v26 = vadd.f32 %v8274_v1, %v7621_v63 }
 0x90b   : > { %v8276_v25 = vpop.f32.mrf.mxu1  ;;  %v8316_v32 = vadd.f32 %v8315_v59, %v7629_v13 }
 0x90c   : > { %v8277_v27 = vadd.f32 %v8276_v25, %v7625_v7  ;;  %v8317_v18 = vpop.f32.mrf.mxu0 }
 0x90d   : > { %v8318_v33 = vadd.f32 %v8317_v18, %v7633_v6  ;;  %v8278_v34 = vpop.f32.mrf.mxu1 }
 0x90e   : > { %v8503_v60 = vcombine.low %v8275_v26, %v8277_v27  ;;  %v8319_v16 = vpop.f32.mrf.mxu0 }
 0x90f   : > { %v8504_v5 = vcombine.low %v8316_v32, %v8318_v33  ;;  %v8279_v22 = vpop.f32.mrf.mxu1 }
 0x910   : > { %v8525_v0 = vrot.slane %v8503_v60, %v11534_v39  ;;  %v8320_v35 = vpop.f32.mrf.mxu0 }
 0x911   : > { %v8532_v23 = vrot.slane %v8504_v5, %v11534_v39 }
 0x913   : > { %v8534_v2 = vcombine.low %v8525_v0, %v8532_v23 }
 0x915   : > { %v8548_v49 = vrot.slane %v8534_v2, %v11534_v39 }
 0x917   : > { %v8549_v40 = vcombine.low %v8541_v17, %v8548_v49 }
 0x919   : > { %8557 = vst [vmem:[%s12461_s27 + $0x18] sm:$0xff] %v8549_v40 }
 0x91a PF: > { %s12579_s29 = sld [smem:[#allocation25_spill]]  ;;  %s12580_s18 = smov %s10672_s19 }
 0x91b   : > { %s12581_s19 = smov %s12583_s30 }
 0x920   : > { %s31_s20 = sadd.s32 1, %s12579_s29  }
 0x921   : > { %p28_p6 = scmp.ge.s32.totalorder %s31_s20, 4  }
 0x923   :  { %30 = sbr.rel (!%p28_p6) target bundleno = 10 (0xa), region = 162 }
 0x928   :  { %8577 = vsyncpa [#allocation4], 1 }
 0x929   :  { %8579 = vsyncpa [#allocation4 + $0x1], 1 }
 0x92a   :  { %8580 = vsyncpa [#allocation6], 1 }
 0x92b   :  { %8581 = vsyncpa [#allocation9], 1 }
 0x92c   :  { %8582 = vsyncpa [#allocation12], 1 }
 0x92d   :  { %8583 = vsyncpa [#allocation15], 1 }
 0x92e   :  { %8584 = vsyncpa [#allocation18], 1 }

</bundles_post_ra>
